<compile_context>
chip_gen: v7x
topology: tpu7x:2x2x1
jax: 0.10.0
libtpu: 0.0.40
codegen_flags: <defaults>
</compile_context>

<pallas_src>
import functools
import math

import jax
import jax.numpy as jnp
from jax.experimental import pallas as pl
from jax.experimental.pallas import tpu as pltpu


def _cla_kernel(q_idx_ref, k_idx_ref,       # SMEM (n_pairs,) i32, prefetched
                xq_ref,    # (Bt, Tq, D)      f32   residual stream, query rows
                v_ref,     # (H, Tk, Bt*dk)   bf16  head-major V, key rows
                qw_ref,    # (H, Tq, dk)      bf16  Q_h.weight rows for q tile
                kw_ref,    # (H, dk, Tk)      bf16  K_h.weight cols for k tile
                wo_ref,    # (D, D)           bf16  Wo.weight^T
                w1_ref,    # (D, 4D)          bf16  W1.weight^T
                w2_ref,    # (4D, D)          bf16  W2.weight^T
                sc_ref,    # (8, D)           f32   [bo, g1, be1, b2, g2, be2, 0, 0]
                b1_ref,    # (1, 4D)          f32   W1.bias
                o_ref,     # (Bt, Tq, D)      f32   output
                acc_ref,   # (H, Tq, Bt*dk)   f32   scratch: head-major mix acc
                *, ep_rows):
    p = pl.program_id(1)
    q_i = q_idx_ref[p]
    k_i = k_idx_ref[p]

    n_head, tq, _ = acc_ref.shape
    bt, _, d = xq_ref.shape
    tk = v_ref.shape[1]
    d_k = d // n_head

    @pl.when(k_i == 0)
    def _init():
        acc_ref[...] = jnp.zeros_like(acc_ref)

    # ---- causal linear attention mixing ------------------------------------
    # The triangular grid guarantees k_i <= q_i; the mask below is trivially
    # all-True for sub-diagonal tiles (its real work only happens when k==q)
    # and is hoisted out of the per-head loop.
    row = jax.lax.broadcasted_iota(jnp.int32, (tq, tk), 0)
    col = jax.lax.broadcasted_iota(jnp.int32, (tq, tk), 1)
    causal = (row - col) >= (k_i - q_i) * tq          # tq == tk

    for h in range(n_head):                           # static, small
        # W_h tile rebuilt on the fly, MXU-native (Tq, dk) @ (dk, Tk).
        w_h = jnp.dot(qw_ref[h], kw_ref[h], preferred_element_type=jnp.float32)
        w_h = jnp.where(causal, w_h, 0.0).astype(jnp.bfloat16)
        # One matmul per head: N = Bt*dk fills the MXU output dimension.
        acc_ref[h] += jnp.dot(w_h, v_ref[h], preferred_element_type=jnp.float32)

    # ---- diagonal tile: Wo, LN1, +x, FFN (GELU_new), LN2, +xs_p -------------
    @pl.when(k_i == q_i)
    def _finalize():
        bo, g1, be1 = sc_ref[0:1, :], sc_ref[1:2, :], sc_ref[2:3, :]
        b2, g2, be2 = sc_ref[3:4, :], sc_ref[4:5, :], sc_ref[5:6, :]
        gelu_c = math.sqrt(2.0 / math.pi)

        def row_slab(start):
            rows = pl.ds(start, ep_rows)
            acc_rows = acc_ref[:, rows, :]            # (H, ep_rows, Bt*dk) f32
            for b in range(bt):                       # static, small
                # head-concat for this batch's row slab: (ep_rows, D)
                cat = jnp.concatenate(
                    [acc_rows[h][:, b * d_k:(b + 1) * d_k] for h in range(n_head)],
                    axis=-1)
                xq = xq_ref[b, rows, :]

                xs_p = jnp.dot(cat.astype(jnp.bfloat16), wo_ref[...],
                               preferred_element_type=jnp.float32) + bo
                mu1 = jnp.mean(xs_p, axis=-1, keepdims=True)
                var1 = jnp.mean((xs_p - mu1) ** 2, axis=-1, keepdims=True)
                xs_p = (xs_p - mu1) * jax.lax.rsqrt(var1 + 1e-5) * g1 + be1
                # TODO(synk): dropout (p=0.1) is identity in eval mode; not applied.
                xs_p = xs_p + xq

                h1 = jnp.dot(xs_p.astype(jnp.bfloat16), w1_ref[...],
                             preferred_element_type=jnp.float32) + b1_ref[...]
                act = 0.5 * h1 * (1.0 + jnp.tanh(
                    gelu_c * (h1 + 0.044715 * h1 * h1 * h1)))
                h2 = jnp.dot(act.astype(jnp.bfloat16), w2_ref[...],
                             preferred_element_type=jnp.float32) + b2
                mu2 = jnp.mean(h2, axis=-1, keepdims=True)
                var2 = jnp.mean((h2 - mu2) ** 2, axis=-1, keepdims=True)
                out = (h2 - mu2) * jax.lax.rsqrt(var2 + 1e-5) * g2 + be2 + xs_p
                o_ref[b, rows, :] = out

        n_slabs = tq // ep_rows
        if n_slabs == 1:
            row_slab(0)
        else:
            def slab_body(i, carry):
                row_slab(pl.multiple_of(i * ep_rows, ep_rows))
                return carry
            jax.lax.fori_loop(0, n_slabs, slab_body, 0)


def _default_vmem_limit_bytes():
    # Generation-aware scoped-VMEM cap: ~75% of physical VMEM (~48 MiB on v7x's
    # 64 MiB cores, 96 MiB on v5e/v6e's 128 MiB); fall back to 64 MiB.
    try:
        cap = pltpu.get_tpu_info().vmem_capacity_bytes
        return int(min(cap * 3 // 4, 96 * 1024 * 1024))
    except Exception:
        return 64 * 1024 * 1024


def causal_linear_attention_pallas(xs, params, n_head=None, *,
                                   batch_tile=None, seq_tile=None,
                                   epilogue_rows=None, vmem_limit_bytes=None):
    """xs: (B, S, D) float32. params: dict from init_params (bf16 weights)."""
    B, S, D = xs.shape
    H, S_w, d_k = params["qw_s"].shape
    if n_head is not None:
        assert n_head == H
    assert S_w == S, "params were precomputed for a different sequence length"
    assert D == H * d_k
    D4 = 4 * D

    # ---- tile selection ------------------------------------------------------
    if seq_tile is None:
        seq_tile = next((c for c in (256, 128) if S % c == 0), S)
    T = seq_tile
    assert S % T == 0
    assert T == S or T % 128 == 0, (
        "seq_tile must be a multiple of 128 (K-weight tiles put it on the lane "
        "axis) or the full sequence length")

    if batch_tile is None:
        valid = [c for c in range(1, B + 1)
                 if B % c == 0 and ((c * d_k) % 128 == 0 or c == B)]
        # keep >= 2 batch blocks when possible so the 'parallel' axis can feed
        # both TensorCores on dual-core chips (v7x); keep the row count modest.
        pref = [c for c in valid if B // c >= 2 and c * T <= 4096] or valid
        batch_tile = max(pref)
    Bt = batch_tile
    assert B % Bt == 0
    assert (Bt * d_k) % 128 == 0 or Bt == B, (
        "batch_tile*d_k must be a multiple of 128 (or batch_tile == batch) so "
        "the fused batch-head lane axis of V tiles legally")

    n_t = S // T
    n_bb = B // Bt

    # epilogue row-slab size: bounds the (rows, 4D) f32 FFN intermediates.
    if epilogue_rows is None:
        max_rows = max(8, (2 * 1024 * 1024) // (4 * 4 * D))   # ~2 MiB per buffer
        epilogue_rows = T
        while epilogue_rows > max_rows and epilogue_rows % 16 == 0:
            epilogue_rows //= 2
    assert T % epilogue_rows == 0
    assert epilogue_rows == T or epilogue_rows % 8 == 0

    if vmem_limit_bytes is None:
        vmem_limit_bytes = _default_vmem_limit_bytes()

    # ---- hoisted V projection (one dense matmul, done by XLA) ----------------
    # V = x @ Vcat^T (bf16 operands, f32 accumulate), then re-laid-out
    # head-major with the batch fused into the lane axis: (H, S, B*d_k).
    x_bf = xs.astype(jnp.bfloat16)
    v = jnp.einsum("bsd,de->bse", x_bf, params["vcat_t"],
                   preferred_element_type=jnp.float32).astype(jnp.bfloat16)
    v_hm = (v.reshape(B, S, H, d_k)
             .transpose(2, 1, 0, 3)
             .reshape(H, S, B * d_k))

    # ---- triangular (q, k) schedule, scalar-prefetched -----------------------
    pairs = [(q, k) for q in range(n_t) for k in range(q + 1)]
    q_idx = jnp.asarray([q for q, _ in pairs], dtype=jnp.int32)
    k_idx = jnp.asarray([k for _, k in pairs], dtype=jnp.int32)
    n_pairs = len(pairs)

    kernel = functools.partial(_cla_kernel, ep_rows=epilogue_rows)

    grid_spec = pltpu.PrefetchScalarGridSpec(
        num_scalar_prefetch=2,
        grid=(n_bb, n_pairs),
        in_specs=[
            pl.BlockSpec((Bt, T, D), lambda bb, p, qi, ki: (bb, qi[p], 0)),       # x (f32)
            pl.BlockSpec((H, T, Bt * d_k), lambda bb, p, qi, ki: (0, ki[p], bb)),  # V (bf16)
            pl.BlockSpec((H, T, d_k), lambda bb, p, qi, ki: (0, qi[p], 0)),        # Q rows
            pl.BlockSpec((H, d_k, T), lambda bb, p, qi, ki: (0, 0, ki[p])),        # K cols
            pl.BlockSpec((D, D), lambda bb, p, qi, ki: (0, 0)),                    # Wo^T
            pl.BlockSpec((D, D4), lambda bb, p, qi, ki: (0, 0)),                   # W1^T
            pl.BlockSpec((D4, D), lambda bb, p, qi, ki: (0, 0)),                   # W2^T
            pl.BlockSpec((8, D), lambda bb, p, qi, ki: (0, 0)),                    # scales
            pl.BlockSpec((1, D4), lambda bb, p, qi, ki: (0, 0)),                   # W1 bias
        ],
        out_specs=pl.BlockSpec((Bt, T, D), lambda bb, p, qi, ki: (bb, qi[p], 0)),
        scratch_shapes=[pltpu.VMEM((H, T, Bt * d_k), jnp.float32)],
    )

    return pl.pallas_call(
        kernel,
        out_shape=jax.ShapeDtypeStruct((B, S, D), jnp.float32),
        grid_spec=grid_spec,
        compiler_params=pltpu.CompilerParams(
            dimension_semantics=("parallel", "arbitrary"),
            vmem_limit_bytes=vmem_limit_bytes,
        ),
    )(q_idx, k_idx, xs, v_hm, params["qw_s"], params["kw_s"],
      params["wo_t"], params["w1_t"], params["w2_t"],
      params["scales"], params["b1"])


def init_params(key, d_model, n_head, max_seq_len, seq_len):
    """Deterministic synthetic weights mirroring the PyTorch module's shapes."""
    d_k = d_model // n_head
    ks = jax.random.split(key, 8)
    scale = 0.1

    # nn.Linear(in, out).weight has shape (out, in)
    q_w = scale * jax.random.normal(ks[0], (n_head, max_seq_len, d_k), jnp.float32)
    k_w = scale * jax.random.normal(ks[1], (n_head, d_k, max_seq_len), jnp.float32)
    v_w = scale * jax.random.normal(ks[2], (n_head, d_k, d_model), jnp.float32)
    wo_w = scale * jax.random.normal(ks[3], (d_model, d_model), jnp.float32)
    bo = scale * jax.random.normal(ks[4], (d_model,), jnp.float32)
    w1_w = scale * jax.random.normal(ks[5], (4 * d_model, d_model), jnp.float32)
    b1 = scale * jax.random.normal(ks[6], (4 * d_model,), jnp.float32)
    w2_w = scale * jax.random.normal(ks[7], (d_model, 4 * d_model), jnp.float32)
    b2 = jnp.zeros((d_model,), jnp.float32)

    # LayerNorm: PyTorch default init (weight=1, bias=0)
    ln1_g = jnp.ones((d_model,), jnp.float32)
    ln1_b = jnp.zeros((d_model,), jnp.float32)
    ln2_g = jnp.ones((d_model,), jnp.float32)
    ln2_b = jnp.zeros((d_model,), jnp.float32)

    # Kernel-ready tensors:
    qw_s = q_w[:, :seq_len, :].astype(jnp.bfloat16)        # (H, S, dk)
    kw_s = k_w[:, :, :seq_len].astype(jnp.bfloat16)        # (H, dk, S)  MXU-native
    vcat_t = jnp.concatenate([v_w[h].T for h in range(n_head)],
                             axis=1).astype(jnp.bfloat16)  # (D, D)

    scales = jnp.zeros((8, d_model), jnp.float32)
    scales = scales.at[0].set(bo).at[1].set(ln1_g).at[2].set(ln1_b)
    scales = scales.at[3].set(b2).at[4].set(ln2_g).at[5].set(ln2_b)

    return {
        "qw_s": qw_s, "kw_s": kw_s, "vcat_t": vcat_t,
        "wo_t": wo_w.T.astype(jnp.bfloat16),
        "w1_t": w1_w.T.astype(jnp.bfloat16),
        "w2_t": w2_w.T.astype(jnp.bfloat16),
        "scales": scales,
        "b1": b1.reshape(1, -1),
    }


def reference_forward(xs, p, n_head):
    """Pure-JAX reference mirroring the kernel's bf16-matmul / f32-everything-else
    numerics (dropout = identity in eval mode)."""
    B, S, D = xs.shape
    d_k = D // n_head
    f32, bf16 = jnp.float32, jnp.bfloat16

    def layernorm(x, g, b):
        mu = jnp.mean(x, axis=-1, keepdims=True)
        var = jnp.mean((x - mu) ** 2, axis=-1, keepdims=True)
        return (x - mu) * jax.lax.rsqrt(var + 1e-5) * g + b

    x_bf = xs.astype(bf16)
    v = jnp.einsum("bsd,de->bse", x_bf, p["vcat_t"],
                   preferred_element_type=f32).astype(bf16)          # (B, S, D)

    causal = jnp.tril(jnp.ones((S, S), bool))
    heads = []
    for h in range(n_head):
        w = jnp.einsum("qc,ck->qk", p["qw_s"][h], p["kw_s"][h],
                       preferred_element_type=f32)
        w = jnp.where(causal, w, 0.0).astype(bf16)
        heads.append(jnp.einsum("qk,bkd->bqd", w, v[..., h * d_k:(h + 1) * d_k],
                                preferred_element_type=f32))
    cat = jnp.concatenate(heads, axis=-1)                             # (B, S, D)

    sc = p["scales"]
    xs_p = jnp.einsum("bsd,de->bse", cat.astype(bf16), p["wo_t"],
                      preferred_element_type=f32) + sc[0]
    xs_p = layernorm(xs_p, sc[1], sc[2]) + xs
    h1 = jnp.einsum("bsd,df->bsf", xs_p.astype(bf16), p["w1_t"],
                    preferred_element_type=f32) + p["b1"][0]
    c = math.sqrt(2.0 / math.pi)
    act = 0.5 * h1 * (1.0 + jnp.tanh(c * (h1 + 0.044715 * h1 ** 3)))
    h2 = jnp.einsum("bsf,fd->bsd", act.astype(bf16), p["w2_t"],
                    preferred_element_type=f32) + sc[3]
    return layernorm(h2, sc[4], sc[5]) + xs_p


if __name__ == "__main__":
    # Small shapes consistent with the module: (batch, seq, d_model).
    # S=256 with seq_tile=128 exercises the triangular grid (3 pairs), the
    # k-axis accumulation, the diagonal finalize and the row-slab epilogue.
    B, S, d_model, n_head, max_seq_len = 4, 256, 32, 4, 512

    key = jax.random.PRNGKey(0)
    k_x, k_p = jax.random.split(key)
    xs = jax.random.normal(k_x, (B, S, d_model), jnp.float32)
    params = init_params(k_p, d_model, n_head, max_seq_len, S)

    out = causal_linear_attention_pallas(xs, params, n_head,
                                         batch_tile=4, seq_tile=128,
                                         epilogue_rows=64)
    out = jax.block_until_ready(out)

    ref = reference_forward(xs, params, n_head)
    assert out.shape == (B, S, d_model)
    err = float(jnp.max(jnp.abs(out - ref)))
    assert jnp.allclose(out, ref, rtol=1e-2, atol=1e-2), f"max abs err = {err}"

    print("KERNEL_OK")
</pallas_src>

<mosaic_0001>
module attributes {stable_mosaic.version = 11 : i64} {
  func.func @_cla_kernel(%arg0: i32, %arg1: i32, %arg2: memref<3xi32, #tpu.memory_space<smem>>, %arg3: memref<3xi32, #tpu.memory_space<smem>>, %arg4: memref<4x128x32xf32, #tpu.memory_space<vmem>>, %arg5: memref<4x128x32xbf16, #tpu.memory_space<vmem>>, %arg6: memref<4x128x8xbf16, #tpu.memory_space<vmem>>, %arg7: memref<4x8x128xbf16, #tpu.memory_space<vmem>>, %arg8: memref<32x32xbf16, #tpu.memory_space<vmem>>, %arg9: memref<32x128xbf16, #tpu.memory_space<vmem>>, %arg10: memref<128x32xbf16, #tpu.memory_space<vmem>>, %arg11: memref<8x32xf32, #tpu.memory_space<vmem>>, %arg12: memref<1x128xf32, #tpu.memory_space<vmem>>, %arg13: memref<4x128x32xf32, #tpu.memory_space<vmem>>, %arg14: memref<4x128x32xf32, #tpu.memory_space<vmem>>) attributes {dimension_semantics = [#tpu.dimension_semantics<parallel>, #tpu.dimension_semantics<arbitrary>], iteration_bounds = array<i64: 1, 3>, scalar_prefetch = 2 : i64, scratch_operands = 1 : i64, tpu.core_type = #tpu.core_type<tc>, window_params = [{transform_indices = @transform_0, window_bounds = array<i64: 4, 128, 32>}, {transform_indices = @transform_1, window_bounds = array<i64: 4, 128, 32>}, {transform_indices = @transform_2, window_bounds = array<i64: 4, 128, 8>}, {transform_indices = @transform_3, window_bounds = array<i64: 4, 8, 128>}, {pipeline_mode = #tpu.pipeline_mode<synchronous>, transform_indices = @transform_4, window_bounds = array<i64: 32, 32>}, {pipeline_mode = #tpu.pipeline_mode<synchronous>, transform_indices = @transform_5, window_bounds = array<i64: 32, 128>}, {pipeline_mode = #tpu.pipeline_mode<synchronous>, transform_indices = @transform_6, window_bounds = array<i64: 128, 32>}, {pipeline_mode = #tpu.pipeline_mode<synchronous>, transform_indices = @transform_7, window_bounds = array<i64: 8, 32>}, {pipeline_mode = #tpu.pipeline_mode<synchronous>, transform_indices = @transform_8, window_bounds = array<i64: 1, 128>}, {transform_indices = @transform_9, window_bounds = array<i64: 4, 128, 32>}]} {
    %0 = arith.index_cast %arg1 : i32 to index
    %1 = memref.load %arg2[%0] : memref<3xi32, #tpu.memory_space<smem>>
    %2 = arith.index_cast %arg1 : i32 to index
    %3 = memref.load %arg3[%2] : memref<3xi32, #tpu.memory_space<smem>>
    %c0_i32 = arith.constant 0 : i32
    %4 = arith.cmpi eq, %3, %c0_i32 : i32
    %5 = arith.extui %4 : i1 to i32
    %c0_i32_0 = arith.constant 0 : i32
    %6 = arith.cmpi ne, %5, %c0_i32_0 : i32
    scf.if %6 {
      %cst_69 = arith.constant 0.000000e+00 : f32
      %85 = vector.broadcast %cst_69 : f32 to vector<4x128x32xf32>
      %c0_70 = arith.constant 0 : index
      %c0_71 = arith.constant 0 : index
      %c0_72 = arith.constant 0 : index
      %86 = vector.load %arg14[%c0_70, %c0_71, %c0_72] : memref<4x128x32xf32, #tpu.memory_space<vmem>>, vector<4x128x32xf32>
      tpu.vector_store %arg14[%c0_70, %c0_71, %c0_72], %85 {strides = array<i32>} : memref<4x128x32xf32, #tpu.memory_space<vmem>>, vector<4x128x32xf32>,
    } else {
    }
    %7 = tpu.iota {dimensions = array<i32: 0>} : vector<128x128xi32>
    %8 = tpu.iota {dimensions = array<i32: 1>} : vector<128x128xi32>
    %9 = arith.subi %7, %8 : vector<128x128xi32>
    %10 = arith.subi %3, %1 : i32
    %c128_i32 = arith.constant 128 : i32
    %11 = arith.muli %10, %c128_i32 : i32
    %12 = vector.broadcast %11 : i32 to vector<128x128xi32>
    %13 = arith.cmpi sge, %9, %12 : vector<128x128xi32>
    %c0 = arith.constant 0 : index
    %c0_1 = arith.constant 0 : index
    %c0_2 = arith.constant 0 : index
    %14 = vector.load %arg6[%c0, %c0_1, %c0_2] : memref<4x128x8xbf16, #tpu.memory_space<vmem>>, vector<1x128x8xbf16>
    %15 = vector.shape_cast %14 : vector<1x128x8xbf16> to vector<128x8xbf16>
    %c0_3 = arith.constant 0 : index
    %c0_4 = arith.constant 0 : index
    %c0_5 = arith.constant 0 : index
    %16 = vector.load %arg7[%c0_3, %c0_4, %c0_5] : memref<4x8x128xbf16, #tpu.memory_space<vmem>>, vector<1x8x128xbf16>
    %17 = vector.shape_cast %16 : vector<1x8x128xbf16> to vector<8x128xbf16>
    %cst = arith.constant dense<0.000000e+00> : vector<128x128xf32>
    %18 = tpu.matmul %15, %17, %cst {dimension_numbers = #tpu.dot_dimension_numbers<[1], [0], [0], [1], [0, 0, 1, 1], [], []>} : vector<128x8xbf16>, vector<8x128xbf16>, vector<128x128xf32> -> vector<128x128xf32>
    %cst_6 = arith.constant 0.000000e+00 : f32
    %19 = vector.broadcast %cst_6 : f32 to vector<128x128xf32>
    %20 = arith.select %13, %18, %19 : vector<128x128xi1>, vector<128x128xf32>
    %21 = arith.truncf %20 : vector<128x128xf32> to vector<128x128xbf16>
    %c0_7 = arith.constant 0 : index
    %c0_8 = arith.constant 0 : index
    %c0_9 = arith.constant 0 : index
    %22 = vector.load %arg14[%c0_7, %c0_8, %c0_9] : memref<4x128x32xf32, #tpu.memory_space<vmem>>, vector<1x128x32xf32>
    %23 = vector.shape_cast %22 : vector<1x128x32xf32> to vector<128x32xf32>
    %c0_10 = arith.constant 0 : index
    %c0_11 = arith.constant 0 : index
    %c0_12 = arith.constant 0 : index
    %24 = vector.load %arg5[%c0_10, %c0_11, %c0_12] : memref<4x128x32xbf16, #tpu.memory_space<vmem>>, vector<1x128x32xbf16>
    %25 = vector.shape_cast %24 : vector<1x128x32xbf16> to vector<128x32xbf16>
    %cst_13 = arith.constant dense<0.000000e+00> : vector<128x32xf32>
    %26 = tpu.matmul %21, %25, %cst_13 {dimension_numbers = #tpu.dot_dimension_numbers<[1], [0], [0], [1], [0, 0, 1, 1], [], []>} : vector<128x128xbf16>, vector<128x32xbf16>, vector<128x32xf32> -> vector<128x32xf32>
    %27 = arith.addf %23, %26 : vector<128x32xf32>
    %c0_14 = arith.constant 0 : index
    %c0_15 = arith.constant 0 : index
    %c0_16 = arith.constant 0 : index
    %28 = vector.load %arg14[%c0_14, %c0_15, %c0_16] : memref<4x128x32xf32, #tpu.memory_space<vmem>>, vector<1x128x32xf32>
    %29 = vector.shape_cast %28 : vector<1x128x32xf32> to vector<128x32xf32>
    %30 = vector.shape_cast %27 : vector<128x32xf32> to vector<1x128x32xf32>
    tpu.vector_store %arg14[%c0_14, %c0_15, %c0_16], %30 {strides = array<i32>} : memref<4x128x32xf32, #tpu.memory_space<vmem>>, vector<1x128x32xf32>,
    %c1 = arith.constant 1 : index
    %c0_17 = arith.constant 0 : index
    %c0_18 = arith.constant 0 : index
    %31 = vector.load %arg6[%c1, %c0_17, %c0_18] : memref<4x128x8xbf16, #tpu.memory_space<vmem>>, vector<1x128x8xbf16>
    %32 = vector.shape_cast %31 : vector<1x128x8xbf16> to vector<128x8xbf16>
    %c1_19 = arith.constant 1 : index
    %c0_20 = arith.constant 0 : index
    %c0_21 = arith.constant 0 : index
    %33 = vector.load %arg7[%c1_19, %c0_20, %c0_21] : memref<4x8x128xbf16, #tpu.memory_space<vmem>>, vector<1x8x128xbf16>
    %34 = vector.shape_cast %33 : vector<1x8x128xbf16> to vector<8x128xbf16>
    %cst_22 = arith.constant dense<0.000000e+00> : vector<128x128xf32>
    %35 = tpu.matmul %32, %34, %cst_22 {dimension_numbers = #tpu.dot_dimension_numbers<[1], [0], [0], [1], [0, 0, 1, 1], [], []>} : vector<128x8xbf16>, vector<8x128xbf16>, vector<128x128xf32> -> vector<128x128xf32>
    %cst_23 = arith.constant 0.000000e+00 : f32
    %36 = vector.broadcast %cst_23 : f32 to vector<128x128xf32>
    %37 = arith.select %13, %35, %36 : vector<128x128xi1>, vector<128x128xf32>
    %38 = arith.truncf %37 : vector<128x128xf32> to vector<128x128xbf16>
    %c1_24 = arith.constant 1 : index
    %c0_25 = arith.constant 0 : index
    %c0_26 = arith.constant 0 : index
    %39 = vector.load %arg14[%c1_24, %c0_25, %c0_26] : memref<4x128x32xf32, #tpu.memory_space<vmem>>, vector<1x128x32xf32>
    %40 = vector.shape_cast %39 : vector<1x128x32xf32> to vector<128x32xf32>
    %c1_27 = arith.constant 1 : index
    %c0_28 = arith.constant 0 : index
    %c0_29 = arith.constant 0 : index
    %41 = vector.load %arg5[%c1_27, %c0_28, %c0_29] : memref<4x128x32xbf16, #tpu.memory_space<vmem>>, vector<1x128x32xbf16>
    %42 = vector.shape_cast %41 : vector<1x128x32xbf16> to vector<128x32xbf16>
    %cst_30 = arith.constant dense<0.000000e+00> : vector<128x32xf32>
    %43 = tpu.matmul %38, %42, %cst_30 {dimension_numbers = #tpu.dot_dimension_numbers<[1], [0], [0], [1], [0, 0, 1, 1], [], []>} : vector<128x128xbf16>, vector<128x32xbf16>, vector<128x32xf32> -> vector<128x32xf32>
    %44 = arith.addf %40, %43 : vector<128x32xf32>
    %c1_31 = arith.constant 1 : index
    %c0_32 = arith.constant 0 : index
    %c0_33 = arith.constant 0 : index
    %45 = vector.load %arg14[%c1_31, %c0_32, %c0_33] : memref<4x128x32xf32, #tpu.memory_space<vmem>>, vector<1x128x32xf32>
    %46 = vector.shape_cast %45 : vector<1x128x32xf32> to vector<128x32xf32>
    %47 = vector.shape_cast %44 : vector<128x32xf32> to vector<1x128x32xf32>
    tpu.vector_store %arg14[%c1_31, %c0_32, %c0_33], %47 {strides = array<i32>} : memref<4x128x32xf32, #tpu.memory_space<vmem>>, vector<1x128x32xf32>,
    %c2 = arith.constant 2 : index
    %c0_34 = arith.constant 0 : index
    %c0_35 = arith.constant 0 : index
    %48 = vector.load %arg6[%c2, %c0_34, %c0_35] : memref<4x128x8xbf16, #tpu.memory_space<vmem>>, vector<1x128x8xbf16>
    %49 = vector.shape_cast %48 : vector<1x128x8xbf16> to vector<128x8xbf16>
    %c2_36 = arith.constant 2 : index
    %c0_37 = arith.constant 0 : index
    %c0_38 = arith.constant 0 : index
    %50 = vector.load %arg7[%c2_36, %c0_37, %c0_38] : memref<4x8x128xbf16, #tpu.memory_space<vmem>>, vector<1x8x128xbf16>
    %51 = vector.shape_cast %50 : vector<1x8x128xbf16> to vector<8x128xbf16>
    %cst_39 = arith.constant dense<0.000000e+00> : vector<128x128xf32>
    %52 = tpu.matmul %49, %51, %cst_39 {dimension_numbers = #tpu.dot_dimension_numbers<[1], [0], [0], [1], [0, 0, 1, 1], [], []>} : vector<128x8xbf16>, vector<8x128xbf16>, vector<128x128xf32> -> vector<128x128xf32>
    %cst_40 = arith.constant 0.000000e+00 : f32
    %53 = vector.broadcast %cst_40 : f32 to vector<128x128xf32>
    %54 = arith.select %13, %52, %53 : vector<128x128xi1>, vector<128x128xf32>
    %55 = arith.truncf %54 : vector<128x128xf32> to vector<128x128xbf16>
    %c2_41 = arith.constant 2 : index
    %c0_42 = arith.constant 0 : index
    %c0_43 = arith.constant 0 : index
    %56 = vector.load %arg14[%c2_41, %c0_42, %c0_43] : memref<4x128x32xf32, #tpu.memory_space<vmem>>, vector<1x128x32xf32>
    %57 = vector.shape_cast %56 : vector<1x128x32xf32> to vector<128x32xf32>
    %c2_44 = arith.constant 2 : index
    %c0_45 = arith.constant 0 : index
    %c0_46 = arith.constant 0 : index
    %58 = vector.load %arg5[%c2_44, %c0_45, %c0_46] : memref<4x128x32xbf16, #tpu.memory_space<vmem>>, vector<1x128x32xbf16>
    %59 = vector.shape_cast %58 : vector<1x128x32xbf16> to vector<128x32xbf16>
    %cst_47 = arith.constant dense<0.000000e+00> : vector<128x32xf32>
    %60 = tpu.matmul %55, %59, %cst_47 {dimension_numbers = #tpu.dot_dimension_numbers<[1], [0], [0], [1], [0, 0, 1, 1], [], []>} : vector<128x128xbf16>, vector<128x32xbf16>, vector<128x32xf32> -> vector<128x32xf32>
    %61 = arith.addf %57, %60 : vector<128x32xf32>
    %c2_48 = arith.constant 2 : index
    %c0_49 = arith.constant 0 : index
    %c0_50 = arith.constant 0 : index
    %62 = vector.load %arg14[%c2_48, %c0_49, %c0_50] : memref<4x128x32xf32, #tpu.memory_space<vmem>>, vector<1x128x32xf32>
    %63 = vector.shape_cast %62 : vector<1x128x32xf32> to vector<128x32xf32>
    %64 = vector.shape_cast %61 : vector<128x32xf32> to vector<1x128x32xf32>
    tpu.vector_store %arg14[%c2_48, %c0_49, %c0_50], %64 {strides = array<i32>} : memref<4x128x32xf32, #tpu.memory_space<vmem>>, vector<1x128x32xf32>,
    %c3 = arith.constant 3 : index
    %c0_51 = arith.constant 0 : index
    %c0_52 = arith.constant 0 : index
    %65 = vector.load %arg6[%c3, %c0_51, %c0_52] : memref<4x128x8xbf16, #tpu.memory_space<vmem>>, vector<1x128x8xbf16>
    %66 = vector.shape_cast %65 : vector<1x128x8xbf16> to vector<128x8xbf16>
    %c3_53 = arith.constant 3 : index
    %c0_54 = arith.constant 0 : index
    %c0_55 = arith.constant 0 : index
    %67 = vector.load %arg7[%c3_53, %c0_54, %c0_55] : memref<4x8x128xbf16, #tpu.memory_space<vmem>>, vector<1x8x128xbf16>
    %68 = vector.shape_cast %67 : vector<1x8x128xbf16> to vector<8x128xbf16>
    %cst_56 = arith.constant dense<0.000000e+00> : vector<128x128xf32>
    %69 = tpu.matmul %66, %68, %cst_56 {dimension_numbers = #tpu.dot_dimension_numbers<[1], [0], [0], [1], [0, 0, 1, 1], [], []>} : vector<128x8xbf16>, vector<8x128xbf16>, vector<128x128xf32> -> vector<128x128xf32>
    %cst_57 = arith.constant 0.000000e+00 : f32
    %70 = vector.broadcast %cst_57 : f32 to vector<128x128xf32>
    %71 = arith.select %13, %69, %70 : vector<128x128xi1>, vector<128x128xf32>
    %72 = arith.truncf %71 : vector<128x128xf32> to vector<128x128xbf16>
    %c3_58 = arith.constant 3 : index
    %c0_59 = arith.constant 0 : index
    %c0_60 = arith.constant 0 : index
    %73 = vector.load %arg14[%c3_58, %c0_59, %c0_60] : memref<4x128x32xf32, #tpu.memory_space<vmem>>, vector<1x128x32xf32>
    %74 = vector.shape_cast %73 : vector<1x128x32xf32> to vector<128x32xf32>
    %c3_61 = arith.constant 3 : index
    %c0_62 = arith.constant 0 : index
    %c0_63 = arith.constant 0 : index
    %75 = vector.load %arg5[%c3_61, %c0_62, %c0_63] : memref<4x128x32xbf16, #tpu.memory_space<vmem>>, vector<1x128x32xbf16>
    %76 = vector.shape_cast %75 : vector<1x128x32xbf16> to vector<128x32xbf16>
    %cst_64 = arith.constant dense<0.000000e+00> : vector<128x32xf32>
    %77 = tpu.matmul %72, %76, %cst_64 {dimension_numbers = #tpu.dot_dimension_numbers<[1], [0], [0], [1], [0, 0, 1, 1], [], []>} : vector<128x128xbf16>, vector<128x32xbf16>, vector<128x32xf32> -> vector<128x32xf32>
    %78 = arith.addf %74, %77 : vector<128x32xf32>
    %c3_65 = arith.constant 3 : index
    %c0_66 = arith.constant 0 : index
    %c0_67 = arith.constant 0 : index
    %79 = vector.load %arg14[%c3_65, %c0_66, %c0_67] : memref<4x128x32xf32, #tpu.memory_space<vmem>>, vector<1x128x32xf32>
    %80 = vector.shape_cast %79 : vector<1x128x32xf32> to vector<128x32xf32>
    %81 = vector.shape_cast %78 : vector<128x32xf32> to vector<1x128x32xf32>
    tpu.vector_store %arg14[%c3_65, %c0_66, %c0_67], %81 {strides = array<i32>} : memref<4x128x32xf32, #tpu.memory_space<vmem>>, vector<1x128x32xf32>,
    %82 = arith.cmpi eq, %3, %1 : i32
    %83 = arith.extui %82 : i1 to i32
    %c0_i32_68 = arith.constant 0 : i32
    %84 = arith.cmpi ne, %83, %c0_i32_68 : i32
    scf.if %84 {
      %c0_69 = arith.constant 0 : index
      %c0_70 = arith.constant 0 : index
      %85 = vector.load %arg11[%c0_69, %c0_70] : memref<8x32xf32, #tpu.memory_space<vmem>>, vector<1x32xf32>
      %c1_71 = arith.constant 1 : index
      %c0_72 = arith.constant 0 : index
      %86 = vector.load %arg11[%c1_71, %c0_72] : memref<8x32xf32, #tpu.memory_space<vmem>>, vector<1x32xf32>
      %c2_73 = arith.constant 2 : index
      %c0_74 = arith.constant 0 : index
      %87 = vector.load %arg11[%c2_73, %c0_74] : memref<8x32xf32, #tpu.memory_space<vmem>>, vector<1x32xf32>
      %c3_75 = arith.constant 3 : index
      %c0_76 = arith.constant 0 : index
      %88 = vector.load %arg11[%c3_75, %c0_76] : memref<8x32xf32, #tpu.memory_space<vmem>>, vector<1x32xf32>
      %c4 = arith.constant 4 : index
      %c0_77 = arith.constant 0 : index
      %89 = vector.load %arg11[%c4, %c0_77] : memref<8x32xf32, #tpu.memory_space<vmem>>, vector<1x32xf32>
      %c5 = arith.constant 5 : index
      %c0_78 = arith.constant 0 : index
      %90 = vector.load %arg11[%c5, %c0_78] : memref<8x32xf32, #tpu.memory_space<vmem>>, vector<1x32xf32>
      %c0_i32_79 = arith.constant 0 : i32
      %c2_i32 = arith.constant 2 : i32
      %91 = arith.addi %c0_i32_79, %c2_i32 : i32
      %c1_i32 = arith.constant 1 : i32
      scf.for %arg15 = %c0_i32_79 to %91 step %c1_i32  : i32 {
        %c64_i32 = arith.constant 64 : i32
        %92 = arith.muli %arg15, %c64_i32 : i32
        %93 = tpu.assume_multiple %92, 64 : i32
        %c0_81 = arith.constant 0 : index
        %94 = arith.index_cast %93 : i32 to index
        %c0_82 = arith.constant 0 : index
        %95 = vector.load %arg14[%c0_81, %94, %c0_82] : memref<4x128x32xf32, #tpu.memory_space<vmem>>, vector<4x64x32xf32>
        %96 = vector.extract_strided_slice %95 {offsets = [0, 0, 0], sizes = [1, 64, 32], strides = [1, 1, 1]} : vector<4x64x32xf32> to vector<1x64x32xf32>
        %97 = vector.shape_cast %96 : vector<1x64x32xf32> to vector<64x32xf32>
        %98 = vector.extract_strided_slice %97 {offsets = [0, 0], sizes = [64, 8], strides = [1, 1]} : vector<64x32xf32> to vector<64x8xf32>
        %99 = vector.extract_strided_slice %95 {offsets = [1, 0, 0], sizes = [1, 64, 32], strides = [1, 1, 1]} : vector<4x64x32xf32> to vector<1x64x32xf32>
        %100 = vector.shape_cast %99 : vector<1x64x32xf32> to vector<64x32xf32>
        %101 = vector.extract_strided_slice %100 {offsets = [0, 0], sizes = [64, 8], strides = [1, 1]} : vector<64x32xf32> to vector<64x8xf32>
        %102 = vector.extract_strided_slice %95 {offsets = [2, 0, 0], sizes = [1, 64, 32], strides = [1, 1, 1]} : vector<4x64x32xf32> to vector<1x64x32xf32>
        %103 = vector.shape_cast %102 : vector<1x64x32xf32> to vector<64x32xf32>
        %104 = vector.extract_strided_slice %103 {offsets = [0, 0], sizes = [64, 8], strides = [1, 1]} : vector<64x32xf32> to vector<64x8xf32>
        %105 = vector.extract_strided_slice %95 {offsets = [3, 0, 0], sizes = [1, 64, 32], strides = [1, 1, 1]} : vector<4x64x32xf32> to vector<1x64x32xf32>
        %106 = vector.shape_cast %105 : vector<1x64x32xf32> to vector<64x32xf32>
        %107 = vector.extract_strided_slice %106 {offsets = [0, 0], sizes = [64, 8], strides = [1, 1]} : vector<64x32xf32> to vector<64x8xf32>
        %108 = tpu.concatenate %98, %101, %104, %107 in 1 : vector<64x8xf32>, vector<64x8xf32>, vector<64x8xf32>, vector<64x8xf32> -> vector<64x32xf32>
        %c0_83 = arith.constant 0 : index
        %109 = arith.index_cast %93 : i32 to index
        %c0_84 = arith.constant 0 : index
        %110 = vector.load %arg4[%c0_83, %109, %c0_84] : memref<4x128x32xf32, #tpu.memory_space<vmem>>, vector<1x64x32xf32>
        %111 = vector.shape_cast %110 : vector<1x64x32xf32> to vector<64x32xf32>
        %112 = arith.truncf %108 : vector<64x32xf32> to vector<64x32xbf16>
        %c0_85 = arith.constant 0 : index
        %c0_86 = arith.constant 0 : index
        %113 = vector.load %arg8[%c0_85, %c0_86] : memref<32x32xbf16, #tpu.memory_space<vmem>>, vector<32x32xbf16>
        %cst_87 = arith.constant dense<0.000000e+00> : vector<64x32xf32>
        %114 = tpu.matmul %112, %113, %cst_87 {dimension_numbers = #tpu.dot_dimension_numbers<[1], [0], [0], [1], [0, 0, 1, 1], [], []>} : vector<64x32xbf16>, vector<32x32xbf16>, vector<64x32xf32> -> vector<64x32xf32>
        %115 = vector.broadcast %85 : vector<1x32xf32> to vector<64x32xf32>
        %116 = arith.addf %114, %115 : vector<64x32xf32>
        %cst_88 = arith.constant dense<0.000000e+00> : vector<64xf32>
        %117 = vector.multi_reduction <add>, %116, %cst_88 [1] : vector<64x32xf32> to vector<64xf32>
        %118 = vector.shape_cast %117 : vector<64xf32> to vector<64x1xf32>
        %cst_89 = arith.constant 3.200000e+01 : f32
        %119 = vector.broadcast %cst_89 : f32 to vector<64x1xf32>
        %120 = arith.divf %118, %119 : vector<64x1xf32>
        %121 = vector.broadcast %120 : vector<64x1xf32> to vector<64x32xf32>
        %122 = arith.subf %116, %121 : vector<64x32xf32>
        %123 = arith.mulf %122, %122 : vector<64x32xf32>
        %cst_90 = arith.constant dense<0.000000e+00> : vector<64xf32>
        %124 = vector.multi_reduction <add>, %123, %cst_90 [1] : vector<64x32xf32> to vector<64xf32>
        %125 = vector.shape_cast %124 : vector<64xf32> to vector<64x1xf32>
        %cst_91 = arith.constant 3.200000e+01 : f32
        %126 = vector.broadcast %cst_91 : f32 to vector<64x1xf32>
        %127 = arith.divf %125, %126 : vector<64x1xf32>
        %128 = vector.broadcast %120 : vector<64x1xf32> to vector<64x32xf32>
        %129 = arith.subf %116, %128 : vector<64x32xf32>
        %cst_92 = arith.constant 9.99999974E-6 : f32
        %130 = vector.broadcast %cst_92 : f32 to vector<64x1xf32>
        %131 = arith.addf %127, %130 : vector<64x1xf32>
        %132 = math.rsqrt %131 : vector<64x1xf32>
        %133 = vector.broadcast %132 : vector<64x1xf32> to vector<64x32xf32>
        %134 = arith.mulf %129, %133 : vector<64x32xf32>
        %135 = vector.broadcast %86 : vector<1x32xf32> to vector<64x32xf32>
        %136 = arith.mulf %134, %135 : vector<64x32xf32>
        %137 = vector.broadcast %87 : vector<1x32xf32> to vector<64x32xf32>
        %138 = arith.addf %136, %137 : vector<64x32xf32>
        %139 = arith.addf %138, %111 : vector<64x32xf32>
        %140 = arith.truncf %139 : vector<64x32xf32> to vector<64x32xbf16>
        %c0_93 = arith.constant 0 : index
        %c0_94 = arith.constant 0 : index
        %141 = vector.load %arg9[%c0_93, %c0_94] : memref<32x128xbf16, #tpu.memory_space<vmem>>, vector<32x128xbf16>
        %cst_95 = arith.constant dense<0.000000e+00> : vector<64x128xf32>
        %142 = tpu.matmul %140, %141, %cst_95 {dimension_numbers = #tpu.dot_dimension_numbers<[1], [0], [0], [1], [0, 0, 1, 1], [], []>} : vector<64x32xbf16>, vector<32x128xbf16>, vector<64x128xf32> -> vector<64x128xf32>
        %c0_96 = arith.constant 0 : index
        %c0_97 = arith.constant 0 : index
        %143 = vector.load %arg12[%c0_96, %c0_97] : memref<1x128xf32, #tpu.memory_space<vmem>>, vector<1x128xf32>
        %144 = vector.broadcast %143 : vector<1x128xf32> to vector<64x128xf32>
        %145 = arith.addf %142, %144 : vector<64x128xf32>
        %cst_98 = arith.constant 5.000000e-01 : f32
        %146 = vector.broadcast %cst_98 : f32 to vector<64x128xf32>
        %147 = arith.mulf %146, %145 : vector<64x128xf32>
        %cst_99 = arith.constant 4.471500e-02 : f32
        %148 = vector.broadcast %cst_99 : f32 to vector<64x128xf32>
        %149 = arith.mulf %148, %145 : vector<64x128xf32>
        %150 = arith.mulf %149, %145 : vector<64x128xf32>
        %151 = arith.mulf %150, %145 : vector<64x128xf32>
        %152 = arith.addf %145, %151 : vector<64x128xf32>
        %cst_100 = arith.constant 0.797884583 : f32
        %153 = vector.broadcast %cst_100 : f32 to vector<64x128xf32>
        %154 = arith.mulf %153, %152 : vector<64x128xf32>
        %155 = math.tanh %154 : vector<64x128xf32>
        %cst_101 = arith.constant 1.000000e+00 : f32
        %156 = vector.broadcast %cst_101 : f32 to vector<64x128xf32>
        %157 = arith.addf %156, %155 : vector<64x128xf32>
        %158 = arith.mulf %147, %157 : vector<64x128xf32>
        %159 = arith.truncf %158 : vector<64x128xf32> to vector<64x128xbf16>
        %c0_102 = arith.constant 0 : index
        %c0_103 = arith.constant 0 : index
        %160 = vector.load %arg10[%c0_102, %c0_103] : memref<128x32xbf16, #tpu.memory_space<vmem>>, vector<128x32xbf16>
        %cst_104 = arith.constant dense<0.000000e+00> : vector<64x32xf32>
        %161 = tpu.matmul %159, %160, %cst_104 {dimension_numbers = #tpu.dot_dimension_numbers<[1], [0], [0], [1], [0, 0, 1, 1], [], []>} : vector<64x128xbf16>, vector<128x32xbf16>, vector<64x32xf32> -> vector<64x32xf32>
        %162 = vector.broadcast %88 : vector<1x32xf32> to vector<64x32xf32>
        %163 = arith.addf %161, %162 : vector<64x32xf32>
        %cst_105 = arith.constant dense<0.000000e+00> : vector<64xf32>
        %164 = vector.multi_reduction <add>, %163, %cst_105 [1] : vector<64x32xf32> to vector<64xf32>
        %165 = vector.shape_cast %164 : vector<64xf32> to vector<64x1xf32>
        %cst_106 = arith.constant 3.200000e+01 : f32
        %166 = vector.broadcast %cst_106 : f32 to vector<64x1xf32>
        %167 = arith.divf %165, %166 : vector<64x1xf32>
        %168 = vector.broadcast %167 : vector<64x1xf32> to vector<64x32xf32>
        %169 = arith.subf %163, %168 : vector<64x32xf32>
        %170 = arith.mulf %169, %169 : vector<64x32xf32>
        %cst_107 = arith.constant dense<0.000000e+00> : vector<64xf32>
        %171 = vector.multi_reduction <add>, %170, %cst_107 [1] : vector<64x32xf32> to vector<64xf32>
        %172 = vector.shape_cast %171 : vector<64xf32> to vector<64x1xf32>
        %cst_108 = arith.constant 3.200000e+01 : f32
        %173 = vector.broadcast %cst_108 : f32 to vector<64x1xf32>
        %174 = arith.divf %172, %173 : vector<64x1xf32>
        %175 = vector.broadcast %167 : vector<64x1xf32> to vector<64x32xf32>
        %176 = arith.subf %163, %175 : vector<64x32xf32>
        %cst_109 = arith.constant 9.99999974E-6 : f32
        %177 = vector.broadcast %cst_109 : f32 to vector<64x1xf32>
        %178 = arith.addf %174, %177 : vector<64x1xf32>
        %179 = math.rsqrt %178 : vector<64x1xf32>
        %180 = vector.broadcast %179 : vector<64x1xf32> to vector<64x32xf32>
        %181 = arith.mulf %176, %180 : vector<64x32xf32>
        %182 = vector.broadcast %89 : vector<1x32xf32> to vector<64x32xf32>
        %183 = arith.mulf %181, %182 : vector<64x32xf32>
        %184 = vector.broadcast %90 : vector<1x32xf32> to vector<64x32xf32>
        %185 = arith.addf %183, %184 : vector<64x32xf32>
        %186 = arith.addf %185, %139 : vector<64x32xf32>
        %c0_110 = arith.constant 0 : index
        %187 = arith.index_cast %93 : i32 to index
        %c0_111 = arith.constant 0 : index
        %188 = vector.load %arg13[%c0_110, %187, %c0_111] : memref<4x128x32xf32, #tpu.memory_space<vmem>>, vector<1x64x32xf32>
        %189 = vector.shape_cast %188 : vector<1x64x32xf32> to vector<64x32xf32>
        %190 = vector.shape_cast %186 : vector<64x32xf32> to vector<1x64x32xf32>
        tpu.vector_store %arg13[%c0_110, %187, %c0_111], %190 {strides = array<i32>} : memref<4x128x32xf32, #tpu.memory_space<vmem>>, vector<1x64x32xf32>,
        %191 = vector.extract_strided_slice %95 {offsets = [0, 0, 0], sizes = [1, 64, 32], strides = [1, 1, 1]} : vector<4x64x32xf32> to vector<1x64x32xf32>
        %192 = vector.shape_cast %191 : vector<1x64x32xf32> to vector<64x32xf32>
        %193 = vector.extract_strided_slice %192 {offsets = [0, 8], sizes = [64, 8], strides = [1, 1]} : vector<64x32xf32> to vector<64x8xf32>
        %194 = vector.extract_strided_slice %95 {offsets = [1, 0, 0], sizes = [1, 64, 32], strides = [1, 1, 1]} : vector<4x64x32xf32> to vector<1x64x32xf32>
        %195 = vector.shape_cast %194 : vector<1x64x32xf32> to vector<64x32xf32>
        %196 = vector.extract_strided_slice %195 {offsets = [0, 8], sizes = [64, 8], strides = [1, 1]} : vector<64x32xf32> to vector<64x8xf32>
        %197 = vector.extract_strided_slice %95 {offsets = [2, 0, 0], sizes = [1, 64, 32], strides = [1, 1, 1]} : vector<4x64x32xf32> to vector<1x64x32xf32>
        %198 = vector.shape_cast %197 : vector<1x64x32xf32> to vector<64x32xf32>
        %199 = vector.extract_strided_slice %198 {offsets = [0, 8], sizes = [64, 8], strides = [1, 1]} : vector<64x32xf32> to vector<64x8xf32>
        %200 = vector.extract_strided_slice %95 {offsets = [3, 0, 0], sizes = [1, 64, 32], strides = [1, 1, 1]} : vector<4x64x32xf32> to vector<1x64x32xf32>
        %201 = vector.shape_cast %200 : vector<1x64x32xf32> to vector<64x32xf32>
        %202 = vector.extract_strided_slice %201 {offsets = [0, 8], sizes = [64, 8], strides = [1, 1]} : vector<64x32xf32> to vector<64x8xf32>
        %203 = tpu.concatenate %193, %196, %199, %202 in 1 : vector<64x8xf32>, vector<64x8xf32>, vector<64x8xf32>, vector<64x8xf32> -> vector<64x32xf32>
        %c1_112 = arith.constant 1 : index
        %204 = arith.index_cast %93 : i32 to index
        %c0_113 = arith.constant 0 : index
        %205 = vector.load %arg4[%c1_112, %204, %c0_113] : memref<4x128x32xf32, #tpu.memory_space<vmem>>, vector<1x64x32xf32>
        %206 = vector.shape_cast %205 : vector<1x64x32xf32> to vector<64x32xf32>
        %207 = arith.truncf %203 : vector<64x32xf32> to vector<64x32xbf16>
        %c0_114 = arith.constant 0 : index
        %c0_115 = arith.constant 0 : index
        %208 = vector.load %arg8[%c0_114, %c0_115] : memref<32x32xbf16, #tpu.memory_space<vmem>>, vector<32x32xbf16>
        %cst_116 = arith.constant dense<0.000000e+00> : vector<64x32xf32>
        %209 = tpu.matmul %207, %208, %cst_116 {dimension_numbers = #tpu.dot_dimension_numbers<[1], [0], [0], [1], [0, 0, 1, 1], [], []>} : vector<64x32xbf16>, vector<32x32xbf16>, vector<64x32xf32> -> vector<64x32xf32>
        %210 = vector.broadcast %85 : vector<1x32xf32> to vector<64x32xf32>
        %211 = arith.addf %209, %210 : vector<64x32xf32>
        %cst_117 = arith.constant dense<0.000000e+00> : vector<64xf32>
        %212 = vector.multi_reduction <add>, %211, %cst_117 [1] : vector<64x32xf32> to vector<64xf32>
        %213 = vector.shape_cast %212 : vector<64xf32> to vector<64x1xf32>
        %cst_118 = arith.constant 3.200000e+01 : f32
        %214 = vector.broadcast %cst_118 : f32 to vector<64x1xf32>
        %215 = arith.divf %213, %214 : vector<64x1xf32>
        %216 = vector.broadcast %215 : vector<64x1xf32> to vector<64x32xf32>
        %217 = arith.subf %211, %216 : vector<64x32xf32>
        %218 = arith.mulf %217, %217 : vector<64x32xf32>
        %cst_119 = arith.constant dense<0.000000e+00> : vector<64xf32>
        %219 = vector.multi_reduction <add>, %218, %cst_119 [1] : vector<64x32xf32> to vector<64xf32>
        %220 = vector.shape_cast %219 : vector<64xf32> to vector<64x1xf32>
        %cst_120 = arith.constant 3.200000e+01 : f32
        %221 = vector.broadcast %cst_120 : f32 to vector<64x1xf32>
        %222 = arith.divf %220, %221 : vector<64x1xf32>
        %223 = vector.broadcast %215 : vector<64x1xf32> to vector<64x32xf32>
        %224 = arith.subf %211, %223 : vector<64x32xf32>
        %cst_121 = arith.constant 9.99999974E-6 : f32
        %225 = vector.broadcast %cst_121 : f32 to vector<64x1xf32>
        %226 = arith.addf %222, %225 : vector<64x1xf32>
        %227 = math.rsqrt %226 : vector<64x1xf32>
        %228 = vector.broadcast %227 : vector<64x1xf32> to vector<64x32xf32>
        %229 = arith.mulf %224, %228 : vector<64x32xf32>
        %230 = vector.broadcast %86 : vector<1x32xf32> to vector<64x32xf32>
        %231 = arith.mulf %229, %230 : vector<64x32xf32>
        %232 = vector.broadcast %87 : vector<1x32xf32> to vector<64x32xf32>
        %233 = arith.addf %231, %232 : vector<64x32xf32>
        %234 = arith.addf %233, %206 : vector<64x32xf32>
        %235 = arith.truncf %234 : vector<64x32xf32> to vector<64x32xbf16>
        %c0_122 = arith.constant 0 : index
        %c0_123 = arith.constant 0 : index
        %236 = vector.load %arg9[%c0_122, %c0_123] : memref<32x128xbf16, #tpu.memory_space<vmem>>, vector<32x128xbf16>
        %cst_124 = arith.constant dense<0.000000e+00> : vector<64x128xf32>
        %237 = tpu.matmul %235, %236, %cst_124 {dimension_numbers = #tpu.dot_dimension_numbers<[1], [0], [0], [1], [0, 0, 1, 1], [], []>} : vector<64x32xbf16>, vector<32x128xbf16>, vector<64x128xf32> -> vector<64x128xf32>
        %c0_125 = arith.constant 0 : index
        %c0_126 = arith.constant 0 : index
        %238 = vector.load %arg12[%c0_125, %c0_126] : memref<1x128xf32, #tpu.memory_space<vmem>>, vector<1x128xf32>
        %239 = vector.broadcast %238 : vector<1x128xf32> to vector<64x128xf32>
        %240 = arith.addf %237, %239 : vector<64x128xf32>
        %cst_127 = arith.constant 5.000000e-01 : f32
        %241 = vector.broadcast %cst_127 : f32 to vector<64x128xf32>
        %242 = arith.mulf %241, %240 : vector<64x128xf32>
        %cst_128 = arith.constant 4.471500e-02 : f32
        %243 = vector.broadcast %cst_128 : f32 to vector<64x128xf32>
        %244 = arith.mulf %243, %240 : vector<64x128xf32>
        %245 = arith.mulf %244, %240 : vector<64x128xf32>
        %246 = arith.mulf %245, %240 : vector<64x128xf32>
        %247 = arith.addf %240, %246 : vector<64x128xf32>
        %cst_129 = arith.constant 0.797884583 : f32
        %248 = vector.broadcast %cst_129 : f32 to vector<64x128xf32>
        %249 = arith.mulf %248, %247 : vector<64x128xf32>
        %250 = math.tanh %249 : vector<64x128xf32>
        %cst_130 = arith.constant 1.000000e+00 : f32
        %251 = vector.broadcast %cst_130 : f32 to vector<64x128xf32>
        %252 = arith.addf %251, %250 : vector<64x128xf32>
        %253 = arith.mulf %242, %252 : vector<64x128xf32>
        %254 = arith.truncf %253 : vector<64x128xf32> to vector<64x128xbf16>
        %c0_131 = arith.constant 0 : index
        %c0_132 = arith.constant 0 : index
        %255 = vector.load %arg10[%c0_131, %c0_132] : memref<128x32xbf16, #tpu.memory_space<vmem>>, vector<128x32xbf16>
        %cst_133 = arith.constant dense<0.000000e+00> : vector<64x32xf32>
        %256 = tpu.matmul %254, %255, %cst_133 {dimension_numbers = #tpu.dot_dimension_numbers<[1], [0], [0], [1], [0, 0, 1, 1], [], []>} : vector<64x128xbf16>, vector<128x32xbf16>, vector<64x32xf32> -> vector<64x32xf32>
        %257 = vector.broadcast %88 : vector<1x32xf32> to vector<64x32xf32>
        %258 = arith.addf %256, %257 : vector<64x32xf32>
        %cst_134 = arith.constant dense<0.000000e+00> : vector<64xf32>
        %259 = vector.multi_reduction <add>, %258, %cst_134 [1] : vector<64x32xf32> to vector<64xf32>
        %260 = vector.shape_cast %259 : vector<64xf32> to vector<64x1xf32>
        %cst_135 = arith.constant 3.200000e+01 : f32
        %261 = vector.broadcast %cst_135 : f32 to vector<64x1xf32>
        %262 = arith.divf %260, %261 : vector<64x1xf32>
        %263 = vector.broadcast %262 : vector<64x1xf32> to vector<64x32xf32>
        %264 = arith.subf %258, %263 : vector<64x32xf32>
        %265 = arith.mulf %264, %264 : vector<64x32xf32>
        %cst_136 = arith.constant dense<0.000000e+00> : vector<64xf32>
        %266 = vector.multi_reduction <add>, %265, %cst_136 [1] : vector<64x32xf32> to vector<64xf32>
        %267 = vector.shape_cast %266 : vector<64xf32> to vector<64x1xf32>
        %cst_137 = arith.constant 3.200000e+01 : f32
        %268 = vector.broadcast %cst_137 : f32 to vector<64x1xf32>
        %269 = arith.divf %267, %268 : vector<64x1xf32>
        %270 = vector.broadcast %262 : vector<64x1xf32> to vector<64x32xf32>
        %271 = arith.subf %258, %270 : vector<64x32xf32>
        %cst_138 = arith.constant 9.99999974E-6 : f32
        %272 = vector.broadcast %cst_138 : f32 to vector<64x1xf32>
        %273 = arith.addf %269, %272 : vector<64x1xf32>
        %274 = math.rsqrt %273 : vector<64x1xf32>
        %275 = vector.broadcast %274 : vector<64x1xf32> to vector<64x32xf32>
        %276 = arith.mulf %271, %275 : vector<64x32xf32>
        %277 = vector.broadcast %89 : vector<1x32xf32> to vector<64x32xf32>
        %278 = arith.mulf %276, %277 : vector<64x32xf32>
        %279 = vector.broadcast %90 : vector<1x32xf32> to vector<64x32xf32>
        %280 = arith.addf %278, %279 : vector<64x32xf32>
        %281 = arith.addf %280, %234 : vector<64x32xf32>
        %c1_139 = arith.constant 1 : index
        %282 = arith.index_cast %93 : i32 to index
        %c0_140 = arith.constant 0 : index
        %283 = vector.load %arg13[%c1_139, %282, %c0_140] : memref<4x128x32xf32, #tpu.memory_space<vmem>>, vector<1x64x32xf32>
        %284 = vector.shape_cast %283 : vector<1x64x32xf32> to vector<64x32xf32>
        %285 = vector.shape_cast %281 : vector<64x32xf32> to vector<1x64x32xf32>
        tpu.vector_store %arg13[%c1_139, %282, %c0_140], %285 {strides = array<i32>} : memref<4x128x32xf32, #tpu.memory_space<vmem>>, vector<1x64x32xf32>,
        %286 = vector.extract_strided_slice %95 {offsets = [0, 0, 0], sizes = [1, 64, 32], strides = [1, 1, 1]} : vector<4x64x32xf32> to vector<1x64x32xf32>
        %287 = vector.shape_cast %286 : vector<1x64x32xf32> to vector<64x32xf32>
        %288 = vector.extract_strided_slice %287 {offsets = [0, 16], sizes = [64, 8], strides = [1, 1]} : vector<64x32xf32> to vector<64x8xf32>
        %289 = vector.extract_strided_slice %95 {offsets = [1, 0, 0], sizes = [1, 64, 32], strides = [1, 1, 1]} : vector<4x64x32xf32> to vector<1x64x32xf32>
        %290 = vector.shape_cast %289 : vector<1x64x32xf32> to vector<64x32xf32>
        %291 = vector.extract_strided_slice %290 {offsets = [0, 16], sizes = [64, 8], strides = [1, 1]} : vector<64x32xf32> to vector<64x8xf32>
        %292 = vector.extract_strided_slice %95 {offsets = [2, 0, 0], sizes = [1, 64, 32], strides = [1, 1, 1]} : vector<4x64x32xf32> to vector<1x64x32xf32>
        %293 = vector.shape_cast %292 : vector<1x64x32xf32> to vector<64x32xf32>
        %294 = vector.extract_strided_slice %293 {offsets = [0, 16], sizes = [64, 8], strides = [1, 1]} : vector<64x32xf32> to vector<64x8xf32>
        %295 = vector.extract_strided_slice %95 {offsets = [3, 0, 0], sizes = [1, 64, 32], strides = [1, 1, 1]} : vector<4x64x32xf32> to vector<1x64x32xf32>
        %296 = vector.shape_cast %295 : vector<1x64x32xf32> to vector<64x32xf32>
        %297 = vector.extract_strided_slice %296 {offsets = [0, 16], sizes = [64, 8], strides = [1, 1]} : vector<64x32xf32> to vector<64x8xf32>
        %298 = tpu.concatenate %288, %291, %294, %297 in 1 : vector<64x8xf32>, vector<64x8xf32>, vector<64x8xf32>, vector<64x8xf32> -> vector<64x32xf32>
        %c2_141 = arith.constant 2 : index
        %299 = arith.index_cast %93 : i32 to index
        %c0_142 = arith.constant 0 : index
        %300 = vector.load %arg4[%c2_141, %299, %c0_142] : memref<4x128x32xf32, #tpu.memory_space<vmem>>, vector<1x64x32xf32>
        %301 = vector.shape_cast %300 : vector<1x64x32xf32> to vector<64x32xf32>
        %302 = arith.truncf %298 : vector<64x32xf32> to vector<64x32xbf16>
        %c0_143 = arith.constant 0 : index
        %c0_144 = arith.constant 0 : index
        %303 = vector.load %arg8[%c0_143, %c0_144] : memref<32x32xbf16, #tpu.memory_space<vmem>>, vector<32x32xbf16>
        %cst_145 = arith.constant dense<0.000000e+00> : vector<64x32xf32>
        %304 = tpu.matmul %302, %303, %cst_145 {dimension_numbers = #tpu.dot_dimension_numbers<[1], [0], [0], [1], [0, 0, 1, 1], [], []>} : vector<64x32xbf16>, vector<32x32xbf16>, vector<64x32xf32> -> vector<64x32xf32>
        %305 = vector.broadcast %85 : vector<1x32xf32> to vector<64x32xf32>
        %306 = arith.addf %304, %305 : vector<64x32xf32>
        %cst_146 = arith.constant dense<0.000000e+00> : vector<64xf32>
        %307 = vector.multi_reduction <add>, %306, %cst_146 [1] : vector<64x32xf32> to vector<64xf32>
        %308 = vector.shape_cast %307 : vector<64xf32> to vector<64x1xf32>
        %cst_147 = arith.constant 3.200000e+01 : f32
        %309 = vector.broadcast %cst_147 : f32 to vector<64x1xf32>
        %310 = arith.divf %308, %309 : vector<64x1xf32>
        %311 = vector.broadcast %310 : vector<64x1xf32> to vector<64x32xf32>
        %312 = arith.subf %306, %311 : vector<64x32xf32>
        %313 = arith.mulf %312, %312 : vector<64x32xf32>
        %cst_148 = arith.constant dense<0.000000e+00> : vector<64xf32>
        %314 = vector.multi_reduction <add>, %313, %cst_148 [1] : vector<64x32xf32> to vector<64xf32>
        %315 = vector.shape_cast %314 : vector<64xf32> to vector<64x1xf32>
        %cst_149 = arith.constant 3.200000e+01 : f32
        %316 = vector.broadcast %cst_149 : f32 to vector<64x1xf32>
        %317 = arith.divf %315, %316 : vector<64x1xf32>
        %318 = vector.broadcast %310 : vector<64x1xf32> to vector<64x32xf32>
        %319 = arith.subf %306, %318 : vector<64x32xf32>
        %cst_150 = arith.constant 9.99999974E-6 : f32
        %320 = vector.broadcast %cst_150 : f32 to vector<64x1xf32>
        %321 = arith.addf %317, %320 : vector<64x1xf32>
        %322 = math.rsqrt %321 : vector<64x1xf32>
        %323 = vector.broadcast %322 : vector<64x1xf32> to vector<64x32xf32>
        %324 = arith.mulf %319, %323 : vector<64x32xf32>
        %325 = vector.broadcast %86 : vector<1x32xf32> to vector<64x32xf32>
        %326 = arith.mulf %324, %325 : vector<64x32xf32>
        %327 = vector.broadcast %87 : vector<1x32xf32> to vector<64x32xf32>
        %328 = arith.addf %326, %327 : vector<64x32xf32>
        %329 = arith.addf %328, %301 : vector<64x32xf32>
        %330 = arith.truncf %329 : vector<64x32xf32> to vector<64x32xbf16>
        %c0_151 = arith.constant 0 : index
        %c0_152 = arith.constant 0 : index
        %331 = vector.load %arg9[%c0_151, %c0_152] : memref<32x128xbf16, #tpu.memory_space<vmem>>, vector<32x128xbf16>
        %cst_153 = arith.constant dense<0.000000e+00> : vector<64x128xf32>
        %332 = tpu.matmul %330, %331, %cst_153 {dimension_numbers = #tpu.dot_dimension_numbers<[1], [0], [0], [1], [0, 0, 1, 1], [], []>} : vector<64x32xbf16>, vector<32x128xbf16>, vector<64x128xf32> -> vector<64x128xf32>
        %c0_154 = arith.constant 0 : index
        %c0_155 = arith.constant 0 : index
        %333 = vector.load %arg12[%c0_154, %c0_155] : memref<1x128xf32, #tpu.memory_space<vmem>>, vector<1x128xf32>
        %334 = vector.broadcast %333 : vector<1x128xf32> to vector<64x128xf32>
        %335 = arith.addf %332, %334 : vector<64x128xf32>
        %cst_156 = arith.constant 5.000000e-01 : f32
        %336 = vector.broadcast %cst_156 : f32 to vector<64x128xf32>
        %337 = arith.mulf %336, %335 : vector<64x128xf32>
        %cst_157 = arith.constant 4.471500e-02 : f32
        %338 = vector.broadcast %cst_157 : f32 to vector<64x128xf32>
        %339 = arith.mulf %338, %335 : vector<64x128xf32>
        %340 = arith.mulf %339, %335 : vector<64x128xf32>
        %341 = arith.mulf %340, %335 : vector<64x128xf32>
        %342 = arith.addf %335, %341 : vector<64x128xf32>
        %cst_158 = arith.constant 0.797884583 : f32
        %343 = vector.broadcast %cst_158 : f32 to vector<64x128xf32>
        %344 = arith.mulf %343, %342 : vector<64x128xf32>
        %345 = math.tanh %344 : vector<64x128xf32>
        %cst_159 = arith.constant 1.000000e+00 : f32
        %346 = vector.broadcast %cst_159 : f32 to vector<64x128xf32>
        %347 = arith.addf %346, %345 : vector<64x128xf32>
        %348 = arith.mulf %337, %347 : vector<64x128xf32>
        %349 = arith.truncf %348 : vector<64x128xf32> to vector<64x128xbf16>
        %c0_160 = arith.constant 0 : index
        %c0_161 = arith.constant 0 : index
        %350 = vector.load %arg10[%c0_160, %c0_161] : memref<128x32xbf16, #tpu.memory_space<vmem>>, vector<128x32xbf16>
        %cst_162 = arith.constant dense<0.000000e+00> : vector<64x32xf32>
        %351 = tpu.matmul %349, %350, %cst_162 {dimension_numbers = #tpu.dot_dimension_numbers<[1], [0], [0], [1], [0, 0, 1, 1], [], []>} : vector<64x128xbf16>, vector<128x32xbf16>, vector<64x32xf32> -> vector<64x32xf32>
        %352 = vector.broadcast %88 : vector<1x32xf32> to vector<64x32xf32>
        %353 = arith.addf %351, %352 : vector<64x32xf32>
        %cst_163 = arith.constant dense<0.000000e+00> : vector<64xf32>
        %354 = vector.multi_reduction <add>, %353, %cst_163 [1] : vector<64x32xf32> to vector<64xf32>
        %355 = vector.shape_cast %354 : vector<64xf32> to vector<64x1xf32>
        %cst_164 = arith.constant 3.200000e+01 : f32
        %356 = vector.broadcast %cst_164 : f32 to vector<64x1xf32>
        %357 = arith.divf %355, %356 : vector<64x1xf32>
        %358 = vector.broadcast %357 : vector<64x1xf32> to vector<64x32xf32>
        %359 = arith.subf %353, %358 : vector<64x32xf32>
        %360 = arith.mulf %359, %359 : vector<64x32xf32>
        %cst_165 = arith.constant dense<0.000000e+00> : vector<64xf32>
        %361 = vector.multi_reduction <add>, %360, %cst_165 [1] : vector<64x32xf32> to vector<64xf32>
        %362 = vector.shape_cast %361 : vector<64xf32> to vector<64x1xf32>
        %cst_166 = arith.constant 3.200000e+01 : f32
        %363 = vector.broadcast %cst_166 : f32 to vector<64x1xf32>
        %364 = arith.divf %362, %363 : vector<64x1xf32>
        %365 = vector.broadcast %357 : vector<64x1xf32> to vector<64x32xf32>
        %366 = arith.subf %353, %365 : vector<64x32xf32>
        %cst_167 = arith.constant 9.99999974E-6 : f32
        %367 = vector.broadcast %cst_167 : f32 to vector<64x1xf32>
        %368 = arith.addf %364, %367 : vector<64x1xf32>
        %369 = math.rsqrt %368 : vector<64x1xf32>
        %370 = vector.broadcast %369 : vector<64x1xf32> to vector<64x32xf32>
        %371 = arith.mulf %366, %370 : vector<64x32xf32>
        %372 = vector.broadcast %89 : vector<1x32xf32> to vector<64x32xf32>
        %373 = arith.mulf %371, %372 : vector<64x32xf32>
        %374 = vector.broadcast %90 : vector<1x32xf32> to vector<64x32xf32>
        %375 = arith.addf %373, %374 : vector<64x32xf32>
        %376 = arith.addf %375, %329 : vector<64x32xf32>
        %c2_168 = arith.constant 2 : index
        %377 = arith.index_cast %93 : i32 to index
        %c0_169 = arith.constant 0 : index
        %378 = vector.load %arg13[%c2_168, %377, %c0_169] : memref<4x128x32xf32, #tpu.memory_space<vmem>>, vector<1x64x32xf32>
        %379 = vector.shape_cast %378 : vector<1x64x32xf32> to vector<64x32xf32>
        %380 = vector.shape_cast %376 : vector<64x32xf32> to vector<1x64x32xf32>
        tpu.vector_store %arg13[%c2_168, %377, %c0_169], %380 {strides = array<i32>} : memref<4x128x32xf32, #tpu.memory_space<vmem>>, vector<1x64x32xf32>,
        %381 = vector.extract_strided_slice %95 {offsets = [0, 0, 0], sizes = [1, 64, 32], strides = [1, 1, 1]} : vector<4x64x32xf32> to vector<1x64x32xf32>
        %382 = vector.shape_cast %381 : vector<1x64x32xf32> to vector<64x32xf32>
        %383 = vector.extract_strided_slice %382 {offsets = [0, 24], sizes = [64, 8], strides = [1, 1]} : vector<64x32xf32> to vector<64x8xf32>
        %384 = vector.extract_strided_slice %95 {offsets = [1, 0, 0], sizes = [1, 64, 32], strides = [1, 1, 1]} : vector<4x64x32xf32> to vector<1x64x32xf32>
        %385 = vector.shape_cast %384 : vector<1x64x32xf32> to vector<64x32xf32>
        %386 = vector.extract_strided_slice %385 {offsets = [0, 24], sizes = [64, 8], strides = [1, 1]} : vector<64x32xf32> to vector<64x8xf32>
        %387 = vector.extract_strided_slice %95 {offsets = [2, 0, 0], sizes = [1, 64, 32], strides = [1, 1, 1]} : vector<4x64x32xf32> to vector<1x64x32xf32>
        %388 = vector.shape_cast %387 : vector<1x64x32xf32> to vector<64x32xf32>
        %389 = vector.extract_strided_slice %388 {offsets = [0, 24], sizes = [64, 8], strides = [1, 1]} : vector<64x32xf32> to vector<64x8xf32>
        %390 = vector.extract_strided_slice %95 {offsets = [3, 0, 0], sizes = [1, 64, 32], strides = [1, 1, 1]} : vector<4x64x32xf32> to vector<1x64x32xf32>
        %391 = vector.shape_cast %390 : vector<1x64x32xf32> to vector<64x32xf32>
        %392 = vector.extract_strided_slice %391 {offsets = [0, 24], sizes = [64, 8], strides = [1, 1]} : vector<64x32xf32> to vector<64x8xf32>
        %393 = tpu.concatenate %383, %386, %389, %392 in 1 : vector<64x8xf32>, vector<64x8xf32>, vector<64x8xf32>, vector<64x8xf32> -> vector<64x32xf32>
        %c3_170 = arith.constant 3 : index
        %394 = arith.index_cast %93 : i32 to index
        %c0_171 = arith.constant 0 : index
        %395 = vector.load %arg4[%c3_170, %394, %c0_171] : memref<4x128x32xf32, #tpu.memory_space<vmem>>, vector<1x64x32xf32>
        %396 = vector.shape_cast %395 : vector<1x64x32xf32> to vector<64x32xf32>
        %397 = arith.truncf %393 : vector<64x32xf32> to vector<64x32xbf16>
        %c0_172 = arith.constant 0 : index
        %c0_173 = arith.constant 0 : index
        %398 = vector.load %arg8[%c0_172, %c0_173] : memref<32x32xbf16, #tpu.memory_space<vmem>>, vector<32x32xbf16>
        %cst_174 = arith.constant dense<0.000000e+00> : vector<64x32xf32>
        %399 = tpu.matmul %397, %398, %cst_174 {dimension_numbers = #tpu.dot_dimension_numbers<[1], [0], [0], [1], [0, 0, 1, 1], [], []>} : vector<64x32xbf16>, vector<32x32xbf16>, vector<64x32xf32> -> vector<64x32xf32>
        %400 = vector.broadcast %85 : vector<1x32xf32> to vector<64x32xf32>
        %401 = arith.addf %399, %400 : vector<64x32xf32>
        %cst_175 = arith.constant dense<0.000000e+00> : vector<64xf32>
        %402 = vector.multi_reduction <add>, %401, %cst_175 [1] : vector<64x32xf32> to vector<64xf32>
        %403 = vector.shape_cast %402 : vector<64xf32> to vector<64x1xf32>
        %cst_176 = arith.constant 3.200000e+01 : f32
        %404 = vector.broadcast %cst_176 : f32 to vector<64x1xf32>
        %405 = arith.divf %403, %404 : vector<64x1xf32>
        %406 = vector.broadcast %405 : vector<64x1xf32> to vector<64x32xf32>
        %407 = arith.subf %401, %406 : vector<64x32xf32>
        %408 = arith.mulf %407, %407 : vector<64x32xf32>
        %cst_177 = arith.constant dense<0.000000e+00> : vector<64xf32>
        %409 = vector.multi_reduction <add>, %408, %cst_177 [1] : vector<64x32xf32> to vector<64xf32>
        %410 = vector.shape_cast %409 : vector<64xf32> to vector<64x1xf32>
        %cst_178 = arith.constant 3.200000e+01 : f32
        %411 = vector.broadcast %cst_178 : f32 to vector<64x1xf32>
        %412 = arith.divf %410, %411 : vector<64x1xf32>
        %413 = vector.broadcast %405 : vector<64x1xf32> to vector<64x32xf32>
        %414 = arith.subf %401, %413 : vector<64x32xf32>
        %cst_179 = arith.constant 9.99999974E-6 : f32
        %415 = vector.broadcast %cst_179 : f32 to vector<64x1xf32>
        %416 = arith.addf %412, %415 : vector<64x1xf32>
        %417 = math.rsqrt %416 : vector<64x1xf32>
        %418 = vector.broadcast %417 : vector<64x1xf32> to vector<64x32xf32>
        %419 = arith.mulf %414, %418 : vector<64x32xf32>
        %420 = vector.broadcast %86 : vector<1x32xf32> to vector<64x32xf32>
        %421 = arith.mulf %419, %420 : vector<64x32xf32>
        %422 = vector.broadcast %87 : vector<1x32xf32> to vector<64x32xf32>
        %423 = arith.addf %421, %422 : vector<64x32xf32>
        %424 = arith.addf %423, %396 : vector<64x32xf32>
        %425 = arith.truncf %424 : vector<64x32xf32> to vector<64x32xbf16>
        %c0_180 = arith.constant 0 : index
        %c0_181 = arith.constant 0 : index
        %426 = vector.load %arg9[%c0_180, %c0_181] : memref<32x128xbf16, #tpu.memory_space<vmem>>, vector<32x128xbf16>
        %cst_182 = arith.constant dense<0.000000e+00> : vector<64x128xf32>
        %427 = tpu.matmul %425, %426, %cst_182 {dimension_numbers = #tpu.dot_dimension_numbers<[1], [0], [0], [1], [0, 0, 1, 1], [], []>} : vector<64x32xbf16>, vector<32x128xbf16>, vector<64x128xf32> -> vector<64x128xf32>
        %c0_183 = arith.constant 0 : index
        %c0_184 = arith.constant 0 : index
        %428 = vector.load %arg12[%c0_183, %c0_184] : memref<1x128xf32, #tpu.memory_space<vmem>>, vector<1x128xf32>
        %429 = vector.broadcast %428 : vector<1x128xf32> to vector<64x128xf32>
        %430 = arith.addf %427, %429 : vector<64x128xf32>
        %cst_185 = arith.constant 5.000000e-01 : f32
        %431 = vector.broadcast %cst_185 : f32 to vector<64x128xf32>
        %432 = arith.mulf %431, %430 : vector<64x128xf32>
        %cst_186 = arith.constant 4.471500e-02 : f32
        %433 = vector.broadcast %cst_186 : f32 to vector<64x128xf32>
        %434 = arith.mulf %433, %430 : vector<64x128xf32>
        %435 = arith.mulf %434, %430 : vector<64x128xf32>
        %436 = arith.mulf %435, %430 : vector<64x128xf32>
        %437 = arith.addf %430, %436 : vector<64x128xf32>
        %cst_187 = arith.constant 0.797884583 : f32
        %438 = vector.broadcast %cst_187 : f32 to vector<64x128xf32>
        %439 = arith.mulf %438, %437 : vector<64x128xf32>
        %440 = math.tanh %439 : vector<64x128xf32>
        %cst_188 = arith.constant 1.000000e+00 : f32
        %441 = vector.broadcast %cst_188 : f32 to vector<64x128xf32>
        %442 = arith.addf %441, %440 : vector<64x128xf32>
        %443 = arith.mulf %432, %442 : vector<64x128xf32>
        %444 = arith.truncf %443 : vector<64x128xf32> to vector<64x128xbf16>
        %c0_189 = arith.constant 0 : index
        %c0_190 = arith.constant 0 : index
        %445 = vector.load %arg10[%c0_189, %c0_190] : memref<128x32xbf16, #tpu.memory_space<vmem>>, vector<128x32xbf16>
        %cst_191 = arith.constant dense<0.000000e+00> : vector<64x32xf32>
        %446 = tpu.matmul %444, %445, %cst_191 {dimension_numbers = #tpu.dot_dimension_numbers<[1], [0], [0], [1], [0, 0, 1, 1], [], []>} : vector<64x128xbf16>, vector<128x32xbf16>, vector<64x32xf32> -> vector<64x32xf32>
        %447 = vector.broadcast %88 : vector<1x32xf32> to vector<64x32xf32>
        %448 = arith.addf %446, %447 : vector<64x32xf32>
        %cst_192 = arith.constant dense<0.000000e+00> : vector<64xf32>
        %449 = vector.multi_reduction <add>, %448, %cst_192 [1] : vector<64x32xf32> to vector<64xf32>
        %450 = vector.shape_cast %449 : vector<64xf32> to vector<64x1xf32>
        %cst_193 = arith.constant 3.200000e+01 : f32
        %451 = vector.broadcast %cst_193 : f32 to vector<64x1xf32>
        %452 = arith.divf %450, %451 : vector<64x1xf32>
        %453 = vector.broadcast %452 : vector<64x1xf32> to vector<64x32xf32>
        %454 = arith.subf %448, %453 : vector<64x32xf32>
        %455 = arith.mulf %454, %454 : vector<64x32xf32>
        %cst_194 = arith.constant dense<0.000000e+00> : vector<64xf32>
        %456 = vector.multi_reduction <add>, %455, %cst_194 [1] : vector<64x32xf32> to vector<64xf32>
        %457 = vector.shape_cast %456 : vector<64xf32> to vector<64x1xf32>
        %cst_195 = arith.constant 3.200000e+01 : f32
        %458 = vector.broadcast %cst_195 : f32 to vector<64x1xf32>
        %459 = arith.divf %457, %458 : vector<64x1xf32>
        %460 = vector.broadcast %452 : vector<64x1xf32> to vector<64x32xf32>
        %461 = arith.subf %448, %460 : vector<64x32xf32>
        %cst_196 = arith.constant 9.99999974E-6 : f32
        %462 = vector.broadcast %cst_196 : f32 to vector<64x1xf32>
        %463 = arith.addf %459, %462 : vector<64x1xf32>
        %464 = math.rsqrt %463 : vector<64x1xf32>
        %465 = vector.broadcast %464 : vector<64x1xf32> to vector<64x32xf32>
        %466 = arith.mulf %461, %465 : vector<64x32xf32>
        %467 = vector.broadcast %89 : vector<1x32xf32> to vector<64x32xf32>
        %468 = arith.mulf %466, %467 : vector<64x32xf32>
        %469 = vector.broadcast %90 : vector<1x32xf32> to vector<64x32xf32>
        %470 = arith.addf %468, %469 : vector<64x32xf32>
        %471 = arith.addf %470, %424 : vector<64x32xf32>
        %c3_197 = arith.constant 3 : index
        %472 = arith.index_cast %93 : i32 to index
        %c0_198 = arith.constant 0 : index
        %473 = vector.load %arg13[%c3_197, %472, %c0_198] : memref<4x128x32xf32, #tpu.memory_space<vmem>>, vector<1x64x32xf32>
        %474 = vector.shape_cast %473 : vector<1x64x32xf32> to vector<64x32xf32>
        %475 = vector.shape_cast %471 : vector<64x32xf32> to vector<1x64x32xf32>
        tpu.vector_store %arg13[%c3_197, %472, %c0_198], %475 {strides = array<i32>} : memref<4x128x32xf32, #tpu.memory_space<vmem>>, vector<1x64x32xf32>,
      }
      %c2_i32_80 = arith.constant 2 : i32
    } else {
    }
    return
  }
  func.func @transform_0(%arg0: i32, %arg1: i32, %arg2: memref<3xi32, #tpu.memory_space<smem>>, %arg3: memref<3xi32, #tpu.memory_space<smem>>) -> (i32, i32, i32) {
    %0 = arith.index_cast %arg1 : i32 to index
    %1 = memref.load %arg2[%0] : memref<3xi32, #tpu.memory_space<smem>>
    %c0_i32 = arith.constant 0 : i32
    %c0_i32_0 = arith.constant 0 : i32
    return %arg0, %1, %c0_i32 : i32, i32, i32
  }
  func.func @transform_1(%arg0: i32, %arg1: i32, %arg2: memref<3xi32, #tpu.memory_space<smem>>, %arg3: memref<3xi32, #tpu.memory_space<smem>>) -> (i32, i32, i32) {
    %0 = arith.index_cast %arg1 : i32 to index
    %1 = memref.load %arg3[%0] : memref<3xi32, #tpu.memory_space<smem>>
    %c0_i32 = arith.constant 0 : i32
    %c0_i32_0 = arith.constant 0 : i32
    return %c0_i32, %1, %arg0 : i32, i32, i32
  }
  func.func @transform_2(%arg0: i32, %arg1: i32, %arg2: memref<3xi32, #tpu.memory_space<smem>>, %arg3: memref<3xi32, #tpu.memory_space<smem>>) -> (i32, i32, i32) {
    %0 = arith.index_cast %arg1 : i32 to index
    %1 = memref.load %arg2[%0] : memref<3xi32, #tpu.memory_space<smem>>
    %c0_i32 = arith.constant 0 : i32
    %c0_i32_0 = arith.constant 0 : i32
    %c0_i32_1 = arith.constant 0 : i32
    return %c0_i32, %1, %c0_i32_0 : i32, i32, i32
  }
  func.func @transform_3(%arg0: i32, %arg1: i32, %arg2: memref<3xi32, #tpu.memory_space<smem>>, %arg3: memref<3xi32, #tpu.memory_space<smem>>) -> (i32, i32, i32) {
    %0 = arith.index_cast %arg1 : i32 to index
    %1 = memref.load %arg3[%0] : memref<3xi32, #tpu.memory_space<smem>>
    %c0_i32 = arith.constant 0 : i32
    %c0_i32_0 = arith.constant 0 : i32
    %c0_i32_1 = arith.constant 0 : i32
    return %c0_i32, %c0_i32_0, %1 : i32, i32, i32
  }
  func.func @transform_4(%arg0: i32, %arg1: i32, %arg2: memref<3xi32, #tpu.memory_space<smem>>, %arg3: memref<3xi32, #tpu.memory_space<smem>>) -> (i32, i32) {
    %c0_i32 = arith.constant 0 : i32
    %c0_i32_0 = arith.constant 0 : i32
    %c0_i32_1 = arith.constant 0 : i32
    return %c0_i32, %c0_i32_0 : i32, i32
  }
  func.func @transform_5(%arg0: i32, %arg1: i32, %arg2: memref<3xi32, #tpu.memory_space<smem>>, %arg3: memref<3xi32, #tpu.memory_space<smem>>) -> (i32, i32) {
    %c0_i32 = arith.constant 0 : i32
    %c0_i32_0 = arith.constant 0 : i32
    %c0_i32_1 = arith.constant 0 : i32
    return %c0_i32, %c0_i32_0 : i32, i32
  }
  func.func @transform_6(%arg0: i32, %arg1: i32, %arg2: memref<3xi32, #tpu.memory_space<smem>>, %arg3: memref<3xi32, #tpu.memory_space<smem>>) -> (i32, i32) {
    %c0_i32 = arith.constant 0 : i32
    %c0_i32_0 = arith.constant 0 : i32
    %c0_i32_1 = arith.constant 0 : i32
    return %c0_i32, %c0_i32_0 : i32, i32
  }
  func.func @transform_7(%arg0: i32, %arg1: i32, %arg2: memref<3xi32, #tpu.memory_space<smem>>, %arg3: memref<3xi32, #tpu.memory_space<smem>>) -> (i32, i32) {
    %c0_i32 = arith.constant 0 : i32
    %c0_i32_0 = arith.constant 0 : i32
    %c0_i32_1 = arith.constant 0 : i32
    return %c0_i32, %c0_i32_0 : i32, i32
  }
  func.func @transform_8(%arg0: i32, %arg1: i32, %arg2: memref<3xi32, #tpu.memory_space<smem>>, %arg3: memref<3xi32, #tpu.memory_space<smem>>) -> (i32, i32) {
    %c0_i32 = arith.constant 0 : i32
    %c0_i32_0 = arith.constant 0 : i32
    %c0_i32_1 = arith.constant 0 : i32
    return %c0_i32, %c0_i32_0 : i32, i32
  }
  func.func @transform_9(%arg0: i32, %arg1: i32, %arg2: memref<3xi32, #tpu.memory_space<smem>>, %arg3: memref<3xi32, #tpu.memory_space<smem>>) -> (i32, i32, i32) {
    %0 = arith.index_cast %arg1 : i32 to index
    %1 = memref.load %arg2[%0] : memref<3xi32, #tpu.memory_space<smem>>
    %c0_i32 = arith.constant 0 : i32
    %c0_i32_0 = arith.constant 0 : i32
    return %arg0, %1, %c0_i32 : i32, i32, i32
  }
}

</mosaic_0001>

<bundles_post_ra>
// kernel: tpu_custom_call.1
= control target key start
LH: loop header
LB: loop body
LE: loop exit
PB: predicated region body
PF: predicated region fallthrough
CT: control target
= control target key end

     0   :  { %s11407_s0 = inlined_call_operand.hbm [shape: s32[3], index: 0, kind: input, shape index: {}]   ;;  %s11408_s2 = inlined_call_operand.hbm [shape: f32[4,256,32], index: 2, kind: input, shape index: {}]   ;;  %s11409_s3 = inlined_call_operand.hbm [shape: bf16[4,256,32], index: 3, kind: input, shape index: {}]   ;;  %s11410_s4 = inlined_call_operand.hbm [shape: bf16[4,256,8], index: 4, kind: input, shape index: {}]   ;;  %s11411_s5 = inlined_call_operand.hbm [shape: bf16[4,8,256], index: 5, kind: input, shape index: {}]   ;;  %s11412_s6 = inlined_call_operand.hbm [shape: bf16[32,32], index: 6, kind: input, shape index: {}]   ;;  %s11413_s7 = inlined_call_operand.hbm [shape: bf16[32,128], index: 7, kind: input, shape index: {}]   ;;  %s11414_s8 = inlined_call_operand.hbm [shape: bf16[128,32], index: 8, kind: input, shape index: {}]   ;;  %s11415_s9 = inlined_call_operand.hbm [shape: f32[8,32], index: 9, kind: input, shape index: {}]   ;;  %s11416_s10 = inlined_call_operand.hbm [shape: f32[1,128], index: 10, kind: input, shape index: {}]   ;;  %s11417_s11 = inlined_call_operand.hbm [shape: f32[4,256,32], index: 11, kind: output, shape index: {}]   ;;  %s11418_s1 = inlined_call_operand.hbm [shape: s32[3], index: 1, kind: input, shape index: {}]  }
   0x1   :  { %11489 = sst [smem:[#allocation95_spill]] %s11408_s2  ;;  %s7927_s19 = scalar_lea.hbm %s11407_s0, 16 }
   0x2   :  { %11490 = sst [smem:[#allocation96_spill]] %s11409_s3  ;;  %p7928_p0 = scmp.ne.s32.totalorder %s11407_s0, %s7927_s19 }
   0x3   :  { %11491 = sst [smem:[#allocation97_spill]] %s11410_s4  ;;  %p7931_p1 = scmp.lt.u32.totalorder %s7927_s19, %s11407_s0 }
   0x4   :  { %11492 = sst [smem:[#allocation98_spill]] %s11411_s5 }
   0x5   :  { %11493 = sst [smem:[#allocation99_spill]] %s11412_s6  ;;  %p7933_p2 = pnand %p7931_p1, %p7928_p0 }
   0x6   :  { %11494 = sst [smem:[#allocation100_spill]] %s11413_s7 }
   0x7   :  { %11495 = sst [smem:[#allocation101_spill]] %s11414_s8 }
   0x8   :  { %11496 = sst [smem:[#allocation102_spill]] %s11415_s9 }
   0x9   :  { %11497 = sst [smem:[#allocation103_spill]] %s11416_s10 }
   0xa   :  { %11498 = sst [smem:[#allocation104_spill]] %s11417_s11 }
   0xb   :  { %7936 = shalt.err (!%p7933_p2)  }
   0xc   :  { %s8301_s24 = smov [#allocation4]   ;;  %s7937_s29 = scalar_lea.hbm %s11418_s1, 16 }
   0xd   :  { %17 = dma.hbm_to_smem %s11407_s0, 16, %s8301_s24, [#allocation3] }
   0xe   :  { %p7938_p3 = scmp.ne.s32.totalorder %s11418_s1, %s7937_s29  ;;  %p7941_p4 = scmp.lt.u32.totalorder %s7937_s29, %s11418_s1 }
  0x10   :  { %p7943_p5 = pnand %p7941_p4, %p7938_p3 }
  0x12   :  { %7946 = shalt.err (!%p7943_p5)  }
  0x13   :  { %s8302_s15 = smov [#allocation5]  }
  0x14   :  { %19 = dma.hbm_to_smem %s11418_s1, 16, %s8302_s15, [#allocation3] }
  0x15   :  { %8191 = dma.done.wait [#allocation3], 32 }
  0x16   :  { %8192 = vsyncadd [#allocation3], 4294967264 }
  0x17   :  { %21 = sfence }
  0x18   :  { %22 = vsyncpa [#allocation7], 0 }
  0x19   :  { %24 = vsyncpa [#allocation7 + $0x1], 0 }
  0x1a   :  { %25 = vsyncpa [#allocation10], 0 }
  0x1b   :  { %27 = vsyncpa [#allocation10 + $0x1], 0 }
  0x1c   :  { %28 = vsyncpa [#allocation13], 0 }
  0x1d   :  { %30 = vsyncpa [#allocation13 + $0x1], 0 }
  0x1e   :  { %31 = vsyncpa [#allocation16], 0 }
  0x1f   :  { %32 = vsyncpa [#allocation19], 0 }
  0x20   :  { %33 = vsyncpa [#allocation8], 0 }
  0x21   :  { %35 = vsyncpa [#allocation8 + $0x1], 0  ;;  %s8430_s0 = smov 0   ;;  %s8432_s18 = smov 0  }
  0x22   :  { %s8434_s19 = smov 0   ;;  %s8436_s1 = smov 0  }
  0x23   :  { %s8438_s20 = smov 0   ;;  %s8440_s21 = smov 0  }
  0x24   :  { %s8442_s22 = smov 0   ;;  %s8444_s23 = smov 0  }
  0x25   :  { %s8446_s24 = smov 0   ;;  %s8448_s25 = smov 0  }
  0x26   :  { %s8450_s26 = smov 0   ;;  %s8452_s27 = smov 0  }
  0x27   :  { %s8454_s28 = smov 0   ;;  %s8456_s29 = smov 0  }
  0x28   :  { %s8458_s30 = smov 0   ;;  %s8460_s12 = smov 0  }
  0x29   :  { %s8462_s13 = smov 0   ;;  %s8464_s14 = smov 0  }
  0x2a LB: > { %11499 = sst [smem:[#allocation47_spill]] %s8227_s0  ;;  %s8519_s15 = sadd.s32 4294967295, %s8295_s14   ;;  %s8295_s14 = sphi %s8464_s14, %s41_s14   ;;  %s8291_s13 = sphi %s8462_s13, %s11674_s13   ;;  %s8287_s12 = sphi %s8460_s12, %s11673_s12   ;;  %s8283_s30 = sphi %s8458_s30, %s11672_s30   ;;  %s8279_s29 = sphi %s8456_s29, %s11671_s29   ;;  %s8275_s28 = sphi %s8454_s28, %s11661_s28   ;;  %s8271_s27 = sphi %s8452_s27, %s11670_s27   ;;  %s8267_s26 = sphi %s8450_s26, %s11669_s26   ;;  %s8263_s25 = sphi %s8448_s25, %s11659_s25   ;;  %s8259_s24 = sphi %s8446_s24, %s11668_s24   ;;  %s8255_s23 = sphi %s8444_s23, %s11667_s23   ;;  %s8251_s22 = sphi %s8442_s22, %s11666_s22   ;;  %s8247_s21 = sphi %s8440_s21, %s11665_s21   ;;  %s8243_s20 = sphi %s8438_s20, %s11664_s20   ;;  %s8239_s1 = sphi %s8436_s1, %s11656_s1   ;;  %s8235_s19 = sphi %s8434_s19, %s11655_s19   ;;  %s8231_s18 = sphi %s8432_s18, %s11654_s18   ;;  %s8227_s0 = sphi %s8430_s0, %s11653_s0  }
  0x2b   : > { %11500 = sst [smem:[#allocation48_spill]] %s8231_s18  ;;  %s50_s17 = sadd.s32 1, %s8291_s13 }
  0x2c   : > { %11501 = sst [smem:[#allocation49_spill]] %s8235_s19  ;;  %p51_p6 = scmp.ge.s32.totalorder %s50_s17, 3 }
  0x2d   : > { %11502 = sst [smem:[#allocation50_spill]] %s8243_s20  ;;  %p71_p7 = scmp.ne.s32.totalorder %s8283_s30, %s8279_s29 }
  0x2e   : > { %11503 = sst [smem:[#allocation51_spill]] %s8267_s26  ;;  %p72_p8 = scmp.eq.s32.totalorder %s8295_s14, 0 }
  0x2f   : > { %11504 = sst [smem:[#allocation52_spill]] %s8279_s29  ;;  %s11676_s17 = smov (%p51_p6, %s50_s17), 0 }
  0x30   : > { %11505 = sst [smem:[#allocation53_spill]] %s8287_s12  ;;  %s64_s12 = sadd.s32 1, %s8283_s30 }
  0x31   : > { %s57_s11 = sld [smem:[#allocation4 + %s8291_s13]]  ;;  %p8532_p9 = por %p72_p8, %p71_p7 }
  0x32   : > { %11506 = sst [smem:[#allocation54_spill]] %s11676_s17  ;;  %p77_p10 = scmp.ne.s32.totalorder %s8279_s29, %s8275_s28 }
  0x33   : > { %s11507_s16 = scalar_select %p8532_p9, 1, 0 }
  0x34   : > { %s58_s5 = sld [smem:[#allocation4 + %s11676_s17]]  ;;  %p11438_p11 = scmp.eq.s32.totalorder %s8519_s15, 0 }
  0x35   : > { %11508 = sst [smem:[#allocation55_spill]] %s11507_s16  ;;  %s94_s10 = sadd.s32 1, %s8271_s27 }
  0x36   : > { %s87_s4 = sld [smem:[#allocation5 + %s8291_s13]]  ;;  %p8543_p12 = por %p11438_p11, %p77_p10 }
  0x37   : > { %s88_s3 = sld [smem:[#allocation5 + %s11676_s17]]  ;;  %p101_p13 = scmp.ne.s32.totalorder %s8271_s27, %s8267_s26 }
  0x38   : > { %s11509_s2 = scalar_select %p8543_p12, 1, 0 }
  0x39   : > { %p107_p0 = scmp.ne.s32.totalorder %s8267_s26, %s8263_s25  ;;  %s117_s28 = sld [smem:[#allocation4 + %s8291_s13]] }
  0x3a   : > { %11510 = sst [smem:[#allocation56_spill]] %s11509_s2  ;;  %p8556_p1 = por %p101_p13, %p72_p8 }
  0x3b   : > { %s118_s29 = sld [smem:[#allocation4 + %s11676_s17]]  ;;  %p8562_p2 = por %p107_p0, %p11438_p11 }
  0x3c   : > { %s11511_s16 = scalar_select %p8556_p1, 1, 0 }
  0x3d   : > { %s11513_s8 = scalar_select %p8562_p2, 1, 0 }
  0x3e   : > { %11512 = sst [smem:[#allocation57_spill]] %s11511_s16  ;;  %s60_s2 = ssub.s32 %s57_s11, %s58_s5 }
  0x3f   : > { %11514 = sst [smem:[#allocation58_spill]] %s11513_s8  ;;  %s122_s25 = sadd.s32 1, %s8259_s24 }
  0x40   : > { %p62_p3 = scmp.eq.s32.totalorder %s60_s2, 0  ;;  %s89_s26 = ssub.s32 %s87_s4, %s88_s3 }
  0x41   : > { %p92_p4 = scmp.eq.s32.totalorder %s89_s26, 0  ;;  %p129_p5 = scmp.ne.s32.totalorder %s8259_s24, %s8255_s23 }
  0x42   : > { %s8570_s16 = scalar_select %p62_p3, %s8283_s30, %s64_s12  }
  0x43   : > { %s8573_s6 = scalar_select %p92_p4, %s8271_s27, %s94_s10  }
  0x44   : > { %11515 = sst [smem:[#allocation59_spill]] %s8570_s16  ;;  %s119_s8 = ssub.s32 %s117_s28, %s118_s29 }
  0x45   : > { %11516 = sst [smem:[#allocation60_spill]] %s8573_s6  ;;  %p8577_p6 = por %p129_p5, %p72_p8 }
  0x46   : > { %p120_p7 = scmp.eq.s32.totalorder %s119_s8, 0  ;;  %p135_p10 = scmp.ne.s32.totalorder %s8255_s23, %s8251_s22 }
  0x47   : > { %s11517_s5 = scalar_select %p8577_p6, 1, 0 }
  0x48   : > { %s145_s2 = sld [smem:[#allocation5 + %s8291_s13]]  ;;  %p8590_p13 = por %p135_p10, %p11438_p11 }
  0x49   : > { %s146_s3 = sld [smem:[#allocation5 + %s11676_s17]]  ;;  %s150_s11 = sadd.s32 1, %s8247_s21 }
  0x4a   : > { %s8586_s4 = scalar_select %p120_p7, %s8259_s24, %s122_s25  }
  0x4b   : > { %s11519_s10 = scalar_select %p8590_p13, 1, 0 }
  0x4c   : > { %11518 = sst [smem:[#allocation61_spill]] %s8586_s4  ;;  %p157_p0 = scmp.ne.s32.totalorder %s8247_s21, %s8243_s20 }
  0x4d   : > { %11520 = sst [smem:[#allocation62_spill]] %s11519_s10  ;;  %p163_p3 = scmp.ne.s32.totalorder %s8243_s20, %s8239_s1 }
  0x4e   : > { %s278_s8 = sld [smem:[#allocation4 + %s8291_s13]]  ;;  %p8603_p4 = por %p157_p0, %p72_p8 }
  0x4f   : > { %s279_s22 = sld [smem:[#allocation4 + %s11676_s17]]  ;;  %p8609_p5 = por %p163_p3, %p11438_p11 }
  0x50   : > { %s11521_s26 = scalar_select %p8603_p4, 1, 0 }
  0x51   : > { %s11522_s29 = scalar_select %p8609_p5, 1, 0 }
  0x52   : > { %s147_s12 = ssub.s32 %s145_s2, %s146_s3  ;;  %s285_s28 = sadd.s32 1, %s8235_s19 }
  0x53   : > { %11523 = sst [smem:[#allocation63_spill]] %s11522_s29  ;;  %p148_p7 = scmp.eq.s32.totalorder %s147_s12, 0 }
  0x54   : > { %p295_p10 = scmp.ne.s32.totalorder %s8235_s19, %s8231_s18  ;;  %p296_p13 = scmp.eq.s32.totalorder %s8519_s15, 2 }
  0x55   : > { %p301_p2 = scmp.ne.s32.totalorder %s8231_s18, %s8227_s0  ;;  %s281_s25 = ssub.s32 %s278_s8, %s279_s22 }
  0x56   : > { %s8620_s1 = scalar_select %p148_p7, %s8247_s21, %s150_s11  }
  0x57   : > { %p8622_p12 = por %p296_p13, %p295_p10  ;;  %p283_p8 = scmp.eq.s32.totalorder %s281_s25, 0 }
  0x58   : > { %11524 = sst [smem:[#allocation64_spill]] %s8620_s1  ;;  %s11527_s16 = sadd.s32 4294967294, %s8295_s14  }
  0x59   : > { %s11525_s17 = scalar_select %p8622_p12, 1, 0 }
  0x5a   : > { %p302_p0 = scmp.eq.s32.totalorder %s11527_s16, 2  ;;  %p5958_p3 = scmp.ge.s32.totalorder %s8295_s14, 1 }
  0x5b   : > { %11526 = sst [smem:[#allocation65_spill]] %s11525_s17  ;;  %p309_p11 = scmp.lt.s32.totalorder %s8295_s14, 4 }
  0x5c   : > { %s8631_s6 = scalar_select %p283_p8, %s8235_s19, %s285_s28  }
  0x5d   : > { %p8633_p5 = por %p302_p0, %p301_p2  ;;  %p8637_p4 = pnand %p5958_p3, %p309_p11 }
  0x5e   : > { %11528 = sst [smem:[#allocation66_spill]] %s8631_s6  ;;  %p11532_p7 = scmp.eq.s32.totalorder %s8519_s15, 0 }
  0x5f   : > { %s11529_s2 = scalar_select %p8633_p5, 1, 0 }
  0x60   : > { %s11531_s3 = scalar_select %p8637_p4, 1, 0 }
  0x61   : > { %11530 = sst [smem:[#allocation67_spill]] %s11529_s2  ;;  %p7116_p13 = pneg %p8637_p4 }
  0x62   : > { %s8303_s16 = smov [#allocation15]   ;;  %s8304_s22 = smov [#allocation18]  }
  0x63   : > { %p8645_p10 = pnand %p7116_p13, %p11532_p7  ;;  %s334_s8 = sshll.u32 %s8303_s16, 4  ;;  %s335_s8 = int_to_ptr.vmem [resolvable:$true] %s334_s8 }
  0x64   : > { %s361_s12 = sshll.u32 %s8304_s22, 4  ;;  %s11534_s7 = sld [smem:[#allocation100_spill]]  ;;  %s8649_s12 = int_to_ptr.vmem [resolvable:$true] %s361_s12 }
  0x65   : > { %p8659_p2 = pneg %p8645_p10 }
  0x6a   : > { %s7947_s4 = scalar_lea.hbm %s11534_s7, 256 }
  0x6b   : > { %p7948_p11 = scmp.ne.s32.totalorder %s11534_s7, %s7947_s4  ;;  %p7954_p3 = scmp.lt.u32.totalorder %s7947_s4, %s11534_s7 }
  0x6d   : > { %p7950_p8 = pnand %p8659_p2, %p7948_p11 }
  0x6f   : > { %p7951_p0 = pneg %p7950_p8 }
  0x71   : > { %p7956_p13 = pnand %p7954_p3, %p7951_p0 }
  0x73   : > { %7959 = shalt.err (!%p7956_p13)
}
  0x74   : > { %s7960_s28 = scalar_lea.vmem %s335_s8, 256  ;;  %p7968_p4 = scmp.lt.s32.totalorder %s335_s8, %s335_s8 }
  0x75   : > { %p7961_p7 = scmp.ne.s32.totalorder %s335_s8, %s7960_s28  ;;  %p7969_p6 = scmp.lt.s32.totalorder %s7960_s28, %s7960_s28 }
  0x77   : > { %p7963_p5 = pnand %p7961_p7, %p8659_p2  ;;  %p7970_p1 = por %p7969_p6, %p7968_p4 }
  0x79   : > { %p7964_p12 = pneg %p7963_p5 }
  0x7b   : > { %p7971_p9 = pnand %p7970_p1, %p7964_p12 }
  0x7d   : > { %7974 = shalt.err (!%p7971_p9)
}
  0x7e   : > { %s11453_s6 = smov 64   ;;  %s11455_s1 = smov 4  }
  0x7f   : > { %7122 = dma.hbm_to_vmem [thread:$0]  (!%p8645_p10), %s11534_s7, 256, %s335_s8, [#allocation16], %s11453_s6, %s11453_s6, %s11455_s1  }
  0x80   : > { %s11536_s9 = sld [smem:[#allocation102_spill]] }
  0x86   : > { %s7975_s2 = scalar_lea.hbm %s11536_s9, 128 }
  0x87   : > { %p7976_p9 = scmp.ne.s32.totalorder %s11536_s9, %s7975_s2  ;;  %p7982_p6 = scmp.lt.u32.totalorder %s7975_s2, %s11536_s9 }
  0x89   : > { %p7978_p12 = pnand %p7976_p9, %p8659_p2 }
  0x8b   : > { %p7979_p1 = pneg %p7978_p12 }
  0x8d   : > { %p7984_p4 = pnand %p7982_p6, %p7979_p1 }
  0x8f   : > { %7987 = shalt.err (!%p7984_p4)
}
  0x90   : > { %s7988_s8 = scalar_lea.vmem %s8649_s12, 128  ;;  %p7996_p0 = scmp.lt.s32.totalorder %s8649_s12, %s8649_s12 }
  0x91   : > { %p7989_p5 = scmp.ne.s32.totalorder %s8649_s12, %s7988_s8  ;;  %p7997_p3 = scmp.lt.s32.totalorder %s7988_s8, %s7988_s8 }
  0x93   : > { %p7991_p11 = pnand %p7989_p5, %p8659_p2  ;;  %p7998_p13 = por %p7997_p3, %p7996_p0 }
  0x95   : > { %p7992_p8 = pneg %p7991_p11 }
  0x97   : > { %p7999_p7 = pnand %p7998_p13, %p7992_p8 }
  0x99   : > { %8002 = shalt.err (!%p7999_p7)
}
  0x9a   : > { %7128 = dma.hbm_to_vmem [thread:$0]  (!%p8645_p10), %s11536_s9, 128, %s8649_s12, [#allocation19]  }
  0x9b   : > { %s8307_s17 = smov [#allocation14]   ;;  %s11537_s16 = sld [smem:[#allocation99_spill]] }
  0x9c   : > { %s321_s2 = sshll.u32 %s8307_s17, 4  ;;  %s322_s2 = int_to_ptr.vmem [resolvable:$true] %s321_s2 }
  0xa1   : > { %s8003_s22 = scalar_lea.hbm %s11537_s16, 256 }
  0xa2   : > { %p8004_p9 = scmp.ne.s32.totalorder %s11537_s16, %s8003_s22  ;;  %p8010_p6 = scmp.lt.u32.totalorder %s8003_s22, %s11537_s16 }
  0xa4   : > { %p8006_p12 = pnand %p8004_p9, %p8659_p2 }
  0xa6   : > { %p8007_p1 = pneg %p8006_p12 }
  0xa8   : > { %p8012_p4 = pnand %p8010_p6, %p8007_p1 }
  0xaa   : > { %8015 = shalt.err (!%p8012_p4)
}
  0xab   : > { %s8016_s12 = scalar_lea.vmem %s322_s2, 256  ;;  %p8024_p0 = scmp.lt.s32.totalorder %s322_s2, %s322_s2 }
  0xac   : > { %p8017_p5 = scmp.ne.s32.totalorder %s322_s2, %s8016_s12  ;;  %p8025_p3 = scmp.lt.s32.totalorder %s8016_s12, %s8016_s12 }
  0xae   : > { %p8019_p11 = pnand %p8017_p5, %p8659_p2  ;;  %p8026_p13 = por %p8025_p3, %p8024_p0 }
  0xb0   : > { %p8020_p8 = pneg %p8019_p11 }
  0xb2   : > { %p8027_p7 = pnand %p8026_p13, %p8020_p8 }
  0xb4   : > { %8030 = shalt.err (!%p8027_p7)
}
  0xb5   : > { %s11538_s0 = smov 4   ;;  %s11539_s18 = smov 64  }
  0xb6   : > { %7119 = dma.hbm_to_vmem [thread:$0]  (!%p8645_p10), %s11537_s16, 256, %s322_s2, [#allocation13], %s11539_s18, %s11539_s18, %s11538_s0  }
  0xb7   : > { %s8308_s17 = smov [#allocation17]   ;;  %s8309_s25 = smov [#allocation20]  }
  0xb8   : > { %s347_s4 = sshll.u32 %s8308_s17, 4  ;;  %s372_s22 = sshll.u32 %s8309_s25, 4  ;;  %s348_s4 = int_to_ptr.vmem [resolvable:$true] %s347_s4  ;;  %s373_s22 = int_to_ptr.vmem [resolvable:$true] %s372_s22 }
  0xb9   : > { %s11540_s12 = sld [smem:[#allocation101_spill]] }
  0xbf   : > { %s11541_s7 = smov %s11540_s12  ;;  %s8031_s9 = scalar_lea.hbm %s11540_s12, 1024 }
  0xc0   : > { %p8032_p9 = scmp.ne.s32.totalorder %s11541_s7, %s8031_s9  ;;  %p8038_p6 = scmp.lt.u32.totalorder %s8031_s9, %s11541_s7 }
  0xc2   : > { %p8034_p12 = pnand %p8032_p9, %p8659_p2 }
  0xc4   : > { %p8035_p1 = pneg %p8034_p12 }
  0xc6   : > { %p8040_p4 = pnand %p8038_p6, %p8035_p1 }
  0xc8   : > { %8043 = shalt.err (!%p8040_p4)
}
  0xc9   : > { %s8044_s2 = scalar_lea.vmem %s348_s4, 1024  ;;  %p8052_p0 = scmp.lt.s32.totalorder %s348_s4, %s348_s4 }
  0xca   : > { %p8045_p5 = scmp.ne.s32.totalorder %s348_s4, %s8044_s2  ;;  %p8053_p3 = scmp.lt.s32.totalorder %s8044_s2, %s8044_s2 }
  0xcc   : > { %p8047_p11 = pnand %p8045_p5, %p8659_p2  ;;  %p8054_p13 = por %p8053_p3, %p8052_p0 }
  0xce   : > { %p8048_p8 = pneg %p8047_p11 }
  0xd0   : > { %p8055_p7 = pnand %p8054_p13, %p8048_p8 }
  0xd2   : > { %8058 = shalt.err (!%p8055_p7)
}
  0xd3   : > { %7125 = dma.hbm_to_vmem [thread:$0]  (!%p8645_p10), %s11541_s7, 1024, %s348_s4, [#allocation16], %s11539_s18, %s11539_s18, %s11538_s0  }
  0xd4   : > { %s11542_s1 = sld [smem:[#allocation103_spill]] }
  0xda   : > { %s11543_s17 = smov %s11542_s1  ;;  %s8059_s25 = scalar_lea.hbm %s11542_s1, 16 }
  0xdb   : > { %p8060_p9 = scmp.ne.s32.totalorder %s11543_s17, %s8059_s25  ;;  %p8066_p6 = scmp.lt.u32.totalorder %s8059_s25, %s11543_s17 }
  0xdd   : > { %p8062_p12 = pnand %p8060_p9, %p8659_p2 }
  0xdf   : > { %p8063_p1 = pneg %p8062_p12 }
  0xe1   : > { %p8068_p4 = pnand %p8066_p6, %p8063_p1 }
  0xe3   : > { %8071 = shalt.err (!%p8068_p4)
}
  0xe4   : > { %s8072_s2 = scalar_lea.vmem %s373_s22, 16  ;;  %s8079_s0 = scalar_lea.vmem %s373_s22, 32 }
  0xe5   : > { %p8073_p5 = scmp.ne.s32.totalorder %s373_s22, %s8072_s2  ;;  %p8080_p0 = scmp.lt.s32.totalorder %s373_s22, %s373_s22 }
  0xe6   : > { %p8081_p3 = scmp.lt.s32.totalorder %s8079_s0, %s8072_s2 }
  0xe7   : > { %p8075_p11 = pnand %p8073_p5, %p8659_p2 }
  0xe8   : > { %p8082_p13 = por %p8081_p3, %p8080_p0 }
  0xe9   : > { %p8076_p8 = pneg %p8075_p11 }
  0xeb   : > { %p8083_p7 = pnand %p8082_p13, %p8076_p8 }
  0xed   : > { %8086 = shalt.err (!%p8083_p7)
}
  0xee   : > { %7131 = dma.hbm_to_vmem [thread:$0]  (!%p8645_p10), %s11543_s17, 16, %s373_s22, [#allocation19]  }
  0xef   : > { %p5964_p9 = scmp.ge.s32.totalorder %s8295_s14, 3 }
  0xf1   : > { %379 = sbr.rel (%p5964_p9) target bundleno = 344 (0x158), region = 36 }
  0xf8   : > { %s11544_s20 = sld [smem:[#allocation55_spill]]  ;;  %s383_s19 = sand.u32 1, %s8283_s30  }
  0xf9   : > { %s5965_s9 = sshll.u32 %s383_s19, 9  ;;  %s8310_s10 = smov 4096  }
  0xfa   : > { %s387_s25 = scalar_lea.vmem [#allocation6], %s5965_s9  ;;  %s8311_s12 = smov 2048  }
  0xfb   : > { %s410_s28 = sshll.u32 %s387_s25, 4  ;;  %s8312_s6 = smov 16   ;;  %s411_s28 = int_to_ptr.vmem [resolvable:$true] %s410_s28 }
  0xfc   : > { %s8313_s2 = smov 128   ;;  %s11546_s9 = sld [smem:[#allocation95_spill]] }
  0xfd   : > { %s384_s25 = scalar_lea.sflag [#allocation7], %s383_s19 }
  0xfe   : > { %p11545_p2 = scmp.ne.s32.totalorder %s11544_s20, 0 }
 0x100   : > { %7062 = sst [smem:[#allocation23]] (%p11545_p2), %s8310_s10 }
 0x101   : > { %s7059_s11 = scalar_select %p11545_p2, [#allocation4], [#allocation30] }
 0x102   : > { %s7060_s22 = scalar_select %p11545_p2, %s8291_s13, 0 }
 0x103   : > { %s7061_s29 = scalar_select %p11545_p2, [#allocation0], [#allocation31] }
 0x104   : > { %s388_s1 = sld [smem:[%s7059_s11 + %s7060_s22]] }
 0x105   : > { %s402_s8 = sld [smem:[%s7061_s29]]   ;;  %s8314_s29 = smov 8  }
 0x106   : > { %7063 = sst [smem:[#allocation23 + $0x1]] (%p11545_p2), %s8311_s12  ;;  %s8315_s12 = smov [#allocation22]  }
 0x107   : > { %7064 = sst [smem:[#allocation23 + $0x2]] (%p11545_p2), %s8312_s6 }
 0x108   : > { %7065 = sst [smem:[#allocation23 + $0x3]] (%p11545_p2), %s8313_s2 }
 0x109   : > { %7066 = sst [smem:[#allocation23 + $0x4]] (%p11545_p2), %s8313_s2 }
 0x10a   : > { %s6437_s0 = sshll.u32 %s388_s1, 11  ;;  %7067 = sst [smem:[#allocation23 + $0x5]] (%p11545_p2), %s8314_s29 }
 0x10b   : > { %s397_s10 = scalar_lea.hbm %s11546_s9, %s6437_s0  ;;  %s5968_s11 = sshll.u32 %s402_s8, 26 }
 0x10c   : > { %s5969_s22 = sadd.s32 134217728, %s5968_s11 }
 0x10d   : > { %7068 = dma.general (%p11545_p2), %s397_s10, 8192, %s411_s28, %s384_s25, %s8315_s12, [#allocation23], %s5969_s22, 0  }
 0x10e   : > { %s11547_s6 = sld [smem:[#allocation57_spill]]  ;;  %s433_s1 = sand.u32 1, %s8295_s14  }
 0x10f   : > { %s435_s2 = sand.u32 1, %s8271_s27   ;;  %s8316_s10 = smov 2048  }
 0x110   : > { %s5970_s8 = sshll.u32 %s435_s2, 8  ;;  %s8317_s11 = smov 1024  }
 0x111   : > { %s437_s18 = scalar_lea.vmem [#allocation9], %s5970_s8  ;;  %s8318_s22 = smov 16  }
 0x112   : > { %s458_s4 = sshll.u32 %s437_s18, 4  ;;  %s8319_s29 = smov 64   ;;  %s459_s4 = int_to_ptr.vmem [resolvable:$true] %s458_s4 }
 0x113   : > { %s11549_s8 = sld [smem:[#allocation96_spill]]  ;;  %s8320_s18 = smov 4  }
 0x114   : > { %p11548_p10 = scmp.ne.s32.totalorder %s11547_s6, 0 }
 0x116   : > { %s7069_s0 = scalar_select %p11548_p10, [#allocation5], [#allocation32] }
 0x117   : > { %s7070_s19 = scalar_select %p11548_p10, %s8291_s13, 0 }
 0x118   : > { %s7071_s20 = scalar_select %p11548_p10, [#allocation0], [#allocation33] }
 0x119   : > { %s438_s28 = sld [smem:[%s7069_s0 + %s7070_s19]] }
 0x11a   : > { %s450_s9 = sld [smem:[%s7071_s20]]  }
 0x11b   : > { %7072 = sst [smem:[#allocation25]] (%p11548_p10), %s8316_s10  ;;  %s8813_s10 = scalar_lea.sflag [#allocation10], %s433_s1 }
 0x11c   : > { %7073 = sst [smem:[#allocation25 + $0x1]] (%p11548_p10), %s8317_s11  ;;  %s8321_s11 = smov [#allocation24]  }
 0x11d   : > { %7074 = sst [smem:[#allocation25 + $0x2]] (%p11548_p10), %s8318_s22 }
 0x11e   : > { %7075 = sst [smem:[#allocation25 + $0x3]] (%p11548_p10), %s8319_s29 }
 0x11f   : > { %s6438_s25 = sshll.u32 %s438_s28, 10  ;;  %7076 = sst [smem:[#allocation25 + $0x4]] (%p11548_p10), %s8319_s29 }
 0x120   : > { %s445_s0 = scalar_lea.hbm %s11549_s8, %s6438_s25  ;;  %s5973_s19 = sshll.u32 %s450_s9, 26 }
 0x121   : > { %s5974_s20 = sadd.s32 134217728, %s5973_s19  ;;  %7077 = sst [smem:[#allocation25 + $0x5]] (%p11548_p10), %s8320_s18 }
 0x122   : > { %7078 = dma.general (%p11548_p10), %s445_s0, 4096, %s459_s4, %s8813_s10, %s8321_s11, [#allocation25], %s5974_s20, 0  }
 0x123   : > { %s483_s28 = sand.u32 1, %s8259_s24   ;;  %s8322_s22 = smov 2048  }
 0x124   : > { %s5975_s9 = sshll.u32 %s483_s28, 8  ;;  %p11550_p12 = scmp.ne.s32.totalorder %s11517_s5, 0 }
 0x125   : > { %s485_s12 = scalar_lea.vmem [#allocation11], %s5975_s9  ;;  %s8323_s0 = smov 1024  }
 0x126   : > { %7082 = sst [smem:[#allocation27]] (%p11550_p12), %s8322_s22  ;;  %s505_s2 = sshll.u32 %s485_s12, 4  ;;  %s506_s2 = int_to_ptr.vmem [resolvable:$true] %s505_s2 }
 0x127   : > { %s7079_s29 = scalar_select %p11550_p12, [#allocation4], [#allocation34] }
 0x128   : > { %s7080_s6 = scalar_select %p11550_p12, %s8291_s13, 0 }
 0x129   : > { %s7081_s4 = scalar_select %p11550_p12, [#allocation0], [#allocation35] }
 0x12a   : > { %s486_s25 = sld [smem:[%s7079_s29 + %s7080_s6]]  ;;  %s8324_s19 = smov 16  }
 0x12b   : > { %s497_s8 = sld [smem:[%s7081_s4]]   ;;  %s8325_s20 = smov 64  }
 0x12c   : > { %7083 = sst [smem:[#allocation27 + $0x1]] (%p11550_p12), %s8323_s0  ;;  %s8326_s11 = smov 4  }
 0x12d   : > { %7084 = sst [smem:[#allocation27 + $0x2]] (%p11550_p12), %s8324_s19  ;;  %s8327_s12 = smov [#allocation26]  }
 0x12e   : > { %7085 = sst [smem:[#allocation27 + $0x3]] (%p11550_p12), %s8325_s20  ;;  %s11551_s22 = sld [smem:[#allocation97_spill]] }
 0x12f   : > { %7086 = sst [smem:[#allocation27 + $0x4]] (%p11550_p12), %s8325_s20  ;;  %s530_s0 = sand.u32 1, %s8247_s21  }
 0x130   : > { %s6439_s18 = sshll.u32 %s486_s25, 10  ;;  %7087 = sst [smem:[#allocation27 + $0x5]] (%p11550_p12), %s8326_s11 }
 0x131   : > { %s5978_s6 = sshll.u32 %s497_s8, 26  ;;  %s5980_s25 = sshll.u32 %s530_s0, 4 }
 0x132   : > { %s5979_s4 = sadd.s32 134217728, %s5978_s6  ;;  %p11552_p1 = scmp.ne.s32.totalorder %s11521_s26, 0 }
 0x133   : > { %s532_s28 = scalar_lea.vmem [#allocation12], %s5980_s25 }
 0x134   : > { %s492_s29 = scalar_lea.hbm %s11551_s22, %s6439_s18  ;;  %s539_s18 = sshll.u32 %s532_s28, 4  ;;  %s8850_s18 = int_to_ptr.vmem [resolvable:$true] %s539_s18 }
 0x135   : > { %7088 = dma.general (%p11550_p12), %s492_s29, 4096, %s506_s2, %s8813_s10, %s8327_s12, [#allocation27], %s5979_s4, 0  }
 0x136   : > { %s7089_s19 = scalar_select %p11552_p1, [#allocation5], [#allocation36] }
 0x137   : > { %s7090_s20 = scalar_select %p11552_p1, %s8291_s13, 0 }
 0x138   : > { %s11553_s2 = sld [smem:[#allocation98_spill]]  ;;  %s8859_s22 = scalar_lea.sflag [#allocation13], %s433_s1 }
 0x139   : > { %s533_s11 = sld [smem:[%s7089_s19 + %s7090_s20]] }
 0x13e   : > { %s8091_s12 = scalar_lea.hbm %s11553_s2, 512 }
 0x13f   : > { %s5981_s8 = sshll.u32 %s533_s11, 6 }
 0x140   : > { %s8855_s9 = scalar_lea.hbm %s11553_s2, %s5981_s8 }
 0x141   : > { %s8087_s29 = scalar_lea.hbm %s8855_s9, 256  ;;  %p8092_p11 = scmp.lt.u32.totalorder %s8855_s9, %s11553_s2 }
 0x142   : > { %p8088_p6 = scmp.ne.s32.totalorder %s8855_s9, %s8087_s29  ;;  %p8093_p8 = scmp.lt.u32.totalorder %s8091_s12, %s8087_s29 }
 0x143   : > { %p8095_p3 = scmp.lt.u32.totalorder %s8087_s29, %s8855_s9 }
 0x144   : > { %p8089_p4 = pnand %p8088_p6, %p11552_p1  ;;  %p8094_p0 = por %p8093_p8, %p8092_p11 }
 0x146   : > { %p8090_p5 = pneg %p8089_p4  ;;  %p8096_p13 = por %p8095_p3, %p8094_p0 }
 0x148   : > { %p8097_p7 = pnand %p8096_p13, %p8090_p5 }
 0x14a   : > { %8100 = shalt.err (!%p8097_p7)
}
 0x14b   : > { %s8101_s1 = scalar_lea.vmem %s8850_s18, 256  ;;  %s8328_s19 = smov [#allocation12]  }
 0x14c   : > { %p8102_p9 = scmp.ne.s32.totalorder %s8850_s18, %s8101_s1  ;;  %s8105_s20 = sshll.u32 %s8328_s19, 4  ;;  %s8106_s20 = int_to_ptr.vmem [resolvable:$false] %s8105_s20 }
 0x14d   : > { %s8107_s11 = scalar_lea.vmem %s8106_s20, 512  ;;  %p8108_p12 = scmp.lt.s32.totalorder %s8850_s18, %s8106_s20 }
 0x14e   : > { %p8103_p2 = pnand %p8102_p9, %p11552_p1  ;;  %p8109_p6 = scmp.lt.s32.totalorder %s8107_s11, %s8101_s1 }
 0x150   : > { %p8104_p10 = pneg %p8103_p2  ;;  %p8110_p4 = por %p8109_p6, %p8108_p12 }
 0x152   : > { %p8111_p11 = pnand %p8110_p4, %p8104_p10 }
 0x154   : > { %8114 = shalt.err (!%p8111_p11)
}
 0x155   : > { %s8329_s28 = smov 128   ;;  %s8330_s8 = smov 64  }
 0x156   : > { %s8331_s5 = smov 4  }
 0x157   : > { %7091 = dma.hbm_to_vmem [thread:$0]  (%p11552_p1), %s8855_s9, 256, %s8850_s18, %s8859_s22, %s8329_s28, %s8330_s8, %s8331_s5  }
 0x158 PF: > { %p11554_p5 = scmp.ne.s32.totalorder %s11531_s3, 0 }
 0x15a   : > { %551 = sbr.rel (%p11554_p5) target bundleno = 4175 (0x104f), region = 56 }
 0x161   : > { %s11555_s10 = sld [smem:[#allocation52_spill]]  ;;  %s11556_s29 = sld [smem:[#allocation56_spill]] }
 0x167   : > { %s553_s6 = sand.u32 1, %s11555_s10   ;;  %p11557_p8 = scmp.ne.s32.totalorder %s11556_s29, 0 }
 0x168   : > { %s8886_s4 = sshll.u32 %s553_s6, 9  ;;  %s554_s12 = scalar_lea.sflag [#allocation7], %s553_s6 }
 0x169   : > { %s557_s0 = scalar_lea.vmem [#allocation6], %s8886_s4 }
 0x16a   : > { %8194 = dma.done.wait (%p11557_p8), %s554_s12, 8192  }
 0x16b   : > { %8196 = vsyncadd (%p11557_p8), %s554_s12, 4294959104  ;;  %s11558_s26 = sld [smem:[#allocation51_spill]]  ;;  %s11559_s18 = sld [smem:[#allocation58_spill]] }
 0x16c   : > { %s562_s9 = sand.u32 1, %s8519_s15  }
 0x16d   : > { %s563_s25 = scalar_lea.sflag [#allocation10], %s562_s9 }
 0x171   : > { %s564_s22 = sand.u32 1, %s11558_s26   ;;  %p11560_p1 = scmp.ne.s32.totalorder %s11559_s18, 0 }
 0x172   : > { %s5984_s3 = sshll.u32 %s564_s22, 8 }
 0x173   : > { %s8895_s1 = scalar_lea.vmem [#allocation9], %s5984_s3 }
 0x174   : > { %8198 = dma.done.wait (%p11560_p1), %s563_s25, 4096  }
 0x175   : > { %8200 = vsyncadd (%p11560_p1), %s563_s25, 4294963200  ;;  %s11561_s19 = sld [smem:[#allocation62_spill]]  ;;  %s573_s20 = sand.u32 1, %s8255_s23  }
 0x176   : > { %s5985_s11 = sshll.u32 %s573_s20, 8 }
 0x177   : > { %s8902_s28 = scalar_lea.vmem [#allocation11], %s5985_s11 }
 0x17b   : > { %p11562_p0 = scmp.ne.s32.totalorder %s11561_s19, 0 }
 0x17d   : > { %8202 = dma.done.wait (%p11562_p0), %s563_s25, 4096  }
 0x17e   : > { %8204 = vsyncadd (%p11562_p0), %s563_s25, 4294963200  ;;  %s11563_s8 = sld [smem:[#allocation50_spill]]  ;;  %s581_s6 = scalar_lea.sflag [#allocation13], %s562_s9 }
 0x17f   : > { %s11564_s5 = sld [smem:[#allocation63_spill]] }
 0x184   : > { %s582_s10 = sand.u32 1, %s11563_s8  }
 0x185   : > { %s5986_s29 = sshll.u32 %s582_s10, 4  ;;  %p11565_p3 = scmp.ne.s32.totalorder %s11564_s5, 0 }
 0x186   : > { %s8909_s12 = scalar_lea.vmem [#allocation12], %s5986_s29 }
 0x187   : > { %8206 = dma.done.wait (%p11565_p3), %s581_s6, 256  }
 0x188   : > { %8208 = vsyncadd (%p11565_p3), %s581_s6, 4294967040  ;;  %p11566_p13 = scmp.eq.s32.totalorder %s8519_s15, 0 }
 0x18a   : > { %8210 = dma.done.wait (%p11566_p13), [#allocation13], 256   ;;  %p11567_p7 = pmov %p11566_p13 }
 0x18c   : > { %8212 = vsyncadd (%p11567_p7), [#allocation13], 4294967040  ;;  %p11568_p9 = pmov %p11567_p7 }
 0x18d   : > { %p11569_p2 = pmov %p11567_p7 }
 0x18e   : > { %8214 = dma.done.wait (%p11568_p9), [#allocation16], 1280  }
 0x18f   : > { %8216 = vsyncadd (%p11569_p2), [#allocation16], 4294966016  ;;  %p11570_p10 = pmov %p11569_p2 }
 0x190   : > { %p11571_p12 = pmov %p11569_p2 }
 0x191   : > { %8218 = dma.done.wait (%p11570_p10), [#allocation19], 144  }
 0x192   : > { %8220 = vsyncadd (%p11571_p12), [#allocation19], 4294967152  ;;  %s11572_s26 = sld [smem:[#allocation48_spill]]  ;;  %s11573_s18 = sld [smem:[#allocation53_spill]] }
 0x198   : > { %s651_s9 = sand.u32 1, %s11572_s26   ;;  %s8929_s22 = sld [smem:[#allocation4 + %s11573_s18]] }
 0x199   : > { %s8932_s3 = sld [smem:[#allocation5 + %s11573_s18]]  ;;  %s8936_s25 = sshll.u32 %s651_s9, 9 }
 0x19a   : > { %s653_s19 = scalar_lea.vmem [#allocation21], %s8936_s25 }
 0x19f   : > { %p5993_p6 = scmp.ne.s32.totalorder %s8932_s3, 0 }
 0x1a0   : > { %vm672_vm0 = vcmask (!%p5993_p6), 261120   ;;  %v8332_v0 = vmov (!%p5993_p6), 0.0  }
 0x1a1   : > { %671 = sbr.rel (%p5993_p6) target bundleno = 449 (0x1c1), region = 96  ;;  %673 = vst.msk [vmem:[#allocation2] sm:$0xff] (!%p5993_p6), %vm672_vm0, %v8332_v0  ;;  %674 = vst.msk [vmem:[#allocation2 + $0x8] sm:$0xff] (!%p5993_p6), %vm672_vm0, %v8332_v0 }
 0x1a2   : > { %675 = vst.msk [vmem:[#allocation2 + $0x10] sm:$0xff] (!%p5993_p6), %vm672_vm0, %v8332_v0  ;;  %676 = vst.msk [vmem:[#allocation2 + $0x18] sm:$0xff] (!%p5993_p6), %vm672_vm0, %v8332_v0 }
 0x1a3   : > { %677 = vst.msk [vmem:[#allocation2 + $0x20] sm:$0xff] (!%p5993_p6), %vm672_vm0, %v8332_v0  ;;  %678 = vst.msk [vmem:[#allocation2 + $0x28] sm:$0xff] (!%p5993_p6), %vm672_vm0, %v8332_v0 }
 0x1a4   : > { %679 = vst.msk [vmem:[#allocation2 + $0x30] sm:$0xff] (!%p5993_p6), %vm672_vm0, %v8332_v0  ;;  %680 = vst.msk [vmem:[#allocation2 + $0x38] sm:$0xff] (!%p5993_p6), %vm672_vm0, %v8332_v0 }
 0x1a5   : > { %681 = vst.msk [vmem:[#allocation2 + $0x40] sm:$0xff] (!%p5993_p6), %vm672_vm0, %v8332_v0  ;;  %682 = vst.msk [vmem:[#allocation2 + $0x48] sm:$0xff] (!%p5993_p6), %vm672_vm0, %v8332_v0 }
 0x1a6   : > { %683 = vst.msk [vmem:[#allocation2 + $0x50] sm:$0xff] (!%p5993_p6), %vm672_vm0, %v8332_v0  ;;  %684 = vst.msk [vmem:[#allocation2 + $0x58] sm:$0xff] (!%p5993_p6), %vm672_vm0, %v8332_v0 }
 0x1a7   : > { %685 = vst.msk [vmem:[#allocation2 + $0x60] sm:$0xff] (!%p5993_p6), %vm672_vm0, %v8332_v0  ;;  %686 = vst.msk [vmem:[#allocation2 + $0x68] sm:$0xff] (!%p5993_p6), %vm672_vm0, %v8332_v0 }
 0x1a8   : > { %687 = vst.msk [vmem:[#allocation2 + $0x70] sm:$0xff] %vm672_vm0, %v8332_v0  ;;  %688 = vst.msk [vmem:[#allocation2 + $0x78] sm:$0xff] %vm672_vm0, %v8332_v0 }
 0x1a9   : > { %689 = vst.msk [vmem:[#allocation2 + $0x80] sm:$0xff] %vm672_vm0, %v8332_v0  ;;  %690 = vst.msk [vmem:[#allocation2 + $0x88] sm:$0xff] %vm672_vm0, %v8332_v0 }
 0x1aa   : > { %691 = vst.msk [vmem:[#allocation2 + $0x90] sm:$0xff] %vm672_vm0, %v8332_v0  ;;  %692 = vst.msk [vmem:[#allocation2 + $0x98] sm:$0xff] %vm672_vm0, %v8332_v0 }
 0x1ab   : > { %693 = vst.msk [vmem:[#allocation2 + $0xa0] sm:$0xff] %vm672_vm0, %v8332_v0  ;;  %694 = vst.msk [vmem:[#allocation2 + $0xa8] sm:$0xff] %vm672_vm0, %v8332_v0 }
 0x1ac   : > { %695 = vst.msk [vmem:[#allocation2 + $0xb0] sm:$0xff] %vm672_vm0, %v8332_v0  ;;  %696 = vst.msk [vmem:[#allocation2 + $0xb8] sm:$0xff] %vm672_vm0, %v8332_v0 }
 0x1ad   : > { %697 = vst.msk [vmem:[#allocation2 + $0xc0] sm:$0xff] %vm672_vm0, %v8332_v0  ;;  %698 = vst.msk [vmem:[#allocation2 + $0xc8] sm:$0xff] %vm672_vm0, %v8332_v0 }
 0x1ae   : > { %699 = vst.msk [vmem:[#allocation2 + $0xd0] sm:$0xff] %vm672_vm0, %v8332_v0  ;;  %700 = vst.msk [vmem:[#allocation2 + $0xd8] sm:$0xff] %vm672_vm0, %v8332_v0 }
 0x1af   : > { %701 = vst.msk [vmem:[#allocation2 + $0xe0] sm:$0xff] %vm672_vm0, %v8332_v0  ;;  %702 = vst.msk [vmem:[#allocation2 + $0xe8] sm:$0xff] %vm672_vm0, %v8332_v0 }
 0x1b0   : > { %703 = vst.msk [vmem:[#allocation2 + $0xf0] sm:$0xff] %vm672_vm0, %v8332_v0  ;;  %704 = vst.msk [vmem:[#allocation2 + $0xf8] sm:$0xff] %vm672_vm0, %v8332_v0 }
 0x1b1   : > { %705 = vst.msk [vmem:[#allocation2 + $0x100] sm:$0xff] %vm672_vm0, %v8332_v0  ;;  %706 = vst.msk [vmem:[#allocation2 + $0x108] sm:$0xff] %vm672_vm0, %v8332_v0 }
 0x1b2   : > { %707 = vst.msk [vmem:[#allocation2 + $0x110] sm:$0xff] %vm672_vm0, %v8332_v0  ;;  %708 = vst.msk [vmem:[#allocation2 + $0x118] sm:$0xff] %vm672_vm0, %v8332_v0 }
 0x1b3   : > { %709 = vst.msk [vmem:[#allocation2 + $0x120] sm:$0xff] %vm672_vm0, %v8332_v0  ;;  %710 = vst.msk [vmem:[#allocation2 + $0x128] sm:$0xff] %vm672_vm0, %v8332_v0 }
 0x1b4   : > { %711 = vst.msk [vmem:[#allocation2 + $0x130] sm:$0xff] %vm672_vm0, %v8332_v0  ;;  %712 = vst.msk [vmem:[#allocation2 + $0x138] sm:$0xff] %vm672_vm0, %v8332_v0 }
 0x1b5   : > { %713 = vst.msk [vmem:[#allocation2 + $0x140] sm:$0xff] %vm672_vm0, %v8332_v0  ;;  %714 = vst.msk [vmem:[#allocation2 + $0x148] sm:$0xff] %vm672_vm0, %v8332_v0 }
 0x1b6   : > { %715 = vst.msk [vmem:[#allocation2 + $0x150] sm:$0xff] %vm672_vm0, %v8332_v0  ;;  %716 = vst.msk [vmem:[#allocation2 + $0x158] sm:$0xff] %vm672_vm0, %v8332_v0 }
 0x1b7   : > { %717 = vst.msk [vmem:[#allocation2 + $0x160] sm:$0xff] %vm672_vm0, %v8332_v0  ;;  %718 = vst.msk [vmem:[#allocation2 + $0x168] sm:$0xff] %vm672_vm0, %v8332_v0 }
 0x1b8   : > { %719 = vst.msk [vmem:[#allocation2 + $0x170] sm:$0xff] %vm672_vm0, %v8332_v0  ;;  %720 = vst.msk [vmem:[#allocation2 + $0x178] sm:$0xff] %vm672_vm0, %v8332_v0 }
 0x1b9   : > { %721 = vst.msk [vmem:[#allocation2 + $0x180] sm:$0xff] %vm672_vm0, %v8332_v0  ;;  %722 = vst.msk [vmem:[#allocation2 + $0x188] sm:$0xff] %vm672_vm0, %v8332_v0 }
 0x1ba   : > { %723 = vst.msk [vmem:[#allocation2 + $0x190] sm:$0xff] %vm672_vm0, %v8332_v0  ;;  %724 = vst.msk [vmem:[#allocation2 + $0x198] sm:$0xff] %vm672_vm0, %v8332_v0 }
 0x1bb   : > { %725 = vst.msk [vmem:[#allocation2 + $0x1a0] sm:$0xff] %vm672_vm0, %v8332_v0  ;;  %726 = vst.msk [vmem:[#allocation2 + $0x1a8] sm:$0xff] %vm672_vm0, %v8332_v0 }
 0x1bc   : > { %727 = vst.msk [vmem:[#allocation2 + $0x1b0] sm:$0xff] %vm672_vm0, %v8332_v0  ;;  %728 = vst.msk [vmem:[#allocation2 + $0x1b8] sm:$0xff] %vm672_vm0, %v8332_v0 }
 0x1bd   : > { %729 = vst.msk [vmem:[#allocation2 + $0x1c0] sm:$0xff] %vm672_vm0, %v8332_v0  ;;  %730 = vst.msk [vmem:[#allocation2 + $0x1c8] sm:$0xff] %vm672_vm0, %v8332_v0 }
 0x1be   : > { %731 = vst.msk [vmem:[#allocation2 + $0x1d0] sm:$0xff] %vm672_vm0, %v8332_v0  ;;  %732 = vst.msk [vmem:[#allocation2 + $0x1d8] sm:$0xff] %vm672_vm0, %v8332_v0 }
 0x1bf   : > { %733 = vst.msk [vmem:[#allocation2 + $0x1e0] sm:$0xff] %vm672_vm0, %v8332_v0  ;;  %734 = vst.msk [vmem:[#allocation2 + $0x1e8] sm:$0xff] %vm672_vm0, %v8332_v0 }
 0x1c0   : > { %735 = vst.msk [vmem:[#allocation2 + $0x1f0] sm:$0xff] %vm672_vm0, %v8332_v0  ;;  %736 = vst.msk [vmem:[#allocation2 + $0x1f8] sm:$0xff] %vm672_vm0, %v8332_v0 }
 0x1c1 PF: > { %v807_v1 = vld [vmem:[%s8909_s12] sm:$0xf]  ;;  %vm873_vm1 = vcmask 1043456   ;;  %vm848_vm2 = vcmask 64512   ;;  %v7344_v4 = vld [vmem:[%s8902_s28 + $0x8] sm:$0xff]   ;;  %v7346_v8 = vld [vmem:[%s8902_s28 + $0x18] sm:$0xff]   ;;  %v737_v58 = vlaneseq  ;;  %s772_s15 = ssub.s32 %s8932_s3, %s8929_s22  ;;  %p6286_p4 = scmp.ne.s32.totalorder %s8932_s3, %s8929_s22 }
 0x1c2   : > { %v7343_v2 = vld [vmem:[%s8902_s28] sm:$0xff]   ;;  %7045 = vmatprep.subr.msk.bf16.mxu0 %vm873_vm1, %v807_v1  ;;  %v875_v3 = vsel %vm873_vm1, %v807_v1, 0  ;;  %v7345_v7 = vld [vmem:[%s8902_s28 + $0x10] sm:$0xff]   ;;  %v6140_v10 = vld [vmem:[%s8909_s12 + $0x8] sm:$0xf]  ;;  %s5994_s20 = sshll.u32 %s772_s15, 7 }
 0x1c3   : > { %6638 = vmatpush3.bf16.msra.mxu0 %v875_v3  ;;  %6639 = vmatprep.mubr.msk.bf16.mxu0 %vm848_vm2, %v7343_v2  ;;  %v6059_v5 = vld [vmem:[%s8909_s12 + $0x4] sm:$0xf]  ;;  %v7348_v11 = vld [vmem:[%s8902_s28 + $0x28] sm:$0xff]   ;;  %v7350_v13 = vld [vmem:[%s8902_s28 + $0x38] sm:$0xff]   ;;  %v1710_v18 = vsel %vm873_vm1, %v6140_v10, 0  ;;  %v9196_v59 = vshrl.u32 %v737_v58, 7  ;;  %v9208_v2 = vstv %s5994_s20 }
 0x1c4   : > { %7046 = vmatprep.subr.msk.bf16.mxu0 %vm873_vm1, %v6059_v5  ;;  %v1292_v6 = vsel %vm873_vm1, %v6059_v5, 0  ;;  %v7347_v9 = vld [vmem:[%s8902_s28 + $0x20] sm:$0xff]   ;;  %v7349_v12 = vld [vmem:[%s8902_s28 + $0x30] sm:$0xff]   ;;  %v7352_v15 = vld [vmem:[%s8902_s28 + $0x48] sm:$0xff]   ;;  %v9201_v61 = vand.u32 127, %v737_v58 }
 0x1c5   : > { %v7351_v14 = vld [vmem:[%s8902_s28 + $0x40] sm:$0xff]   ;;  %v7353_v16 = vld [vmem:[%s8902_s28 + $0x50] sm:$0xff]   ;;  %v7376_v19 = vld [vmem:[%s8895_s1 + $0x8] sm:$0xff]   ;;  %v739_v60 = vadd.s32 8, %v9196_v59  ;;  %v740_v62 = vadd.s32 16, %v9196_v59  ;;  %v741_v63 = vadd.s32 24, %v9196_v59 }
 0x1c6   : > { %6640 = vmatmul.mubr.msk.bf16.vlgmr.msra.gmra.mrb[0].mxu0 %vm848_vm2, %v7344_v4  ;;  %v7375_v17 = vld [vmem:[%s8895_s1] sm:$0xff]   ;;  %v6221_v20 = vld [vmem:[%s8909_s12 + $0xc] sm:$0xf]  ;;  %v7377_v21 = vld [vmem:[%s8895_s1 + $0x10] sm:$0xff]   ;;  %v756_v0 = vsub.s32 %v9196_v59, %v9201_v61 }
 0x1c7   : > { %6688 = vmatpush3.bf16.msra.mxu0 %v1292_v6  ;;  %6643 = vmatprep.mubr.msk.bf16.mxu0 %vm848_vm2, %v7345_v7  ;;  %v7354_v22 = vld [vmem:[%s8902_s28 + $0x58] sm:$0xff]   ;;  %v7355_v23 = vld [vmem:[%s8902_s28 + $0x60] sm:$0xff]   ;;  %v7356_v26 = vld [vmem:[%s8902_s28 + $0x68] sm:$0xff]   ;;  %v2128_v34 = vsel %vm873_vm1, %v6221_v20, 0  ;;  %v757_v1 = vsub.s32 %v739_v60, %v9201_v61  ;;  %v758_v3 = vsub.s32 %v740_v62, %v9201_v61  ;;  %v759_v4 = vsub.s32 %v741_v63, %v9201_v61 }
 0x1c8   : > { %7047 = vmatprep.subr.msk.bf16.mxu0 %vm873_vm1, %v6140_v10  ;;  %6655 = vmatprep.subr.bf16.mxu1 %v7375_v17  ;;  %v7378_v24 = vld [vmem:[%s8895_s1 + $0x18] sm:$0xff]   ;;  %v7379_v25 = vld [vmem:[%s8895_s1 + $0x20] sm:$0xff]   ;;  %v7357_v27 = vld [vmem:[%s8902_s28 + $0x70] sm:$0xff]   ;;  %vm775_vm3 = vcmp.ge.s32.totalorder %v756_v0, %v9208_v2  ;;  %v742_v6 = vadd.s32 32, %v9196_v59  ;;  %v743_v7 = vadd.s32 40, %v9196_v59  ;;  %v745_v10 = vadd.s32 56, %v9196_v59 }
 0x1c9   : > { %6656 = vmatpush3.bf16.msra.mxu1 %v7375_v17  ;;  %v7380_v28 = vld [vmem:[%s8895_s1 + $0x28] sm:$0xff]   ;;  %v7381_v29 = vld [vmem:[%s8895_s1 + $0x30] sm:$0xff]   ;;  %v7358_v30 = vld [vmem:[%s8902_s28 + $0x78] sm:$0xff]   ;;  %vm776_vm4 = vcmp.ge.s32.totalorder %v757_v1, %v9208_v2  ;;  %vm777_vm5 = vcmp.ge.s32.totalorder %v758_v3, %v9208_v2  ;;  %vm778_vm6 = vcmp.ge.s32.totalorder %v759_v4, %v9208_v2 }
 0x1ca   : > { %6657 = vmatprep.subr.bf16.mxu1 %v7376_v19  ;;  %v7359_v31 = vld [vmem:[%s8902_s28 + $0x80] sm:$0xff]   ;;  %v7360_v32 = vld [vmem:[%s8902_s28 + $0x88] sm:$0xff]   ;;  %v7361_v33 = vld [vmem:[%s8902_s28 + $0x90] sm:$0xff]   ;;  %v760_v17 = vsub.s32 %v742_v6, %v9201_v61 }
 0x1cb   : > { %v7362_v35 = vld [vmem:[%s8902_s28 + $0x98] sm:$0xff]   ;;  %v7363_v36 = vld [vmem:[%s8902_s28 + $0xa0] sm:$0xff]   ;;  %v7364_v37 = vld [vmem:[%s8902_s28 + $0xa8] sm:$0xff]  }
 0x1cc   : > { %v7365_v38 = vld [vmem:[%s8902_s28 + $0xb0] sm:$0xff]   ;;  %v7366_v39 = vld [vmem:[%s8902_s28 + $0xb8] sm:$0xff]   ;;  %v7367_v41 = vld [vmem:[%s8902_s28 + $0xc0] sm:$0xff]   ;;  %vm779_vm9 = vcmp.ge.s32.totalorder %v760_v17, %v9208_v2 }
 0x1cd   : > { %6658 = vmatpush3.bf16.msra.mxu1 %v7376_v19  ;;  %v7382_v40 = vld [vmem:[%s8895_s1 + $0x38] sm:$0xff]   ;;  %v9138_v42 = vld [vmem:[%s8895_s1 + $0x40] sm:$0xff]   ;;  %v7368_v43 = vld [vmem:[%s8902_s28 + $0xc8] sm:$0xff]  }
 0x1ce   : > { %6644 = vmatmul.mubr.msk.bf16.gmra.mrb[4].mxu0 %vm848_vm2, %v7346_v8  ;;  %6659 = vmatprep.subr.bf16.mxu1 %v7377_v21  ;;  %v7369_v44 = vld [vmem:[%s8902_s28 + $0xd0] sm:$0xff]   ;;  %v7370_v45 = vld [vmem:[%s8902_s28 + $0xd8] sm:$0xff]   ;;  %v7371_v46 = vld [vmem:[%s8902_s28 + $0xe0] sm:$0xff]  }
 0x1cf   : > { %6647 = vmatprep.mubr.msk.bf16.mxu0 %vm848_vm2, %v7347_v9  ;;  %v7372_v47 = vld [vmem:[%s8902_s28 + $0xe8] sm:$0xff]   ;;  %v7373_v48 = vld [vmem:[%s8902_s28 + $0xf0] sm:$0xff]   ;;  %v7374_v49 = vld [vmem:[%s8902_s28 + $0xf8] sm:$0xff]   ;;  %v744_v9 = vadd.s32 48, %v9196_v59 }
 0x1d0   : > { %v9157_v50 = vld [vmem:[%s8895_s1 + $0xc0] sm:$0xff]   ;;  %v9162_v51 = vld [vmem:[%s8895_s1 + $0xc8] sm:$0xff]   ;;  %v9167_v52 = vld [vmem:[%s8895_s1 + $0xd0] sm:$0xff]  }
 0x1d1   : > { %6660 = vmatpush3.bf16.msra.mxu1 %v7377_v21  ;;  %v9172_v53 = vld [vmem:[%s8895_s1 + $0xd8] sm:$0xff]   ;;  %v9177_v54 = vld [vmem:[%s8895_s1 + $0xe0] sm:$0xff]   ;;  %v9182_v55 = vld [vmem:[%s8895_s1 + $0xe8] sm:$0xff]   ;;  %v763_v21 = vsub.s32 %v745_v10, %v9201_v61 }
 0x1d2   : > { %6661 = vmatprep.subr.bf16.mxu1 %v7378_v24  ;;  %v9187_v56 = vld [vmem:[%s8895_s1 + $0xf0] sm:$0xff]   ;;  %v9192_v57 = vld [vmem:[%s8895_s1 + $0xf8] sm:$0xff]   ;;  %vm9220_vm7 = vmpackc.low %vm776_vm4, %vm775_vm3 }
 0x1d3   : > { %vm9224_vm8 = vmpackc.low %vm778_vm6, %vm777_vm5  ;;  %v7384_v19 = vld [vmem:[%s8895_s1 + $0x48] sm:$0xff]   ;;  %vm782_vm12 = vcmp.ge.s32.totalorder %v763_v21, %v9208_v2  ;;  %v1001_v58 = vld [vmem:[#allocation2 + $0x18] sm:$0xff] }
 0x1d4   : > { %v7392_v21 = vld [vmem:[%s8895_s1 + $0x88] sm:$0xff]  }
 0x1d5   : > { %6662 = vmatpush3.bf16.msra.mxu1 %v7378_v24  ;;  %v747_v24 = vadd.s32 72, %v9196_v59 }
 0x1d6   : > { %6648 = vmatmul.mubr.msk.bf16.gmra.mrb[8].mxu0 %vm848_vm2, %v7348_v11  ;;  %6663 = vmatprep.subr.bf16.mxu1 %v7379_v25 }
 0x1d7   : > { %6651 = vmatprep.mubr.msk.bf16.mxu0 %vm848_vm2, %v7349_v12 }
 0x1d9   : > { %6664 = vmatpush3.bf16.msra.mxu1 %v7379_v25 }
 0x1da   : > { %6665 = vmatprep.subr.bf16.mxu1 %v7380_v28 }
 0x1dd   : > { %6666 = vmatpush3.bf16.msra.mxu1 %v7380_v28  ;;  %v749_v28 = vadd.s32 88, %v9196_v59 }
 0x1de   : > { %6652 = vmatmul.mubr.msk.bf16.gmra.mrb[12].mxu0 %vm848_vm2, %v7350_v13  ;;  %6667 = vmatprep.subr.bf16.mxu1 %v7381_v29 }
 0x1df   : > { %6689 = vmatprep.mubr.msk.bf16.mxu0 %vm848_vm2, %v7351_v14 }
 0x1e1   : > { %6668 = vmatpush3.bf16.msra.mxu1 %v7381_v29 }
 0x1e2   : > { %6669 = vmatprep.subr.bf16.mxu1 %v7382_v40 }
 0x1e5   : > { %6670 = vmatpush3.bf16.msra.mxu1 %v7382_v40 }
 0x1e6   : > { %6690 = vmatmul.mubr.msk.bf16.vlgmr.msra.gmra.mrb[16].mxu0 %vm848_vm2, %v7352_v15  ;;  %6705 = vmatprep.subr.bf16.mxu1 %v9138_v42 }
 0x1e7   : > { %6738 = vmatpush3.bf16.msra.mxu0 %v1710_v18  ;;  %6693 = vmatprep.mubr.msk.bf16.mxu0 %vm848_vm2, %v7353_v16  ;;  %v761_v18 = vsub.s32 %v743_v7, %v9201_v61 }
 0x1e8   : > { %7048 = vmatprep.subr.msk.bf16.mxu0 %vm873_vm1, %v6221_v20  ;;  %v762_v20 = vsub.s32 %v744_v9, %v9201_v61 }
 0x1e9   : > { %vm780_vm10 = vcmp.ge.s32.totalorder %v761_v18, %v9208_v2 }
 0x1ea   : > { %vm781_vm11 = vcmp.ge.s32.totalorder %v762_v20, %v9208_v2  ;;  %vm9247_vm13 = vmpackc.low %vm780_vm10, %vm779_vm9 }
 0x1eb   : > { %vm9251_vm14 = vmpackc.low %vm782_vm12, %vm781_vm11 }
 0x1ee   : > { %6694 = vmatmul.mubr.msk.bf16.gmra.mrb[20].mxu0 %vm848_vm2, %v7354_v22 }
 0x1ef   : > { %6697 = vmatprep.mubr.msk.bf16.mxu0 %vm848_vm2, %v7355_v23  ;;  %v746_v23 = vadd.s32 64, %v9196_v59 }
 0x1f6   : > { %6698 = vmatmul.mubr.msk.bf16.gmra.mrb[24].mxu0 %vm848_vm2, %v7356_v26  ;;  %v7385_v26 = vld [vmem:[%s8895_s1 + $0x50] sm:$0xff]  }
 0x1f7   : > { %6701 = vmatprep.mubr.msk.bf16.mxu0 %vm848_vm2, %v7357_v27  ;;  %v748_v27 = vadd.s32 80, %v9196_v59 }
 0x1fe   : > { %6702 = vmatmul.mubr.msk.bf16.gmra.mrb[28].mxu0 %vm848_vm2, %v7358_v30 }
 0x1ff   : > { %6739 = vmatprep.mubr.msk.bf16.mxu0 %vm848_vm2, %v7359_v31 }
 0x206   : > { %6740 = vmatmul.mubr.msk.bf16.vlgmr.msra.gmra.mrb[32].mxu0 %vm848_vm2, %v7360_v32 }
 0x207   : > { %6788 = vmatpush3.bf16.msra.mxu0 %v2128_v34  ;;  %6743 = vmatprep.mubr.msk.bf16.mxu0 %vm848_vm2, %v7361_v33  ;;  %v1000_v34 = vld [vmem:[#allocation2 + $0x10] sm:$0xff] }
 0x208   : > { %6805 = vmatprep.subr.bf16.mxu0 %v9157_v50 }
 0x20e   : > { %6744 = vmatmul.mubr.msk.bf16.gmra.mrb[36].mxu0 %vm848_vm2, %v7362_v35  ;;  %v764_v35 = vsub.s32 %v746_v23, %v9201_v61 }
 0x20f   : > { %6747 = vmatprep.mubr.msk.bf16.mxu0 %vm848_vm2, %v7363_v36  ;;  %v765_v36 = vsub.s32 %v747_v24, %v9201_v61  ;;  %v7393_v24 = vld [vmem:[%s8895_s1 + $0x90] sm:$0xff]  }
 0x210   : > { %vm783_vm15 = vcmp.ge.s32.totalorder %v764_v35, %v9208_v2 }
 0x211   : > { %vm784_vm0 = vcmp.ge.s32.totalorder %v765_v36, %v9208_v2 }
 0x212   : > { %vm9273_vm4 = vmpackc.low %vm784_vm0, %vm783_vm15 }
 0x216   : > { %6748 = vmatmul.mubr.msk.bf16.gmra.mrb[40].mxu0 %vm848_vm2, %v7364_v37  ;;  %v7386_v37 = vld [vmem:[%s8895_s1 + $0x58] sm:$0xff]  }
 0x217   : > { %6751 = vmatprep.mubr.msk.bf16.mxu0 %vm848_vm2, %v7365_v38  ;;  %v766_v38 = vsub.s32 %v748_v27, %v9201_v61 }
 0x219   : > { %vm785_vm1 = vcmp.ge.s32.totalorder %v766_v38, %v9208_v2 }
 0x21e   : > { %6752 = vmatmul.mubr.msk.bf16.gmra.mrb[44].mxu0 %vm848_vm2, %v7366_v39  ;;  %v767_v39 = vsub.s32 %v749_v28, %v9201_v61 }
 0x21f   : > { %6789 = vmatprep.mubr.msk.bf16.mxu0 %vm848_vm2, %v7367_v41  ;;  %v750_v41 = vadd.s32 96, %v9196_v59 }
 0x220   : > { %vm786_vm3 = vcmp.ge.s32.totalorder %v767_v39, %v9208_v2  ;;  %v7396_v39 = vld [vmem:[%s8895_s1 + $0xa8] sm:$0xff]  }
 0x221   : > { %vm9277_vm5 = vmpackc.low %vm786_vm3, %vm785_vm1  ;;  %v768_v63 = vsub.s32 %v750_v41, %v9201_v61 }
 0x223   : > { %vm787_vm6 = vcmp.ge.s32.totalorder %v768_v63, %v9208_v2 }
 0x226   : > { %6790 = vmatmul.mubr.msk.bf16.vlgmr.msra.gmra.mrb[48].mxu0 %vm848_vm2, %v7368_v43 }
 0x227   : > { %6793 = vmatprep.mubr.msk.bf16.mxu0 %vm848_vm2, %v7369_v44  ;;  %6806 = vmatpush3.bf16.msra.mxu0 %v9157_v50  ;;  %v7387_v44 = vld [vmem:[%s8895_s1 + $0x60] sm:$0xff]  }
 0x228   : > { %6807 = vmatprep.subr.bf16.mxu0 %v9162_v51 }
 0x22b   : > { %6808 = vmatpush3.bf16.msra.mxu0 %v9162_v51 }
 0x22c   : > { %6809 = vmatprep.subr.bf16.mxu0 %v9167_v52 }
 0x22e   : > { %6794 = vmatmul.mubr.msk.bf16.gmra.mrb[52].mxu0 %vm848_vm2, %v7370_v45  ;;  %v752_v45 = vadd.s32 112, %v9196_v59 }
 0x22f   : > { %6797 = vmatprep.mubr.msk.bf16.mxu0 %vm848_vm2, %v7371_v46  ;;  %6810 = vmatpush3.bf16.msra.mxu0 %v9167_v52  ;;  %v753_v46 = vadd.s32 120, %v9196_v59 }
 0x230   : > { %6811 = vmatprep.subr.bf16.mxu0 %v9172_v53  ;;  %v770_v1 = vsub.s32 %v752_v45, %v9201_v61 }
 0x231   : > { %v771_v3 = vsub.s32 %v753_v46, %v9201_v61 }
 0x232   : > { %vm789_vm10 = vcmp.ge.s32.totalorder %v770_v1, %v9208_v2 }
 0x233   : > { %6812 = vmatpush3.bf16.msra.mxu0 %v9172_v53  ;;  %vm790_vm11 = vcmp.ge.s32.totalorder %v771_v3, %v9208_v2 }
 0x234   : > { %6813 = vmatprep.subr.bf16.mxu0 %v9177_v54  ;;  %vm9299_vm15 = vmpackc.low %vm790_vm11, %vm789_vm10 }
 0x236   : > { %6798 = vmatmul.mubr.msk.bf16.gmra.mrb[56].mxu0 %vm848_vm2, %v7372_v47 }
 0x237   : > { %6801 = vmatprep.mubr.msk.bf16.mxu0 %vm848_vm2, %v7373_v48  ;;  %6814 = vmatpush3.bf16.msra.mxu0 %v9177_v54 }
 0x238   : > { %6815 = vmatprep.subr.bf16.mxu0 %v9182_v55 }
 0x23b   : > { %6816 = vmatpush3.bf16.msra.mxu0 %v9182_v55 }
 0x23c   : > { %6817 = vmatprep.subr.bf16.mxu0 %v9187_v56 }
 0x23e   : > { %6802 = vmatmul.mubr.msk.bf16.gmra.mrb[60].mxu0 %vm848_vm2, %v7374_v49 }
 0x23f   : > { %6818 = vmatpush3.bf16.msra.mxu0 %v9187_v56 }
 0x240   : > { %6819 = vmatprep.subr.bf16.mxu0 %v9192_v57 }
 0x243   : > { %6820 = vmatpush3.bf16.msra.mxu0 %v9192_v57 }
 0x299   : > { %v6641_v5 = vpop.f32.mrb[0].mxu0 }
 0x29a   : > { %v911_v8 = vpop.f32.mrb[1].mxu0 }
 0x29b   : > { %v6642_v11 = vpop.f32.mrb[2].mxu0 }
 0x29c   : > { %v6023_v12 = vpack.c.bf16 %v6642_v11, %v6641_v5  ;;  %v914_v13 = vpop.f32.mrb[3].mxu0  ;;  %v1004_v11 = vld [vmem:[#allocation2 + $0x30] sm:$0xff] }
 0x29d   : > { %v6020_v15 = vpack.c.bf16 %v914_v13, %v911_v8 }
 0x29f   : > { %6671 = vmatprep.mubr.msk.bf16.mxu1 %vm9220_vm7, %v6020_v15  ;;  %v7391_v15 = vld [vmem:[%s8895_s1 + $0x80] sm:$0xff]  }
 0x2a0   : > { %6672 = vmatmul.mubr.msk.bf16.vlgmr.msra.gmra.mrb[0].mxu1 %vm9224_vm8, %v6023_v12  ;;  %v7390_v12 = vld [vmem:[%s8895_s1 + $0x78] sm:$0xff]  }
 0x2a1   : > { %v6645_v22 = vpop.f32.mrb[4].mxu0  ;;  %6706 = vmatpush3.bf16.msra.mxu1 %v9138_v42  ;;  %v751_v42 = vadd.s32 104, %v9196_v59  ;;  %v7388_v59 = vld [vmem:[%s8895_s1 + $0x68] sm:$0xff]  }
 0x2a2   : > { %v927_v25 = vpop.f32.mrb[5].mxu0  ;;  %6707 = vmatprep.subr.bf16.mxu1 %v7384_v19 }
 0x2a3   : > { %v6646_v29 = vpop.f32.mrb[6].mxu0  ;;  %v769_v0 = vsub.s32 %v751_v42, %v9201_v61  ;;  %v7389_v61 = vld [vmem:[%s8895_s1 + $0x70] sm:$0xff]  }
 0x2a4   : > { %v6029_v30 = vpack.c.bf16 %v6646_v29, %v6645_v22  ;;  %v930_v31 = vpop.f32.mrb[7].mxu0  ;;  %v7394_v29 = vld [vmem:[%s8895_s1 + $0x98] sm:$0xff]   ;;  %v7397_v42 = vld [vmem:[%s8895_s1 + $0xb0] sm:$0xff]  }
 0x2a5   : > { %v6026_v33 = vpack.c.bf16 %v930_v31, %v927_v25  ;;  %6708 = vmatpush3.bf16.msra.mxu1 %v7384_v19  ;;  %vm788_vm9 = vcmp.ge.s32.totalorder %v769_v0, %v9208_v2 }
 0x2a6   : > { %6709 = vmatprep.subr.bf16.mxu1 %v7385_v26  ;;  %vm9295_vm12 = vmpackc.low %vm788_vm9, %vm787_vm6 }
 0x2a7   : > { %6675 = vmatprep.mubr.msk.bf16.mxu1 %vm9247_vm13, %v6026_v33  ;;  %v7395_v33 = vld [vmem:[%s8895_s1 + $0xa0] sm:$0xff]  }
 0x2a8   : > { %6676 = vmatmul.mubr.msk.bf16.gmra.mrb[4].mxu1 %vm9251_vm14, %v6029_v30 }
 0x2a9   : > { %v6649_v40 = vpop.f32.mrb[8].mxu0  ;;  %6710 = vmatpush3.bf16.msra.mxu1 %v7385_v26 }
 0x2aa   : > { %v943_v43 = vpop.f32.mrb[9].mxu0  ;;  %6711 = vmatprep.subr.bf16.mxu1 %v7386_v37 }
 0x2ab   : > { %v6650_v47 = vpop.f32.mrb[10].mxu0 }
 0x2ac   : > { %v6035_v48 = vpack.c.bf16 %v6650_v47, %v6649_v40  ;;  %v946_v49 = vpop.f32.mrb[11].mxu0  ;;  %v7398_v47 = vld [vmem:[%s8895_s1 + $0xb8] sm:$0xff]   ;;  %s9458_s1 = smov (!%p6286_p4), 0  }
 0x2ad   : > { %v6032_v60 = vpack.c.bf16 %v946_v49, %v943_v43  ;;  %6712 = vmatpush3.bf16.msra.mxu1 %v7386_v37 }
 0x2ae   : > { %6713 = vmatprep.subr.bf16.mxu1 %v7387_v44 }
 0x2af   : > { %6679 = vmatprep.mubr.msk.bf16.mxu1 %vm9273_vm4, %v6032_v60 }
 0x2b0   : > { %6680 = vmatmul.mubr.msk.bf16.gmra.mrb[8].mxu1 %vm9277_vm5, %v6035_v48 }
 0x2b1   : > { %v6653_v4 = vpop.f32.mrb[12].mxu0  ;;  %6714 = vmatpush3.bf16.msra.mxu1 %v7387_v44 }
 0x2b2   : > { %v959_v5 = vpop.f32.mrb[13].mxu0  ;;  %6715 = vmatprep.subr.bf16.mxu1 %v7388_v59 }
 0x2b3   : > { %v6654_v6 = vpop.f32.mrb[14].mxu0 }
 0x2b4   : > { %v6041_v7 = vpack.c.bf16 %v6654_v6, %v6653_v4  ;;  %v962_v8 = vpop.f32.mrb[15].mxu0 }
 0x2b5   : > { %v6038_v10 = vpack.c.bf16 %v962_v8, %v959_v5  ;;  %6716 = vmatpush3.bf16.msra.mxu1 %v7388_v59 }
 0x2b6   : > { %6717 = vmatprep.subr.bf16.mxu1 %v7389_v61 }
 0x2b7   : > { %6683 = vmatprep.mubr.msk.bf16.mxu1 %vm9295_vm12, %v6038_v10 }
 0x2b8   : > { %6684 = vmatmul.mubr.msk.bf16.gmra.mrb[12].mxu1 %vm9299_vm15, %v6041_v7 }
 0x2b9   : > { %v6691_v2 = vpop.f32.mrb[16].mxu0  ;;  %6718 = vmatpush3.bf16.msra.mxu1 %v7389_v61 }
 0x2ba   : > { %v1328_v13 = vpop.f32.mrb[17].mxu0  ;;  %6719 = vmatprep.subr.bf16.mxu1 %v7390_v12 }
 0x2bb   : > { %v6692_v17 = vpop.f32.mrb[18].mxu0 }
 0x2bc   : > { %v6104_v18 = vpack.c.bf16 %v6692_v17, %v6691_v2  ;;  %v1331_v19 = vpop.f32.mrb[19].mxu0 }
 0x2bd   : > { %v6101_v20 = vpack.c.bf16 %v1331_v19, %v1328_v13  ;;  %6720 = vmatpush3.bf16.msra.mxu1 %v7390_v12 }
 0x2be   : > { %6755 = vmatprep.subr.bf16.mxu1 %v7391_v15 }
 0x2bf   : > { %6721 = vmatprep.mubr.msk.bf16.mxu1 %vm9220_vm7, %v6101_v20 }
 0x2c0   : > { %6722 = vmatmul.mubr.msk.bf16.vlgmr.msra.gmra.mrb[16].mxu1 %vm9224_vm8, %v6104_v18 }
 0x2c1   : > { %v6695_v22 = vpop.f32.mrb[20].mxu0  ;;  %6756 = vmatpush3.bf16.msra.mxu1 %v7391_v15 }
 0x2c2   : > { %v1344_v23 = vpop.f32.mrb[21].mxu0  ;;  %6757 = vmatprep.subr.bf16.mxu1 %v7392_v21 }
 0x2c3   : > { %v6696_v25 = vpop.f32.mrb[22].mxu0 }
 0x2c4   : > { %v6110_v26 = vpack.c.bf16 %v6696_v25, %v6695_v22  ;;  %v1347_v27 = vpop.f32.mrb[23].mxu0 }
 0x2c5   : > { %v6107_v28 = vpack.c.bf16 %v1347_v27, %v1344_v23  ;;  %6758 = vmatpush3.bf16.msra.mxu1 %v7392_v21 }
 0x2c6   : > { %6759 = vmatprep.subr.bf16.mxu1 %v7393_v24 }
 0x2c7   : > { %6725 = vmatprep.mubr.msk.bf16.mxu1 %vm9247_vm13, %v6107_v28 }
 0x2c8   : > { %6726 = vmatmul.mubr.msk.bf16.gmra.mrb[20].mxu1 %vm9251_vm14, %v6110_v26 }
 0x2c9   : > { %v6699_v30 = vpop.f32.mrb[24].mxu0  ;;  %6760 = vmatpush3.bf16.msra.mxu1 %v7393_v24 }
 0x2ca   : > { %v1360_v31 = vpop.f32.mrb[25].mxu0  ;;  %6761 = vmatprep.subr.bf16.mxu1 %v7394_v29 }
 0x2cb   : > { %v6700_v35 = vpop.f32.mrb[26].mxu0 }
 0x2cc   : > { %v6116_v36 = vpack.c.bf16 %v6700_v35, %v6699_v30  ;;  %v1363_v37 = vpop.f32.mrb[27].mxu0 }
 0x2cd   : > { %v6113_v38 = vpack.c.bf16 %v1363_v37, %v1360_v31  ;;  %6762 = vmatpush3.bf16.msra.mxu1 %v7394_v29  ;;  %v998_v37 = vld [vmem:[#allocation2] sm:$0xff] }
 0x2ce   : > { %6763 = vmatprep.subr.bf16.mxu1 %v7395_v33 }
 0x2cf   : > { %6729 = vmatprep.mubr.msk.bf16.mxu1 %vm9273_vm4, %v6113_v38 }
 0x2d0   : > { %6730 = vmatmul.mubr.msk.bf16.gmra.mrb[24].mxu1 %vm9277_vm5, %v6116_v36 }
 0x2d1   : > { %v6703_v40 = vpop.f32.mrb[28].mxu0  ;;  %6764 = vmatpush3.bf16.msra.mxu1 %v7395_v33 }
 0x2d2   : > { %v1376_v41 = vpop.f32.mrb[29].mxu0  ;;  %6765 = vmatprep.subr.bf16.mxu1 %v7396_v39 }
 0x2d3   : > { %v6704_v43 = vpop.f32.mrb[30].mxu0 }
 0x2d4   : > { %v6122_v44 = vpack.c.bf16 %v6704_v43, %v6703_v40  ;;  %v1379_v45 = vpop.f32.mrb[31].mxu0  ;;  %v999_v40 = vld [vmem:[#allocation2 + $0x8] sm:$0xff] }
 0x2d5   : > { %v6119_v46 = vpack.c.bf16 %v1379_v45, %v1376_v41  ;;  %6766 = vmatpush3.bf16.msra.mxu1 %v7396_v39  ;;  %v1002_v45 = vld [vmem:[#allocation2 + $0x20] sm:$0xff] }
 0x2d6   : > { %6767 = vmatprep.subr.bf16.mxu1 %v7397_v42 }
 0x2d7   : > { %6733 = vmatprep.mubr.msk.bf16.mxu1 %vm9295_vm12, %v6119_v46 }
 0x2d8   : > { %6734 = vmatmul.mubr.msk.bf16.gmra.mrb[28].mxu1 %vm9299_vm15, %v6122_v44 }
 0x2d9   : > { %v6741_v48 = vpop.f32.mrb[32].mxu0  ;;  %6768 = vmatpush3.bf16.msra.mxu1 %v7397_v42 }
 0x2da   : > { %v1746_v49 = vpop.f32.mrb[33].mxu0  ;;  %6769 = vmatprep.subr.bf16.mxu1 %v7398_v47 }
 0x2db   : > { %v6742_v60 = vpop.f32.mrb[34].mxu0 }
 0x2dc   : > { %v6185_v63 = vpack.c.bf16 %v6742_v60, %v6741_v48  ;;  %v1749_v0 = vpop.f32.mrb[35].mxu0  ;;  %v1003_v60 = vld [vmem:[#allocation2 + $0x28] sm:$0xff] }
 0x2dd   : > { %v6182_v59 = vpack.c.bf16 %v1749_v0, %v1746_v49  ;;  %6770 = vmatpush3.bf16.msra.mxu1 %v7398_v47  ;;  %v1005_v47 = vld [vmem:[#allocation2 + $0x38] sm:$0xff] }
 0x2de   : > { %7029 = vmatprep.subr.bf16.mxu1 %v9157_v50 }
 0x2df   : > { %6771 = vmatprep.mubr.msk.bf16.mxu1 %vm9220_vm7, %v6182_v59 }
 0x2e0   : > { %6772 = vmatmul.mubr.msk.bf16.vlgmr.msra.gmra.mrb[32].mxu1 %vm9224_vm8, %v6185_v63 }
 0x2e1   : > { %v6745_v1 = vpop.f32.mrb[36].mxu0  ;;  %7037 = vmatpush3.bf16.msra.mxu1 %v9157_v50 }
 0x2e2   : > { %v1762_v3 = vpop.f32.mrb[37].mxu0  ;;  %7030 = vmatprep.subr.bf16.mxu1 %v9162_v51 }
 0x2e3   : > { %v6746_v4 = vpop.f32.mrb[38].mxu0 }
 0x2e4   : > { %v6191_v5 = vpack.c.bf16 %v6746_v4, %v6745_v1  ;;  %v1765_v61 = vpop.f32.mrb[39].mxu0  ;;  %v1008_v4 = vld [vmem:[#allocation2 + $0x50] sm:$0xff] }
 0x2e5   : > { %v6188_v6 = vpack.c.bf16 %v1765_v61, %v1762_v3  ;;  %7038 = vmatpush3.bf16.msra.mxu1 %v9162_v51 }
 0x2e6   : > { %7031 = vmatprep.subr.bf16.mxu1 %v9167_v52 }
 0x2e7   : > { %6775 = vmatprep.mubr.msk.bf16.mxu1 %vm9247_vm13, %v6188_v6  ;;  %v1009_v6 = vld [vmem:[#allocation2 + $0x58] sm:$0xff] }
 0x2e8   : > { %6776 = vmatmul.mubr.msk.bf16.gmra.mrb[36].mxu1 %vm9251_vm14, %v6191_v5  ;;  %v1006_v5 = vld [vmem:[#allocation2 + $0x40] sm:$0xff] }
 0x2e9   : > { %v6749_v7 = vpop.f32.mrb[40].mxu0  ;;  %7039 = vmatpush3.bf16.msra.mxu1 %v9167_v52 }
 0x2ea   : > { %v1778_v50 = vpop.f32.mrb[41].mxu0  ;;  %7032 = vmatprep.subr.bf16.mxu1 %v9172_v53 }
 0x2eb   : > { %v6750_v8 = vpop.f32.mrb[42].mxu0 }
 0x2ec   : > { %v6197_v10 = vpack.c.bf16 %v6750_v8, %v6749_v7  ;;  %v1781_v12 = vpop.f32.mrb[43].mxu0  ;;  %v1007_v8 = vld [vmem:[#allocation2 + $0x48] sm:$0xff] }
 0x2ed   : > { %v6194_v2 = vpack.c.bf16 %v1781_v12, %v1778_v50  ;;  %7040 = vmatpush3.bf16.msra.mxu1 %v9172_v53 }
 0x2ee   : > { %7033 = vmatprep.subr.bf16.mxu1 %v9177_v54 }
 0x2ef   : > { %6779 = vmatprep.mubr.msk.bf16.mxu1 %vm9273_vm4, %v6194_v2 }
 0x2f0   : > { %6780 = vmatmul.mubr.msk.bf16.gmra.mrb[40].mxu1 %vm9277_vm5, %v6197_v10 }
 0x2f1   : > { %v6753_v51 = vpop.f32.mrb[44].mxu0  ;;  %7041 = vmatpush3.bf16.msra.mxu1 %v9177_v54 }
 0x2f2   : > { %v1794_v52 = vpop.f32.mrb[45].mxu0  ;;  %7034 = vmatprep.subr.bf16.mxu1 %v9182_v55 }
 0x2f3   : > { %v6754_v13 = vpop.f32.mrb[46].mxu0 }
 0x2f4   : > { %v6203_v15 = vpack.c.bf16 %v6754_v13, %v6753_v51  ;;  %v1797_v17 = vpop.f32.mrb[47].mxu0  ;;  %v1012_v13 = vld [vmem:[#allocation2 + $0x70] sm:$0xff] }
 0x2f5   : > { %v6200_v18 = vpack.c.bf16 %v1797_v17, %v1794_v52  ;;  %7042 = vmatpush3.bf16.msra.mxu1 %v9182_v55 }
 0x2f6   : > { %7035 = vmatprep.subr.bf16.mxu1 %v9187_v56 }
 0x2f7   : > { %6783 = vmatprep.mubr.msk.bf16.mxu1 %vm9295_vm12, %v6200_v18  ;;  %v1013_v18 = vld [vmem:[#allocation2 + $0x78] sm:$0xff] }
 0x2f8   : > { %6784 = vmatmul.mubr.msk.bf16.gmra.mrb[44].mxu1 %vm9299_vm15, %v6203_v15  ;;  %v1010_v15 = vld [vmem:[#allocation2 + $0x60] sm:$0xff] }
 0x2f9   : > { %v6791_v53 = vpop.f32.mrb[48].mxu0  ;;  %7043 = vmatpush3.bf16.msra.mxu1 %v9187_v56 }
 0x2fa   : > { %v2164_v54 = vpop.f32.mrb[49].mxu0  ;;  %7036 = vmatprep.subr.bf16.mxu1 %v9192_v57 }
 0x2fb   : > { %v6792_v19 = vpop.f32.mrb[50].mxu0 }
 0x2fc   : > { %v6266_v20 = vpack.c.bf16 %v6792_v19, %v6791_v53  ;;  %v2167_v21 = vpop.f32.mrb[51].mxu0  ;;  %v1011_v19 = vld [vmem:[#allocation2 + $0x68] sm:$0xff] }
 0x2fd   : > { %v6263_v22 = vpack.c.bf16 %v2167_v21, %v2164_v54  ;;  %7044 = vmatpush3.bf16.msra.mxu1 %v9192_v57 }
 0x2ff   : > { %6821 = vmatprep.mubr.msk.bf16.mxu0 %vm9220_vm7, %v6263_v22  ;;  %vm1191_vm7 = vcmask 261120  }
 0x300   : > { %6822 = vmatmul.mubr.msk.bf16.vlgmr.msra.gmra.mrb[64].mxu0 %vm9224_vm8, %v6266_v20 }
 0x301   : > { %v6795_v55 = vpop.f32.mrb[52].mxu0 }
 0x302   : > { %v2180_v23 = vpop.f32.mrb[53].mxu0 }
 0x303   : > { %v6796_v24 = vpop.f32.mrb[54].mxu0 }
 0x304   : > { %v6272_v25 = vpack.c.bf16 %v6796_v24, %v6795_v55  ;;  %v2183_v56 = vpop.f32.mrb[55].mxu0  ;;  %v1418_v24 = vld [vmem:[#allocation2 + $0x90] sm:$0xff] }
 0x305   : > { %v6269_v26 = vpack.c.bf16 %v2183_v56, %v2180_v23 }
 0x307   : > { %6825 = vmatprep.mubr.msk.bf16.mxu1 %vm9247_vm13, %v6269_v26  ;;  %v1419_v26 = vld [vmem:[#allocation2 + $0x98] sm:$0xff] }
 0x308   : > { %6826 = vmatmul.mubr.msk.bf16.vlgmr.msra.gmra.mrb[48].mxu1 %vm9251_vm14, %v6272_v25  ;;  %v1416_v25 = vld [vmem:[#allocation2 + $0x80] sm:$0xff] }
 0x309   : > { %v6799_v27 = vpop.f32.mrb[56].mxu0 }
 0x30a   : > { %v2196_v57 = vpop.f32.mrb[57].mxu0 }
 0x30b   : > { %v6800_v28 = vpop.f32.mrb[58].mxu0 }
 0x30c   : > { %v6278_v14 = vpack.c.bf16 %v6800_v28, %v6799_v27  ;;  %v2199_v29 = vpop.f32.mrb[59].mxu0  ;;  %v1417_v28 = vld [vmem:[#allocation2 + $0x88] sm:$0xff] }
 0x30d   : > { %v6275_v30 = vpack.c.bf16 %v2199_v29, %v2196_v57 }
 0x30f   : > { %6829 = vmatprep.mubr.msk.bf16.mxu1 %vm9273_vm4, %v6275_v30 }
 0x310   : > { %6830 = vmatmul.mubr.msk.bf16.gmra.mrb[52].mxu1 %vm9277_vm5, %v6278_v14 }
 0x311   : > { %v6803_v16 = vpop.f32.mrb[60].mxu0 }
 0x312   : > { %v2212_v31 = vpop.f32.mrb[61].mxu0 }
 0x313   : > { %v6804_v33 = vpop.f32.mrb[62].mxu0 }
 0x314   : > { %v6284_v32 = vpack.c.bf16 %v6804_v33, %v6803_v16  ;;  %v2215_v35 = vpop.f32.mrb[63].mxu0  ;;  %v1422_v33 = vld [vmem:[#allocation2 + $0xb0] sm:$0xff] }
 0x315   : > { %v6281_v36 = vpack.c.bf16 %v2215_v35, %v2212_v31 }
 0x317   : > { %6833 = vmatprep.mubr.msk.bf16.mxu1 %vm9295_vm12, %v6281_v36  ;;  %v1423_v36 = vld [vmem:[#allocation2 + $0xb8] sm:$0xff] }
 0x318   : > { %6834 = vmatmul.mubr.msk.bf16.gmra.mrb[56].mxu1 %vm9299_vm15, %v6284_v32  ;;  %v1420_v32 = vld [vmem:[#allocation2 + $0xa0] sm:$0xff] }
 0x373   : > { %v6673_v38 = vpop.f32.mrb[0].mxu1 }
 0x374   : > { %v1177_v39 = vadd.f32 %v6673_v38, %v1000_v34  ;;  %v1112_v62 = vpop.f32.mrb[1].mxu1  ;;  %v1421_v38 = vld [vmem:[#allocation2 + $0xa8] sm:$0xff] }
 0x375   : > { %v1175_v41 = vadd.f32 %v1112_v62, %v998_v37  ;;  %v6674_v42 = vpop.f32.mrb[2].mxu1 }
 0x376   : > { %1194 = vst.msk [vmem:[#allocation2 + $0x10] sm:$0xff] %vm1191_vm7, %v1177_v39  ;;  %v1178_v43 = vadd.f32 %v6674_v42, %v1001_v58  ;;  %v1115_v44 = vpop.f32.mrb[3].mxu1  ;;  %v1426_v42 = vld [vmem:[#allocation2 + $0xd0] sm:$0xff] }
 0x377   : > { %1192 = vst.msk [vmem:[#allocation2] sm:$0xff] %vm1191_vm7, %v1175_v41  ;;  %v1176_v9 = vadd.f32 %v1115_v44, %v999_v40 }
 0x378   : > { %1195 = vst.msk [vmem:[#allocation2 + $0x18] sm:$0xff] %vm1191_vm7, %v1178_v43  ;;  %v1424_v43 = vld [vmem:[#allocation2 + $0xc0] sm:$0xff] }
 0x379   : > { %1193 = vst.msk [vmem:[#allocation2 + $0x8] sm:$0xff] %vm1191_vm7, %v1176_v9  ;;  %v1427_v9 = vld [vmem:[#allocation2 + $0xd8] sm:$0xff] }
 0x37b   : > { %v6677_v46 = vpop.f32.mrb[4].mxu1 }
 0x37c   : > { %v1181_v48 = vadd.f32 %v6677_v46, %v1004_v11  ;;  %v1128_v49 = vpop.f32.mrb[5].mxu1  ;;  %v1425_v46 = vld [vmem:[#allocation2 + $0xc8] sm:$0xff] }
 0x37d   : > { %v1179_v63 = vadd.f32 %v1128_v49, %v1002_v45  ;;  %v6678_v0 = vpop.f32.mrb[6].mxu1 }
 0x37e   : > { %1198 = vst.msk [vmem:[#allocation2 + $0x30] sm:$0xff] %vm1191_vm7, %v1181_v48  ;;  %v1182_v59 = vadd.f32 %v6678_v0, %v1005_v47  ;;  %v1131_v1 = vpop.f32.mrb[7].mxu1  ;;  %v1430_v0 = vld [vmem:[#allocation2 + $0xf0] sm:$0xff] }
 0x37f   : > { %1196 = vst.msk [vmem:[#allocation2 + $0x20] sm:$0xff] %vm1191_vm7, %v1179_v63  ;;  %v1180_v3 = vadd.f32 %v1131_v1, %v1003_v60 }
 0x380   : > { %1199 = vst.msk [vmem:[#allocation2 + $0x38] sm:$0xff] %vm1191_vm7, %v1182_v59  ;;  %v1428_v59 = vld [vmem:[#allocation2 + $0xe0] sm:$0xff] }
 0x381   : > { %1197 = vst.msk [vmem:[#allocation2 + $0x28] sm:$0xff] %vm1191_vm7, %v1180_v3  ;;  %v1431_v3 = vld [vmem:[#allocation2 + $0xf8] sm:$0xff] }
 0x383   : > { %v6681_v61 = vpop.f32.mrb[8].mxu1 }
 0x384   : > { %v1185_v7 = vadd.f32 %v6681_v61, %v1008_v4  ;;  %v1144_v50 = vpop.f32.mrb[9].mxu1  ;;  %v1429_v61 = vld [vmem:[#allocation2 + $0xe8] sm:$0xff] }
 0x385   : > { %v1183_v10 = vadd.f32 %v1144_v50, %v1006_v5  ;;  %v6682_v12 = vpop.f32.mrb[10].mxu1 }
 0x386   : > { %1202 = vst.msk [vmem:[#allocation2 + $0x50] sm:$0xff] %vm1191_vm7, %v1185_v7  ;;  %v1186_v2 = vadd.f32 %v6682_v12, %v1009_v6  ;;  %v1147_v51 = vpop.f32.mrb[11].mxu1  ;;  %v1836_v12 = vld [vmem:[#allocation2 + $0x110] sm:$0xff] }
 0x387   : > { %1200 = vst.msk [vmem:[#allocation2 + $0x40] sm:$0xff] %vm1191_vm7, %v1183_v10  ;;  %v1184_v52 = vadd.f32 %v1147_v51, %v1007_v8 }
 0x388   : > { %1203 = vst.msk [vmem:[#allocation2 + $0x58] sm:$0xff] %vm1191_vm7, %v1186_v2  ;;  %v1834_v2 = vld [vmem:[#allocation2 + $0x100] sm:$0xff] }
 0x389   : > { %1201 = vst.msk [vmem:[#allocation2 + $0x48] sm:$0xff] %vm1191_vm7, %v1184_v52  ;;  %v1837_v52 = vld [vmem:[#allocation2 + $0x118] sm:$0xff] }
 0x38b   : > { %v6685_v17 = vpop.f32.mrb[12].mxu1 }
 0x38c   : > { %v1189_v53 = vadd.f32 %v6685_v17, %v1012_v13  ;;  %v1160_v54 = vpop.f32.mrb[13].mxu1  ;;  %v1835_v17 = vld [vmem:[#allocation2 + $0x108] sm:$0xff] }
 0x38d   : > { %v1187_v20 = vadd.f32 %v1160_v54, %v1010_v15  ;;  %v6686_v21 = vpop.f32.mrb[14].mxu1 }
 0x38e   : > { %1206 = vst.msk [vmem:[#allocation2 + $0x70] sm:$0xff] %vm1191_vm7, %v1189_v53  ;;  %v1190_v22 = vadd.f32 %v6686_v21, %v1013_v18  ;;  %v1163_v55 = vpop.f32.mrb[15].mxu1  ;;  %v1840_v21 = vld [vmem:[#allocation2 + $0x130] sm:$0xff] }
 0x38f   : > { %1204 = vst.msk [vmem:[#allocation2 + $0x60] sm:$0xff] %vm1191_vm7, %v1187_v20  ;;  %v1188_v23 = vadd.f32 %v1163_v55, %v1011_v19 }
 0x390   : > { %1207 = vst.msk [vmem:[#allocation2 + $0x78] sm:$0xff] %vm1191_vm7, %v1190_v22  ;;  %v1838_v22 = vld [vmem:[#allocation2 + $0x120] sm:$0xff] }
 0x391   : > { %1205 = vst.msk [vmem:[#allocation2 + $0x68] sm:$0xff] %vm1191_vm7, %v1188_v23  ;;  %v1841_v23 = vld [vmem:[#allocation2 + $0x138] sm:$0xff] }
 0x393   : > { %v6723_v56 = vpop.f32.mrb[16].mxu1 }
 0x394   : > { %v1596_v27 = vadd.f32 %v6723_v56, %v1418_v24  ;;  %v1531_v57 = vpop.f32.mrb[17].mxu1  ;;  %v1839_v56 = vld [vmem:[#allocation2 + $0x128] sm:$0xff] }
 0x395   : > { %v1594_v14 = vadd.f32 %v1531_v57, %v1416_v25  ;;  %v6724_v29 = vpop.f32.mrb[18].mxu1 }
 0x396   : > { %1612 = vst.msk [vmem:[#allocation2 + $0x90] sm:$0xff] %vm1191_vm7, %v1596_v27  ;;  %v1597_v30 = vadd.f32 %v6724_v29, %v1419_v26  ;;  %v1534_v16 = vpop.f32.mrb[19].mxu1  ;;  %v1844_v29 = vld [vmem:[#allocation2 + $0x150] sm:$0xff] }
 0x397   : > { %1610 = vst.msk [vmem:[#allocation2 + $0x80] sm:$0xff] %vm1191_vm7, %v1594_v14  ;;  %v1595_v31 = vadd.f32 %v1534_v16, %v1417_v28 }
 0x398   : > { %1613 = vst.msk [vmem:[#allocation2 + $0x98] sm:$0xff] %vm1191_vm7, %v1597_v30  ;;  %v1842_v30 = vld [vmem:[#allocation2 + $0x140] sm:$0xff] }
 0x399   : > { %1611 = vst.msk [vmem:[#allocation2 + $0x88] sm:$0xff] %vm1191_vm7, %v1595_v31  ;;  %v1845_v31 = vld [vmem:[#allocation2 + $0x158] sm:$0xff] }
 0x39b   : > { %v6727_v35 = vpop.f32.mrb[20].mxu1 }
 0x39c   : > { %v1600_v34 = vadd.f32 %v6727_v35, %v1422_v33  ;;  %v1547_v37 = vpop.f32.mrb[21].mxu1  ;;  %v1843_v35 = vld [vmem:[#allocation2 + $0x148] sm:$0xff] }
 0x39d   : > { %v1598_v58 = vadd.f32 %v1547_v37, %v1420_v32  ;;  %v6728_v39 = vpop.f32.mrb[22].mxu1 }
 0x39e   : > { %1616 = vst.msk [vmem:[#allocation2 + $0xb0] sm:$0xff] %vm1191_vm7, %v1600_v34  ;;  %v1601_v62 = vadd.f32 %v6728_v39, %v1423_v36  ;;  %v1550_v40 = vpop.f32.mrb[23].mxu1  ;;  %v1848_v39 = vld [vmem:[#allocation2 + $0x170] sm:$0xff] }
 0x39f   : > { %1614 = vst.msk [vmem:[#allocation2 + $0xa0] sm:$0xff] %vm1191_vm7, %v1598_v58  ;;  %v1599_v41 = vadd.f32 %v1550_v40, %v1421_v38 }
 0x3a0   : > { %1617 = vst.msk [vmem:[#allocation2 + $0xb8] sm:$0xff] %vm1191_vm7, %v1601_v62  ;;  %v1846_v62 = vld [vmem:[#allocation2 + $0x160] sm:$0xff] }
 0x3a1   : > { %1615 = vst.msk [vmem:[#allocation2 + $0xa8] sm:$0xff] %vm1191_vm7, %v1599_v41  ;;  %v1849_v41 = vld [vmem:[#allocation2 + $0x178] sm:$0xff] }
 0x3a3   : > { %v6731_v44 = vpop.f32.mrb[24].mxu1 }
 0x3a4   : > { %v1604_v11 = vadd.f32 %v6731_v44, %v1426_v42  ;;  %v1563_v45 = vpop.f32.mrb[25].mxu1  ;;  %v1847_v44 = vld [vmem:[#allocation2 + $0x168] sm:$0xff] }
 0x3a5   : > { %v1602_v47 = vadd.f32 %v1563_v45, %v1424_v43  ;;  %v6732_v48 = vpop.f32.mrb[26].mxu1 }
 0x3a6   : > { %1620 = vst.msk [vmem:[#allocation2 + $0xd0] sm:$0xff] %vm1191_vm7, %v1604_v11  ;;  %v1605_v49 = vadd.f32 %v6732_v48, %v1427_v9  ;;  %v1566_v60 = vpop.f32.mrb[27].mxu1  ;;  %v2254_v48 = vld [vmem:[#allocation2 + $0x190] sm:$0xff] }
 0x3a7   : > { %1618 = vst.msk [vmem:[#allocation2 + $0xc0] sm:$0xff] %vm1191_vm7, %v1602_v47  ;;  %v1603_v63 = vadd.f32 %v1566_v60, %v1425_v46 }
 0x3a8   : > { %1621 = vst.msk [vmem:[#allocation2 + $0xd8] sm:$0xff] %vm1191_vm7, %v1605_v49  ;;  %v2252_v49 = vld [vmem:[#allocation2 + $0x180] sm:$0xff] }
 0x3a9   : > { %1619 = vst.msk [vmem:[#allocation2 + $0xc8] sm:$0xff] %vm1191_vm7, %v1603_v63  ;;  %v2255_v63 = vld [vmem:[#allocation2 + $0x198] sm:$0xff] }
 0x3ab   : > { %v6735_v1 = vpop.f32.mrb[28].mxu1 }
 0x3ac   : > { %v1608_v4 = vadd.f32 %v6735_v1, %v1430_v0  ;;  %v1579_v5 = vpop.f32.mrb[29].mxu1  ;;  %v2253_v1 = vld [vmem:[#allocation2 + $0x188] sm:$0xff] }
 0x3ad   : > { %v1606_v6 = vadd.f32 %v1579_v5, %v1428_v59  ;;  %v6736_v7 = vpop.f32.mrb[30].mxu1 }
 0x3ae   : > { %1624 = vst.msk [vmem:[#allocation2 + $0xf0] sm:$0xff] %vm1191_vm7, %v1608_v4  ;;  %v1609_v50 = vadd.f32 %v6736_v7, %v1431_v3  ;;  %v1582_v8 = vpop.f32.mrb[31].mxu1  ;;  %v2258_v7 = vld [vmem:[#allocation2 + $0x1b0] sm:$0xff] }
 0x3af   : > { %1622 = vst.msk [vmem:[#allocation2 + $0xe0] sm:$0xff] %vm1191_vm7, %v1606_v6  ;;  %v1607_v10 = vadd.f32 %v1582_v8, %v1429_v61 }
 0x3b0   : > { %1625 = vst.msk [vmem:[#allocation2 + $0xf8] sm:$0xff] %vm1191_vm7, %v1609_v50  ;;  %v2256_v50 = vld [vmem:[#allocation2 + $0x1a0] sm:$0xff] }
 0x3b1   : > { %1623 = vst.msk [vmem:[#allocation2 + $0xe8] sm:$0xff] %vm1191_vm7, %v1607_v10  ;;  %v2259_v10 = vld [vmem:[#allocation2 + $0x1b8] sm:$0xff] }
 0x3b3   : > { %v6773_v51 = vpop.f32.mrb[32].mxu1 }
 0x3b4   : > { %v2014_v13 = vadd.f32 %v6773_v51, %v1836_v12  ;;  %v1949_v15 = vpop.f32.mrb[33].mxu1  ;;  %v2257_v51 = vld [vmem:[#allocation2 + $0x1a8] sm:$0xff] }
 0x3b5   : > { %v2012_v18 = vadd.f32 %v1949_v15, %v1834_v2  ;;  %v6774_v53 = vpop.f32.mrb[34].mxu1 }
 0x3b6   : > { %2030 = vst.msk [vmem:[#allocation2 + $0x110] sm:$0xff] %vm1191_vm7, %v2014_v13  ;;  %v2015_v54 = vadd.f32 %v6774_v53, %v1837_v52  ;;  %v1952_v19 = vpop.f32.mrb[35].mxu1  ;;  %v2262_v53 = vld [vmem:[#allocation2 + $0x1d0] sm:$0xff] }
 0x3b7   : > { %2028 = vst.msk [vmem:[#allocation2 + $0x100] sm:$0xff] %vm1191_vm7, %v2012_v18  ;;  %v2013_v20 = vadd.f32 %v1952_v19, %v1835_v17 }
 0x3b8   : > { %2031 = vst.msk [vmem:[#allocation2 + $0x118] sm:$0xff] %vm1191_vm7, %v2015_v54  ;;  %v2260_v54 = vld [vmem:[#allocation2 + $0x1c0] sm:$0xff] }
 0x3b9   : > { %2029 = vst.msk [vmem:[#allocation2 + $0x108] sm:$0xff] %vm1191_vm7, %v2013_v20  ;;  %v2263_v20 = vld [vmem:[#allocation2 + $0x1d8] sm:$0xff] }
 0x3bb   : > { %v6777_v55 = vpop.f32.mrb[36].mxu1 }
 0x3bc   : > { %v2018_v24 = vadd.f32 %v6777_v55, %v1840_v21  ;;  %v1965_v25 = vpop.f32.mrb[37].mxu1  ;;  %v2261_v55 = vld [vmem:[#allocation2 + $0x1c8] sm:$0xff] }
 0x3bd   : > { %v2016_v26 = vadd.f32 %v1965_v25, %v1838_v22  ;;  %v6778_v27 = vpop.f32.mrb[38].mxu1 }
 0x3be   : > { %2034 = vst.msk [vmem:[#allocation2 + $0x130] sm:$0xff] %vm1191_vm7, %v2018_v24  ;;  %v2019_v57 = vadd.f32 %v6778_v27, %v1841_v23  ;;  %v1968_v28 = vpop.f32.mrb[39].mxu1  ;;  %v2266_v27 = vld [vmem:[#allocation2 + $0x1f0] sm:$0xff] }
 0x3bf   : > { %2032 = vst.msk [vmem:[#allocation2 + $0x120] sm:$0xff] %vm1191_vm7, %v2016_v26  ;;  %v2017_v14 = vadd.f32 %v1968_v28, %v1839_v56 }
 0x3c0   : > { %2035 = vst.msk [vmem:[#allocation2 + $0x138] sm:$0xff] %vm1191_vm7, %v2019_v57  ;;  %v2264_v57 = vld [vmem:[#allocation2 + $0x1e0] sm:$0xff] }
 0x3c1   : > { %2033 = vst.msk [vmem:[#allocation2 + $0x128] sm:$0xff] %vm1191_vm7, %v2017_v14  ;;  %v2267_v14 = vld [vmem:[#allocation2 + $0x1f8] sm:$0xff] }
 0x3c3   : > { %v6781_v16 = vpop.f32.mrb[40].mxu1 }
 0x3c4   : > { %v2022_v33 = vadd.f32 %v6781_v16, %v1844_v29  ;;  %v1981_v32 = vpop.f32.mrb[41].mxu1  ;;  %v2265_v16 = vld [vmem:[#allocation2 + $0x1e8] sm:$0xff] }
 0x3c5   : > { %v2020_v36 = vadd.f32 %v1981_v32, %v1842_v30  ;;  %v6782_v34 = vpop.f32.mrb[42].mxu1 }
 0x3c6   : > { %2038 = vst.msk [vmem:[#allocation2 + $0x150] sm:$0xff] %vm1191_vm7, %v2022_v33  ;;  %v2023_v37 = vadd.f32 %v6782_v34, %v1845_v31  ;;  %v1984_v38 = vpop.f32.mrb[43].mxu1  ;;  %v9446_v34 = vld [vmem:[#allocation18] ss:$0 sm:$0xff] (!%p6286_p4) }
 0x3c7   : > { %2036 = vst.msk [vmem:[#allocation2 + $0x140] sm:$0xff] %vm1191_vm7, %v2020_v36  ;;  %v2021_v58 = vadd.f32 %v1984_v38, %v1843_v35  ;;  %11590 = vst [vmem:[#allocation68_spill] sm:$0xff] (!%p6286_p4), %v9446_v34  ;;  %v9450_v38 = vld [vmem:[#allocation18 + $0x2] ss:$0 sm:$0xff] (!%p6286_p4) }
 0x3c8   : > { %2039 = vst.msk [vmem:[#allocation2 + $0x158] sm:$0xff] %vm1191_vm7, %v2023_v37  ;;  %v9448_v37 = vld [vmem:[#allocation18 + $0x1] ss:$0 sm:$0xff] (!%p6286_p4)  ;;  %11592 = vst [vmem:[#allocation70_spill] sm:$0xff] (!%p6286_p4), %v9450_v38 }
 0x3c9   : > { %2037 = vst.msk [vmem:[#allocation2 + $0x148] sm:$0xff] %vm1191_vm7, %v2021_v58  ;;  %11591 = vst [vmem:[#allocation69_spill] sm:$0xff] (!%p6286_p4), %v9448_v37  ;;  %v9452_v58 = vld [vmem:[#allocation18 + $0x3] ss:$0 sm:$0xff] (!%p6286_p4) }
 0x3cb   : > { %v6785_v40 = vpop.f32.mrb[44].mxu1 }
 0x3cc   : > { %v2026_v42 = vadd.f32 %v6785_v40, %v1848_v39  ;;  %v1997_v43 = vpop.f32.mrb[45].mxu1  ;;  %v9454_v39 = vld [vmem:[#allocation18 + $0x4] ss:$0 sm:$0xff] (!%p6286_p4) }
 0x3cd   : > { %v2024_v9 = vadd.f32 %v1997_v43, %v1846_v62  ;;  %v6786_v11 = vpop.f32.mrb[46].mxu1  ;;  %v9456_v62 = vld [vmem:[#allocation18 + $0x5] ss:$0 sm:$0xff] (!%p6286_p4) }
 0x3ce   : > { %2042 = vst.msk [vmem:[#allocation2 + $0x170] sm:$0xff] %vm1191_vm7, %v2026_v42  ;;  %v2027_v45 = vadd.f32 %v6786_v11, %v1849_v41  ;;  %v2000_v46 = vpop.f32.mrb[47].mxu1 }
 0x3cf   : > { %2040 = vst.msk [vmem:[#allocation2 + $0x160] sm:$0xff] %vm1191_vm7, %v2024_v9  ;;  %v2025_v47 = vadd.f32 %v2000_v46, %v1847_v44 }
 0x3d0   : > { %2043 = vst.msk [vmem:[#allocation2 + $0x178] sm:$0xff] %vm1191_vm7, %v2027_v45 }
 0x3d1   : > { %2041 = vst.msk [vmem:[#allocation2 + $0x168] sm:$0xff] %vm1191_vm7, %v2025_v47 }
 0x3d3   : > { %v6823_v60 = vpop.f32.mrb[64].mxu0 }
 0x3d4   : > { %v2432_v0 = vadd.f32 %v6823_v60, %v2254_v48  ;;  %v2367_v59 = vpop.f32.mrb[65].mxu0 }
 0x3d5   : > { %v2430_v3 = vadd.f32 %v2367_v59, %v2252_v49  ;;  %v6824_v4 = vpop.f32.mrb[66].mxu0 }
 0x3d6   : > { %2448 = vst.msk [vmem:[#allocation2 + $0x190] sm:$0xff] %vm1191_vm7, %v2432_v0  ;;  %v2433_v5 = vadd.f32 %v6824_v4, %v2255_v63  ;;  %v2370_v61 = vpop.f32.mrb[67].mxu0 }
 0x3d7   : > { %2446 = vst.msk [vmem:[#allocation2 + $0x180] sm:$0xff] %vm1191_vm7, %v2430_v3  ;;  %v2431_v6 = vadd.f32 %v2370_v61, %v2253_v1 }
 0x3d8   : > { %2449 = vst.msk [vmem:[#allocation2 + $0x198] sm:$0xff] %vm1191_vm7, %v2433_v5 }
 0x3d9   : > { %2447 = vst.msk [vmem:[#allocation2 + $0x188] sm:$0xff] %vm1191_vm7, %v2431_v6 }
 0x3db   : > { %v6827_v8 = vpop.f32.mrb[48].mxu1 }
 0x3dc   : > { %v2436_v12 = vadd.f32 %v6827_v8, %v2258_v7  ;;  %v2383_v2 = vpop.f32.mrb[49].mxu1 }
 0x3dd   : > { %v2434_v52 = vadd.f32 %v2383_v2, %v2256_v50  ;;  %v6828_v13 = vpop.f32.mrb[50].mxu1 }
 0x3de   : > { %2452 = vst.msk [vmem:[#allocation2 + $0x1b0] sm:$0xff] %vm1191_vm7, %v2436_v12  ;;  %v2437_v15 = vadd.f32 %v6828_v13, %v2259_v10  ;;  %v2386_v17 = vpop.f32.mrb[51].mxu1 }
 0x3df   : > { %2450 = vst.msk [vmem:[#allocation2 + $0x1a0] sm:$0xff] %vm1191_vm7, %v2434_v52  ;;  %v2435_v18 = vadd.f32 %v2386_v17, %v2257_v51 }
 0x3e0   : > { %2453 = vst.msk [vmem:[#allocation2 + $0x1b8] sm:$0xff] %vm1191_vm7, %v2437_v15 }
 0x3e1   : > { %2451 = vst.msk [vmem:[#allocation2 + $0x1a8] sm:$0xff] %vm1191_vm7, %v2435_v18 }
 0x3e3   : > { %v6831_v19 = vpop.f32.mrb[52].mxu1 }
 0x3e4   : > { %v2440_v21 = vadd.f32 %v6831_v19, %v2262_v53  ;;  %v2399_v22 = vpop.f32.mrb[53].mxu1 }
 0x3e5   : > { %v2438_v23 = vadd.f32 %v2399_v22, %v2260_v54  ;;  %v6832_v24 = vpop.f32.mrb[54].mxu1 }
 0x3e6   : > { %2456 = vst.msk [vmem:[#allocation2 + $0x1d0] sm:$0xff] %vm1191_vm7, %v2440_v21  ;;  %v2441_v25 = vadd.f32 %v6832_v24, %v2263_v20  ;;  %v2402_v56 = vpop.f32.mrb[55].mxu1 }
 0x3e7   : > { %2454 = vst.msk [vmem:[#allocation2 + $0x1c0] sm:$0xff] %vm1191_vm7, %v2438_v23  ;;  %v2439_v26 = vadd.f32 %v2402_v56, %v2261_v55 }
 0x3e8   : > { %2457 = vst.msk [vmem:[#allocation2 + $0x1d8] sm:$0xff] %vm1191_vm7, %v2441_v25 }
 0x3e9   : > { %2455 = vst.msk [vmem:[#allocation2 + $0x1c8] sm:$0xff] %vm1191_vm7, %v2439_v26 }
 0x3eb   : > { %v6835_v28 = vpop.f32.mrb[56].mxu1  ;;  %2465 = sbr.rel (%p6286_p4) target bundleno = 4155 (0x103b), region = 100 }
 0x3ec   : > { %v2444_v29 = vadd.f32 %v6835_v28, %v2266_v27  ;;  %v2415_v30 = vpop.f32.mrb[57].mxu1 }
 0x3ed   : > { %v2442_v31 = vadd.f32 %v2415_v30, %v2264_v57  ;;  %v6836_v33 = vpop.f32.mrb[58].mxu1 }
 0x3ee   : > { %2460 = vst.msk [vmem:[#allocation2 + $0x1f0] sm:$0xff] %vm1191_vm7, %v2444_v29  ;;  %v2445_v32 = vadd.f32 %v6836_v33, %v2267_v14  ;;  %v2418_v35 = vpop.f32.mrb[59].mxu1 }
 0x3ef   : > { %2458 = vst.msk [vmem:[#allocation2 + $0x1e0] sm:$0xff] %vm1191_vm7, %v2442_v31  ;;  %v2443_v36 = vadd.f32 %v2418_v35, %v2265_v16 }
 0x3f0   : > { %2461 = vst.msk [vmem:[#allocation2 + $0x1f8] sm:$0xff] %vm1191_vm7, %v2445_v32 }
 0x3f1   : > { %2459 = vst.msk [vmem:[#allocation2 + $0x1e8] sm:$0xff] %vm1191_vm7, %v2443_v36 }
 0x3f2 LB: >> { %v11593_v38 = vld [vmem:[#allocation70_spill] sm:$0xff]  ;;  %v11594_v37 = vld [vmem:[#allocation69_spill] sm:$0xff]  ;;  %v11595_v34 = vld [vmem:[#allocation68_spill] sm:$0xff]  ;;  %s9464_s11 = sshll.u32 %s8299_s1, 6  ;;  %s8333_s8 = smov 16   ;;  %vm2616_vm8 = vcmask 130048   ;;  %s8299_s1 = sphi %s9458_s1, %s2477_s1  }
 0x3f3   : >> { %v7647_v40 = vld [vmem:[#allocation14] sm:$0xff]   ;;  %v7648_v41 = vld [vmem:[#allocation14 + $0x8] sm:$0xff]   ;;  %s9467_s28 = scalar_lea.vmem [#allocation2], %s9464_s11  ;;  %s8334_s5 = smov 8   ;;  %vm2625_vm13 = vcmask 195584  }
 0x3f4   : >> { %6837 = vmatprep.subr.bf16.mxu1 %v7647_v40  ;;  %s8335_s10 = smov 24   ;;  %s8336_s29 = smov 120  }
 0x3f5   : >> { %6838 = vmatpush3.bf16.msra.mxu1 %v7647_v40  ;;  %s9705_s6 = scalar_lea.vmem %s557_s0, %s9464_s11 [#allocation6]  ;;  %s8337_s12 = smov 112  }
 0x3f6   : >> { %6839 = vmatprep.subr.bf16.mxu1 %v7648_v41  ;;  %s8338_s26 = smov 104   ;;  %s11126_s18 = scalar_lea.vmem %s653_s19, %s9464_s11 [#allocation21] }
 0x3f7   : >> { %s2477_s1 = sadd.s32 1, %s8299_s1  }
 0x3f8   : >> { %v2496_v42 = vld [vmem:[%s9467_s28 + $0x100] sm:$0xff]  ;;  %v2497_v43 = vld [vmem:[%s9467_s28 + $0x108] sm:$0xff]  ;;  %v2498_v45 = vld [vmem:[%s9467_s28 + $0x110] sm:$0xff]  ;;  %p2474_p11 = scmp.ge.s32.totalorder %s2477_s1, 2  }
 0x3f9   : >> { %v9472_v44 = vld [vmem:[%s9467_s28 + $0x80] sm:$0xff]  ;;  %v9474_v9 = vpack.i.bf16 %v2497_v43, %v2496_v42  ;;  %v9477_v11 = vld [vmem:[%s9467_s28 + $0x88] sm:$0xff]  ;;  %v2499_v46 = vld [vmem:[%s9467_s28 + $0x118] sm:$0xff]  ;;  %6840 = vmatpush3.bf16.msra.mxu1 %v7648_v41 }
 0x3fa   : >> { %v7407_v47 = vpack.i.bf16 %v9477_v11, %v9472_v44  ;;  %v9484_v48 = vld [vmem:[%s9467_s28 + $0x90] sm:$0xff]  ;;  %v9487_v49 = vld [vmem:[%s9467_s28 + $0x98] sm:$0xff]  ;;  %v9491_v60 = vpack.i.bf16 %v2499_v46, %v2498_v45  ;;  %v2504_v1 = vld [vmem:[%s9467_s28 + $0x180] sm:$0xff] }
 0x3fb   : >> { %7418 = vrot.lane.b32.xlu1 %v9474_v9, %s8333_s8  ;;  %v7412_v63 = vpack.i.bf16 %v9487_v49, %v9484_v48  ;;  %v2506_v0 = vld [vmem:[%s9467_s28 + $0x190] sm:$0xff]  ;;  %v2507_v59 = vld [vmem:[%s9467_s28 + $0x198] sm:$0xff]  ;;  %v2505_v3 = vld [vmem:[%s9467_s28 + $0x188] sm:$0xff] }
 0x3fc   : >> { %7408 = vrot.lane.b32.xlu0 %v7407_v47, %s8334_s5  ;;  %v9502_v4 = vpack.i.bf16 %v2507_v59, %v2506_v0  ;;  %v9505_v5 = vpack.i.bf16 %v2505_v3, %v2504_v1  ;;  %v9508_v61 = vld [vmem:[%s9467_s28 + $0xb0] sm:$0xff]  ;;  %v9511_v6 = vld [vmem:[%s9467_s28 + $0xb8] sm:$0xff]  ;;  %v9514_v7 = vld [vmem:[%s9467_s28 + $0xa0] sm:$0xff] }
 0x3fd   : >> { %v9517_v50 = vld [vmem:[%s9467_s28 + $0xa8] sm:$0xff]  ;;  %v2502_v8 = vld [vmem:[%s9467_s28 + $0x130] sm:$0xff]  ;;  %v2503_v10 = vld [vmem:[%s9467_s28 + $0x138] sm:$0xff]  ;;  %v7442_v12 = vpack.i.bf16 %v9511_v6, %v9508_v61 }
 0x3fe   : >> { %v2500_v2 = vld [vmem:[%s9467_s28 + $0x120] sm:$0xff]  ;;  %v2501_v51 = vld [vmem:[%s9467_s28 + $0x128] sm:$0xff]  ;;  %v7437_v52 = vpack.i.bf16 %v9517_v50, %v9514_v7  ;;  %v2510_v13 = vld [vmem:[%s9467_s28 + $0x1b0] sm:$0xff]  ;;  %v9532_v17 = vpack.i.bf16 %v2503_v10, %v2502_v8 }
 0x3ff   : >> { %7423 = vrot.lane.b32.xlu1 %v9491_v60, %s8333_s8  ;;  %v2511_v15 = vld [vmem:[%s9467_s28 + $0x1b8] sm:$0xff]  ;;  %v2508_v18 = vld [vmem:[%s9467_s28 + $0x1a0] sm:$0xff]  ;;  %v2509_v53 = vld [vmem:[%s9467_s28 + $0x1a8] sm:$0xff]  ;;  %v9537_v54 = vpack.i.bf16 %v2501_v51, %v2500_v2 }
 0x400   : >> { %7413 = vrot.lane.b32.xlu0 %v7412_v63, %s8334_s5  ;;  %v9541_v19 = vpack.i.bf16 %v2511_v15, %v2510_v13  ;;  %v9545_v20 = vpack.i.bf16 %v2509_v53, %v2508_v18  ;;  %v9550_v25 = vld [vmem:[%s9467_s28 + $0x10] sm:$0xff]  ;;  %v9553_v26 = vld [vmem:[%s9467_s28 + $0x18] sm:$0xff]  ;;  %v9556_v27 = vld [vmem:[%s9467_s28] sm:$0xff] }
 0x401   : >> { %v9559_v57 = vld [vmem:[%s9467_s28 + $0x8] sm:$0xff]  ;;  %v9580_v53 = vld [vmem:[%s9467_s28 + $0x30] sm:$0xff] }
 0x403   : >> { %7433 = vrot.lane.b32.xlu1 %v9502_v4, %s8335_s10 }
 0x404   : >> { %7428 = vrot.lane.b32.xlu0 %v9505_v5, %s8335_s10 }
 0x407   : >> { %7443 = vrot.lane.b32.xlu1 %v7442_v12, %s8334_s5 }
 0x408   : >> { %7438 = vrot.lane.b32.xlu0 %v7437_v52, %s8334_s5 }
 0x40b   : >> { %7453 = vrot.lane.b32.xlu1 %v9532_v17, %s8333_s8 }
 0x40c   : >> { %7448 = vrot.lane.b32.xlu0 %v9537_v54, %s8333_s8 }
 0x40f   : >> { %7463 = vrot.lane.b32.xlu1 %v9541_v19, %s8335_s10 }
 0x410   : >> { %7458 = vrot.lane.b32.xlu0 %v9545_v20, %s8335_s10 }
 0x46d   : >> { %v7419_v21 = vpop.permute.xlu1 %7418 }
 0x46e   : >> { %v7409_v22 = vpop.permute.xlu0 %7408  ;;  %v7421_v16 = vunpack.i.h.bf16 %v7419_v21  ;;  %v7420_v31 = vunpack.i.l.bf16 %v7419_v21  ;;  %v9583_v21 = vld [vmem:[%s9467_s28 + $0x38] sm:$0xff] }
 0x46f   : >> { %v7411_v55 = vunpack.i.h.bf16 %v7409_v22  ;;  %v7410_v23 = vunpack.i.l.bf16 %v7409_v22 }
 0x471   : >> { %v7424_v24 = vpop.permute.xlu1 %7423  ;;  %v2608_v36 = vsel %vm848_vm2, %v9556_v27, %v7410_v23  ;;  %v2609_v40 = vsel %vm848_vm2, %v9559_v57, %v7411_v55 }
 0x472   : >> { %v7414_v56 = vpop.permute.xlu0 %7413  ;;  %v7426_v28 = vunpack.i.h.bf16 %v7424_v24  ;;  %v7425_v14 = vunpack.i.l.bf16 %v7424_v24  ;;  %v2617_v0 = vsel %vm2616_vm8, %v2608_v36, %v7420_v31  ;;  %v2618_v59 = vsel %vm2616_vm8, %v2609_v40, %v7421_v16  ;;  %v9586_v24 = vld [vmem:[%s9467_s28 + $0x20] sm:$0xff] }
 0x473   : >> { %v7416_v29 = vunpack.i.h.bf16 %v7414_v56  ;;  %v7415_v30 = vunpack.i.l.bf16 %v7414_v56  ;;  %v9589_v56 = vld [vmem:[%s9467_s28 + $0x28] sm:$0xff] }
 0x475   : >> { %v2610_v33 = vsel %vm848_vm2, %v9550_v25, %v7415_v30  ;;  %v2611_v32 = vsel %vm848_vm2, %v9553_v26, %v7416_v29  ;;  %v7434_v35 = vpop.permute.xlu1 %7433 }
 0x476   : >> { %v7436_v41 = vunpack.i.h.bf16 %v7434_v35  ;;  %v7435_v42 = vunpack.i.l.bf16 %v7434_v35  ;;  %v7429_v43 = vpop.permute.xlu0 %7428  ;;  %v2619_v47 = vsel %vm2616_vm8, %v2610_v33, %v7425_v14  ;;  %v2620_v63 = vsel %vm2616_vm8, %v2611_v32, %v7426_v28 }
 0x477   : >> { %v7431_v45 = vunpack.i.h.bf16 %v7429_v43  ;;  %v7430_v46 = vunpack.i.l.bf16 %v7429_v43 }
 0x478   : >> { %v2628_v1 = vsel %vm2625_vm13, %v2619_v47, %v7435_v42  ;;  %v2629_v3 = vsel %vm2625_vm13, %v2620_v63, %v7436_v41 }
 0x479   : >> { %v7444_v8 = vpop.permute.xlu1 %7443  ;;  %v2626_v10 = vsel %vm2625_vm13, %v2617_v0, %v7430_v46  ;;  %v2627_v12 = vsel %vm2625_vm13, %v2618_v59, %v7431_v45  ;;  %v2644_v2 = vpack.c.bf16 %v2629_v3, %v2628_v1 }
 0x47a   : >> { %v7439_v51 = vpop.permute.xlu0 %7438  ;;  %v2643_v52 = vpack.c.bf16 %v2627_v12, %v2626_v10  ;;  %v7446_v13 = vunpack.i.h.bf16 %v7444_v8  ;;  %v7445_v15 = vunpack.i.l.bf16 %v7444_v8 }
 0x47b   : >> { %v7441_v22 = vunpack.i.h.bf16 %v7439_v51  ;;  %v7440_v55 = vunpack.i.l.bf16 %v7439_v51 }
 0x47c   : >> { %6841 = vmatprep.mubr.msk.bf16.mxu1 %vm1191_vm7, %v2643_v52  ;;  %v2614_v16 = vsel %vm848_vm2, %v9580_v53, %v7445_v15  ;;  %v2615_v31 = vsel %vm848_vm2, %v9583_v21, %v7446_v13 }
 0x47d   : >> { %6842 = vmatmul.mubr.msk.bf16.vlgmr.msra.gmra.mrb[0].mxu1 %vm1191_vm7, %v2644_v2  ;;  %v7454_v18 = vpop.permute.xlu1 %7453  ;;  %v2612_v32 = vsel %vm848_vm2, %v9586_v24, %v7440_v55  ;;  %v2613_v35 = vsel %vm848_vm2, %v9589_v56, %v7441_v22 }
 0x47e   : >> { %v7449_v23 = vpop.permute.xlu0 %7448  ;;  %v7456_v28 = vunpack.i.h.bf16 %v7454_v18  ;;  %v7455_v14 = vunpack.i.l.bf16 %v7454_v18 }
 0x47f   : >> { %v7451_v29 = vunpack.i.h.bf16 %v7449_v23  ;;  %v7450_v30 = vunpack.i.l.bf16 %v7449_v23 }
 0x480   : >> { %v2623_v45 = vsel %vm2616_vm8, %v2614_v16, %v7455_v14  ;;  %v2624_v46 = vsel %vm2616_vm8, %v2615_v31, %v7456_v28 }
 0x481   : >> { %v7464_v33 = vpop.permute.xlu1 %7463  ;;  %v2621_v47 = vsel %vm2616_vm8, %v2612_v32, %v7450_v30  ;;  %v2622_v63 = vsel %vm2616_vm8, %v2613_v35, %v7451_v29 }
 0x482   : >> { %v7466_v36 = vunpack.i.h.bf16 %v7464_v33  ;;  %v7465_v40 = vunpack.i.l.bf16 %v7464_v33  ;;  %v7459_v41 = vpop.permute.xlu0 %7458 }
 0x483   : >> { %v7461_v42 = vunpack.i.h.bf16 %v7459_v41  ;;  %v7460_v43 = vunpack.i.l.bf16 %v7459_v41 }
 0x484   : >> { %v2632_v0 = vsel %vm2625_vm13, %v2623_v45, %v7465_v40  ;;  %v2633_v59 = vsel %vm2625_vm13, %v2624_v46, %v7466_v36 }
 0x485   : >> { %v2630_v1 = vsel %vm2625_vm13, %v2621_v47, %v7460_v43  ;;  %v2631_v3 = vsel %vm2625_vm13, %v2622_v63, %v7461_v42  ;;  %v2646_v8 = vpack.c.bf16 %v2633_v59, %v2632_v0 }
 0x486   : >> { %v2645_v10 = vpack.c.bf16 %v2631_v3, %v2630_v1 }
 0x488   : >> { %6845 = vmatprep.mubr.msk.bf16.mxu1 %vm1191_vm7, %v2645_v10 }
 0x489   : >> { %6846 = vmatmul.mubr.msk.bf16.gmra.mrb[4].mxu1 %vm1191_vm7, %v2646_v8 }
 0x550   : >> { %v6843_v12 = vpop.f32.mrb[0].mxu1 }
 0x551   : >> { %v2713_v2 = vpop.f32.mrb[1].mxu1  ;;  %v2722_v15 = vadd.f32 %v6843_v12, %v11595_v34 }
 0x552   : >> { %v2714_v51 = vadd.f32 %v11595_v34, %v2713_v2  ;;  %v6844_v52 = vpop.f32.mrb[2].mxu1 }
 0x553   : >> { %v2716_v13 = vpop.f32.mrb[3].mxu1  ;;  %v2725_v23 = vadd.f32 %v6844_v52, %v11595_v34  ;;  %v2750_v28 = vsel %vm1191_vm7, %v2722_v15, 0.0 }
 0x554   : >> { %v2717_v18 = vadd.f32 %v11595_v34, %v2716_v13  ;;  %v2744_v22 = vsel %vm1191_vm7, %v2714_v51, 0.0 }
 0x555   : >> { %2745 = vadd.xlane.f32.xlu0 %v2744_v22  ;;  %v2753_v29 = vsel %vm1191_vm7, %v2725_v23, 0.0 }
 0x556   : >> { %v2747_v55 = vsel %vm1191_vm7, %v2717_v18, 0.0 }
 0x557   : >> { %2748 = vadd.xlane.f32.xlu1 %v2747_v55 }
 0x559   : >> { %2751 = vadd.xlane.f32.xlu0 %v2750_v28 }
 0x55c   : >> { %v6847_v14 = vpop.f32.mrb[4].mxu1 }
 0x55d   : >> { %v2729_v30 = vpop.f32.mrb[5].mxu1  ;;  %2754 = vadd.xlane.f32.xlu0 %v2753_v29  ;;  %v2738_v32 = vadd.f32 %v6847_v14, %v11595_v34 }
 0x55e   : >> { %v2730_v16 = vadd.f32 %v11595_v34, %v2729_v30  ;;  %v6848_v31 = vpop.f32.mrb[6].mxu1 }
 0x55f   : >> { %v2732_v33 = vpop.f32.mrb[7].mxu1  ;;  %v2741_v40 = vadd.f32 %v6848_v31, %v11595_v34  ;;  %v2762_v42 = vsel %vm1191_vm7, %v2738_v32, 0.0 }
 0x560   : >> { %v2733_v35 = vadd.f32 %v11595_v34, %v2732_v33  ;;  %v2756_v36 = vsel %vm1191_vm7, %v2730_v16, 0.0 }
 0x561   : >> { %2757 = vadd.xlane.f32.xlu1 %v2756_v36  ;;  %v2765_v43 = vsel %vm1191_vm7, %v2741_v40, 0.0 }
 0x562   : >> { %v2759_v41 = vsel %vm1191_vm7, %v2733_v35, 0.0 }
 0x563   : >> { %2760 = vadd.xlane.f32.xlu0 %v2759_v41 }
 0x565   : >> { %2763 = vadd.xlane.f32.xlu1 %v2762_v42 }
 0x567   : >> { %2766 = vadd.xlane.f32.xlu0 %v2765_v43 }
 0x5e2   : >> { %v2746_v45 = vpop.xlane.xlu0 %2745 }
 0x5e3   : >> { %v2769_v47 = vmul.f32 0.03125, %v2746_v45 }
 0x5e4   : >> { %v2749_v46 = vpop.xlane.xlu1 %2748 }
 0x5e5   : >> { %v2770_v63 = vmul.f32 0.03125, %v2749_v46  ;;  %v9631_v10 = vsub.f32 %v2714_v51, %v2769_v47 }
 0x5e6   : >> { %v2752_v0 = vpop.xlane.xlu0 %2751 }
 0x5e7   : >> { %v2771_v59 = vmul.f32 0.03125, %v2752_v0  ;;  %v9625_v1 = vsub.f32 %v2717_v18, %v2770_v63  ;;  %v2785_v18 = vmul.f32 %v9631_v10, %v9631_v10 }
 0x5e9   : >> { %v2786_v3 = vmul.f32 %v9625_v1, %v9625_v1  ;;  %v9629_v8 = vsub.f32 %v2722_v15, %v2771_v59  ;;  %v2793_v30 = vsel %vm1191_vm7, %v2785_v18, 0.0 }
 0x5ea   : >> { %v2755_v12 = vpop.xlane.xlu0 %2754 }
 0x5eb   : >> { %v2772_v2 = vmul.f32 0.03125, %v2755_v12  ;;  %v2796_v52 = vsel %vm1191_vm7, %v2786_v3, 0.0  ;;  %v2787_v13 = vmul.f32 %v9629_v8, %v9629_v8  ;;  %v7472_v12 = vpack.i.bf16 %v9553_v26, %v9550_v25  ;;  %v9680_v25 = vld [vmem:[#allocation14] sm:$0xff]  }
 0x5ec   : >> { %2797 = vadd.xlane.f32.xlu0 %v2796_v52  ;;  %v7650_v52 = vld [vmem:[#allocation15 + $0x8] sm:$0xff]  }
 0x5ed   : >> { %v2799_v22 = vsel %vm1191_vm7, %v2787_v13, 0.0  ;;  %v9639_v55 = vsub.f32 %v2725_v23, %v2772_v2  ;;  %v7649_v2 = vld [vmem:[#allocation15] sm:$0xff]  }
 0x5ee   : >> { %v2758_v28 = vpop.xlane.xlu1 %2757  ;;  %2800 = vadd.xlane.f32.xlu1 %v2799_v22  ;;  %6849 = vmatprep.subr.bf16.mxu1 %v7649_v2 }
 0x5ef   : >> { %v2788_v51 = vmul.f32 %v9639_v55, %v9639_v55  ;;  %v2773_v14 = vmul.f32 0.03125, %v2758_v28  ;;  %6850 = vmatpush3.bf16.msra.mxu1 %v7649_v2 }
 0x5f0   : >> { %v2761_v15 = vpop.xlane.xlu0 %2760  ;;  %6851 = vmatprep.subr.bf16.mxu1 %v7650_v52 }
 0x5f1   : >> { %v2774_v29 = vmul.f32 0.03125, %v2761_v15  ;;  %v2802_v31 = vsel %vm1191_vm7, %v2788_v51, 0.0  ;;  %v9651_v46 = vsub.f32 %v2730_v16, %v2773_v14 }
 0x5f2   : >> { %v2764_v33 = vpop.xlane.xlu1 %2763  ;;  %2794 = vadd.xlane.f32.xlu1 %v2793_v30  ;;  %2803 = vadd.xlane.f32.xlu0 %v2802_v31 }
 0x5f3   : >> { %v2775_v36 = vmul.f32 0.03125, %v2764_v33  ;;  %v9645_v41 = vsub.f32 %v2733_v35, %v2774_v29  ;;  %v2789_v3 = vmul.f32 %v9651_v46, %v9651_v46  ;;  %6852 = vmatpush3.bf16.msra.mxu1 %v7650_v52 }
 0x5f4   : >> { %v2767_v23 = vpop.xlane.xlu0 %2766  ;;  %6885 = vmatprep.subr.bf16.mxu1 %v9680_v25 }
 0x5f5   : >> { %v2776_v42 = vmul.f32 0.03125, %v2767_v23  ;;  %v2790_v43 = vmul.f32 %v9645_v41, %v9645_v41  ;;  %v9649_v45 = vsub.f32 %v2738_v32, %v2775_v36  ;;  %v2805_v32 = vsel %vm1191_vm7, %v2789_v3, 0.0 }
 0x5f7   : >> { %v2808_v47 = vsel %vm1191_vm7, %v2790_v43, 0.0  ;;  %v2791_v63 = vmul.f32 %v9649_v45, %v9649_v45  ;;  %v9656_v0 = vsub.f32 %v2741_v40, %v2776_v42  ;;  %v7467_v40 = vpack.i.bf16 %v9559_v57, %v9556_v27 }
 0x5f8   : >> { %2809 = vadd.xlane.f32.xlu0 %v2808_v47  ;;  %v7497_v27 = vpack.i.bf16 %v9589_v56, %v9586_v24 }
 0x5f9   : >> { %v2811_v35 = vsel %vm1191_vm7, %v2791_v63, 0.0  ;;  %v2792_v59 = vmul.f32 %v9656_v0, %v9656_v0 }
 0x5fa   : >> { %2812 = vadd.xlane.f32.xlu1 %v2811_v35 }
 0x5fb   : >> { %v2814_v16 = vsel %vm1191_vm7, %v2792_v59, 0.0 }
 0x5fc   : >> { %2815 = vadd.xlane.f32.xlu0 %v2814_v16 }
 0x5fe   : >> { %2806 = vadd.xlane.f32.xlu1 %v2805_v32 }
 0x60f   : >> { %7468 = vrot.lane.b32.xlu1 %v7467_v40, %s8336_s29 }
 0x612   : >> { %7473 = vrot.lane.b32.xlu0 %v7472_v12, %s8336_s29 }
 0x613   : >> { %7478 = vrot.lane.b32.xlu1 %v9474_v9, %s8334_s5  ;;  %v7502_v9 = vpack.i.bf16 %v9583_v21, %v9580_v53 }
 0x616   : >> { %7488 = vrot.lane.b32.xlu0 %v9505_v5, %s8333_s8 }
 0x617   : >> { %7483 = vrot.lane.b32.xlu1 %v9491_v60, %s8334_s5 }
 0x61a   : >> { %7498 = vrot.lane.b32.xlu0 %v7497_v27, %s8336_s29  ;;  %v2635_v27 = vld [vmem:[%s9705_s6] sm:$0xff] }
 0x61b   : >> { %7493 = vrot.lane.b32.xlu1 %v9502_v4, %s8333_s8 }
 0x61e   : >> { %7508 = vrot.lane.b32.xlu0 %v9537_v54, %s8334_s5 }
 0x61f   : >> { %7503 = vrot.lane.b32.xlu1 %v7502_v9, %s8336_s29  ;;  %v2636_v9 = vld [vmem:[%s9705_s6 + $0x8] sm:$0xff] }
 0x622   : >> { %7518 = vrot.lane.b32.xlu0 %v9545_v20, %s8333_s8 }
 0x623   : >> { %7513 = vrot.lane.b32.xlu1 %v9532_v17, %s8334_s5 }
 0x627   : >> { %7523 = vrot.lane.b32.xlu1 %v9541_v19, %s8333_s8 }
 0x679   : >> { %v2798_v60 = vpop.xlane.xlu0 %2797 }
 0x67a   : >> { %v2818_v4 = vmul.f32 0.03125, %v2798_v60 }
 0x67b   : >> { %v2801_v5 = vpop.xlane.xlu1 %2800 }
 0x67c   : >> { %v2826_v26 = vadd.f32 1e-05, %v2818_v4  ;;  %v2819_v57 = vmul.f32 0.03125, %v2801_v5  ;;  %v2637_v5 = vld [vmem:[%s9705_s6 + $0x10] sm:$0xff] }
 0x67e   : >> { %7695 = vrsqrt.f32 %v2826_v26  ;;  %v2827_v53 = vadd.f32 1e-05, %v2819_v57 }
 0x67f   : >> { %v2795_v21 = vpop.xlane.xlu1 %2794  ;;  %v2804_v54 = vpop.xlane.xlu0 %2803 }
 0x680   : >> { %7697 = vrsqrt.f32 %v2827_v53  ;;  %v2817_v24 = vmul.f32 0.03125, %v2795_v21  ;;  %v2820_v56 = vmul.f32 0.03125, %v2804_v54 }
 0x682   : >> { %v2825_v13 = vadd.f32 1e-05, %v2817_v24  ;;  %v2828_v20 = vadd.f32 1e-05, %v2820_v56 }
 0x684   : >> { %7699 = vrsqrt.f32 %v2825_v13 }
 0x685   : >> { %7701 = vrsqrt.f32 %v2828_v20  ;;  %v2810_v17 = vpop.xlane.xlu0 %2809 }
 0x686   : >> { %v2822_v22 = vmul.f32 0.03125, %v2810_v17 }
 0x687   : >> { %v2813_v18 = vpop.xlane.xlu1 %2812 }
 0x688   : >> { %v7696_v19 = vpop.eup %7695  ;;  %v2830_v28 = vadd.f32 1e-05, %v2822_v22  ;;  %v2823_v51 = vmul.f32 0.03125, %v2813_v18 }
 0x689   : >> { %v2816_v15 = vpop.xlane.xlu0 %2815  ;;  %v2842_v14 = vmul.f32 %v7696_v19, %v9625_v1 }
 0x68a   : >> { %v7698_v29 = vpop.eup %7697  ;;  %7703 = vrsqrt.f32 %v2830_v28  ;;  %v2831_v30 = vadd.f32 1e-05, %v2823_v51  ;;  %v2824_v31 = vmul.f32 0.03125, %v2816_v15  ;;  %v7652_v15 = vld [vmem:[#allocation14 + $0x8] sm:$0xff]  }
 0x68b   : >> { %v2843_v33 = vmul.f32 %v7698_v29, %v9629_v8  ;;  %v2807_v36 = vpop.xlane.xlu1 %2806  ;;  %v2854_v47 = vmul.f32 %v11594_v37, %v2842_v14 }
 0x68c   : >> { %7705 = vrsqrt.f32 %v2831_v30  ;;  %v2832_v23 = vadd.f32 1e-05, %v2824_v31  ;;  %v2821_v42 = vmul.f32 0.03125, %v2807_v36 }
 0x68d   : >> { %v9698_v43 = vpop.permute.xlu0 %7473  ;;  %v2855_v35 = vmul.f32 %v11594_v37, %v2843_v33  ;;  %v2866_v40 = vadd.f32 %v11593_v38, %v2854_v47 }
 0x68e   : >> { %v7700_v63 = vpop.eup %7699  ;;  %7707 = vrsqrt.f32 %v2832_v23  ;;  %v2829_v1 = vadd.f32 1e-05, %v2821_v42 }
 0x68f   : >> { %v7702_v59 = vpop.eup %7701  ;;  %v7469_v3 = vpop.permute.xlu1 %7468  ;;  %v2841_v8 = vmul.f32 %v7700_v63, %v9631_v10  ;;  %v2867_v2 = vadd.f32 %v11593_v38, %v2855_v35  ;;  %v2638_v10 = vld [vmem:[%s9705_s6 + $0x18] sm:$0xff]  ;;  %v9723_v53 = vadd.f32 %v2866_v40, %v2636_v9  ;;  %v7476_v35 = vunpack.i.h.bf16 %v9698_v43 }
 0x690   : >> { %v2844_v16 = vmul.f32 %v7702_v59, %v9639_v55  ;;  %7709 = vrsqrt.f32 %v2829_v1  ;;  %v7471_v19 = vunpack.i.h.bf16 %v7469_v3  ;;  %v7470_v28 = vunpack.i.l.bf16 %v7469_v3 }
 0x691   : >> { %v2853_v32 = vmul.f32 %v11594_v37, %v2841_v8  ;;  %v9711_v12 = vpop.permute.xlu0 %7488  ;;  %v9726_v56 = vadd.f32 %v2867_v2, %v2637_v5  ;;  %v7475_v40 = vunpack.i.l.bf16 %v9698_v43 }
 0x692   : >> { %v2856_v52 = vmul.f32 %v11594_v37, %v2844_v16  ;;  %v3419_v47 = vsel %vm848_vm2, %v7470_v28, %v9472_v44  ;;  %v7491_v3 = vunpack.i.h.bf16 %v9711_v12  ;;  %v7490_v8 = vunpack.i.l.bf16 %v9711_v12  ;;  %v2639_v16 = vld [vmem:[%s9705_s6 + $0x20] sm:$0xff] }
 0x693   : >> { %v7479_v60 = vpop.permute.xlu1 %7478  ;;  %v2865_v4 = vadd.f32 %v11593_v38, %v2853_v32  ;;  %11596 = vst [vmem:[#allocation71_spill] sm:$0xff] %v9726_v56  ;;  %v2640_v32 = vld [vmem:[%s9705_s6 + $0x28] sm:$0xff] }
 0x694   : >> { %v7704_v26 = vpop.eup %7703  ;;  %v2868_v55 = vadd.f32 %v11593_v38, %v2856_v52  ;;  %v7480_v31 = vunpack.i.l.bf16 %v7479_v60 }
 0x695   : >> { %v9721_v57 = vadd.f32 %v2865_v4, %v2635_v27  ;;  %v7499_v21 = vpop.permute.xlu0 %7498  ;;  %v2846_v54 = vmul.f32 %v7704_v26, %v9645_v41  ;;  %v2641_v27 = vld [vmem:[%s9705_s6 + $0x30] sm:$0xff] }
 0x696   : >> { %v7706_v24 = vpop.eup %7705  ;;  %v9728_v13 = vadd.f32 %v2868_v55, %v2638_v10  ;;  %v7501_v63 = vunpack.i.h.bf16 %v7499_v21  ;;  %v3427_v9 = vsel %vm2616_vm8, %v3419_v47, %v7480_v31 }
 0x697   : >> { %v2881_v20 = vpack.c.bf16 %v9723_v53, %v9721_v57  ;;  %v9732_v17 = vpop.permute.xlu1 %7483  ;;  %v2847_v22 = vmul.f32 %v7706_v24, %v9649_v45  ;;  %v2858_v41 = vmul.f32 %v11594_v37, %v2846_v54  ;;  %v7481_v45 = vunpack.i.h.bf16 %v7479_v60 }
 0x698   : >> { %11597 = vst [vmem:[#allocation72_spill] sm:$0xff] %v9728_v13  ;;  %v7708_v18 = vpop.eup %7707  ;;  %v2882_v51 = vpack.c.bf16 %v9728_v13, %v9726_v56  ;;  %v7486_v4 = vunpack.i.h.bf16 %v9732_v17  ;;  %v7485_v12 = vunpack.i.l.bf16 %v9732_v17  ;;  %v3424_v5 = vsel %vm848_vm2, %v7501_v63, %v9517_v50 }
 0x699   : >> { %6853 = vmatprep.mubr.msk.bf16.mxu1 %vm1191_vm7, %v2881_v20  ;;  %v2848_v14 = vmul.f32 %v7708_v18, %v9656_v0  ;;  %v2859_v30 = vmul.f32 %v11594_v37, %v2847_v22  ;;  %v7509_v23 = vpop.permute.xlu0 %7508  ;;  %v3420_v0 = vsel %vm848_vm2, %v7471_v19, %v9477_v11  ;;  %v2870_v1 = vadd.f32 %v11593_v38, %v2858_v41 }
 0x69a   : >> { %v7710_v29 = vpop.eup %7709  ;;  %6854 = vmatmul.mubr.msk.bf16.vlgmr.msra.gmra.mrb[8].mxu1 %vm1191_vm7, %v2882_v51  ;;  %v7500_v11 = vunpack.i.l.bf16 %v7499_v21  ;;  %v3428_v60 = vsel %vm2616_vm8, %v3420_v0, %v7481_v45  ;;  %v7511_v55 = vunpack.i.h.bf16 %v7509_v23  ;;  %v7510_v21 = vunpack.i.l.bf16 %v7509_v23 }
 0x69b   : >> { %v9742_v33 = vpop.permute.xlu1 %7493  ;;  %6886 = vmatpush3.bf16.msra.mxu1 %v9680_v25  ;;  %v2845_v36 = vmul.f32 %v7710_v29, %v9651_v46  ;;  %v2860_v42 = vmul.f32 %v11594_v37, %v2848_v14  ;;  %v2642_v46 = vld [vmem:[%s9705_s6 + $0x38] sm:$0xff]  ;;  %v2871_v44 = vadd.f32 %v11593_v38, %v2859_v30  ;;  %v9774_v43 = vadd.f32 %v2870_v1, %v2640_v32 }
 0x69c   : >> { %6887 = vmatprep.subr.bf16.mxu1 %v7652_v15  ;;  %v3423_v24 = vsel %vm848_vm2, %v7500_v11, %v9514_v7  ;;  %v3435_v22 = vsel %vm2625_vm13, %v3427_v9, %v7490_v8  ;;  %v3436_v17 = vsel %vm2625_vm13, %v3428_v60, %v7491_v3  ;;  %v3422_v50 = vsel %vm848_vm2, %v7476_v35, %v9487_v49  ;;  %v7658_v9 = vld [vmem:[#allocation17 + $0x28] sm:$0xff]   ;;  %v7659_v60 = vld [vmem:[#allocation17 + $0x30] sm:$0xff]  }
 0x69d   : >> { %v2857_v25 = vmul.f32 %v11594_v37, %v2845_v36  ;;  %v2872_v59 = vadd.f32 %v11593_v38, %v2860_v42  ;;  %11600 = vst [vmem:[#allocation75_spill] sm:$0xff] %v9774_v43  ;;  %v7519_v54 = vpop.permute.xlu0 %7518  ;;  %v9778_v20 = vadd.f32 %v2871_v44, %v2641_v27  ;;  %v3421_v18 = vsel %vm848_vm2, %v7475_v40, %v9484_v48  ;;  %v7654_v40 = vld [vmem:[#allocation17 + $0x8] sm:$0xff]   ;;  %v7657_v27 = vld [vmem:[#allocation17 + $0x20] sm:$0xff]  }
 0x69e   : >> { %v7496_v28 = vunpack.i.h.bf16 %v9742_v33  ;;  %v7520_v41 = vunpack.i.l.bf16 %v7519_v54  ;;  %v7495_v14 = vunpack.i.l.bf16 %v9742_v33  ;;  %v3453_v29 = vpack.c.bf16 %v3436_v17, %v3435_v22 }
 0x69f   : >> { %v7504_v2 = vpop.permute.xlu1 %7503  ;;  %v2869_v52 = vadd.f32 %v11593_v38, %v2857_v25  ;;  %6888 = vmatpush3.bf16.msra.mxu1 %v7652_v15  ;;  %v9770_v10 = vadd.f32 %v2872_v59, %v2642_v46  ;;  %11601 = vst [vmem:[#allocation76_spill] sm:$0xff] %v9778_v20  ;;  %v7521_v15 = vunpack.i.h.bf16 %v7519_v54  ;;  %v3431_v49 = vsel %vm2616_vm8, %v3423_v24, %v7510_v21 }
 0x6a0   : >> { %v3432_v48 = vsel %vm2616_vm8, %v3424_v5, %v7511_v55  ;;  %v3429_v30 = vsel %vm2616_vm8, %v3421_v18, %v7485_v12  ;;  %v3430_v45 = vsel %vm2616_vm8, %v3422_v50, %v7486_v4  ;;  %v7506_v31 = vunpack.i.h.bf16 %v7504_v2  ;;  %v7660_v4 = vld [vmem:[#allocation17 + $0x38] sm:$0xff]   ;;  %v9814_v12 = vld [vmem:[#allocation20] ss:$0 sm:$0xff] }
 0x6a1   : >> { %11598 = vst [vmem:[#allocation73_spill] sm:$0xff] %v9770_v10  ;;  %v9772_v26 = vadd.f32 %v2869_v52, %v2639_v16  ;;  %v2884_v7 = vpack.c.bf16 %v9770_v10, %v9778_v20  ;;  %v7505_v36 = vunpack.i.l.bf16 %v7504_v2  ;;  %v3439_v23 = vsel %vm2625_vm13, %v3431_v49, %v7520_v41  ;;  %v7655_v2 = vld [vmem:[#allocation17 + $0x10] sm:$0xff]   ;;  %v7656_v52 = vld [vmem:[#allocation17 + $0x18] sm:$0xff]  }
 0x6a2   : >> { %v3440_v33 = vsel %vm2625_vm13, %v3432_v48, %v7521_v15  ;;  %v3437_v42 = vsel %vm2625_vm13, %v3429_v30, %v7495_v14  ;;  %v3438_v0 = vsel %vm2625_vm13, %v3430_v45, %v7496_v28  ;;  %v3426_v25 = vsel %vm848_vm2, %v7506_v31, %v9511_v6 }
 0x6a3   : >> { %11599 = vst [vmem:[#allocation74_spill] sm:$0xff] %v9772_v26  ;;  %v2883_v19 = vpack.c.bf16 %v9774_v43, %v9772_v26  ;;  %v7514_v51 = vpop.permute.xlu1 %7513  ;;  %v3425_v1 = vsel %vm848_vm2, %v7505_v36, %v9508_v61  ;;  %v3455_v46 = vpack.c.bf16 %v3440_v33, %v3439_v23  ;;  %v3454_v59 = vpack.c.bf16 %v3438_v0, %v3437_v42  ;;  %v7653_v61 = vld [vmem:[#allocation17] sm:$0xff]  }
 0x6a4   : >> { %v7516_v47 = vunpack.i.h.bf16 %v7514_v51  ;;  %v7515_v63 = vunpack.i.l.bf16 %v7514_v51  ;;  %6861 = vmatprep.subr.bf16.mxu0 %v7653_v61 }
 0x6a5   : >> { %6857 = vmatprep.mubr.msk.bf16.mxu1 %vm1191_vm7, %v2883_v19  ;;  %6862 = vmatpush3.bf16.msra.mxu0 %v7653_v61 }
 0x6a6   : >> { %6858 = vmatmul.mubr.msk.bf16.gmra.mrb[12].mxu1 %vm1191_vm7, %v2884_v7  ;;  %v3433_v11 = vsel %vm2616_vm8, %v3425_v1, %v7515_v63  ;;  %v3434_v16 = vsel %vm2616_vm8, %v3426_v25, %v7516_v47  ;;  %6863 = vmatprep.subr.bf16.mxu0 %v7654_v40 }
 0x6a7   : >> { %6889 = vmatprep.mubr.msk.bf16.mxu1 %vm1191_vm7, %v3453_v29  ;;  %v7524_v35 = vpop.permute.xlu1 %7523 }
 0x6a8   : >> { %v7526_v3 = vunpack.i.h.bf16 %v7524_v35  ;;  %v7525_v8 = vunpack.i.l.bf16 %v7524_v35 }
 0x6a9   : >> { %6864 = vmatpush3.bf16.msra.mxu0 %v7654_v40 }
 0x6aa   : >> { %v3441_v32 = vsel %vm2625_vm13, %v3433_v11, %v7525_v8  ;;  %v3442_v44 = vsel %vm2625_vm13, %v3434_v16, %v7526_v3  ;;  %6865 = vmatprep.subr.bf16.mxu0 %v7655_v2 }
 0x6ab   : >> { %v3456_v6 = vpack.c.bf16 %v3442_v44, %v3441_v32 }
 0x6ad   : >> { %6866 = vmatpush3.bf16.msra.mxu0 %v7655_v2 }
 0x6ae   : >> { %6890 = vmatmul.mubr.msk.bf16.vlgmr.msra.gmra.mrb[16].mxu1 %vm1191_vm7, %v3454_v59  ;;  %6867 = vmatprep.subr.bf16.mxu0 %v7656_v52 }
 0x6af   : >> { %6893 = vmatprep.mubr.msk.bf16.mxu1 %vm1191_vm7, %v3455_v46 }
 0x6b1   : >> { %6868 = vmatpush3.bf16.msra.mxu0 %v7656_v52 }
 0x6b2   : >> { %6869 = vmatprep.subr.bf16.mxu0 %v7657_v27 }
 0x6b5   : >> { %6870 = vmatpush3.bf16.msra.mxu0 %v7657_v27 }
 0x6b6   : >> { %6894 = vmatmul.mubr.msk.bf16.gmra.mrb[20].mxu1 %vm1191_vm7, %v3456_v6  ;;  %6871 = vmatprep.subr.bf16.mxu0 %v7658_v9 }
 0x6b9   : >> { %6872 = vmatpush3.bf16.msra.mxu0 %v7658_v9 }
 0x6ba   : >> { %6873 = vmatprep.subr.bf16.mxu0 %v7659_v60 }
 0x6bd   : >> { %6874 = vmatpush3.bf16.msra.mxu0 %v7659_v60 }
 0x6be   : >> { %6875 = vmatprep.subr.bf16.mxu0 %v7660_v4 }
 0x6c1   : >> { %6876 = vmatpush3.bf16.msra.mxu0 %v7660_v4 }
 0x76d   : >> { %v6855_v5 = vpop.f32.mrb[8].mxu1 }
 0x76e   : >> { %v2963_v55 = vadd.f32 %v6855_v5, %v9814_v12  ;;  %v2954_v21 = vpop.f32.mrb[9].mxu1 }
 0x76f   : >> { %v9818_v54 = vadd.f32 %v9814_v12, %v2954_v21  ;;  %v6856_v24 = vpop.f32.mrb[10].mxu1 }
 0x770   : >> { %v2995_v22 = vmul.f32 0.044715, %v2963_v55  ;;  %v9821_v17 = vadd.f32 %v6856_v24, %v9814_v12  ;;  %v2957_v50 = vpop.f32.mrb[11].mxu1 }
 0x771   : >> { %v2993_v18 = vmul.f32 0.044715, %v9818_v54  ;;  %v9825_v19 = vadd.f32 %v9814_v12, %v2957_v50 }
 0x772   : >> { %v3003_v28 = vmul.f32 %v2995_v22, %v2963_v55  ;;  %v2996_v51 = vmul.f32 0.044715, %v9821_v17 }
 0x773   : >> { %v2994_v7 = vmul.f32 0.044715, %v9825_v19  ;;  %v3001_v15 = vmul.f32 %v2993_v18, %v9818_v54 }
 0x774   : >> { %v3011_v41 = vmul.f32 %v3003_v28, %v2963_v55  ;;  %v3004_v14 = vmul.f32 %v2996_v51, %v9821_v17 }
 0x775   : >> { %v3002_v29 = vmul.f32 %v2994_v7, %v9825_v19  ;;  %v3009_v49 = vmul.f32 %v3001_v15, %v9818_v54  ;;  %v2987_v7 = vmul.f32 0.5, %v2963_v55 }
 0x776   : >> { %v3012_v48 = vmul.f32 %v3004_v14, %v9821_v17  ;;  %v3019_v30 = vadd.f32 %v3011_v41, %v2963_v55 }
 0x777   : >> { %v3010_v45 = vmul.f32 %v3002_v29, %v9825_v19  ;;  %v3017_v31 = vadd.f32 %v3009_v49, %v9818_v54 }
 0x778   : >> { %v3020_v36 = vadd.f32 %v3012_v48, %v9821_v17  ;;  %v3027_v23 = vmul.f32 0.7978846, %v3019_v30 }
 0x779   : >> { %v6859_v33 = vpop.f32.mrb[12].mxu1  ;;  %v3018_v42 = vadd.f32 %v3010_v45, %v9825_v19  ;;  %v3025_v0 = vmul.f32 0.7978846, %v3017_v31  ;;  %v2988_v31 = vmul.f32 0.5, %v9821_v17 }
 0x77a   : >> { %v9839_v47 = vadd.f32 %v6859_v33, %v9814_v12  ;;  %v2970_v63 = vpop.f32.mrb[13].mxu1  ;;  %v3028_v35 = vmul.f32 0.7978846, %v3020_v36  ;;  %7711 = vtanh.f32 %v3027_v23 }
 0x77b   : >> { %v9842_v25 = vadd.f32 %v9814_v12, %v2970_v63  ;;  %v6860_v1 = vpop.f32.mrb[14].mxu1  ;;  %v3026_v46 = vmul.f32 0.7978846, %v3018_v42  ;;  %7713 = vtanh.f32 %v3025_v0 }
 0x77c   : >> { %v2999_v59 = vmul.f32 0.044715, %v9839_v47  ;;  %v9846_v3 = vadd.f32 %v6860_v1, %v9814_v12  ;;  %v2973_v8 = vpop.f32.mrb[15].mxu1  ;;  %7715 = vtanh.f32 %v3028_v35  ;;  %v2985_v35 = vmul.f32 0.5, %v9818_v54 }
 0x77d   : >> { %v2997_v11 = vmul.f32 0.044715, %v9842_v25  ;;  %v9850_v16 = vadd.f32 %v9814_v12, %v2973_v8  ;;  %7717 = vtanh.f32 %v3026_v46  ;;  %v2986_v1 = vmul.f32 0.5, %v9825_v19 }
 0x77e   : >> { %v3007_v32 = vmul.f32 %v2999_v59, %v9839_v47  ;;  %v3000_v44 = vmul.f32 0.044715, %v9846_v3 }
 0x77f   : >> { %v3005_v6 = vmul.f32 %v2997_v11, %v9842_v25  ;;  %v2998_v61 = vmul.f32 0.044715, %v9850_v16 }
 0x780   : >> { %v3015_v40 = vmul.f32 %v3007_v32, %v9839_v47  ;;  %v3008_v2 = vmul.f32 %v3000_v44, %v9846_v3 }
 0x781   : >> { %v3013_v52 = vmul.f32 %v3005_v6, %v9842_v25  ;;  %v3006_v27 = vmul.f32 %v2998_v61, %v9850_v16  ;;  %v6891_v9 = vpop.f32.mrb[16].mxu1 }
 0x782   : >> { %v3016_v60 = vmul.f32 %v3008_v2, %v9846_v3  ;;  %v3519_v4 = vpop.f32.mrb[17].mxu1  ;;  %v3023_v5 = vadd.f32 %v3015_v40, %v9839_v47  ;;  %v9868_v28 = vadd.f32 %v6891_v9, %v11595_v34 }
 0x783   : >> { %v3014_v21 = vmul.f32 %v3006_v27, %v9850_v16  ;;  %v9864_v24 = vadd.f32 %v11595_v34, %v3519_v4  ;;  %v6892_v22 = vpop.f32.mrb[18].mxu1  ;;  %v3021_v50 = vadd.f32 %v3013_v52, %v9842_v25 }
 0x784   : >> { %v7712_v18 = vpop.eup %7711  ;;  %v3522_v51 = vpop.f32.mrb[19].mxu1  ;;  %v3024_v15 = vadd.f32 %v3016_v60, %v9846_v3  ;;  %v3031_v23 = vmul.f32 0.7978846, %v3023_v5  ;;  %v3556_v17 = vsel %vm1191_vm7, %v9868_v28, 0.0  ;;  %v9885_v32 = vadd.f32 %v6892_v22, %v11595_v34 }
 0x785   : >> { %v7714_v41 = vpop.eup %7713  ;;  %v9872_v14 = vadd.f32 %v11595_v34, %v3522_v51  ;;  %v3550_v29 = vsel %vm1191_vm7, %v9864_v24, 0.0  ;;  %v3043_v49 = vadd.f32 1.0, %v7712_v18  ;;  %v3022_v48 = vadd.f32 %v3014_v21, %v9850_v16 }
 0x786   : >> { %v7716_v30 = vpop.eup %7715  ;;  %3551 = vadd.xlane.f32.xlu0 %v3550_v29  ;;  %v3041_v45 = vadd.f32 1.0, %v7714_v41  ;;  %v3029_v36 = vmul.f32 0.7978846, %v3021_v50  ;;  %v3032_v63 = vmul.f32 0.7978846, %v3024_v15  ;;  %v3559_v4 = vsel %vm1191_vm7, %v9885_v32, 0.0 }
 0x787   : >> { %v7718_v55 = vpop.eup %7717  ;;  %v3553_v33 = vsel %vm1191_vm7, %v9872_v14, 0.0  ;;  %v3044_v42 = vadd.f32 1.0, %v7716_v30  ;;  %v3030_v0 = vmul.f32 0.7978846, %v3022_v48  ;;  %v3051_v8 = vmul.f32 %v3043_v49, %v2987_v7 }
 0x788   : >> { %3554 = vadd.xlane.f32.xlu1 %v3553_v33  ;;  %v3042_v46 = vadd.f32 1.0, %v7718_v55  ;;  %7719 = vtanh.f32 %v3029_v36  ;;  %v3049_v6 = vmul.f32 %v3041_v45, %v2985_v35  ;;  %v2989_v15 = vmul.f32 0.5, %v9842_v25 }
 0x789   : >> { %v6895_v59 = vpop.f32.mrb[20].mxu1  ;;  %v3052_v11 = vmul.f32 %v3044_v42, %v2988_v31  ;;  %7721 = vtanh.f32 %v3030_v0  ;;  %v2990_v41 = vmul.f32 0.5, %v9850_v16  ;;  %v2991_v48 = vmul.f32 0.5, %v9839_v47 }
 0x78a   : >> { %v3535_v44 = vpop.f32.mrb[21].mxu1  ;;  %3557 = vadd.xlane.f32.xlu0 %v3556_v17  ;;  %v3050_v61 = vmul.f32 %v3042_v46, %v2986_v1  ;;  %7723 = vtanh.f32 %v3031_v23  ;;  %v3544_v27 = vadd.f32 %v6895_v59, %v11595_v34  ;;  %v2992_v30 = vmul.f32 0.5, %v9846_v3 }
 0x78b   : >> { %v9888_v54 = vadd.f32 %v11595_v34, %v3535_v44  ;;  %v6896_v19 = vpop.f32.mrb[22].mxu1  ;;  %v3058_v40 = vpack.c.bf16 %v3052_v11, %v3051_v8  ;;  %7725 = vtanh.f32 %v3032_v63 }
 0x78c   : >> { %v3538_v2 = vpop.f32.mrb[23].mxu1  ;;  %v3057_v52 = vpack.c.bf16 %v3050_v61, %v3049_v6  ;;  %v3568_v5 = vsel %vm1191_vm7, %v3544_v27, 0.0  ;;  %v9900_v22 = vadd.f32 %v6896_v19, %v11595_v34 }
 0x78d   : >> { %v3562_v9 = vsel %vm1191_vm7, %v9888_v54, 0.0  ;;  %v9894_v60 = vadd.f32 %v11595_v34, %v3538_v2 }
 0x78e   : >> { %6877 = vmatprep.mubr.bf16.mxu0 %v3057_v52  ;;  %3563 = vadd.xlane.f32.xlu1 %v3562_v9  ;;  %v3571_v31 = vsel %vm1191_vm7, %v9900_v22, 0.0 }
 0x78f   : >> { %3560 = vadd.xlane.f32.xlu0 %v3559_v4  ;;  %6878 = vmatmul.mubr.bf16.vlgmr.msra.gmra.mrb[0].mxu0 %v3058_v40  ;;  %v3565_v50 = vsel %vm1191_vm7, %v9894_v60, 0.0 }
 0x792   : >> { %v7720_v21 = vpop.eup %7719  ;;  %3569 = vadd.xlane.f32.xlu1 %v3568_v5 }
 0x793   : >> { %v7722_v18 = vpop.eup %7721  ;;  %3566 = vadd.xlane.f32.xlu0 %v3565_v50  ;;  %v3045_v51 = vadd.f32 1.0, %v7720_v21 }
 0x794   : >> { %v7724_v7 = vpop.eup %7723  ;;  %v3046_v29 = vadd.f32 1.0, %v7722_v18 }
 0x795   : >> { %v7726_v49 = vpop.eup %7725  ;;  %v3047_v45 = vadd.f32 1.0, %v7724_v7  ;;  %v3053_v36 = vmul.f32 %v3045_v51, %v2989_v15 }
 0x796   : >> { %v3054_v23 = vmul.f32 %v3046_v29, %v2990_v41  ;;  %v3048_v55 = vadd.f32 1.0, %v7726_v49 }
 0x797   : >> { %3572 = vadd.xlane.f32.xlu0 %v3571_v31  ;;  %v3055_v42 = vmul.f32 %v3047_v45, %v2991_v48  ;;  %v7887_v31 = vld [vmem:[%s9467_s28] sm:$0xff] }
 0x798   : >> { %v3059_v33 = vpack.c.bf16 %v3054_v23, %v3053_v36  ;;  %v3056_v0 = vmul.f32 %v3048_v55, %v2992_v30  ;;  %v7888_v36 = vld [vmem:[%s9467_s28 + $0x8] sm:$0xff]  ;;  %v7890_v55 = vld [vmem:[%s9467_s28 + $0x18] sm:$0xff] }
 0x799   : >> { %v9959_v23 = vpack.i.bf16 %v7888_v36, %v7887_v31 }
 0x79a   : >> { %6881 = vmatprep.mubr.bf16.mxu0 %v3059_v33  ;;  %v3060_v25 = vpack.c.bf16 %v3056_v0, %v3055_v42  ;;  %v7891_v42 = vld [vmem:[%s9467_s28 + $0x80] sm:$0xff]  ;;  %v7892_v0 = vld [vmem:[%s9467_s28 + $0x88] sm:$0xff] }
 0x79c   : >> { %6882 = vmatmul.mubr.bf16.gmra.mrb[4].mxu0 %v3060_v25  ;;  %v9969_v25 = vpack.i.bf16 %v7892_v0, %v7891_v42 }
 0x813   : >> { %v3552_v16 = vpop.xlane.xlu0 %3551 }
 0x814   : >> { %v3574_v35 = vmul.f32 0.03125, %v3552_v16  ;;  %v7893_v16 = vld [vmem:[%s9467_s28 + $0x90] sm:$0xff] }
 0x815   : >> { %v3555_v63 = vpop.xlane.xlu1 %3554 }
 0x816   : >> { %v3575_v47 = vmul.f32 0.03125, %v3555_v63  ;;  %v9919_v8 = vsub.f32 %v9864_v24, %v3574_v35  ;;  %v7894_v63 = vld [vmem:[%s9467_s28 + $0x98] sm:$0xff] }
 0x817   : >> { %v3558_v1 = vpop.xlane.xlu0 %3557  ;;  %v9975_v35 = vpack.i.bf16 %v7894_v63, %v7893_v16 }
 0x818   : >> { %v3576_v3 = vmul.f32 0.03125, %v3558_v1  ;;  %v9911_v46 = vsub.f32 %v9872_v14, %v3575_v47  ;;  %v3590_v2 = vmul.f32 %v9919_v8, %v9919_v8  ;;  %v7895_v47 = vld [vmem:[%s9467_s28 + $0x180] sm:$0xff]  ;;  %v7896_v1 = vld [vmem:[%s9467_s28 + $0x188] sm:$0xff] }
 0x81a   : >> { %v3591_v59 = vmul.f32 %v9911_v46, %v9911_v46  ;;  %v9916_v17 = vsub.f32 %v9868_v28, %v3576_v3  ;;  %v3598_v21 = vsel %vm1191_vm7, %v3590_v2, 0.0  ;;  %v7547_v3 = vpack.i.bf16 %v7896_v1, %v7895_v47  ;;  %v7901_v2 = vld [vmem:[%s9467_s28 + $0xa0] sm:$0xff] }
 0x81b   : >> { %v3564_v11 = vpop.xlane.xlu1 %3563 }
 0x81c   : >> { %v3561_v44 = vpop.xlane.xlu0 %3560  ;;  %v3601_v6 = vsel %vm1191_vm7, %v3591_v59, 0.0  ;;  %v3592_v61 = vmul.f32 %v9916_v17, %v9916_v17  ;;  %v3578_v14 = vmul.f32 0.03125, %v3564_v11  ;;  %v7897_v59 = vld [vmem:[%s9467_s28 + $0x190] sm:$0xff]  ;;  %v7898_v11 = vld [vmem:[%s9467_s28 + $0x198] sm:$0xff] }
 0x81d   : >> { %v3577_v19 = vmul.f32 0.03125, %v3561_v44  ;;  %3602 = vadd.xlane.f32.xlu0 %v3601_v6  ;;  %v7552_v44 = vpack.i.bf16 %v7898_v11, %v7897_v59  ;;  %v7661_v6 = vld [vmem:[#allocation15] sm:$0xff]  }
 0x81e   : >> { %v3604_v40 = vsel %vm1191_vm7, %v3592_v61, 0.0  ;;  %v9936_v18 = vsub.f32 %v9888_v54, %v3578_v14  ;;  %v7662_v61 = vld [vmem:[#allocation15 + $0x8] sm:$0xff]   ;;  %v7900_v14 = vld [vmem:[%s9467_s28 + $0x28] sm:$0xff]  ;;  %6897 = vmatprep.subr.bf16.mxu1 %v7661_v6 }
 0x81f   : >> { %v3570_v28 = vpop.xlane.xlu1 %3569  ;;  %3605 = vadd.xlane.f32.xlu1 %v3604_v40  ;;  %v9928_v24 = vsub.f32 %v9885_v32, %v3577_v19  ;;  %v7899_v19 = vld [vmem:[%s9467_s28 + $0x20] sm:$0xff]  ;;  %6898 = vmatpush3.bf16.msra.mxu1 %v7661_v6 }
 0x820   : >> { %v3580_v52 = vmul.f32 0.03125, %v3570_v28  ;;  %v3567_v9 = vpop.xlane.xlu0 %3566  ;;  %v3594_v29 = vmul.f32 %v9936_v18, %v9936_v18  ;;  %v9988_v40 = vpack.i.bf16 %v7900_v14, %v7899_v19  ;;  %v7902_v28 = vld [vmem:[%s9467_s28 + $0xa8] sm:$0xff]  ;;  %6899 = vmatprep.subr.bf16.mxu1 %v7662_v61 }
 0x821   : >> { %v3579_v4 = vmul.f32 0.03125, %v3567_v9  ;;  %v3593_v5 = vmul.f32 %v9928_v24, %v9928_v24  ;;  %v7903_v9 = vld [vmem:[%s9467_s28 + $0x30] sm:$0xff] }
 0x822   : >> { %v9933_v50 = vsub.f32 %v3544_v27, %v3580_v52  ;;  %v3610_v30 = vsel %vm1191_vm7, %v3594_v29, 0.0  ;;  %v9993_v52 = vpack.i.bf16 %v7902_v28, %v7901_v2  ;;  %v7909_v29 = vld [vmem:[%s9467_s28 + $0x1b0] sm:$0xff] }
 0x823   : >> { %3599 = vadd.xlane.f32.xlu1 %v3598_v21  ;;  %v3607_v51 = vsel %vm1191_vm7, %v3593_v5, 0.0  ;;  %v9940_v7 = vsub.f32 %v9894_v60, %v3579_v4  ;;  %v7904_v4 = vld [vmem:[%s9467_s28 + $0x38] sm:$0xff]  ;;  %v10001_v21 = vld [vmem:[#allocation14] sm:$0xff]   ;;  %6900 = vmatpush3.bf16.msra.mxu1 %v7662_v61 }
 0x824   : >> { %3608 = vadd.xlane.f32.xlu0 %v3607_v51  ;;  %v3573_v32 = vpop.xlane.xlu0 %3572  ;;  %v3596_v15 = vmul.f32 %v9933_v50, %v9933_v50  ;;  %v9999_v5 = vpack.i.bf16 %v7904_v4, %v7903_v9  ;;  %v7905_v51 = vld [vmem:[%s9467_s28 + $0xb0] sm:$0xff]  ;;  %6933 = vmatprep.subr.bf16.mxu1 %v10001_v21 }
 0x825   : >> { %v3581_v41 = vmul.f32 0.03125, %v3573_v32  ;;  %v3595_v27 = vmul.f32 %v9940_v7, %v9940_v7  ;;  %v7906_v32 = vld [vmem:[%s9467_s28 + $0xb8] sm:$0xff] }
 0x826   : >> { %v3616_v54 = vsel %vm1191_vm7, %v3596_v15, 0.0  ;;  %v10007_v15 = vpack.i.bf16 %v7906_v32, %v7905_v51 }
 0x827   : >> { %3617 = vadd.xlane.f32.xlu1 %v3616_v54  ;;  %v3613_v60 = vsel %vm1191_vm7, %v3595_v27, 0.0  ;;  %v9951_v49 = vsub.f32 %v9900_v22, %v3581_v41  ;;  %v7889_v22 = vld [vmem:[%s9467_s28 + $0x10] sm:$0xff]  ;;  %v7907_v41 = vld [vmem:[%s9467_s28 + $0x1a0] sm:$0xff]  ;;  %v7908_v27 = vld [vmem:[%s9467_s28 + $0x1a8] sm:$0xff] }
 0x828   : >> { %3614 = vadd.xlane.f32.xlu0 %v3613_v60  ;;  %v9965_v33 = vpack.i.bf16 %v7890_v55, %v7889_v22  ;;  %v7577_v54 = vpack.i.bf16 %v7908_v27, %v7907_v41  ;;  %v7910_v60 = vld [vmem:[%s9467_s28 + $0x1b8] sm:$0xff] }
 0x829   : >> { %v3597_v48 = vmul.f32 %v9951_v49, %v9951_v49 }
 0x82b   : >> { %3611 = vadd.xlane.f32.xlu1 %v3610_v30  ;;  %v3619_v45 = vsel %vm1191_vm7, %v3597_v48, 0.0  ;;  %v7582_v48 = vpack.i.bf16 %v7910_v60, %v7909_v29 }
 0x82c   : >> { %3620 = vadd.xlane.f32.xlu0 %v3619_v45 }
 0x83c   : >> { %7528 = vrot.lane.b32.xlu1 %v9959_v23, %s8337_s12 }
 0x840   : >> { %7538 = vrot.lane.b32.xlu1 %v9965_v33, %s8337_s12 }
 0x842   : >> { %7533 = vrot.lane.b32.xlu0 %v9969_v25, %s8336_s29 }
 0x844   : >> { %7543 = vrot.lane.b32.xlu1 %v9975_v35, %s8336_s29 }
 0x846   : >> { %7548 = vrot.lane.b32.xlu0 %v7547_v3, %s8334_s5 }
 0x848   : >> { %7553 = vrot.lane.b32.xlu1 %v7552_v44, %s8334_s5 }
 0x84a   : >> { %7558 = vrot.lane.b32.xlu0 %v9988_v40, %s8337_s12 }
 0x84c   : >> { %7563 = vrot.lane.b32.xlu1 %v9993_v52, %s8336_s29 }
 0x84e   : >> { %7568 = vrot.lane.b32.xlu0 %v9999_v5, %s8337_s12 }
 0x850   : >> { %7573 = vrot.lane.b32.xlu1 %v10007_v15, %s8336_s29 }
 0x852   : >> { %7578 = vrot.lane.b32.xlu0 %v7577_v54, %s8334_s5 }
 0x854   : >> { %7583 = vrot.lane.b32.xlu1 %v7582_v48, %s8334_s5 }
 0x862   : >> { %v10020_v30 = vpop.f32.mrb[0].mxu0 }
 0x863   : >> { %v10022_v45 = vpop.f32.mrb[1].mxu0 }
 0x864   : >> { %v10024_v31 = vpop.f32.mrb[2].mxu0 }
 0x865   : >> { %v10026_v36 = vpop.f32.mrb[3].mxu0 }
 0x86f   : >> { %v10028_v22 = vpop.f32.mrb[4].mxu0 }
 0x870   : >> { %v10030_v55 = vpop.f32.mrb[5].mxu0 }
 0x871   : >> { %v10032_v42 = vpop.f32.mrb[6].mxu0 }
 0x872   : >> { %v10034_v0 = vpop.f32.mrb[7].mxu0 }
 0x8aa   : >> { %v3603_v16 = vpop.xlane.xlu0 %3602 }
 0x8ab   : >> { %v3623_v63 = vmul.f32 0.03125, %v3603_v16 }
 0x8ac   : >> { %v3606_v47 = vpop.xlane.xlu1 %3605 }
 0x8ad   : >> { %v3631_v1 = vadd.f32 1e-05, %v3623_v63  ;;  %v3624_v3 = vmul.f32 0.03125, %v3606_v47 }
 0x8af   : >> { %7727 = vrsqrt.f32 %v3631_v1  ;;  %v3632_v59 = vadd.f32 1e-05, %v3624_v3 }
 0x8b0   : >> { %v3600_v11 = vpop.xlane.xlu1 %3599 }
 0x8b1   : >> { %7729 = vrsqrt.f32 %v3632_v59  ;;  %v3622_v44 = vmul.f32 0.03125, %v3600_v11  ;;  %v3609_v6 = vpop.xlane.xlu0 %3608 }
 0x8b2   : >> { %v3625_v61 = vmul.f32 0.03125, %v3609_v6 }
 0x8b3   : >> { %v3630_v19 = vadd.f32 1e-05, %v3622_v44 }
 0x8b4   : >> { %v3633_v14 = vadd.f32 1e-05, %v3625_v61  ;;  %v3618_v2 = vpop.xlane.xlu1 %3617 }
 0x8b5   : >> { %7731 = vrsqrt.f32 %v3630_v19  ;;  %v3628_v28 = vmul.f32 0.03125, %v3618_v2  ;;  %v3615_v9 = vpop.xlane.xlu0 %3614 }
 0x8b6   : >> { %7733 = vrsqrt.f32 %v3633_v14  ;;  %v3627_v4 = vmul.f32 0.03125, %v3615_v9 }
 0x8b7   : >> { %v3636_v51 = vadd.f32 1e-05, %v3628_v28 }
 0x8b8   : >> { %v3635_v32 = vadd.f32 1e-05, %v3627_v4  ;;  %v3612_v41 = vpop.xlane.xlu1 %3611 }
 0x8b9   : >> { %v7728_v27 = vpop.eup %7727  ;;  %7735 = vrsqrt.f32 %v3636_v51  ;;  %v3626_v54 = vmul.f32 0.03125, %v3612_v41  ;;  %v3621_v29 = vpop.xlane.xlu0 %3620 }
 0x8ba   : >> { %7737 = vrsqrt.f32 %v3635_v32  ;;  %v3629_v60 = vmul.f32 0.03125, %v3621_v29  ;;  %v3647_v48 = vmul.f32 %v7728_v27, %v9911_v46  ;;  %v6316_v27 = vld [vmem:[%s9705_s6 + $0x80] sm:$0xff] }
 0x8bb   : >> { %v7730_v16 = vpop.eup %7729  ;;  %v3634_v63 = vadd.f32 1e-05, %v3626_v54  ;;  %v6317_v54 = vld [vmem:[%s9705_s6 + $0x88] sm:$0xff] }
 0x8bc   : >> { %v3648_v47 = vmul.f32 %v7730_v16, %v9916_v17  ;;  %v3637_v1 = vadd.f32 1e-05, %v3629_v60  ;;  %v7529_v3 = vpop.permute.xlu1 %7528  ;;  %v3655_v11 = vmul.f32 %v11594_v37, %v3647_v48  ;;  %v6318_v16 = vld [vmem:[%s9705_s6 + $0x90] sm:$0xff] }
 0x8bd   : >> { %7739 = vrsqrt.f32 %v3634_v63  ;;  %v7534_v59 = vpop.permute.xlu0 %7533  ;;  %v7531_v32 = vunpack.i.h.bf16 %v7529_v3  ;;  %v7530_v41 = vunpack.i.l.bf16 %v7529_v3  ;;  %v6319_v63 = vld [vmem:[%s9705_s6 + $0x98] sm:$0xff] }
 0x8be   : >> { %7741 = vrsqrt.f32 %v3637_v1  ;;  %v3656_v6 = vmul.f32 %v11594_v37, %v3648_v47  ;;  %v3663_v28 = vadd.f32 %v11593_v38, %v3655_v11  ;;  %v7536_v29 = vunpack.i.h.bf16 %v7534_v59 }
 0x8bf   : >> { %v7732_v44 = vpop.eup %7731 }
 0x8c0   : >> { %v7734_v61 = vpop.eup %7733  ;;  %v10040_v19 = vpop.permute.xlu1 %7538  ;;  %v3646_v46 = vmul.f32 %v7732_v44, %v9919_v8  ;;  %v3664_v4 = vadd.f32 %v11593_v38, %v3656_v6  ;;  %v10062_v3 = vadd.f32 %v6317_v54, %v3663_v28  ;;  %v7664_v54 = vld [vmem:[#allocation14 + $0x8] sm:$0xff]  }
 0x8c1   : >> { %v3649_v14 = vmul.f32 %v7734_v61, %v9928_v24  ;;  %v10044_v17 = vpop.permute.xlu0 %7548  ;;  %v7535_v24 = vunpack.i.l.bf16 %v7534_v59 }
 0x8c2   : >> { %v3654_v2 = vmul.f32 %v11594_v37, %v3646_v46  ;;  %11603 = vst [vmem:[#allocation78_spill] sm:$0xff] %v10062_v3  ;;  %v10064_v46 = vadd.f32 %v6318_v16, %v3664_v4  ;;  %v6321_v16 = vld [vmem:[%s9705_s6 + $0xa8] sm:$0xff] }
 0x8c3   : >> { %v7736_v9 = vpop.eup %7735  ;;  %v3657_v51 = vmul.f32 %v11594_v37, %v3649_v14 }
 0x8c4   : >> { %v7738_v8 = vpop.eup %7737  ;;  %v10052_v60 = vpop.permute.xlu1 %7543  ;;  %v3662_v48 = vadd.f32 %v11593_v38, %v3654_v2  ;;  %v3652_v47 = vmul.f32 %v7736_v9, %v9933_v50  ;;  %11604 = vst [vmem:[#allocation79_spill] sm:$0xff] %v10064_v46  ;;  %v4197_v50 = vsel %vm848_vm2, %v7531_v32, %v7536_v29  ;;  %v4196_v9 = vsel %vm848_vm2, %v7530_v41, %v7535_v24 }
 0x8c5   : >> { %v3665_v1 = vadd.f32 %v11593_v38, %v3657_v51  ;;  %v7559_v11 = vpop.permute.xlu0 %7558  ;;  %v3651_v44 = vmul.f32 %v7738_v8, %v9940_v7  ;;  %v7541_v51 = vunpack.i.h.bf16 %v10040_v19  ;;  %v7551_v8 = vunpack.i.h.bf16 %v10044_v17 }
 0x8c6   : >> { %v10060_v6 = vadd.f32 %v6316_v27, %v3662_v48  ;;  %v3660_v2 = vmul.f32 %v11594_v37, %v3652_v47  ;;  %v7540_v27 = vunpack.i.l.bf16 %v10040_v19  ;;  %v7550_v19 = vunpack.i.l.bf16 %v10044_v17  ;;  %v6320_v48 = vld [vmem:[%s9705_s6 + $0xa0] sm:$0xff] }
 0x8c7   : >> { %v7740_v61 = vpop.eup %7739  ;;  %v10066_v59 = vadd.f32 %v6319_v63, %v3665_v1  ;;  %v3659_v14 = vmul.f32 %v11594_v37, %v3651_v44  ;;  %v10094_v47 = vld [vmem:[%s9467_s28 + $0x100] sm:$0xff]  ;;  %v10099_v44 = vld [vmem:[%s9467_s28 + $0x108] sm:$0xff] }
 0x8c8   : >> { %11602 = vst [vmem:[#allocation77_spill] sm:$0xff] %v10060_v6  ;;  %v7742_v10 = vpop.eup %7741  ;;  %v3678_v7 = vpack.c.bf16 %v10062_v3, %v10060_v6  ;;  %v10074_v28 = vpop.permute.xlu1 %7553  ;;  %v3650_v4 = vmul.f32 %v7740_v61, %v9936_v18  ;;  %v3668_v63 = vadd.f32 %v11593_v38, %v3660_v2  ;;  %v4204_v1 = vsel %vm2616_vm8, %v4196_v9, %v10094_v47 }
 0x8c9   : >> { %11605 = vst [vmem:[#allocation80_spill] sm:$0xff] %v10066_v59  ;;  %v3679_v32 = vpack.c.bf16 %v10066_v59, %v10064_v46  ;;  %v10081_v41 = vpop.permute.xlu0 %7568  ;;  %v3667_v18 = vadd.f32 %v11593_v38, %v3659_v14  ;;  %v3653_v24 = vmul.f32 %v7742_v10, %v9951_v49  ;;  %v4205_v61 = vsel %vm2616_vm8, %v4197_v50, %v10099_v44  ;;  %v6323_v46 = vld [vmem:[%s9705_s6 + $0xb8] sm:$0xff] }
 0x8ca   : >> { %6901 = vmatprep.mubr.msk.bf16.mxu1 %vm1191_vm7, %v3678_v7  ;;  %v3658_v29 = vmul.f32 %v11594_v37, %v3650_v4  ;;  %v7561_v10 = vunpack.i.h.bf16 %v7559_v11  ;;  %v7560_v49 = vunpack.i.l.bf16 %v7559_v11  ;;  %v6322_v7 = vld [vmem:[%s9705_s6 + $0xb0] sm:$0xff]  ;;  %v7546_v4 = vunpack.i.h.bf16 %v10052_v60 }
 0x8cb   : >> { %6902 = vmatmul.mubr.msk.bf16.vlgmr.msra.gmra.mrb[24].mxu1 %vm1191_vm7, %v3679_v32  ;;  %v3661_v2 = vmul.f32 %v11594_v37, %v3653_v24  ;;  %v7545_v32 = vunpack.i.l.bf16 %v10052_v60  ;;  %v10112_v50 = vadd.f32 %v6321_v16, %v3667_v18  ;;  %v10115_v11 = vadd.f32 %v6322_v7, %v3668_v63 }
 0x8cc   : >> { %6934 = vmatpush3.bf16.msra.mxu1 %v10001_v21  ;;  %v7564_v17 = vpop.permute.xlu1 %7563  ;;  %v3666_v14 = vadd.f32 %v11593_v38, %v3658_v29  ;;  %v4212_v29 = vsel %vm2625_vm13, %v4204_v1, %v7550_v19  ;;  %v4213_v24 = vsel %vm2625_vm13, %v4205_v61, %v7551_v8  ;;  %v4199_v19 = vsel %vm848_vm2, %v7541_v51, %v7546_v4 }
 0x8cd   : >> { %v7566_v9 = vunpack.i.h.bf16 %v7564_v17  ;;  %v7565_v59 = vunpack.i.l.bf16 %v7564_v17  ;;  %6935 = vmatprep.subr.bf16.mxu1 %v7664_v54  ;;  %11607 = vst [vmem:[#allocation82_spill] sm:$0xff] %v10112_v50  ;;  %v3669_v21 = vadd.f32 %v11593_v38, %v3661_v2  ;;  %11608 = vst [vmem:[#allocation83_spill] sm:$0xff] %v10115_v11  ;;  %v7579_v6 = vpop.permute.xlu0 %7578  ;;  %v4198_v16 = vsel %vm848_vm2, %v7540_v27, %v7545_v32  ;;  %v10148_v2 = vld [vmem:[%s9467_s28 + $0x118] sm:$0xff] }
 0x8ce   : >> { %v10110_v3 = vadd.f32 %v6320_v48, %v3666_v14  ;;  %v7556_v8 = vunpack.i.h.bf16 %v10074_v28  ;;  %v7581_v1 = vunpack.i.h.bf16 %v7579_v6  ;;  %v7580_v61 = vunpack.i.l.bf16 %v7579_v6  ;;  %v10143_v14 = vld [vmem:[%s9467_s28 + $0x110] sm:$0xff] }
 0x8cf   : >> { %v4200_v60 = vsel %vm848_vm2, %v7560_v49, %v7565_v59  ;;  %v4201_v17 = vsel %vm848_vm2, %v7561_v10, %v7566_v9  ;;  %v10123_v18 = vadd.f32 %v6323_v46, %v3669_v21  ;;  %v7555_v46 = vunpack.i.l.bf16 %v10074_v28  ;;  %v10133_v49 = vld [vmem:[%s9467_s28 + $0x120] sm:$0xff] }
 0x8d0   : >> { %11606 = vst [vmem:[#allocation81_spill] sm:$0xff] %v10110_v3  ;;  %v3680_v48 = vpack.c.bf16 %v10112_v50, %v10110_v3  ;;  %6936 = vmatpush3.bf16.msra.mxu1 %v7664_v54  ;;  %v7574_v63 = vpop.permute.xlu1 %7573  ;;  %v4230_v10 = vpack.c.bf16 %v4213_v24, %v4212_v29  ;;  %v4208_v27 = vsel %vm2616_vm8, %v4200_v60, %v10133_v49  ;;  %v10138_v54 = vld [vmem:[%s9467_s28 + $0x128] sm:$0xff]  ;;  %v7571_v28 = vunpack.i.h.bf16 %v10081_v41 }
 0x8d1   : >> { %11609 = vst [vmem:[#allocation84_spill] sm:$0xff] %v10123_v18  ;;  %v3681_v59 = vpack.c.bf16 %v10123_v18, %v10115_v11  ;;  %v4209_v51 = vsel %vm2616_vm8, %v4201_v17, %v10138_v54  ;;  %v4206_v7 = vsel %vm2616_vm8, %v4198_v16, %v10143_v14  ;;  %v4207_v6 = vsel %vm2616_vm8, %v4199_v19, %v10148_v2 }
 0x8d2   : >> { %6905 = vmatprep.mubr.msk.bf16.mxu1 %vm1191_vm7, %v3680_v48  ;;  %v7570_v4 = vunpack.i.l.bf16 %v10081_v41  ;;  %v7576_v32 = vunpack.i.h.bf16 %v7574_v63  ;;  %v7575_v9 = vunpack.i.l.bf16 %v7574_v63  ;;  %v4216_v21 = vsel %vm2625_vm13, %v4208_v27, %v7580_v61  ;;  %v10164_v63 = vld [vmem:[%s9467_s28 + $0x130] sm:$0xff]  ;;  %v10169_v61 = vld [vmem:[%s9467_s28 + $0x138] sm:$0xff] }
 0x8d3   : >> { %6906 = vmatmul.mubr.msk.bf16.gmra.mrb[28].mxu1 %vm1191_vm7, %v3681_v59  ;;  %v4217_v29 = vsel %vm2625_vm13, %v4209_v51, %v7581_v1  ;;  %v4214_v24 = vsel %vm2625_vm13, %v4206_v7, %v7555_v46  ;;  %v4215_v60 = vsel %vm2625_vm13, %v4207_v6, %v7556_v8  ;;  %v7665_v7 = vld [vmem:[#allocation17] sm:$0xff]   ;;  %v7666_v6 = vld [vmem:[#allocation17 + $0x8] sm:$0xff]  }
 0x8d4   : >> { %6937 = vmatprep.mubr.msk.bf16.mxu1 %vm1191_vm7, %v4230_v10  ;;  %v7584_v17 = vpop.permute.xlu1 %7583  ;;  %v4202_v48 = vsel %vm848_vm2, %v7570_v4, %v7575_v9  ;;  %v4203_v16 = vsel %vm848_vm2, %v7571_v28, %v7576_v32  ;;  %v4232_v41 = vpack.c.bf16 %v4217_v29, %v4216_v21  ;;  %v4231_v19 = vpack.c.bf16 %v4215_v60, %v4214_v24  ;;  %v7667_v28 = vld [vmem:[#allocation17 + $0x10] sm:$0xff]   ;;  %v7668_v4 = vld [vmem:[#allocation17 + $0x18] sm:$0xff]   ;;  %v7669_v32 = vld [vmem:[#allocation17 + $0x20] sm:$0xff]  }
 0x8d5   : >> { %v7586_v59 = vunpack.i.h.bf16 %v7584_v17  ;;  %v7585_v10 = vunpack.i.l.bf16 %v7584_v17  ;;  %v4210_v1 = vsel %vm2616_vm8, %v4202_v48, %v10164_v63  ;;  %v4211_v8 = vsel %vm2616_vm8, %v4203_v16, %v10169_v61  ;;  %6909 = vmatprep.subr.bf16.mxu0 %v7665_v7  ;;  %v7670_v9 = vld [vmem:[#allocation17 + $0x28] sm:$0xff]   ;;  %v7671_v21 = vld [vmem:[#allocation17 + $0x30] sm:$0xff]   ;;  %v7672_v29 = vld [vmem:[#allocation17 + $0x38] sm:$0xff]  }
 0x8d6   : >> { %6910 = vmatpush3.bf16.msra.mxu0 %v7665_v7 }
 0x8d7   : >> { %v4218_v46 = vsel %vm2625_vm13, %v4210_v1, %v7585_v10  ;;  %v4219_v27 = vsel %vm2625_vm13, %v4211_v8, %v7586_v59  ;;  %6911 = vmatprep.subr.bf16.mxu0 %v7666_v6 }
 0x8d8   : >> { %v4233_v51 = vpack.c.bf16 %v4219_v27, %v4218_v46 }
 0x8da   : >> { %6912 = vmatpush3.bf16.msra.mxu0 %v7666_v6 }
 0x8db   : >> { %6938 = vmatmul.mubr.msk.bf16.vlgmr.msra.gmra.mrb[32].mxu1 %vm1191_vm7, %v4231_v19  ;;  %6913 = vmatprep.subr.bf16.mxu0 %v7667_v28 }
 0x8dc   : >> { %6941 = vmatprep.mubr.msk.bf16.mxu1 %vm1191_vm7, %v4232_v41 }
 0x8de   : >> { %6914 = vmatpush3.bf16.msra.mxu0 %v7667_v28 }
 0x8df   : >> { %6915 = vmatprep.subr.bf16.mxu0 %v7668_v4 }
 0x8e2   : >> { %6916 = vmatpush3.bf16.msra.mxu0 %v7668_v4 }
 0x8e3   : >> { %6942 = vmatmul.mubr.msk.bf16.gmra.mrb[36].mxu1 %vm1191_vm7, %v4233_v51  ;;  %6917 = vmatprep.subr.bf16.mxu0 %v7669_v32 }
 0x8e6   : >> { %6918 = vmatpush3.bf16.msra.mxu0 %v7669_v32 }
 0x8e7   : >> { %6919 = vmatprep.subr.bf16.mxu0 %v7670_v9 }
 0x8ea   : >> { %6920 = vmatpush3.bf16.msra.mxu0 %v7670_v9 }
 0x8eb   : >> { %6921 = vmatprep.subr.bf16.mxu0 %v7671_v21 }
 0x8ee   : >> { %6922 = vmatpush3.bf16.msra.mxu0 %v7671_v21 }
 0x8ef   : >> { %6923 = vmatprep.subr.bf16.mxu0 %v7672_v29 }
 0x8f2   : >> { %6924 = vmatpush3.bf16.msra.mxu0 %v7672_v29 }
 0x99e   : >> { %v6903_v24 = vpop.f32.mrb[24].mxu1 }
 0x99f   : >> { %v10178_v60 = vadd.f32 %v6903_v24, %v9814_v12  ;;  %v3751_v17 = vpop.f32.mrb[25].mxu1 }
 0x9a0   : >> { %v10181_v48 = vadd.f32 %v9814_v12, %v3751_v17  ;;  %v6904_v16 = vpop.f32.mrb[26].mxu1 }
 0x9a1   : >> { %v3792_v41 = vmul.f32 0.044715, %v10178_v60  ;;  %v10185_v19 = vadd.f32 %v6904_v16, %v9814_v12  ;;  %v3754_v59 = vpop.f32.mrb[27].mxu1 }
 0x9a2   : >> { %v3790_v10 = vmul.f32 0.044715, %v10181_v48  ;;  %v10189_v1 = vadd.f32 %v9814_v12, %v3754_v59 }
 0x9a3   : >> { %v3800_v8 = vmul.f32 %v3792_v41, %v10178_v60  ;;  %v3793_v46 = vmul.f32 0.044715, %v10185_v19 }
 0x9a4   : >> { %v3798_v27 = vmul.f32 %v3790_v10, %v10181_v48  ;;  %v3791_v51 = vmul.f32 0.044715, %v10189_v1 }
 0x9a5   : >> { %v3808_v7 = vmul.f32 %v3800_v8, %v10178_v60  ;;  %v3801_v6 = vmul.f32 %v3793_v46, %v10185_v19 }
 0x9a6   : >> { %v3806_v28 = vmul.f32 %v3798_v27, %v10181_v48  ;;  %v3799_v4 = vmul.f32 %v3791_v51, %v10189_v1  ;;  %v6907_v21 = vpop.f32.mrb[28].mxu1 }
 0x9a7   : >> { %v3816_v32 = vadd.f32 %v3808_v7, %v10178_v60  ;;  %v3809_v9 = vmul.f32 %v3801_v6, %v10185_v19  ;;  %v10203_v24 = vadd.f32 %v6907_v21, %v9814_v12  ;;  %v3767_v17 = vpop.f32.mrb[29].mxu1 }
 0x9a8   : >> { %v3807_v29 = vmul.f32 %v3799_v4, %v10189_v1  ;;  %v3814_v16 = vadd.f32 %v3806_v28, %v10181_v48  ;;  %v10208_v10 = vadd.f32 %v9814_v12, %v3767_v17  ;;  %v6908_v8 = vpop.f32.mrb[30].mxu1 }
 0x9a9   : >> { %v3824_v41 = vmul.f32 0.7978846, %v3816_v32  ;;  %v3817_v59 = vadd.f32 %v3809_v9, %v10185_v19  ;;  %v3796_v46 = vmul.f32 0.044715, %v10203_v24  ;;  %v10212_v27 = vadd.f32 %v6908_v8, %v9814_v12  ;;  %v3770_v51 = vpop.f32.mrb[31].mxu1 }
 0x9aa   : >> { %v3815_v7 = vadd.f32 %v3807_v29, %v10189_v1  ;;  %v3822_v6 = vmul.f32 0.7978846, %v3814_v16  ;;  %v3794_v28 = vmul.f32 0.044715, %v10208_v10  ;;  %v10217_v32 = vadd.f32 %v9814_v12, %v3770_v51 }
 0x9ab   : >> { %7743 = vtanh.f32 %v3824_v41  ;;  %v3825_v4 = vmul.f32 0.7978846, %v3817_v59  ;;  %v3804_v9 = vmul.f32 %v3796_v46, %v10203_v24  ;;  %v3797_v21 = vmul.f32 0.044715, %v10212_v27 }
 0x9ac   : >> { %v3823_v17 = vmul.f32 0.7978846, %v3815_v7  ;;  %7745 = vtanh.f32 %v3822_v6  ;;  %v3802_v8 = vmul.f32 %v3794_v28, %v10208_v10  ;;  %v3795_v18 = vmul.f32 0.044715, %v10217_v32 }
 0x9ad   : >> { %7747 = vtanh.f32 %v3825_v4  ;;  %v3812_v29 = vmul.f32 %v3804_v9, %v10203_v24  ;;  %v3805_v16 = vmul.f32 %v3797_v21, %v10212_v27 }
 0x9ae   : >> { %7749 = vtanh.f32 %v3823_v17  ;;  %v3810_v41 = vmul.f32 %v3802_v8, %v10208_v10  ;;  %v3803_v12 = vmul.f32 %v3795_v18, %v10217_v32  ;;  %v6939_v59 = vpop.f32.mrb[32].mxu1 }
 0x9af   : >> { %v3813_v46 = vmul.f32 %v3805_v16, %v10212_v27  ;;  %v4296_v51 = vpop.f32.mrb[33].mxu1  ;;  %v3820_v7 = vadd.f32 %v3812_v29, %v10203_v24  ;;  %v10235_v21 = vadd.f32 %v6939_v59, %v11595_v34 }
 0x9b0   : >> { %v3811_v6 = vmul.f32 %v3803_v12, %v10217_v32  ;;  %v10231_v4 = vadd.f32 %v11595_v34, %v4296_v51  ;;  %v6940_v28 = vpop.f32.mrb[34].mxu1  ;;  %v3818_v9 = vadd.f32 %v3810_v41, %v10208_v10 }
 0x9b1   : >> { %v4299_v17 = vpop.f32.mrb[35].mxu1  ;;  %v3821_v18 = vadd.f32 %v3813_v46, %v10212_v27  ;;  %v3828_v8 = vmul.f32 0.7978846, %v3820_v7  ;;  %v10247_v7 = vadd.f32 %v6940_v28, %v11595_v34 }
 0x9b2   : >> { %v10239_v16 = vadd.f32 %v11595_v34, %v4299_v17  ;;  %v4327_v29 = vsel %vm1191_vm7, %v10231_v4, 0.0  ;;  %v3819_v12 = vadd.f32 %v3811_v6, %v10217_v32  ;;  %v3826_v51 = vmul.f32 0.7978846, %v3818_v9 }
 0x9b3   : >> { %4328 = vadd.xlane.f32.xlu0 %v4327_v29  ;;  %v3829_v11 = vmul.f32 0.7978846, %v3821_v18  ;;  %7751 = vtanh.f32 %v3828_v8  ;;  %v4333_v6 = vsel %vm1191_vm7, %v10235_v21, 0.0  ;;  %v3784_v8 = vmul.f32 0.5, %v10178_v60 }
 0x9b4   : >> { %v4330_v59 = vsel %vm1191_vm7, %v10239_v16, 0.0  ;;  %v3827_v50 = vmul.f32 0.7978846, %v3819_v12  ;;  %7753 = vtanh.f32 %v3826_v51  ;;  %v3785_v29 = vmul.f32 0.5, %v10185_v19 }
 0x9b5   : >> { %v7744_v41 = vpop.eup %7743  ;;  %4331 = vadd.xlane.f32.xlu1 %v4330_v59  ;;  %7755 = vtanh.f32 %v3829_v11  ;;  %v3782_v11 = vmul.f32 0.5, %v10181_v48  ;;  %v3783_v59 = vmul.f32 0.5, %v10189_v1  ;;  %v4336_v60 = vsel %vm1191_vm7, %v10247_v7, 0.0 }
 0x9b6   : >> { %v7746_v46 = vpop.eup %7745  ;;  %v3840_v17 = vadd.f32 1.0, %v7744_v41  ;;  %v6943_v20 = vpop.f32.mrb[36].mxu1  ;;  %7757 = vtanh.f32 %v3827_v50 }
 0x9b7   : >> { %v7748_v3 = vpop.eup %7747  ;;  %v3838_v9 = vadd.f32 1.0, %v7746_v46  ;;  %v4312_v12 = vpop.f32.mrb[37].mxu1  ;;  %4334 = vadd.xlane.f32.xlu0 %v4333_v6  ;;  %v10259_v46 = vadd.f32 %v6943_v20, %v11595_v34 }
 0x9b8   : >> { %v7750_v18 = vpop.eup %7749  ;;  %v3841_v51 = vadd.f32 1.0, %v7748_v3  ;;  %v10254_v28 = vadd.f32 %v11595_v34, %v4312_v12  ;;  %v6944_v41 = vpop.f32.mrb[38].mxu1  ;;  %v3848_v19 = vmul.f32 %v3840_v17, %v3784_v8 }
 0x9b9   : >> { %v3839_v43 = vadd.f32 1.0, %v7750_v18  ;;  %v4315_v50 = vpop.f32.mrb[39].mxu1  ;;  %v3846_v12 = vmul.f32 %v3838_v9, %v3782_v11  ;;  %v10269_v56 = vadd.f32 %v6944_v41, %v11595_v34  ;;  %v4345_v17 = vsel %vm1191_vm7, %v10259_v46, 0.0 }
 0x9ba   : >> { %v3849_v26 = vmul.f32 %v3841_v51, %v3785_v29  ;;  %v10264_v3 = vadd.f32 %v11595_v34, %v4315_v50  ;;  %v4339_v6 = vsel %vm1191_vm7, %v10254_v28, 0.0  ;;  %v3789_v11 = vmul.f32 0.5, %v10212_v27 }
 0x9bb   : >> { %v3847_v48 = vmul.f32 %v3839_v43, %v3783_v59  ;;  %4340 = vadd.xlane.f32.xlu1 %v4339_v6  ;;  %4337 = vadd.xlane.f32.xlu0 %v4336_v60  ;;  %v3786_v59 = vmul.f32 0.5, %v10208_v10  ;;  %v3787_v50 = vmul.f32 0.5, %v10217_v32 }
 0x9bc   : >> { %v3855_v1 = vpack.c.bf16 %v3849_v26, %v3848_v19  ;;  %v4342_v8 = vsel %vm1191_vm7, %v10264_v3, 0.0  ;;  %v3788_v26 = vmul.f32 0.5, %v10203_v24  ;;  %v4348_v19 = vsel %vm1191_vm7, %v10269_v56, 0.0 }
 0x9bd   : >> { %v3854_v18 = vpack.c.bf16 %v3847_v48, %v3846_v12  ;;  %v7752_v20 = vpop.eup %7751 }
 0x9be   : >> { %v7754_v13 = vpop.eup %7753  ;;  %v3844_v29 = vadd.f32 1.0, %v7752_v20 }
 0x9bf   : >> { %6925 = vmatprep.mubr.bf16.mxu0 %v3854_v18  ;;  %v7756_v51 = vpop.eup %7755  ;;  %4346 = vadd.xlane.f32.xlu1 %v4345_v17  ;;  %v3842_v43 = vadd.f32 1.0, %v7754_v13 }
 0x9c0   : >> { %4343 = vadd.xlane.f32.xlu0 %v4342_v8  ;;  %v7758_v9 = vpop.eup %7757  ;;  %6926 = vmatmul.mubr.bf16.vlgmr.msra.gmra.mrb[8].mxu0 %v3855_v1  ;;  %v3845_v41 = vadd.f32 1.0, %v7756_v51  ;;  %v3852_v6 = vmul.f32 %v3844_v29, %v3788_v26 }
 0x9c1   : >> { %v3843_v60 = vadd.f32 1.0, %v7758_v9  ;;  %v3850_v48 = vmul.f32 %v3842_v43, %v3786_v59 }
 0x9c2   : >> { %v3853_v12 = vmul.f32 %v3845_v41, %v3789_v11 }
 0x9c3   : >> { %v3851_v13 = vmul.f32 %v3843_v60, %v3787_v50 }
 0x9c4   : >> { %4349 = vadd.xlane.f32.xlu0 %v4348_v19  ;;  %v3857_v18 = vpack.c.bf16 %v3853_v12, %v3852_v6 }
 0x9c5   : >> { %v3856_v1 = vpack.c.bf16 %v3851_v13, %v3850_v48 }
 0x9c7   : >> { %6929 = vmatprep.mubr.bf16.mxu0 %v3856_v1 }
 0x9c8   : >> { %6930 = vmatmul.mubr.bf16.gmra.mrb[12].mxu0 %v3857_v18 }
 0xa40   : >> { %v4329_v24 = vpop.xlane.xlu0 %4328 }
 0xa41   : >> { %v4351_v27 = vmul.f32 0.03125, %v4329_v24 }
 0xa42   : >> { %v4332_v20 = vpop.xlane.xlu1 %4331 }
 0xa43   : >> { %v4352_v17 = vmul.f32 0.03125, %v4332_v20  ;;  %v10285_v51 = vsub.f32 %v10231_v4, %v4351_v27 }
 0xa44   : >> { %v4335_v10 = vpop.xlane.xlu0 %4334 }
 0xa45   : >> { %v4353_v8 = vmul.f32 0.03125, %v4335_v10  ;;  %v10282_v32 = vsub.f32 %v10239_v16, %v4352_v17  ;;  %v4367_v16 = vmul.f32 %v10285_v51, %v10285_v51 }
 0xa47   : >> { %v4368_v29 = vmul.f32 %v10282_v32, %v10282_v32  ;;  %v10290_v43 = vsub.f32 %v10235_v21, %v4353_v8  ;;  %v4375_v13 = vsel %vm1191_vm7, %v4367_v16, 0.0 }
 0xa48   : >> { %v4341_v9 = vpop.xlane.xlu1 %4340  ;;  %v4338_v26 = vpop.xlane.xlu0 %4337 }
 0xa49   : >> { %v4354_v11 = vmul.f32 0.03125, %v4338_v26  ;;  %v4378_v41 = vsel %vm1191_vm7, %v4368_v29, 0.0  ;;  %v4369_v59 = vmul.f32 %v10290_v43, %v10290_v43  ;;  %v4355_v4 = vmul.f32 0.03125, %v4341_v9 }
 0xa4a   : >> { %4379 = vadd.xlane.f32.xlu0 %v4378_v41  ;;  %v7673_v41 = vld [vmem:[#allocation15] sm:$0xff]  }
 0xa4b   : >> { %v4381_v50 = vsel %vm1191_vm7, %v4369_v59, 0.0  ;;  %v10299_v60 = vsub.f32 %v10247_v7, %v4354_v11  ;;  %v10312_v7 = vsub.f32 %v10254_v28, %v4355_v4  ;;  %v7612_v11 = vpack.i.bf16 %v10148_v2, %v10143_v14  ;;  %v7674_v59 = vld [vmem:[#allocation15 + $0x8] sm:$0xff]   ;;  %6945 = vmatprep.subr.bf16.mxu1 %v7673_v41 }
 0xa4c   : >> { %v4347_v21 = vpop.xlane.xlu1 %4346  ;;  %4382 = vadd.xlane.f32.xlu1 %v4381_v50  ;;  %6946 = vmatpush3.bf16.msra.mxu1 %v7673_v41 }
 0xa4d   : >> { %v4344_v19 = vpop.xlane.xlu0 %4343  ;;  %v4357_v6 = vmul.f32 0.03125, %v4347_v21  ;;  %v4370_v48 = vmul.f32 %v10299_v60, %v10299_v60  ;;  %6947 = vmatprep.subr.bf16.mxu1 %v7674_v59 }
 0xa4e   : >> { %v4356_v12 = vmul.f32 0.03125, %v4344_v19 }
 0xa4f   : >> { %v4384_v18 = vsel %vm1191_vm7, %v4370_v48, 0.0  ;;  %v10306_v1 = vsub.f32 %v10259_v46, %v4357_v6 }
 0xa50   : >> { %v10309_v24 = vsub.f32 %v10264_v3, %v4356_v12  ;;  %4376 = vadd.xlane.f32.xlu1 %v4375_v13  ;;  %4385 = vadd.xlane.f32.xlu0 %v4384_v18  ;;  %v4371_v3 = vmul.f32 %v10312_v7, %v10312_v7 }
 0xa51   : >> { %v4350_v27 = vpop.xlane.xlu0 %4349  ;;  %v4373_v17 = vmul.f32 %v10306_v1, %v10306_v1  ;;  %6948 = vmatpush3.bf16.msra.mxu1 %v7674_v59 }
 0xa52   : >> { %v4358_v20 = vmul.f32 0.03125, %v4350_v27  ;;  %v4372_v10 = vmul.f32 %v10309_v24, %v10309_v24  ;;  %v4387_v9 = vsel %vm1191_vm7, %v4371_v3, 0.0 }
 0xa53   : >> { %v4393_v8 = vsel %vm1191_vm7, %v4373_v17, 0.0 }
 0xa54   : >> { %v4390_v46 = vsel %vm1191_vm7, %v4372_v10, 0.0  ;;  %v10323_v28 = vsub.f32 %v10269_v56, %v4358_v20  ;;  %4394 = vadd.xlane.f32.xlu1 %v4393_v8  ;;  %v7607_v56 = vpack.i.bf16 %v10099_v44, %v10094_v47 }
 0xa55   : >> { %4391 = vadd.xlane.f32.xlu0 %v4390_v46 }
 0xa56   : >> { %v4374_v29 = vmul.f32 %v10323_v28, %v10323_v28 }
 0xa58   : >> { %v4396_v26 = vsel %vm1191_vm7, %v4374_v29, 0.0  ;;  %4388 = vadd.xlane.f32.xlu1 %v4387_v9 }
 0xa59   : >> { %4397 = vadd.xlane.f32.xlu0 %v4396_v26 }
 0xa69   : >> { %7588 = vrot.lane.b32.xlu1 %v9959_v23, %s8338_s26  ;;  %v10342_v23 = vld [vmem:[#allocation14] sm:$0xff]  }
 0xa6a   : >> { %6981 = vmatprep.subr.bf16.mxu1 %v10342_v23 }
 0xa6d   : >> { %7598 = vrot.lane.b32.xlu1 %v9965_v33, %s8338_s26  ;;  %v7637_v33 = vpack.i.bf16 %v10138_v54, %v10133_v49 }
 0xa6f   : >> { %7593 = vrot.lane.b32.xlu0 %v9969_v25, %s8337_s12  ;;  %v7642_v25 = vpack.i.bf16 %v10169_v61, %v10164_v63 }
 0xa71   : >> { %7603 = vrot.lane.b32.xlu1 %v9975_v35, %s8337_s12 }
 0xa73   : >> { %7608 = vrot.lane.b32.xlu0 %v7607_v56, %s8336_s29 }
 0xa75   : >> { %7613 = vrot.lane.b32.xlu1 %v7612_v11, %s8336_s29 }
 0xa77   : >> { %7618 = vrot.lane.b32.xlu0 %v9988_v40, %s8338_s26 }
 0xa79   : >> { %7623 = vrot.lane.b32.xlu1 %v9993_v52, %s8337_s12 }
 0xa7b   : >> { %7628 = vrot.lane.b32.xlu0 %v9999_v5, %s8338_s26 }
 0xa7d   : >> { %7633 = vrot.lane.b32.xlu1 %v10007_v15, %s8337_s12 }
 0xa7f   : >> { %7638 = vrot.lane.b32.xlu0 %v7637_v33, %s8336_s29 }
 0xa81   : >> { %7643 = vrot.lane.b32.xlu1 %v7642_v25, %s8336_s29 }
 0xa93   : >> { %v10356_v35 = vpop.f32.mrb[8].mxu0 }
 0xa94   : >> { %v10358_v40 = vpop.f32.mrb[9].mxu0 }
 0xa95   : >> { %v10360_v52 = vpop.f32.mrb[10].mxu0 }
 0xa96   : >> { %v10362_v5 = vpop.f32.mrb[11].mxu0 }
 0xa9b   : >> { %v10364_v47 = vpop.f32.mrb[12].mxu0 }
 0xa9c   : >> { %v10366_v44 = vpop.f32.mrb[13].mxu0 }
 0xa9d   : >> { %v10368_v15 = vpop.f32.mrb[14].mxu0 }
 0xa9e   : >> { %v10370_v49 = vpop.f32.mrb[15].mxu0 }
 0xad7   : >> { %v4380_v54 = vpop.xlane.xlu0 %4379 }
 0xad8   : >> { %v4400_v14 = vmul.f32 0.03125, %v4380_v54 }
 0xad9   : >> { %v4383_v2 = vpop.xlane.xlu1 %4382 }
 0xada   : >> { %v4408_v63 = vadd.f32 1e-05, %v4400_v14  ;;  %v4401_v61 = vmul.f32 0.03125, %v4383_v2 }
 0xadc   : >> { %7759 = vrsqrt.f32 %v4408_v63  ;;  %v4409_v16 = vadd.f32 1e-05, %v4401_v61 }
 0xadd   : >> { %v4377_v4 = vpop.xlane.xlu1 %4376  ;;  %v4386_v50 = vpop.xlane.xlu0 %4385 }
 0xade   : >> { %7761 = vrsqrt.f32 %v4409_v16  ;;  %v4399_v21 = vmul.f32 0.03125, %v4377_v4  ;;  %v4402_v19 = vmul.f32 0.03125, %v4386_v50 }
 0xae0   : >> { %v4407_v6 = vadd.f32 1e-05, %v4399_v21  ;;  %v4410_v12 = vadd.f32 1e-05, %v4402_v19 }
 0xae1   : >> { %v4395_v48 = vpop.xlane.xlu1 %4394 }
 0xae2   : >> { %v4392_v13 = vpop.xlane.xlu0 %4391  ;;  %7763 = vrsqrt.f32 %v4407_v6  ;;  %v4405_v18 = vmul.f32 0.03125, %v4395_v48  ;;  %v6355_v48 = vld [vmem:[%s9705_s6 + $0x100] sm:$0xff] }
 0xae3   : >> { %v4404_v27 = vmul.f32 0.03125, %v4392_v13  ;;  %7765 = vrsqrt.f32 %v4410_v12  ;;  %v6356_v13 = vld [vmem:[%s9705_s6 + $0x108] sm:$0xff] }
 0xae4   : >> { %v4413_v20 = vadd.f32 1e-05, %v4405_v18 }
 0xae5   : >> { %v4412_v17 = vadd.f32 1e-05, %v4404_v27  ;;  %v4389_v10 = vpop.xlane.xlu1 %4388 }
 0xae6   : >> { %v4398_v8 = vpop.xlane.xlu0 %4397  ;;  %v7760_v46 = vpop.eup %7759  ;;  %7767 = vrsqrt.f32 %v4413_v20  ;;  %v4403_v3 = vmul.f32 0.03125, %v4389_v10  ;;  %v6357_v20 = vld [vmem:[%s9705_s6 + $0x110] sm:$0xff] }
 0xae7   : >> { %v4406_v29 = vmul.f32 0.03125, %v4398_v8  ;;  %7769 = vrsqrt.f32 %v4412_v17  ;;  %v4424_v9 = vmul.f32 %v7760_v46, %v10282_v32 }
 0xae8   : >> { %v7762_v26 = vpop.eup %7761  ;;  %v4411_v56 = vadd.f32 1e-05, %v4403_v3 }
 0xae9   : >> { %v4414_v11 = vadd.f32 1e-05, %v4406_v29  ;;  %v4425_v41 = vmul.f32 %v7762_v26, %v10290_v43  ;;  %v7589_v59 = vpop.permute.xlu1 %7588  ;;  %v4432_v25 = vmul.f32 %v11594_v37, %v4424_v9 }
 0xaea   : >> { %v7594_v33 = vpop.permute.xlu0 %7593  ;;  %7771 = vrsqrt.f32 %v4411_v56  ;;  %v7591_v6 = vunpack.i.h.bf16 %v7589_v59  ;;  %v7590_v8 = vunpack.i.l.bf16 %v7589_v59 }
 0xaeb   : >> { %7773 = vrsqrt.f32 %v4414_v11  ;;  %v4433_v14 = vmul.f32 %v11594_v37, %v4425_v41  ;;  %v4440_v4 = vadd.f32 %v11593_v38, %v4432_v25  ;;  %v7596_v12 = vunpack.i.h.bf16 %v7594_v33 }
 0xaec   : >> { %v7764_v54 = vpop.eup %7763  ;;  %v7595_v46 = vunpack.i.l.bf16 %v7594_v33 }
 0xaed   : >> { %v7766_v2 = vpop.eup %7765  ;;  %v10376_v63 = vpop.permute.xlu1 %7598  ;;  %v4423_v61 = vmul.f32 %v7764_v54, %v10285_v51  ;;  %v4441_v21 = vadd.f32 %v11593_v38, %v4433_v14  ;;  %v10397_v9 = vadd.f32 %v6356_v13, %v4440_v4  ;;  %v4974_v11 = vsel %vm848_vm2, %v7591_v6, %v7596_v12  ;;  %v7676_v4 = vld [vmem:[#allocation14 + $0x8] sm:$0xff]  }
 0xaee   : >> { %v7609_v32 = vpop.permute.xlu0 %7608  ;;  %v4426_v43 = vmul.f32 %v7766_v2, %v10299_v60  ;;  %v6358_v60 = vld [vmem:[%s9705_s6 + $0x118] sm:$0xff]  ;;  %v7600_v6 = vunpack.i.l.bf16 %v10376_v63  ;;  %v6360_v13 = vld [vmem:[%s9705_s6 + $0x128] sm:$0xff] }
 0xaef   : >> { %v4431_v16 = vmul.f32 %v11594_v37, %v4423_v61  ;;  %v7611_v41 = vunpack.i.h.bf16 %v7609_v32  ;;  %v10401_v25 = vadd.f32 %v6357_v20, %v4441_v21  ;;  %v7610_v2 = vunpack.i.l.bf16 %v7609_v32 }
 0xaf0   : >> { %v7768_v50 = vpop.eup %7767  ;;  %v4434_v19 = vmul.f32 %v11594_v37, %v4426_v43  ;;  %v4973_v43 = vsel %vm848_vm2, %v7590_v8, %v7595_v46 }
 0xaf1   : >> { %v7770_v18 = vpop.eup %7769  ;;  %v10386_v27 = vpop.permute.xlu1 %7603  ;;  %v4439_v51 = vadd.f32 %v11593_v38, %v4431_v16  ;;  %v4429_v3 = vmul.f32 %v7768_v50, %v10306_v1  ;;  %v4982_v12 = vsel %vm2616_vm8, %v4974_v11, %v7611_v41  ;;  %v6361_v11 = vld [vmem:[%s9705_s6 + $0x130] sm:$0xff]  ;;  %v6362_v41 = vld [vmem:[%s9705_s6 + $0x138] sm:$0xff] }
 0xaf2   : >> { %v10391_v17 = vpop.permute.xlu0 %7618  ;;  %v4442_v10 = vadd.f32 %v11593_v38, %v4434_v19  ;;  %v4428_v26 = vmul.f32 %v7770_v18, %v10309_v24  ;;  %v7601_v19 = vunpack.i.h.bf16 %v10376_v63  ;;  %v4981_v18 = vsel %vm2616_vm8, %v4973_v43, %v7610_v2 }
 0xaf3   : >> { %v10395_v29 = vadd.f32 %v6355_v48, %v4439_v51  ;;  %v4437_v32 = vmul.f32 %v11594_v37, %v4429_v3  ;;  %v6359_v48 = vld [vmem:[%s9705_s6 + $0x120] sm:$0xff]  ;;  %v7621_v51 = vunpack.i.h.bf16 %v10391_v17 }
 0xaf4   : >> { %v7772_v56 = vpop.eup %7771  ;;  %v10403_v54 = vadd.f32 %v6358_v60, %v4442_v10  ;;  %v4436_v24 = vmul.f32 %v11594_v37, %v4428_v26  ;;  %v7605_v26 = vunpack.i.l.bf16 %v10386_v27 }
 0xaf5   : >> { %v7774_v14 = vpop.eup %7773  ;;  %v4455_v59 = vpack.c.bf16 %v10397_v9, %v10395_v29  ;;  %v7614_v1 = vpop.permute.xlu1 %7613  ;;  %v4427_v33 = vmul.f32 %v7772_v56, %v10312_v7  ;;  %v4445_v46 = vadd.f32 %v11593_v38, %v4437_v32 }
 0xaf6   : >> { %v10409_v61 = vpop.permute.xlu0 %7628  ;;  %v4456_v16 = vpack.c.bf16 %v10403_v54, %v10401_v25  ;;  %v4444_v21 = vadd.f32 %v11593_v38, %v4436_v24  ;;  %v4430_v7 = vmul.f32 %v7774_v14, %v10323_v28  ;;  %v7620_v28 = vunpack.i.l.bf16 %v10391_v17  ;;  %v7920_v24 = vld [vmem:[%s9467_s28 + $0x188] sm:$0xff] }
 0xaf7   : >> { %6949 = vmatprep.mubr.msk.bf16.mxu1 %vm1191_vm7, %v4455_v59  ;;  %v4435_v50 = vmul.f32 %v11594_v37, %v4427_v33  ;;  %v7616_v14 = vunpack.i.h.bf16 %v7614_v1  ;;  %v7919_v59 = vld [vmem:[%s9467_s28 + $0x180] sm:$0xff]  ;;  %v4990_v43 = vsel %vm2625_vm13, %v4982_v12, %v7920_v24 }
 0xaf8   : >> { %6950 = vmatmul.mubr.msk.bf16.vlgmr.msra.gmra.mrb[40].mxu1 %vm1191_vm7, %v4456_v16  ;;  %v4438_v8 = vmul.f32 %v11594_v37, %v4430_v7  ;;  %v10436_v17 = vadd.f32 %v6360_v13, %v4444_v21  ;;  %v4989_v33 = vsel %vm2625_vm13, %v4981_v18, %v7919_v59  ;;  %v7615_v16 = vunpack.i.l.bf16 %v7614_v1 }
 0xaf9   : >> { %6982 = vmatpush3.bf16.msra.mxu1 %v10342_v23  ;;  %v7624_v20 = vpop.permute.xlu1 %7623  ;;  %v4443_v63 = vadd.f32 %v11593_v38, %v4435_v50  ;;  %v7606_v23 = vunpack.i.h.bf16 %v10386_v27  ;;  %v10449_v13 = vadd.f32 %v6361_v11, %v4445_v46  ;;  %v4975_v18 = vsel %vm848_vm2, %v7600_v6, %v7605_v26  ;;  %v7922_v26 = vld [vmem:[%s9467_s28 + $0x1a8] sm:$0xff] }
 0xafa   : >> { %v7626_v60 = vunpack.i.h.bf16 %v7624_v20  ;;  %v7625_v10 = vunpack.i.l.bf16 %v7624_v20  ;;  %6983 = vmatprep.subr.bf16.mxu1 %v7676_v4  ;;  %v7639_v3 = vpop.permute.xlu0 %7638  ;;  %v4446_v2 = vadd.f32 %v11593_v38, %v4438_v8  ;;  %v5007_v12 = vpack.c.bf16 %v4990_v43, %v4989_v33 }
 0xafb   : >> { %v10434_v56 = vadd.f32 %v6359_v48, %v4443_v63  ;;  %v7641_v50 = vunpack.i.h.bf16 %v7639_v3  ;;  %v7640_v21 = vunpack.i.l.bf16 %v7639_v3  ;;  %11610 = vst [vmem:[#allocation85_spill] sm:$0xff] %v10449_v13  ;;  %v4976_v1 = vsel %vm848_vm2, %v7601_v19, %v7606_v23  ;;  %v7921_v3 = vld [vmem:[%s9467_s28 + $0x1a0] sm:$0xff] }
 0xafc   : >> { %v4977_v7 = vsel %vm848_vm2, %v7620_v28, %v7625_v10  ;;  %v4978_v48 = vsel %vm848_vm2, %v7621_v51, %v7626_v60  ;;  %v10451_v20 = vadd.f32 %v6362_v41, %v4446_v2  ;;  %v4983_v63 = vsel %vm2616_vm8, %v4975_v18, %v7615_v16  ;;  %v7923_v41 = vld [vmem:[%s9467_s28 + $0x190] sm:$0xff]  ;;  %v7924_v2 = vld [vmem:[%s9467_s28 + $0x198] sm:$0xff] }
 0xafd   : >> { %v4457_v32 = vpack.c.bf16 %v10436_v17, %v10434_v56  ;;  %6984 = vmatpush3.bf16.msra.mxu1 %v7676_v4  ;;  %v7634_v27 = vpop.permute.xlu1 %7633  ;;  %v4985_v28 = vsel %vm2616_vm8, %v4977_v7, %v7640_v21  ;;  %v4986_v51 = vsel %vm2616_vm8, %v4978_v48, %v7641_v50  ;;  %v4984_v6 = vsel %vm2616_vm8, %v4976_v1, %v7616_v14  ;;  %v7925_v21 = vld [vmem:[%s9467_s28 + $0x1b0] sm:$0xff]  ;;  %v7926_v48 = vld [vmem:[%s9467_s28 + $0x1b8] sm:$0xff] }
 0xafe   : >> { %11611 = vst [vmem:[#allocation86_spill] sm:$0xff] %v10451_v20  ;;  %v4458_v4 = vpack.c.bf16 %v10451_v20, %v10449_v13  ;;  %v7631_v19 = vunpack.i.h.bf16 %v10409_v61  ;;  %v7630_v60 = vunpack.i.l.bf16 %v10409_v61  ;;  %v7636_v10 = vunpack.i.h.bf16 %v7634_v27 }
 0xaff   : >> { %6953 = vmatprep.mubr.msk.bf16.mxu1 %vm1191_vm7, %v4457_v32  ;;  %v7635_v8 = vunpack.i.l.bf16 %v7634_v27  ;;  %v4993_v23 = vsel %vm2625_vm13, %v4985_v28, %v7921_v3  ;;  %v4994_v11 = vsel %vm2625_vm13, %v4986_v51, %v7922_v26  ;;  %v4991_v14 = vsel %vm2625_vm13, %v4983_v63, %v7923_v41  ;;  %v7679_v28 = vld [vmem:[#allocation17 + $0x10] sm:$0xff]   ;;  %v7680_v51 = vld [vmem:[#allocation17 + $0x18] sm:$0xff]   ;;  %v7681_v63 = vld [vmem:[#allocation17 + $0x20] sm:$0xff]  }
 0xb00   : >> { %6954 = vmatmul.mubr.msk.bf16.gmra.mrb[44].mxu1 %vm1191_vm7, %v4458_v4  ;;  %v4992_v59 = vsel %vm2625_vm13, %v4984_v6, %v7924_v2  ;;  %v4980_v43 = vsel %vm848_vm2, %v7631_v19, %v7636_v10  ;;  %v5009_v16 = vpack.c.bf16 %v4994_v11, %v4993_v23  ;;  %v7677_v4 = vld [vmem:[#allocation17] sm:$0xff]   ;;  %v7682_v6 = vld [vmem:[#allocation17 + $0x28] sm:$0xff]   ;;  %v7683_v19 = vld [vmem:[#allocation17 + $0x30] sm:$0xff]  }
 0xb01   : >> { %6985 = vmatprep.mubr.msk.bf16.mxu1 %vm1191_vm7, %v5007_v12  ;;  %v7644_v46 = vpop.permute.xlu1 %7643  ;;  %v4979_v24 = vsel %vm848_vm2, %v7630_v60, %v7635_v8  ;;  %v5008_v32 = vpack.c.bf16 %v4992_v59, %v4991_v14  ;;  %6957 = vmatprep.subr.bf16.mxu0 %v7677_v4  ;;  %v7678_v12 = vld [vmem:[#allocation17 + $0x8] sm:$0xff]   ;;  %v7684_v60 = vld [vmem:[#allocation17 + $0x38] sm:$0xff]  }
 0xb02   : >> { %v7646_v61 = vunpack.i.h.bf16 %v7644_v46  ;;  %v7645_v33 = vunpack.i.l.bf16 %v7644_v46  ;;  %6958 = vmatpush3.bf16.msra.mxu0 %v7677_v4  ;;  %v10485_v10 = vld [vmem:[#allocation20] ss:$0 sm:$0xff] }
 0xb03   : >> { %6959 = vmatprep.subr.bf16.mxu0 %v7678_v12 }
 0xb04   : >> { %v4987_v27 = vsel %vm2616_vm8, %v4979_v24, %v7645_v33  ;;  %v4988_v50 = vsel %vm2616_vm8, %v4980_v43, %v7646_v61 }
 0xb05   : >> { %v4995_v7 = vsel %vm2625_vm13, %v4987_v27, %v7925_v21  ;;  %v4996_v18 = vsel %vm2625_vm13, %v4988_v50, %v7926_v48 }
 0xb06   : >> { %v5010_v1 = vpack.c.bf16 %v4996_v18, %v4995_v7  ;;  %6960 = vmatpush3.bf16.msra.mxu0 %v7678_v12 }
 0xb07   : >> { %6961 = vmatprep.subr.bf16.mxu0 %v7679_v28 }
 0xb08   : >> { %6986 = vmatmul.mubr.msk.bf16.vlgmr.msra.gmra.mrb[48].mxu1 %vm1191_vm7, %v5008_v32 }
 0xb09   : >> { %6989 = vmatprep.mubr.msk.bf16.mxu1 %vm1191_vm7, %v5009_v16 }
 0xb0a   : >> { %6962 = vmatpush3.bf16.msra.mxu0 %v7679_v28 }
 0xb0b   : >> { %6963 = vmatprep.subr.bf16.mxu0 %v7680_v51 }
 0xb0e   : >> { %6964 = vmatpush3.bf16.msra.mxu0 %v7680_v51 }
 0xb0f   : >> { %6965 = vmatprep.subr.bf16.mxu0 %v7681_v63 }
 0xb10   : >> { %6990 = vmatmul.mubr.msk.bf16.gmra.mrb[52].mxu1 %vm1191_vm7, %v5010_v1 }
 0xb12   : >> { %6966 = vmatpush3.bf16.msra.mxu0 %v7681_v63 }
 0xb13   : >> { %6967 = vmatprep.subr.bf16.mxu0 %v7682_v6 }
 0xb16   : >> { %6968 = vmatpush3.bf16.msra.mxu0 %v7682_v6 }
 0xb17   : >> { %6969 = vmatprep.subr.bf16.mxu0 %v7683_v19 }
 0xb1a   : >> { %6970 = vmatpush3.bf16.msra.mxu0 %v7683_v19 }
 0xb1b   : >> { %6971 = vmatprep.subr.bf16.mxu0 %v7684_v60 }
 0xb1e   : >> { %6972 = vmatpush3.bf16.msra.mxu0 %v7684_v60 }
 0xbcb   : >> { %v6951_v8 = vpop.f32.mrb[40].mxu1 }
 0xbcc   : >> { %v10488_v46 = vadd.f32 %v6951_v8, %v10485_v10  ;;  %v4528_v3 = vpop.f32.mrb[41].mxu1 }
 0xbcd   : >> { %v10491_v23 = vadd.f32 %v10485_v10, %v4528_v3  ;;  %v6952_v26 = vpop.f32.mrb[42].mxu1 }
 0xbce   : >> { %v4569_v11 = vmul.f32 0.044715, %v10488_v46  ;;  %v10495_v41 = vadd.f32 %v6952_v26, %v10485_v10  ;;  %v4531_v14 = vpop.f32.mrb[43].mxu1 }
 0xbcf   : >> { %v4567_v2 = vmul.f32 0.044715, %v10491_v23  ;;  %v10499_v59 = vadd.f32 %v10485_v10, %v4531_v14 }
 0xbd0   : >> { %v4577_v61 = vmul.f32 %v4569_v11, %v10488_v46  ;;  %v4570_v33 = vmul.f32 0.044715, %v10495_v41 }
 0xbd1   : >> { %v4575_v24 = vmul.f32 %v4567_v2, %v10491_v23  ;;  %v4568_v43 = vmul.f32 0.044715, %v10499_v59 }
 0xbd2   : >> { %v4585_v16 = vmul.f32 %v4577_v61, %v10488_v46  ;;  %v4578_v32 = vmul.f32 %v4570_v33, %v10495_v41 }
 0xbd3   : >> { %v4583_v27 = vmul.f32 %v4575_v24, %v10491_v23  ;;  %v4576_v50 = vmul.f32 %v4568_v43, %v10499_v59  ;;  %v6955_v18 = vpop.f32.mrb[44].mxu1 }
 0xbd4   : >> { %v4593_v21 = vadd.f32 %v4585_v16, %v10488_v46  ;;  %v4586_v7 = vmul.f32 %v4578_v32, %v10495_v41  ;;  %v10515_v28 = vadd.f32 %v6955_v18, %v10485_v10  ;;  %v4544_v51 = vpop.f32.mrb[45].mxu1 }
 0xbd5   : >> { %v4584_v48 = vmul.f32 %v4576_v50, %v10499_v59  ;;  %v4591_v1 = vadd.f32 %v4583_v27, %v10491_v23  ;;  %v10518_v63 = vadd.f32 %v10485_v10, %v4544_v51  ;;  %v6956_v6 = vpop.f32.mrb[46].mxu1 }
 0xbd6   : >> { %v4601_v4 = vmul.f32 0.7978846, %v4593_v21  ;;  %v4594_v12 = vadd.f32 %v4586_v7, %v10495_v41  ;;  %v4573_v3 = vmul.f32 0.044715, %v10515_v28  ;;  %v10523_v26 = vadd.f32 %v6956_v6, %v10485_v10  ;;  %v4547_v11 = vpop.f32.mrb[47].mxu1 }
 0xbd7   : >> { %v4592_v19 = vadd.f32 %v4584_v48, %v10499_v59  ;;  %v4599_v60 = vmul.f32 0.7978846, %v4591_v1  ;;  %v4571_v14 = vmul.f32 0.044715, %v10518_v63  ;;  %v10527_v2 = vadd.f32 %v10485_v10, %v4547_v11 }
 0xbd8   : >> { %7775 = vtanh.f32 %v4601_v4  ;;  %v4602_v8 = vmul.f32 0.7978846, %v4594_v12  ;;  %v4581_v33 = vmul.f32 %v4573_v3, %v10515_v28  ;;  %v4574_v24 = vmul.f32 0.044715, %v10523_v26 }
 0xbd9   : >> { %v4600_v61 = vmul.f32 0.7978846, %v4592_v19  ;;  %7777 = vtanh.f32 %v4599_v60  ;;  %v4579_v43 = vmul.f32 %v4571_v14, %v10518_v63  ;;  %v4572_v16 = vmul.f32 0.044715, %v10527_v2 }
 0xbda   : >> { %7779 = vtanh.f32 %v4602_v8  ;;  %v4589_v32 = vmul.f32 %v4581_v33, %v10515_v28  ;;  %v4582_v27 = vmul.f32 %v4574_v24, %v10523_v26 }
 0xbdb   : >> { %7781 = vtanh.f32 %v4600_v61  ;;  %v4587_v50 = vmul.f32 %v4579_v43, %v10518_v63  ;;  %v4580_v21 = vmul.f32 %v4572_v16, %v10527_v2  ;;  %v6987_v7 = vpop.f32.mrb[48].mxu1 }
 0xbdc   : >> { %v4590_v48 = vmul.f32 %v4582_v27, %v10523_v26  ;;  %v5073_v18 = vpop.f32.mrb[49].mxu1  ;;  %v4597_v1 = vadd.f32 %v4589_v32, %v10515_v28  ;;  %v10545_v19 = vadd.f32 %v6987_v7, %v11595_v34  ;;  %v4561_v7 = vmul.f32 0.5, %v10488_v46 }
 0xbdd   : >> { %v4588_v4 = vmul.f32 %v4580_v21, %v10527_v2  ;;  %v10541_v12 = vadd.f32 %v11595_v34, %v5073_v18  ;;  %v6988_v51 = vpop.f32.mrb[50].mxu1  ;;  %v4595_v6 = vadd.f32 %v4587_v50, %v10518_v63  ;;  %v4560_v46 = vmul.f32 0.5, %v10499_v59 }
 0xbde   : >> { %v5076_v60 = vpop.f32.mrb[51].mxu1  ;;  %v4598_v8 = vadd.f32 %v4590_v48, %v10523_v26  ;;  %v4605_v3 = vmul.f32 0.7978846, %v4597_v1  ;;  %v10558_v48 = vadd.f32 %v6988_v51, %v11595_v34 }
 0xbdf   : >> { %v10549_v11 = vadd.f32 %v11595_v34, %v5076_v60  ;;  %v5104_v14 = vsel %vm1191_vm7, %v10541_v12, 0.0  ;;  %v4596_v61 = vadd.f32 %v4588_v4, %v10527_v2  ;;  %v4603_v33 = vmul.f32 0.7978846, %v4595_v6 }
 0xbe0   : >> { %5105 = vadd.xlane.f32.xlu0 %v5104_v14  ;;  %v4606_v43 = vmul.f32 0.7978846, %v4598_v8  ;;  %7783 = vtanh.f32 %v4605_v3  ;;  %v4562_v4 = vmul.f32 0.5, %v10495_v41  ;;  %v5110_v60 = vsel %vm1191_vm7, %v10545_v19, 0.0 }
 0xbe1   : >> { %v5107_v32 = vsel %vm1191_vm7, %v10549_v11, 0.0  ;;  %v4604_v50 = vmul.f32 0.7978846, %v4596_v61  ;;  %7785 = vtanh.f32 %v4603_v33  ;;  %v4559_v14 = vmul.f32 0.5, %v10491_v23 }
 0xbe2   : >> { %v7776_v24 = vpop.eup %7775  ;;  %5108 = vadd.xlane.f32.xlu1 %v5107_v32  ;;  %7787 = vtanh.f32 %v4606_v43 }
 0xbe3   : >> { %v7778_v16 = vpop.eup %7777  ;;  %v4617_v27 = vadd.f32 1.0, %v7776_v24  ;;  %v6991_v6 = vpop.f32.mrb[52].mxu1  ;;  %7789 = vtanh.f32 %v4604_v50 }
 0xbe4   : >> { %v7780_v21 = vpop.eup %7779  ;;  %v4615_v18 = vadd.f32 1.0, %v7778_v16  ;;  %v5089_v3 = vpop.f32.mrb[53].mxu1  ;;  %5111 = vadd.xlane.f32.xlu0 %v5110_v60  ;;  %v5113_v16 = vsel %vm1191_vm7, %v10558_v48, 0.0  ;;  %v10571_v50 = vadd.f32 %v6991_v6, %v11595_v34 }
 0xbe5   : >> { %v7782_v1 = vpop.eup %7781  ;;  %v4618_v8 = vadd.f32 1.0, %v7780_v21  ;;  %v10566_v61 = vadd.f32 %v11595_v34, %v5089_v3  ;;  %v6992_v33 = vpop.f32.mrb[54].mxu1  ;;  %v4625_v24 = vmul.f32 %v4617_v27, %v4561_v7 }
 0xbe6   : >> { %v4616_v51 = vadd.f32 1.0, %v7782_v1  ;;  %v5092_v41 = vpop.f32.mrb[55].mxu1  ;;  %v4623_v32 = vmul.f32 %v4615_v18, %v4559_v14  ;;  %v10579_v60 = vadd.f32 %v6992_v33, %v11595_v34  ;;  %v5122_v18 = vsel %vm1191_vm7, %v10571_v50, 0.0 }
 0xbe7   : >> { %v4626_v43 = vmul.f32 %v4618_v8, %v4562_v4  ;;  %v10574_v23 = vadd.f32 %v11595_v34, %v5092_v41  ;;  %v5116_v59 = vsel %vm1191_vm7, %v10566_v61, 0.0  ;;  %v4563_v33 = vmul.f32 0.5, %v10518_v63 }
 0xbe8   : >> { %v4624_v21 = vmul.f32 %v4616_v51, %v4560_v46  ;;  %5117 = vadd.xlane.f32.xlu1 %v5116_v59  ;;  %5114 = vadd.xlane.f32.xlu0 %v5113_v16  ;;  %v4565_v51 = vmul.f32 0.5, %v10515_v28  ;;  %v4564_v41 = vmul.f32 0.5, %v10527_v2 }
 0xbe9   : >> { %v4632_v1 = vpack.c.bf16 %v4626_v43, %v4625_v24  ;;  %v5119_v6 = vsel %vm1191_vm7, %v10574_v23, 0.0  ;;  %v4566_v24 = vmul.f32 0.5, %v10523_v26 }
 0xbea   : >> { %v4631_v27 = vpack.c.bf16 %v4624_v21, %v4623_v32  ;;  %v7784_v7 = vpop.eup %7783  ;;  %v5125_v32 = vsel %vm1191_vm7, %v10579_v60, 0.0 }
 0xbeb   : >> { %v7786_v4 = vpop.eup %7785  ;;  %v4621_v8 = vadd.f32 1.0, %v7784_v7 }
 0xbec   : >> { %6973 = vmatprep.mubr.bf16.mxu0 %v4631_v27  ;;  %v7788_v3 = vpop.eup %7787  ;;  %5123 = vadd.xlane.f32.xlu1 %v5122_v18  ;;  %v4619_v14 = vadd.f32 1.0, %v7786_v4 }
 0xbed   : >> { %6974 = vmatmul.mubr.bf16.vlgmr.msra.gmra.mrb[16].mxu0 %v4632_v1  ;;  %5120 = vadd.xlane.f32.xlu0 %v5119_v6  ;;  %v7790_v46 = vpop.eup %7789  ;;  %v4622_v43 = vadd.f32 1.0, %v7788_v3  ;;  %v4629_v21 = vmul.f32 %v4621_v8, %v4565_v51 }
 0xbee   : >> { %v4620_v16 = vadd.f32 1.0, %v7790_v46  ;;  %v4627_v1 = vmul.f32 %v4619_v14, %v4563_v33 }
 0xbef   : >> { %v4630_v59 = vmul.f32 %v4622_v43, %v4566_v24 }
 0xbf0   : >> { %v4628_v27 = vmul.f32 %v4620_v16, %v4564_v41 }
 0xbf1   : >> { %5126 = vadd.xlane.f32.xlu0 %v5125_v32  ;;  %v4634_v7 = vpack.c.bf16 %v4630_v59, %v4629_v21 }
 0xbf2   : >> { %v4633_v4 = vpack.c.bf16 %v4628_v27, %v4627_v1 }
 0xbf4   : >> { %6977 = vmatprep.mubr.bf16.mxu0 %v4633_v4 }
 0xbf5   : >> { %6978 = vmatmul.mubr.bf16.gmra.mrb[20].mxu0 %v4634_v7 }
 0xc6d   : >> { %v5106_v28 = vpop.xlane.xlu0 %5105 }
 0xc6e   : >> { %v5128_v26 = vmul.f32 0.03125, %v5106_v28 }
 0xc6f   : >> { %v5109_v18 = vpop.xlane.xlu1 %5108 }
 0xc70   : >> { %v10592_v63 = vsub.f32 %v10541_v12, %v5128_v26  ;;  %v5129_v2 = vmul.f32 0.03125, %v5109_v18 }
 0xc71   : >> { %v5112_v6 = vpop.xlane.xlu0 %5111 }
 0xc72   : >> { %v10595_v3 = vsub.f32 %v10549_v11, %v5129_v2  ;;  %v5130_v8 = vmul.f32 0.03125, %v5112_v6  ;;  %v5144_v14 = vmul.f32 %v10592_v63, %v10592_v63 }
 0xc74   : >> { %v10600_v46 = vsub.f32 %v10545_v19, %v5130_v8  ;;  %v5152_v51 = vsel %vm1191_vm7, %v5144_v14, 0.0  ;;  %v5145_v24 = vmul.f32 %v10595_v3, %v10595_v3 }
 0xc75   : >> { %v5118_v43 = vpop.xlane.xlu1 %5117  ;;  %5153 = vadd.xlane.f32.xlu1 %v5152_v51  ;;  %v5115_v12 = vpop.xlane.xlu0 %5114 }
 0xc76   : >> { %v5132_v33 = vmul.f32 0.03125, %v5118_v43  ;;  %v5131_v41 = vmul.f32 0.03125, %v5115_v12  ;;  %v5155_v11 = vsel %vm1191_vm7, %v5145_v24, 0.0  ;;  %v5146_v16 = vmul.f32 %v10600_v46, %v10600_v46 }
 0xc77   : >> { %5156 = vadd.xlane.f32.xlu0 %v5155_v11  ;;  %v10644_v12 = vadd.f32 %v10020_v30, %v9452_v58  ;;  %v10659_v11 = vadd.f32 %v9452_v58, %v10030_v55 }
 0xc78   : >> { %v10609_v32 = vsub.f32 %v10566_v61, %v5132_v33  ;;  %v10612_v19 = vsub.f32 %v10558_v48, %v5131_v41  ;;  %v5158_v21 = vsel %vm1191_vm7, %v5146_v16, 0.0  ;;  %v10655_v41 = vadd.f32 %v10024_v31, %v9452_v58 }
 0xc79   : >> { %v5124_v59 = vpop.xlane.xlu1 %5123  ;;  %5159 = vadd.xlane.f32.xlu1 %v5158_v21  ;;  %v3200_v30 = vsel %vm1191_vm7, %v10644_v12, 0.0  ;;  %v10667_v16 = vadd.f32 %v10028_v22, %v9452_v58  ;;  %v10671_v31 = vadd.f32 %v9452_v58, %v10034_v0  ;;  %v3206_v55 = vsel %vm1191_vm7, %v10659_v11, 0.0 }
 0xc7a   : >> { %v5121_v1 = vpop.xlane.xlu0 %5120  ;;  %v5134_v27 = vmul.f32 0.03125, %v5124_v59  ;;  %v5148_v4 = vmul.f32 %v10609_v32, %v10609_v32  ;;  %v5147_v28 = vmul.f32 %v10612_v19, %v10612_v19  ;;  %v3203_v21 = vsel %vm1191_vm7, %v10655_v41, 0.0 }
 0xc7b   : >> { %v5133_v7 = vmul.f32 0.03125, %v5121_v1  ;;  %v10679_v59 = vadd.f32 %v10032_v42, %v9452_v58  ;;  %v10683_v22 = vadd.f32 %v9452_v58, %v10358_v40  ;;  %v3212_v0 = vsel %vm1191_vm7, %v10667_v16, 0.0 }
 0xc7c   : >> { %v10620_v26 = vsub.f32 %v10571_v50, %v5134_v27  ;;  %v5164_v48 = vsel %vm1191_vm7, %v5148_v4, 0.0  ;;  %v5161_v18 = vsel %vm1191_vm7, %v5147_v28, 0.0  ;;  %v10633_v50 = vadd.f32 %v9452_v58, %v10022_v45 }
 0xc7d   : >> { %v10623_v61 = vsub.f32 %v10574_v23, %v5133_v7  ;;  %5165 = vadd.xlane.f32.xlu1 %v5164_v48  ;;  %5162 = vadd.xlane.f32.xlu0 %v5161_v18  ;;  %v10648_v45 = vadd.f32 %v9452_v58, %v10026_v36  ;;  %v3209_v1 = vsel %vm1191_vm7, %v10671_v31, 0.0  ;;  %v10691_v27 = vadd.f32 %v10356_v35, %v9452_v58 }
 0xc7e   : >> { %v5127_v2 = vpop.xlane.xlu0 %5126  ;;  %v5150_v8 = vmul.f32 %v10620_v26, %v10620_v26  ;;  %v10695_v42 = vadd.f32 %v9452_v58, %v10362_v5  ;;  %v3987_v40 = vsel %vm1191_vm7, %v10683_v22, 0.0  ;;  %v3215_v7 = vsel %vm1191_vm7, %v10679_v59, 0.0 }
 0xc7f   : >> { %v5135_v6 = vmul.f32 0.03125, %v5127_v2  ;;  %v5149_v14 = vmul.f32 %v10623_v61, %v10623_v61  ;;  %v3197_v36 = vsel %vm1191_vm7, %v10648_v45, 0.0  ;;  %v10703_v4 = vadd.f32 %v10360_v52, %v9452_v58  ;;  %v7685_v2 = vld [vmem:[#allocation15] sm:$0xff]  }
 0xc80   : >> { %v5170_v51 = vsel %vm1191_vm7, %v5150_v8, 0.0  ;;  %v10707_v35 = vadd.f32 %v9452_v58, %v10366_v44  ;;  %v3993_v5 = vsel %vm1191_vm7, %v10691_v27, 0.0  ;;  %v3990_v28 = vsel %vm1191_vm7, %v10695_v42, 0.0  ;;  %6993 = vmatprep.subr.bf16.mxu1 %v7685_v2 }
 0xc81   : >> { %v10636_v23 = vsub.f32 %v10579_v60, %v5135_v6  ;;  %v5167_v24 = vsel %vm1191_vm7, %v5149_v14, 0.0  ;;  %5171 = vadd.xlane.f32.xlu1 %v5170_v51  ;;  %v3194_v60 = vsel %vm1191_vm7, %v10633_v50, 0.0  ;;  %v10715_v48 = vadd.f32 %v10364_v47, %v9452_v58  ;;  %v7686_v6 = vld [vmem:[#allocation15 + $0x8] sm:$0xff]   ;;  %6994 = vmatpush3.bf16.msra.mxu1 %v7685_v2 }
 0xc82   : >> { %5168 = vadd.xlane.f32.xlu0 %v5167_v24  ;;  %v10719_v52 = vadd.f32 %v9452_v58, %v10370_v49  ;;  %v3999_v44 = vsel %vm1191_vm7, %v10707_v35, 0.0  ;;  %v3996_v18 = vsel %vm1191_vm7, %v10703_v4, 0.0  ;;  %v10727_v8 = vadd.f32 %v10368_v15, %v9452_v58  ;;  %6995 = vmatprep.subr.bf16.mxu1 %v7686_v6 }
 0xc83   : >> { %v5151_v43 = vmul.f32 %v10636_v23, %v10636_v23  ;;  %v4005_v47 = vsel %vm1191_vm7, %v10715_v48, 0.0 }
 0xc84   : >> { %v4002_v49 = vsel %vm1191_vm7, %v10719_v52, 0.0  ;;  %v4008_v14 = vsel %vm1191_vm7, %v10727_v8, 0.0 }
 0xc85   : >> { %v5173_v33 = vsel %vm1191_vm7, %v5151_v43, 0.0  ;;  %3195 = vadd.xlane.f32.xlu1 %v3194_v60  ;;  %6996 = vmatpush3.bf16.msra.mxu1 %v7686_v6 }
 0xc86   : >> { %5174 = vadd.xlane.f32.xlu0 %v5173_v33 }
 0xc89   : >> { %3201 = vadd.xlane.f32.xlu1 %v3200_v30 }
 0xc8a   : >> { %3198 = vadd.xlane.f32.xlu0 %v3197_v36 }
 0xc8d   : >> { %3207 = vadd.xlane.f32.xlu1 %v3206_v55 }
 0xc8e   : >> { %3204 = vadd.xlane.f32.xlu0 %v3203_v21 }
 0xc91   : >> { %3213 = vadd.xlane.f32.xlu1 %v3212_v0 }
 0xc92   : >> { %3210 = vadd.xlane.f32.xlu0 %v3209_v1 }
 0xc95   : >> { %3988 = vadd.xlane.f32.xlu1 %v3987_v40 }
 0xc96   : >> { %3216 = vadd.xlane.f32.xlu0 %v3215_v7 }
 0xc99   : >> { %3994 = vadd.xlane.f32.xlu1 %v3993_v5 }
 0xc9a   : >> { %3991 = vadd.xlane.f32.xlu0 %v3990_v28 }
 0xc9d   : >> { %4000 = vadd.xlane.f32.xlu1 %v3999_v44 }
 0xc9e   : >> { %3997 = vadd.xlane.f32.xlu0 %v3996_v18 }
 0xca1   : >> { %4006 = vadd.xlane.f32.xlu1 %v4005_v47 }
 0xca2   : >> { %4003 = vadd.xlane.f32.xlu0 %v4002_v49 }
 0xca6   : >> { %4009 = vadd.xlane.f32.xlu0 %v4008_v14 }
 0xcc0   : >> { %v6975_v51 = vpop.f32.mrb[16].mxu0 }
 0xcc1   : >> { %v10736_v15 = vadd.f32 %v6975_v51, %v9452_v58  ;;  %v4733_v24 = vpop.f32.mrb[17].mxu0 }
 0xcc2   : >> { %v6976_v43 = vpop.f32.mrb[18].mxu0  ;;  %v10739_v60 = vadd.f32 %v9452_v58, %v4733_v24 }
 0xcc3   : >> { %v10742_v33 = vadd.f32 %v6976_v43, %v9452_v58  ;;  %v4736_v30 = vpop.f32.mrb[19].mxu0  ;;  %v4770_v36 = vsel %vm1191_vm7, %v10736_v15, 0.0 }
 0xcc4   : >> { %4771 = vadd.xlane.f32.xlu1 %v4770_v36  ;;  %v10747_v55 = vadd.f32 %v9452_v58, %v4736_v30  ;;  %v4764_v0 = vsel %vm1191_vm7, %v10739_v60, 0.0 }
 0xcc5   : >> { %v4773_v21 = vsel %vm1191_vm7, %v10742_v33, 0.0 }
 0xcc6   : >> { %4774 = vadd.xlane.f32.xlu0 %v4773_v21  ;;  %v4767_v1 = vsel %vm1191_vm7, %v10747_v55, 0.0 }
 0xcc8   : >> { %4765 = vadd.xlane.f32.xlu1 %v4764_v0  ;;  %v6979_v40 = vpop.f32.mrb[20].mxu0 }
 0xcc9   : >> { %v10756_v7 = vadd.f32 %v6979_v40, %v9452_v58  ;;  %v4749_v5 = vpop.f32.mrb[21].mxu0 }
 0xcca   : >> { %4768 = vadd.xlane.f32.xlu0 %v4767_v1  ;;  %v6980_v28 = vpop.f32.mrb[22].mxu0  ;;  %v10759_v44 = vadd.f32 %v9452_v58, %v4749_v5 }
 0xccb   : >> { %v10762_v18 = vadd.f32 %v6980_v28, %v9452_v58  ;;  %v4752_v2 = vpop.f32.mrb[23].mxu0  ;;  %v4782_v6 = vsel %vm1191_vm7, %v10756_v7, 0.0 }
 0xccc   : >> { %4783 = vadd.xlane.f32.xlu1 %v4782_v6  ;;  %v10767_v47 = vadd.f32 %v9452_v58, %v4752_v2  ;;  %v4776_v14 = vsel %vm1191_vm7, %v10759_v44, 0.0 }
 0xccd   : >> { %v4785_v49 = vsel %vm1191_vm7, %v10762_v18, 0.0 }
 0xcce   : >> { %4786 = vadd.xlane.f32.xlu0 %v4785_v49  ;;  %v4779_v51 = vsel %vm1191_vm7, %v10767_v47, 0.0 }
 0xcd0   : >> { %4777 = vadd.xlane.f32.xlu1 %v4776_v14 }
 0xcd2   : >> { %4780 = vadd.xlane.f32.xlu0 %v4779_v51 }
 0xd02   : >> { %v5154_v24 = vpop.xlane.xlu1 %5153 }
 0xd03   : >> { %v5176_v43 = vmul.f32 0.03125, %v5154_v24 }
 0xd04   : >> { %v5157_v30 = vpop.xlane.xlu0 %5156 }
 0xd05   : >> { %v5184_v36 = vadd.f32 1e-05, %v5176_v43  ;;  %v5177_v21 = vmul.f32 0.03125, %v5157_v30 }
 0xd06   : >> { %v5160_v0 = vpop.xlane.xlu1 %5159 }
 0xd07   : >> { %7791 = vrsqrt.f32 %v5184_v36  ;;  %v5185_v1 = vadd.f32 1e-05, %v5177_v21  ;;  %v5178_v40 = vmul.f32 0.03125, %v5160_v0 }
 0xd09   : >> { %7793 = vrsqrt.f32 %v5185_v1  ;;  %v5186_v5 = vadd.f32 1e-05, %v5178_v40 }
 0xd0a   : >> { %v5166_v28 = vpop.xlane.xlu1 %5165  ;;  %v5163_v2 = vpop.xlane.xlu0 %5162 }
 0xd0b   : >> { %7795 = vrsqrt.f32 %v5186_v5  ;;  %v5180_v6 = vmul.f32 0.03125, %v5166_v28  ;;  %v5179_v49 = vmul.f32 0.03125, %v5163_v2 }
 0xd0d   : >> { %v5188_v14 = vadd.f32 1e-05, %v5180_v6  ;;  %v5187_v34 = vadd.f32 1e-05, %v5179_v49  ;;  %v6394_v49 = vld [vmem:[%s9705_s6 + $0x180] sm:$0xff] }
 0xd0e   : >> { %v5172_v20 = vpop.xlane.xlu1 %5171 }
 0xd0f   : >> { %v5169_v51 = vpop.xlane.xlu0 %5168  ;;  %7797 = vrsqrt.f32 %v5188_v14  ;;  %v5182_v24 = vmul.f32 0.03125, %v5172_v20  ;;  %v6395_v14 = vld [vmem:[%s9705_s6 + $0x188] sm:$0xff] }
 0xd10   : >> { %v5181_v13 = vmul.f32 0.03125, %v5169_v51  ;;  %7799 = vrsqrt.f32 %v5187_v34 }
 0xd11   : >> { %v7792_v43 = vpop.eup %7791  ;;  %v5190_v30 = vadd.f32 1e-05, %v5182_v24 }
 0xd12   : >> { %v5189_v36 = vadd.f32 1e-05, %v5181_v13  ;;  %v5200_v0 = vmul.f32 %v7792_v43, %v10592_v63 }
 0xd13   : >> { %v5175_v21 = vpop.xlane.xlu0 %5174  ;;  %v7794_v1 = vpop.eup %7793  ;;  %7801 = vrsqrt.f32 %v5190_v30 }
 0xd14   : >> { %v5183_v40 = vmul.f32 0.03125, %v5175_v21  ;;  %7803 = vrsqrt.f32 %v5189_v36  ;;  %v5201_v5 = vmul.f32 %v7794_v1, %v10595_v3  ;;  %v5208_v28 = vmul.f32 %v11594_v37, %v5200_v0 }
 0xd15   : >> { %v7796_v2 = vpop.eup %7795 }
 0xd16   : >> { %v5191_v20 = vadd.f32 1e-05, %v5183_v40  ;;  %v5202_v34 = vmul.f32 %v7796_v2, %v10600_v46  ;;  %v5209_v6 = vmul.f32 %v11594_v37, %v5201_v5  ;;  %v5216_v13 = vadd.f32 %v11593_v38, %v5208_v28  ;;  %v6396_v2 = vld [vmem:[%s9705_s6 + $0x190] sm:$0xff] }
 0xd18   : >> { %7805 = vrsqrt.f32 %v5191_v20  ;;  %v5217_v63 = vadd.f32 %v11593_v38, %v5209_v6  ;;  %v5210_v3 = vmul.f32 %v11594_v37, %v5202_v34  ;;  %v10785_v43 = vadd.f32 %v6394_v49, %v5216_v13  ;;  %v6397_v20 = vld [vmem:[%s9705_s6 + $0x198] sm:$0xff] }
 0xd19   : >> { %v7798_v51 = vpop.eup %7797 }
 0xd1a   : >> { %v7800_v24 = vpop.eup %7799  ;;  %11612 = vst [vmem:[#allocation87_spill] sm:$0xff] %v10785_v43  ;;  %v10787_v30 = vadd.f32 %v6395_v14, %v5217_v63  ;;  %v5204_v46 = vmul.f32 %v7798_v51, %v10609_v32  ;;  %v5218_v1 = vadd.f32 %v11593_v38, %v5210_v3  ;;  %v6398_v3 = vld [vmem:[%s9705_s6 + $0x1a0] sm:$0xff] }
 0xd1b   : >> { %v5203_v36 = vmul.f32 %v7800_v24, %v10612_v19  ;;  %v6399_v24 = vld [vmem:[%s9705_s6 + $0x1a8] sm:$0xff] }
 0xd1c   : >> { %11613 = vst [vmem:[#allocation88_spill] sm:$0xff] %v10787_v30  ;;  %v5232_v21 = vpack.c.bf16 %v10787_v30, %v10785_v43  ;;  %v5212_v5 = vmul.f32 %v11594_v37, %v5204_v46  ;;  %v10803_v49 = vadd.f32 %v6396_v2, %v5218_v1 }
 0xd1d   : >> { %v7802_v0 = vpop.eup %7801  ;;  %v5211_v40 = vmul.f32 %v11594_v37, %v5203_v36 }
 0xd1e   : >> { %v7804_v28 = vpop.eup %7803  ;;  %6997 = vmatprep.mubr.msk.bf16.mxu1 %vm1191_vm7, %v5232_v21  ;;  %v5206_v32 = vmul.f32 %v7802_v0, %v10620_v26  ;;  %11614 = vst [vmem:[#allocation89_spill] sm:$0xff] %v10803_v49  ;;  %v5220_v51 = vadd.f32 %v11593_v38, %v5212_v5  ;;  %v6401_v5 = vld [vmem:[%s9705_s6 + $0x1b8] sm:$0xff] }
 0xd1f   : >> { %v5219_v19 = vadd.f32 %v11593_v38, %v5211_v40  ;;  %v5205_v34 = vmul.f32 %v7804_v28, %v10623_v61  ;;  %v6400_v40 = vld [vmem:[%s9705_s6 + $0x1b0] sm:$0xff] }
 0xd20   : >> { %v5214_v6 = vmul.f32 %v11594_v37, %v5206_v32  ;;  %v10818_v0 = vadd.f32 %v6398_v3, %v5220_v51  ;;  %v7692_v51 = vld [vmem:[#allocation17 + $0x28] sm:$0xff]   ;;  %v7693_v3 = vld [vmem:[#allocation17 + $0x30] sm:$0xff]  }
 0xd21   : >> { %v10805_v14 = vadd.f32 %v6397_v20, %v5219_v19  ;;  %v5213_v63 = vmul.f32 %v11594_v37, %v5205_v34  ;;  %v7687_v19 = vld [vmem:[#allocation17] sm:$0xff]   ;;  %v7688_v34 = vld [vmem:[#allocation17 + $0x8] sm:$0xff]  }
 0xd22   : >> { %v7806_v13 = vpop.eup %7805  ;;  %v5222_v21 = vadd.f32 %v11593_v38, %v5214_v6  ;;  %11616 = vst [vmem:[#allocation91_spill] sm:$0xff] %v10818_v0  ;;  %7005 = vmatprep.subr.bf16.mxu0 %v7687_v19  ;;  %v7689_v6 = vld [vmem:[#allocation17 + $0x10] sm:$0xff]  }
 0xd23   : >> { %11615 = vst [vmem:[#allocation90_spill] sm:$0xff] %v10805_v14  ;;  %v5207_v26 = vmul.f32 %v7806_v13, %v10636_v23  ;;  %v5233_v61 = vpack.c.bf16 %v10805_v14, %v10803_v49  ;;  %v5221_v46 = vadd.f32 %v11593_v38, %v5213_v63  ;;  %7006 = vmatpush3.bf16.msra.mxu0 %v7687_v19  ;;  %v7690_v13 = vld [vmem:[#allocation17 + $0x18] sm:$0xff]   ;;  %v7691_v63 = vld [vmem:[#allocation17 + $0x20] sm:$0xff]  }
 0xd24   : >> { %v10827_v2 = vadd.f32 %v6400_v40, %v5222_v21  ;;  %7007 = vmatprep.subr.bf16.mxu0 %v7688_v34 }
 0xd25   : >> { %v5215_v36 = vmul.f32 %v11594_v37, %v5207_v26  ;;  %6998 = vmatmul.mubr.msk.bf16.vlgmr.msra.gmra.mrb[56].mxu1 %vm1191_vm7, %v5233_v61  ;;  %v10820_v1 = vadd.f32 %v6399_v24, %v5221_v46  ;;  %v7694_v24 = vld [vmem:[#allocation17 + $0x38] sm:$0xff]  }
 0xd26   : >> { %11618 = vst [vmem:[#allocation93_spill] sm:$0xff] %v10827_v2 }
 0xd27   : >> { %11617 = vst [vmem:[#allocation92_spill] sm:$0xff] %v10820_v1  ;;  %v5223_v28 = vadd.f32 %v11593_v38, %v5215_v36  ;;  %v5234_v23 = vpack.c.bf16 %v10820_v1, %v10818_v0  ;;  %7008 = vmatpush3.bf16.msra.mxu0 %v7688_v34 }
 0xd28   : >> { %7009 = vmatprep.subr.bf16.mxu0 %v7689_v6 }
 0xd29   : >> { %v10829_v20 = vadd.f32 %v6401_v5, %v5223_v28  ;;  %7001 = vmatprep.mubr.msk.bf16.mxu1 %vm1191_vm7, %v5234_v23 }
 0xd2b   : >> { %11619 = vst [vmem:[#allocation94_spill] sm:$0xff] %v10829_v20  ;;  %v5235_v32 = vpack.c.bf16 %v10829_v20, %v10827_v2  ;;  %7010 = vmatpush3.bf16.msra.mxu0 %v7689_v6 }
 0xd2c   : >> { %7011 = vmatprep.subr.bf16.mxu0 %v7690_v13 }
 0xd2d   : >> { %7002 = vmatmul.mubr.msk.bf16.gmra.mrb[60].mxu1 %vm1191_vm7, %v5235_v32 }
 0xd2f   : >> { %7012 = vmatpush3.bf16.msra.mxu0 %v7690_v13 }
 0xd30   : >> { %7013 = vmatprep.subr.bf16.mxu0 %v7691_v63 }
 0xd33   : >> { %7014 = vmatpush3.bf16.msra.mxu0 %v7691_v63 }
 0xd34   : >> { %7015 = vmatprep.subr.bf16.mxu0 %v7692_v51 }
 0xd37   : >> { %7016 = vmatpush3.bf16.msra.mxu0 %v7692_v51 }
 0xd38   : >> { %7017 = vmatprep.subr.bf16.mxu0 %v7693_v3 }
 0xd3b   : >> { %7018 = vmatpush3.bf16.msra.mxu0 %v7693_v3 }
 0xd3c   : >> { %7019 = vmatprep.subr.bf16.mxu0 %v7694_v24 }
 0xd3f   : >> { %7020 = vmatpush3.bf16.msra.mxu0 %v7694_v24 }
 0xdf8   : >> { %v6999_v26 = vpop.f32.mrb[56].mxu1 }
 0xdf9   : >> { %v10836_v61 = vadd.f32 %v6999_v26, %v10485_v10  ;;  %v5305_v46 = vpop.f32.mrb[57].mxu1 }
 0xdfa   : >> { %v10839_v36 = vadd.f32 %v10485_v10, %v5305_v46  ;;  %v7000_v21 = vpop.f32.mrb[58].mxu1 }
 0xdfb   : >> { %v5346_v40 = vmul.f32 0.044715, %v10836_v61  ;;  %v10843_v5 = vadd.f32 %v7000_v21, %v10485_v10  ;;  %v5308_v28 = vpop.f32.mrb[59].mxu1 }
 0xdfc   : >> { %v5344_v23 = vmul.f32 0.044715, %v10839_v36  ;;  %v10847_v32 = vadd.f32 %v10485_v10, %v5308_v28 }
 0xdfd   : >> { %v5354_v19 = vmul.f32 %v5346_v40, %v10836_v61  ;;  %v5347_v34 = vmul.f32 0.044715, %v10843_v5 }
 0xdfe   : >> { %v5352_v6 = vmul.f32 %v5344_v23, %v10839_v36  ;;  %v5345_v13 = vmul.f32 0.044715, %v10847_v32 }
 0xdff   : >> { %v5362_v63 = vmul.f32 %v5354_v19, %v10836_v61  ;;  %v5355_v51 = vmul.f32 %v5347_v34, %v10843_v5 }
 0xe00   : >> { %v5360_v3 = vmul.f32 %v5352_v6, %v10839_v36  ;;  %v5353_v24 = vmul.f32 %v5345_v13, %v10847_v32  ;;  %v7003_v26 = vpop.f32.mrb[60].mxu1 }
 0xe01   : >> { %v5370_v46 = vadd.f32 %v5362_v63, %v10836_v61  ;;  %v5363_v21 = vmul.f32 %v5355_v51, %v10843_v5  ;;  %v10860_v40 = vadd.f32 %v7003_v26, %v10485_v10  ;;  %v5321_v28 = vpop.f32.mrb[61].mxu1 }
 0xe02   : >> { %v5361_v23 = vmul.f32 %v5353_v24, %v10847_v32  ;;  %v10864_v37 = vadd.f32 %v10485_v10, %v5321_v28  ;;  %v7004_v19 = vpop.f32.mrb[62].mxu1  ;;  %v5368_v34 = vadd.f32 %v5360_v3, %v10839_v36 }
 0xe03   : >> { %v5378_v6 = vmul.f32 0.7978846, %v5370_v46  ;;  %v5371_v13 = vadd.f32 %v5363_v21, %v10843_v5  ;;  %v5350_v38 = vmul.f32 0.044715, %v10860_v40  ;;  %v5333_v63 = vadd.f32 %v7004_v19, %v10485_v10  ;;  %v5324_v51 = vpop.f32.mrb[63].mxu1 }
 0xe04   : >> { %v5348_v26 = vmul.f32 0.044715, %v10864_v37  ;;  %v5325_v20 = vadd.f32 %v10485_v10, %v5324_v51  ;;  %v5369_v24 = vadd.f32 %v5361_v23, %v10847_v32  ;;  %v5376_v2 = vmul.f32 0.7978846, %v5368_v34 }
 0xe05   : >> { %7807 = vtanh.f32 %v5378_v6  ;;  %v5379_v28 = vmul.f32 0.7978846, %v5371_v13  ;;  %v5358_v1 = vmul.f32 %v5350_v38, %v10860_v40  ;;  %v5351_v3 = vmul.f32 0.044715, %v5333_v63 }
 0xe06   : >> { %v5356_v46 = vmul.f32 %v5348_v26, %v10864_v37  ;;  %v5349_v21 = vmul.f32 0.044715, %v5325_v20  ;;  %v5377_v0 = vmul.f32 0.7978846, %v5369_v24  ;;  %7809 = vtanh.f32 %v5376_v2 }
 0xe07   : >> { %7811 = vtanh.f32 %v5379_v28  ;;  %v5366_v19 = vmul.f32 %v5358_v1, %v10860_v40  ;;  %v5359_v30 = vmul.f32 %v5351_v3, %v5333_v63 }
 0xe08   : >> { %v5364_v43 = vmul.f32 %v5356_v46, %v10864_v37  ;;  %v5357_v10 = vmul.f32 %v5349_v21, %v5325_v20  ;;  %7813 = vtanh.f32 %v5377_v0  ;;  %v5338_v21 = vmul.f32 0.5, %v10836_v61 }
 0xe09   : >> { %v5367_v23 = vmul.f32 %v5359_v30, %v5333_v63  ;;  %v5374_v34 = vadd.f32 %v5366_v19, %v10860_v40 }
 0xe0a   : >> { %v5365_v6 = vmul.f32 %v5357_v10, %v5325_v20  ;;  %v5372_v38 = vadd.f32 %v5364_v43, %v10864_v37  ;;  %v5339_v43 = vmul.f32 0.5, %v10843_v5  ;;  %v5336_v10 = vmul.f32 0.5, %v10839_v36 }
 0xe0b   : >> { %v5375_v13 = vadd.f32 %v5367_v23, %v5333_v63  ;;  %v5382_v51 = vmul.f32 0.7978846, %v5374_v34  ;;  %v5337_v23 = vmul.f32 0.5, %v10847_v32  ;;  %v5342_v5 = vmul.f32 0.5, %v10860_v40 }
 0xe0c   : >> { %v5373_v26 = vadd.f32 %v5365_v6, %v5325_v20  ;;  %v5380_v14 = vmul.f32 0.7978846, %v5372_v38  ;;  %v5343_v36 = vmul.f32 0.5, %v5333_v63  ;;  %v5340_v32 = vmul.f32 0.5, %v10864_v37 }
 0xe0d   : >> { %v5383_v24 = vmul.f32 0.7978846, %v5375_v13  ;;  %7815 = vtanh.f32 %v5382_v51 }
 0xe0e   : >> { %v5381_v2 = vmul.f32 0.7978846, %v5373_v26  ;;  %7817 = vtanh.f32 %v5380_v14 }
 0xe0f   : >> { %v7808_v1 = vpop.eup %7807  ;;  %7819 = vtanh.f32 %v5383_v24 }
 0xe10   : >> { %v7810_v28 = vpop.eup %7809  ;;  %v5394_v3 = vadd.f32 1.0, %v7808_v1  ;;  %7821 = vtanh.f32 %v5381_v2 }
 0xe11   : >> { %v7812_v0 = vpop.eup %7811  ;;  %v5392_v30 = vadd.f32 1.0, %v7810_v28 }
 0xe12   : >> { %v7814_v46 = vpop.eup %7813  ;;  %v5395_v19 = vadd.f32 1.0, %v7812_v0  ;;  %v5402_v6 = vmul.f32 %v5394_v3, %v5338_v21  ;;  %v5341_v3 = vmul.f32 0.5, %v5325_v20 }
 0xe13   : >> { %v5393_v34 = vadd.f32 1.0, %v7814_v46  ;;  %v5400_v38 = vmul.f32 %v5392_v30, %v5336_v10 }
 0xe14   : >> { %v5403_v14 = vmul.f32 %v5395_v19, %v5339_v43 }
 0xe15   : >> { %v5401_v13 = vmul.f32 %v5393_v34, %v5337_v23  ;;  %v3196_v34 = vpop.xlane.xlu1 %3195 }
 0xe16   : >> { %v5409_v51 = vpack.c.bf16 %v5403_v14, %v5402_v6  ;;  %v3199_v6 = vpop.xlane.xlu0 %3198 }
 0xe17   : >> { %v7816_v26 = vpop.eup %7815  ;;  %v5408_v24 = vpack.c.bf16 %v5401_v13, %v5400_v38 }
 0xe18   : >> { %v7818_v2 = vpop.eup %7817  ;;  %v5398_v1 = vadd.f32 1.0, %v7816_v26 }
 0xe19   : >> { %v7820_v28 = vpop.eup %7819  ;;  %7021 = vmatprep.mubr.bf16.mxu0 %v5408_v24  ;;  %v5396_v61 = vadd.f32 1.0, %v7818_v2  ;;  %v3202_v14 = vpop.xlane.xlu1 %3201 }
 0xe1a   : >> { %v7822_v49 = vpop.eup %7821  ;;  %7022 = vmatmul.mubr.bf16.vlgmr.msra.gmra.mrb[24].mxu0 %v5409_v51  ;;  %v5399_v0 = vadd.f32 1.0, %v7820_v28  ;;  %v5406_v30 = vmul.f32 %v5398_v1, %v5342_v5  ;;  %v3205_v38 = vpop.xlane.xlu0 %3204 }
 0xe1b   : >> { %v5397_v46 = vadd.f32 1.0, %v7822_v49  ;;  %v5404_v43 = vmul.f32 %v5396_v61, %v5340_v32 }
 0xe1c   : >> { %v5407_v21 = vmul.f32 %v5399_v0, %v5343_v36  ;;  %v3218_v0 = vmul.f32 0.03125, %v3196_v34 }
 0xe1d   : >> { %v5405_v19 = vmul.f32 %v5397_v46, %v5341_v3  ;;  %v3208_v13 = vpop.xlane.xlu1 %3207 }
 0xe1e   : >> { %v5411_v10 = vpack.c.bf16 %v5407_v21, %v5406_v30  ;;  %v3211_v40 = vpop.xlane.xlu0 %3210 }
 0xe1f   : >> { %v5410_v23 = vpack.c.bf16 %v5405_v19, %v5404_v43  ;;  %v3219_v43 = vmul.f32 0.03125, %v3199_v6 }
 0xe21   : >> { %7025 = vmatprep.mubr.bf16.mxu0 %v5410_v23  ;;  %v3214_v63 = vpop.xlane.xlu1 %3213  ;;  %v10909_v23 = vsub.f32 %v10633_v50, %v3218_v0 }
 0xe22   : >> { %7026 = vmatmul.mubr.bf16.gmra.mrb[28].mxu0 %v5411_v10  ;;  %v3217_v26 = vpop.xlane.xlu0 %3216 }
 0xe25   : >> { %v3989_v61 = vpop.xlane.xlu1 %3988 }
 0xe26   : >> { %v3992_v32 = vpop.xlane.xlu0 %3991 }
 0xe29   : >> { %v3995_v34 = vpop.xlane.xlu1 %3994 }
 0xeed   : >> { %v7023_v51 = vpop.f32.mrb[24].mxu0 }
 0xeee   : >> { %v10886_v37 = vadd.f32 %v7023_v51, %v9452_v58  ;;  %v5510_v49 = vpop.f32.mrb[25].mxu0 }
 0xeef   : >> { %v7024_v20 = vpop.f32.mrb[26].mxu0  ;;  %v10889_v24 = vadd.f32 %v9452_v58, %v5510_v49  ;;  %v3220_v49 = vmul.f32 0.03125, %v3202_v14 }
 0xef0   : >> { %v10892_v2 = vadd.f32 %v7024_v20, %v9452_v58  ;;  %v5513_v1 = vpop.f32.mrb[27].mxu0  ;;  %v5547_v28 = vsel %vm1191_vm7, %v10886_v37, 0.0 }
 0xef1   : >> { %5548 = vadd.xlane.f32.xlu1 %v5547_v28  ;;  %v10897_v5 = vadd.f32 %v9452_v58, %v5513_v1  ;;  %v5541_v3 = vsel %vm1191_vm7, %v10889_v24, 0.0  ;;  %v3998_v28 = vpop.xlane.xlu0 %3997  ;;  %v10928_v0 = vsub.f32 %v10644_v12, %v3220_v49  ;;  %v3224_v49 = vmul.f32 0.03125, %v3214_v63 }
 0xef2   : >> { %v5550_v36 = vsel %vm1191_vm7, %v10892_v2, 0.0  ;;  %v4011_v63 = vmul.f32 0.03125, %v3989_v61  ;;  %v4013_v61 = vmul.f32 0.03125, %v3995_v34 }
 0xef3   : >> { %5551 = vadd.xlane.f32.xlu0 %v5550_v36  ;;  %v5544_v21 = vsel %vm1191_vm7, %v10897_v5, 0.0  ;;  %v10920_v36 = vsub.f32 %v10648_v45, %v3219_v43  ;;  %v4001_v45 = vpop.xlane.xlu1 %4000  ;;  %v3223_v43 = vmul.f32 0.03125, %v3211_v40  ;;  %v3225_v40 = vmul.f32 0.03125, %v3217_v26 }
 0xef4   : >> { %v4012_v26 = vmul.f32 0.03125, %v3992_v32  ;;  %v4014_v32 = vmul.f32 0.03125, %v3998_v28  ;;  %v4015_v34 = vmul.f32 0.03125, %v4001_v45 }
 0xef5   : >> { %5542 = vadd.xlane.f32.xlu1 %v5541_v3  ;;  %v7027_v46 = vpop.f32.mrb[28].mxu0  ;;  %v3221_v3 = vmul.f32 0.03125, %v3205_v38  ;;  %v3235_v12 = vmul.f32 %v10920_v36, %v10920_v36 }
 0xef6   : >> { %v5526_v30 = vpop.f32.mrb[29].mxu0  ;;  %v10912_v20 = vadd.f32 %v7027_v46, %v9452_v58  ;;  %v3222_v46 = vmul.f32 0.03125, %v3208_v13 }
 0xef7   : >> { %v10906_v19 = vadd.f32 %v9452_v58, %v5526_v30  ;;  %5545 = vadd.xlane.f32.xlu0 %v5544_v21  ;;  %v7028_v10 = vpop.f32.mrb[30].mxu0  ;;  %v3234_v21 = vmul.f32 %v10909_v23, %v10909_v23  ;;  %v10935_v38 = vsub.f32 %v10655_v41, %v3221_v3  ;;  %v10948_v41 = vsub.f32 %v10671_v31, %v3223_v43 }
 0xef8   : >> { %v5529_v51 = vpop.f32.mrb[31].mxu0  ;;  %v10923_v50 = vadd.f32 %v7028_v10, %v9452_v58  ;;  %v5559_v30 = vsel %vm1191_vm7, %v10912_v20, 0.0  ;;  %v10942_v13 = vsub.f32 %v10659_v11, %v3222_v46  ;;  %v3245_v3 = vsel %vm1191_vm7, %v3235_v12, 0.0 }
 0xef9   : >> { %v10915_v1 = vadd.f32 %v9452_v58, %v5529_v51  ;;  %v5553_v6 = vsel %vm1191_vm7, %v10906_v19, 0.0  ;;  %v4004_v51 = vpop.xlane.xlu0 %4003  ;;  %v10954_v11 = vsub.f32 %v10667_v16, %v3224_v49  ;;  %v10960_v31 = vsub.f32 %v10679_v59, %v3225_v40 }
 0xefa   : >> { %5554 = vadd.xlane.f32.xlu1 %v5553_v6  ;;  %v5562_v10 = vsel %vm1191_vm7, %v10923_v50, 0.0  ;;  %v3242_v6 = vsel %vm1191_vm7, %v3234_v21, 0.0  ;;  %v3238_v21 = vmul.f32 %v10942_v13, %v10942_v13  ;;  %v3239_v12 = vmul.f32 %v10948_v41, %v10948_v41 }
 0xefb   : >> { %v5556_v14 = vsel %vm1191_vm7, %v10915_v1, 0.0  ;;  %v10966_v16 = vsub.f32 %v10683_v22, %v4011_v63  ;;  %v10972_v59 = vsub.f32 %v10695_v42, %v4012_v26  ;;  %v10978_v22 = vsub.f32 %v10691_v27, %v4013_v61 }
 0xefc   : >> { %5557 = vadd.xlane.f32.xlu0 %v5556_v14  ;;  %v3236_v14 = vmul.f32 %v10928_v0, %v10928_v0  ;;  %v3254_v49 = vsel %vm1191_vm7, %v3238_v21, 0.0  ;;  %v3257_v40 = vsel %vm1191_vm7, %v3239_v12, 0.0  ;;  %v10984_v42 = vsub.f32 %v10703_v4, %v4014_v32 }
 0xefd   : >> { %v4027_v21 = vmul.f32 %v10966_v16, %v10966_v16  ;;  %v4016_v28 = vmul.f32 0.03125, %v4004_v51  ;;  %v4028_v12 = vmul.f32 %v10972_v59, %v10972_v59  ;;  %v10990_v27 = vsub.f32 %v10707_v35, %v4015_v34 }
 0xefe   : >> { %5560 = vadd.xlane.f32.xlu1 %v5559_v30  ;;  %v3237_v30 = vmul.f32 %v10935_v38, %v10935_v38  ;;  %v3248_v46 = vsel %vm1191_vm7, %v3236_v14, 0.0  ;;  %v3240_v14 = vmul.f32 %v10954_v11, %v10954_v11 }
 0xeff   : >> { %v4035_v61 = vsel %vm1191_vm7, %v4027_v21, 0.0  ;;  %v10996_v4 = vsub.f32 %v10719_v52, %v4016_v28  ;;  %v4038_v32 = vsel %vm1191_vm7, %v4028_v12, 0.0 }
 0xf00   : >> { %5563 = vadd.xlane.f32.xlu0 %v5562_v10  ;;  %v4007_v10 = vpop.xlane.xlu1 %4006  ;;  %v3251_v43 = vsel %vm1191_vm7, %v3237_v30, 0.0  ;;  %v3241_v30 = vmul.f32 %v10960_v31, %v10960_v31  ;;  %v3260_v63 = vsel %vm1191_vm7, %v3240_v14, 0.0  ;;  %v4029_v14 = vmul.f32 %v10978_v22, %v10978_v22 }
 0xf01   : >> { %v4017_v45 = vmul.f32 0.03125, %v4007_v10 }
 0xf02   : >> { %3243 = vadd.xlane.f32.xlu1 %v3242_v6  ;;  %v4010_v6 = vpop.xlane.xlu0 %4009  ;;  %v3263_v26 = vsel %vm1191_vm7, %v3241_v30, 0.0  ;;  %v4041_v34 = vsel %vm1191_vm7, %v4029_v14, 0.0 }
 0xf03   : >> { %v4018_v51 = vmul.f32 0.03125, %v4010_v6  ;;  %v11002_v35 = vsub.f32 %v10715_v48, %v4017_v45 }
 0xf04   : >> { %3246 = vadd.xlane.f32.xlu0 %v3245_v3  ;;  %v4772_v3 = vpop.xlane.xlu1 %4771 }
 0xf05   : >> { %v11008_v52 = vsub.f32 %v10727_v8, %v4018_v51  ;;  %v4790_v48 = vmul.f32 0.03125, %v4772_v3  ;;  %v4033_v45 = vmul.f32 %v11002_v35, %v11002_v35 }
 0xf06   : >> { %3249 = vadd.xlane.f32.xlu1 %v3248_v46  ;;  %v4775_v46 = vpop.xlane.xlu0 %4774 }
 0xf07   : >> { %v4791_v8 = vmul.f32 0.03125, %v4775_v46  ;;  %v4034_v51 = vmul.f32 %v11008_v52, %v11008_v52 }
 0xf08   : >> { %3252 = vadd.xlane.f32.xlu0 %v3251_v43  ;;  %v4766_v43 = vpop.xlane.xlu1 %4765 }
 0xf09   : >> { %v4788_v10 = vmul.f32 0.03125, %v4766_v43 }
 0xf0a   : >> { %3255 = vadd.xlane.f32.xlu1 %v3254_v49  ;;  %v4769_v49 = vpop.xlane.xlu0 %4768 }
 0xf0b   : >> { %v4789_v6 = vmul.f32 0.03125, %v4769_v49  ;;  %v11014_v43 = vsub.f32 %v10739_v60, %v4788_v10  ;;  %v11026_v60 = vsub.f32 %v10736_v15, %v4790_v48 }
 0xf0c   : >> { %3258 = vadd.xlane.f32.xlu0 %v3257_v40  ;;  %v4030_v40 = vmul.f32 %v10984_v42, %v10984_v42  ;;  %v4784_v30 = vpop.xlane.xlu1 %4783 }
 0xf0d   : >> { %v11020_v49 = vsub.f32 %v10747_v55, %v4789_v6  ;;  %v4804_v10 = vmul.f32 %v11014_v43, %v11014_v43  ;;  %v11032_v55 = vsub.f32 %v10742_v33, %v4791_v8  ;;  %v4794_v6 = vmul.f32 0.03125, %v4784_v30 }
 0xf0e   : >> { %3261 = vadd.xlane.f32.xlu1 %v3260_v63  ;;  %v4031_v63 = vmul.f32 %v10990_v27, %v10990_v27  ;;  %v4787_v21 = vpop.xlane.xlu0 %4786  ;;  %v4044_v28 = vsel %vm1191_vm7, %v4030_v40, 0.0  ;;  %v4053_v40 = vsel %vm1191_vm7, %v4033_v45, 0.0 }
 0xf0f   : >> { %v4795_v48 = vmul.f32 0.03125, %v4787_v21  ;;  %v4807_v45 = vmul.f32 %v11032_v55, %v11032_v55  ;;  %v11050_v30 = vsub.f32 %v10756_v7, %v4794_v6 }
 0xf10   : >> { %3264 = vadd.xlane.f32.xlu0 %v3263_v26  ;;  %v4032_v26 = vmul.f32 %v10996_v4, %v10996_v4  ;;  %v4047_v12 = vsel %vm1191_vm7, %v4031_v63, 0.0  ;;  %v4805_v63 = vmul.f32 %v11020_v49, %v11020_v49 }
 0xf11   : >> { %v11056_v21 = vsub.f32 %v10762_v18, %v4795_v48  ;;  %v4810_v7 = vmul.f32 %v11050_v30, %v11050_v30 }
 0xf12   : >> { %4036 = vadd.xlane.f32.xlu1 %v4035_v61  ;;  %v4778_v61 = vpop.xlane.xlu1 %4777  ;;  %v4050_v14 = vsel %vm1191_vm7, %v4032_v26, 0.0  ;;  %v4781_v3 = vpop.xlane.xlu0 %4780  ;;  %v4806_v26 = vmul.f32 %v11026_v60, %v11026_v60 }
 0xf13   : >> { %v4793_v46 = vmul.f32 0.03125, %v4781_v3  ;;  %v4811_v3 = vmul.f32 %v11056_v21, %v11056_v21  ;;  %v4830_v18 = vsel %vm1191_vm7, %v4810_v7, 0.0 }
 0xf14   : >> { %4039 = vadd.xlane.f32.xlu0 %v4038_v32  ;;  %v4792_v32 = vmul.f32 0.03125, %v4778_v61 }
 0xf15   : >> { %v11044_v33 = vsub.f32 %v10767_v47, %v4793_v46  ;;  %v4821_v47 = vsel %vm1191_vm7, %v4807_v45, 0.0 }
 0xf16   : >> { %4042 = vadd.xlane.f32.xlu1 %v4041_v34  ;;  %v4056_v34 = vsel %vm1191_vm7, %v4034_v51, 0.0  ;;  %v11038_v15 = vsub.f32 %v10759_v44, %v4792_v32  ;;  %v4818_v44 = vsel %vm1191_vm7, %v4806_v26, 0.0  ;;  %v4833_v32 = vsel %vm1191_vm7, %v4811_v3, 0.0 }
 0xf17   : >> { %v4809_v8 = vmul.f32 %v11044_v33, %v11044_v33 }
 0xf18   : >> { %4045 = vadd.xlane.f32.xlu0 %v4044_v28  ;;  %v4812_v28 = vsel %vm1191_vm7, %v4804_v10, 0.0  ;;  %v4808_v61 = vmul.f32 %v11038_v15, %v11038_v15 }
 0xf19   : >> { %v4827_v51 = vsel %vm1191_vm7, %v4809_v8, 0.0 }
 0xf1a   : >> { %4048 = vadd.xlane.f32.xlu1 %v4047_v12  ;;  %v4815_v12 = vsel %vm1191_vm7, %v4805_v63, 0.0 }
 0xf1c   : >> { %4051 = vadd.xlane.f32.xlu0 %v4050_v14  ;;  %v4824_v14 = vsel %vm1191_vm7, %v4808_v61, 0.0 }
 0xf1e   : >> { %4054 = vadd.xlane.f32.xlu1 %v4053_v40 }
 0xf20   : >> { %4057 = vadd.xlane.f32.xlu0 %v4056_v34 }
 0xf22   : >> { %4813 = vadd.xlane.f32.xlu1 %v4812_v28 }
 0xf24   : >> { %4816 = vadd.xlane.f32.xlu0 %v4815_v12 }
 0xf26   : >> { %4819 = vadd.xlane.f32.xlu1 %v4818_v44 }
 0xf28   : >> { %4822 = vadd.xlane.f32.xlu0 %v4821_v47 }
 0xf2a   : >> { %4825 = vadd.xlane.f32.xlu1 %v4824_v14 }
 0xf2c   : >> { %4828 = vadd.xlane.f32.xlu0 %v4827_v51 }
 0xf2e   : >> { %4831 = vadd.xlane.f32.xlu1 %v4830_v18 }
 0xf30   : >> { %4834 = vadd.xlane.f32.xlu0 %v4833_v32 }
 0xf7e   : >> { %v5549_v40 = vpop.xlane.xlu1 %5548 }
 0xf7f   : >> { %v5567_v10 = vmul.f32 0.03125, %v5549_v40 }
 0xf80   : >> { %v5552_v46 = vpop.xlane.xlu0 %5551 }
 0xf81   : >> { %v11070_v34 = vsub.f32 %v10886_v37, %v5567_v10  ;;  %v5568_v63 = vmul.f32 0.03125, %v5552_v46 }
 0xf82   : >> { %v5543_v6 = vpop.xlane.xlu1 %5542 }
 0xf83   : >> { %v11073_v28 = vsub.f32 %v10892_v2, %v5568_v63  ;;  %v5565_v26 = vmul.f32 0.03125, %v5543_v6  ;;  %v5583_v48 = vmul.f32 %v11070_v34, %v11070_v34 }
 0xf84   : >> { %v5546_v12 = vpop.xlane.xlu0 %5545 }
 0xf85   : >> { %v11078_v45 = vsub.f32 %v10889_v24, %v5565_v26  ;;  %v5566_v44 = vmul.f32 0.03125, %v5546_v12  ;;  %v5595_v61 = vsel %vm1191_vm7, %v5583_v48, 0.0  ;;  %v5584_v37 = vmul.f32 %v11073_v28, %v11073_v28 }
 0xf86   : >> { %5596 = vadd.xlane.f32.xlu1 %v5595_v61 }
 0xf87   : >> { %v11084_v47 = vsub.f32 %v10897_v5, %v5566_v44  ;;  %v5555_v2 = vpop.xlane.xlu1 %5554  ;;  %v5598_v8 = vsel %vm1191_vm7, %v5584_v37, 0.0  ;;  %v5581_v14 = vmul.f32 %v11078_v45, %v11078_v45 }
 0xf88   : >> { %v5569_v7 = vmul.f32 0.03125, %v5555_v2  ;;  %5599 = vadd.xlane.f32.xlu0 %v5598_v8 }
 0xf89   : >> { %v5558_v24 = vpop.xlane.xlu0 %5557  ;;  %v5589_v51 = vsel %vm1191_vm7, %v5581_v14, 0.0  ;;  %v5582_v3 = vmul.f32 %v11084_v47, %v11084_v47 }
 0xf8a   : >> { %v11093_v18 = vsub.f32 %v10906_v19, %v5569_v7  ;;  %v5570_v32 = vmul.f32 0.03125, %v5558_v24  ;;  %5590 = vadd.xlane.f32.xlu1 %v5589_v51 }
 0xf8b   : >> { %v5561_v5 = vpop.xlane.xlu1 %5560  ;;  %v5592_v40 = vsel %vm1191_vm7, %v5582_v3, 0.0 }
 0xf8c   : >> { %v11097_v10 = vsub.f32 %v10915_v1, %v5570_v32  ;;  %v5571_v46 = vmul.f32 0.03125, %v5561_v5  ;;  %5593 = vadd.xlane.f32.xlu0 %v5592_v40  ;;  %v5585_v63 = vmul.f32 %v11093_v18, %v11093_v18 }
 0xf8d   : >> { %v5564_v6 = vpop.xlane.xlu0 %5563 }
 0xf8e   : >> { %v11102_v26 = vsub.f32 %v10912_v20, %v5571_v46  ;;  %v5572_v48 = vmul.f32 0.03125, %v5564_v6  ;;  %v5601_v19 = vsel %vm1191_vm7, %v5585_v63, 0.0  ;;  %v5586_v12 = vmul.f32 %v11097_v10, %v11097_v10 }
 0xf8f   : >> { %5602 = vadd.xlane.f32.xlu1 %v5601_v19  ;;  %v3244_v44 = vpop.xlane.xlu1 %3243 }
 0xf90   : >> { %v11108_v1 = vsub.f32 %v10923_v50, %v5572_v48  ;;  %v3266_v61 = vmul.f32 0.03125, %v3244_v44  ;;  %v5604_v37 = vsel %vm1191_vm7, %v5586_v12, 0.0  ;;  %v5587_v2 = vmul.f32 %v11102_v26, %v11102_v26 }
 0xf91   : >> { %5605 = vadd.xlane.f32.xlu0 %v5604_v37  ;;  %v3247_v20 = vpop.xlane.xlu0 %3246 }
 0xf92   : >> { %v3274_v8 = vadd.f32 1e-05, %v3266_v61  ;;  %v3267_v14 = vmul.f32 0.03125, %v3247_v20  ;;  %v5607_v7 = vsel %vm1191_vm7, %v5587_v2, 0.0  ;;  %v5588_v24 = vmul.f32 %v11108_v1, %v11108_v1 }
 0xf93   : >> { %5608 = vadd.xlane.f32.xlu1 %v5607_v7  ;;  %v3250_v51 = vpop.xlane.xlu1 %3249 }
 0xf94   : >> { %7823 = vrsqrt.f32 %v3274_v8  ;;  %v3275_v50 = vadd.f32 1e-05, %v3267_v14  ;;  %v3268_v3 = vmul.f32 0.03125, %v3250_v51  ;;  %v5610_v32 = vsel %vm1191_vm7, %v5588_v24, 0.0 }
 0xf95   : >> { %5611 = vadd.xlane.f32.xlu0 %v5610_v32  ;;  %v3253_v5 = vpop.xlane.xlu0 %3252 }
 0xf96   : >> { %7825 = vrsqrt.f32 %v3275_v50  ;;  %v3276_v40 = vadd.f32 1e-05, %v3268_v3  ;;  %v3269_v46 = vmul.f32 0.03125, %v3253_v5 }
 0xf97   : >> { %v3256_v63 = vpop.xlane.xlu1 %3255 }
 0xf98   : >> { %7827 = vrsqrt.f32 %v3276_v40  ;;  %v3277_v6 = vadd.f32 1e-05, %v3269_v46  ;;  %v3270_v48 = vmul.f32 0.03125, %v3256_v63 }
 0xf99   : >> { %v3259_v19 = vpop.xlane.xlu0 %3258 }
 0xf9a   : >> { %7829 = vrsqrt.f32 %v3277_v6  ;;  %v3278_v12 = vadd.f32 1e-05, %v3270_v48  ;;  %v3271_v44 = vmul.f32 0.03125, %v3259_v19 }
 0xf9b   : >> { %v3262_v61 = vpop.xlane.xlu1 %3261 }
 0xf9c   : >> { %7831 = vrsqrt.f32 %v3278_v12  ;;  %v3279_v37 = vadd.f32 1e-05, %v3271_v44  ;;  %v3272_v2 = vmul.f32 0.03125, %v3262_v61 }
 0xf9d   : >> { %v3265_v20 = vpop.xlane.xlu0 %3264 }
 0xf9e   : >> { %v7824_v8 = vpop.eup %7823  ;;  %7833 = vrsqrt.f32 %v3279_v37  ;;  %v3280_v14 = vadd.f32 1e-05, %v3272_v2  ;;  %v3273_v7 = vmul.f32 0.03125, %v3265_v20 }
 0xf9f   : >> { %v3290_v24 = vmul.f32 %v7824_v8, %v10909_v23  ;;  %v4037_v51 = vpop.xlane.xlu1 %4036 }
 0xfa0   : >> { %v7826_v50 = vpop.eup %7825  ;;  %7835 = vrsqrt.f32 %v3280_v14  ;;  %v3281_v3 = vadd.f32 1e-05, %v3273_v7  ;;  %v4059_v32 = vmul.f32 0.03125, %v4037_v51 }
 0xfa1   : >> { %v3302_v5 = vmul.f32 %v9454_v39, %v3290_v24  ;;  %v3291_v40 = vmul.f32 %v7826_v50, %v10920_v36  ;;  %v4040_v46 = vpop.xlane.xlu0 %4039 }
 0xfa2   : >> { %v7828_v63 = vpop.eup %7827  ;;  %7837 = vrsqrt.f32 %v3281_v3  ;;  %v4067_v6 = vadd.f32 1e-05, %v4059_v32  ;;  %v4060_v48 = vmul.f32 0.03125, %v4040_v46 }
 0xfa3   : >> { %v3314_v19 = vadd.f32 %v9456_v62, %v3302_v5  ;;  %v3303_v23 = vmul.f32 %v9454_v39, %v3291_v40  ;;  %v3292_v12 = vmul.f32 %v7828_v63, %v10928_v0  ;;  %v4043_v44 = vpop.xlane.xlu1 %4042  ;;  %v11620_v63 = vld [vmem:[#allocation71_spill] sm:$0xff] }
 0xfa4   : >> { %v7830_v61 = vpop.eup %7829  ;;  %7839 = vrsqrt.f32 %v4067_v6  ;;  %v4068_v37 = vadd.f32 1e-05, %v4060_v48  ;;  %v4061_v36 = vmul.f32 0.03125, %v4043_v44 }
 0xfa5   : >> { %v3322_v2 = vadd.f32 %v3314_v19, %v9721_v57  ;;  %v3315_v20 = vadd.f32 %v9456_v62, %v3303_v23  ;;  %v3304_v8 = vmul.f32 %v9454_v39, %v3292_v12  ;;  %v3293_v14 = vmul.f32 %v7830_v61, %v10935_v38  ;;  %v4046_v7 = vpop.xlane.xlu0 %4045  ;;  %v11621_v61 = vld [vmem:[#allocation72_spill] sm:$0xff] }
 0xfa6   : >> { %v7832_v0 = vpop.eup %7831  ;;  %7841 = vrsqrt.f32 %v4068_v37  ;;  %v4069_v24 = vadd.f32 1e-05, %v4061_v36  ;;  %v4062_v51 = vmul.f32 0.03125, %v4046_v7 }
 0xfa7   : >> { %3331 = vst.msk [vmem:[%s11126_s18] sm:$0xff] %vm1191_vm7, %v3322_v2  ;;  %v3323_v50 = vadd.f32 %v3315_v20, %v9723_v53  ;;  %v3316_v3 = vadd.f32 %v9456_v62, %v3304_v8  ;;  %v3305_v57 = vmul.f32 %v9454_v39, %v3293_v14  ;;  %v3294_v32 = vmul.f32 %v7832_v0, %v10942_v13  ;;  %v4049_v5 = vpop.xlane.xlu1 %4048  ;;  %v11622_v0 = vld [vmem:[#allocation74_spill] sm:$0xff] }
 0xfa8   : >> { %v7834_v40 = vpop.eup %7833  ;;  %7843 = vrsqrt.f32 %v4069_v24  ;;  %v4070_v38 = vadd.f32 1e-05, %v4062_v51  ;;  %v4063_v46 = vmul.f32 0.03125, %v4049_v5 }
 0xfa9   : >> { %3332 = vst.msk [vmem:[%s11126_s18 + $0x8] sm:$0xff] %vm1191_vm7, %v3323_v50  ;;  %v3324_v6 = vadd.f32 %v3316_v3, %v11620_v63  ;;  %v3317_v48 = vadd.f32 %v9456_v62, %v3305_v57  ;;  %v3306_v53 = vmul.f32 %v9454_v39, %v3294_v32  ;;  %v3295_v19 = vmul.f32 %v7834_v40, %v10948_v41  ;;  %v4052_v23 = vpop.xlane.xlu0 %4051  ;;  %v11623_v40 = vld [vmem:[#allocation75_spill] sm:$0xff] }
 0xfaa   : >> { %v7836_v12 = vpop.eup %7835  ;;  %7845 = vrsqrt.f32 %v4070_v38  ;;  %v4071_v13 = vadd.f32 1e-05, %v4063_v46  ;;  %v4064_v44 = vmul.f32 0.03125, %v4052_v23  ;;  %v11624_v23 = vld [vmem:[#allocation76_spill] sm:$0xff] }
 0xfab   : >> { %3333 = vst.msk [vmem:[%s11126_s18 + $0x10] sm:$0xff] %vm1191_vm7, %v3324_v6  ;;  %v3325_v37 = vadd.f32 %v3317_v48, %v11621_v61  ;;  %v3318_v36 = vadd.f32 %v9456_v62, %v3306_v53  ;;  %v3307_v2 = vmul.f32 %v9454_v39, %v3295_v19  ;;  %v3296_v20 = vmul.f32 %v7836_v12, %v10954_v11  ;;  %v4055_v8 = vpop.xlane.xlu1 %4054 }
 0xfac   : >> { %v7838_v14 = vpop.eup %7837  ;;  %7847 = vrsqrt.f32 %v4071_v13  ;;  %v4072_v41 = vadd.f32 1e-05, %v4064_v44  ;;  %v4065_v7 = vmul.f32 0.03125, %v4055_v8 }
 0xfad   : >> { %3334 = vst.msk [vmem:[%s11126_s18 + $0x18] sm:$0xff] %vm1191_vm7, %v3325_v37  ;;  %v3326_v24 = vadd.f32 %v3318_v36, %v11622_v0  ;;  %v3319_v51 = vadd.f32 %v9456_v62, %v3307_v2  ;;  %v3308_v50 = vmul.f32 %v9454_v39, %v3296_v20  ;;  %v3297_v3 = vmul.f32 %v7838_v14, %v10960_v31  ;;  %v4058_v57 = vpop.xlane.xlu0 %4057  ;;  %v11625_v20 = vld [vmem:[#allocation73_spill] sm:$0xff] }
 0xfae   : >> { %v7840_v32 = vpop.eup %7839  ;;  %7849 = vrsqrt.f32 %v4072_v41  ;;  %v4073_v11 = vadd.f32 1e-05, %v4065_v7  ;;  %v4066_v5 = vmul.f32 0.03125, %v4058_v57 }
 0xfaf   : >> { %3335 = vst.msk [vmem:[%s11126_s18 + $0x20] sm:$0xff] %vm1191_vm7, %v3326_v24  ;;  %v3327_v38 = vadd.f32 %v3319_v51, %v11623_v40  ;;  %v3320_v46 = vadd.f32 %v9456_v62, %v3308_v50  ;;  %v3309_v63 = vmul.f32 %v9454_v39, %v3297_v3  ;;  %v4083_v6 = vmul.f32 %v7840_v32, %v10966_v16  ;;  %v4814_v48 = vpop.xlane.xlu1 %4813  ;;  %v11626_v50 = vld [vmem:[#allocation77_spill] sm:$0xff] }
 0xfb0   : >> { %v7842_v53 = vpop.eup %7841  ;;  %7851 = vrsqrt.f32 %v4073_v11  ;;  %v4074_v31 = vadd.f32 1e-05, %v4066_v5  ;;  %v4836_v19 = vmul.f32 0.03125, %v4814_v48 }
 0xfb1   : >> { %3336 = vst.msk [vmem:[%s11126_s18 + $0x28] sm:$0xff] %vm1191_vm7, %v3327_v38  ;;  %v3328_v12 = vadd.f32 %v3320_v46, %v11624_v23  ;;  %v3321_v13 = vadd.f32 %v9456_v62, %v3309_v63  ;;  %v4091_v44 = vmul.f32 %v9454_v39, %v4083_v6  ;;  %v4084_v61 = vmul.f32 %v7842_v53, %v10972_v59  ;;  %v4817_v37 = vpop.xlane.xlu0 %4816  ;;  %v11627_v46 = vld [vmem:[#allocation78_spill] sm:$0xff] }
 0xfb2   : >> { %v7844_v36 = vpop.eup %7843  ;;  %7853 = vrsqrt.f32 %v4074_v31  ;;  %v4844_v16 = vadd.f32 1e-05, %v4836_v19  ;;  %v4837_v2 = vmul.f32 0.03125, %v4817_v37 }
 0xfb3   : >> { %3337 = vst.msk [vmem:[%s11126_s18 + $0x30] sm:$0xff] %vm1191_vm7, %v3328_v12  ;;  %v3329_v8 = vadd.f32 %v3321_v13, %v11625_v20  ;;  %v4099_v14 = vadd.f32 %v9456_v62, %v4091_v44  ;;  %v4092_v41 = vmul.f32 %v9454_v39, %v4084_v61  ;;  %v4085_v7 = vmul.f32 %v7844_v36, %v10978_v22  ;;  %v4820_v0 = vpop.xlane.xlu1 %4819  ;;  %v11628_v12 = vld [vmem:[#allocation79_spill] sm:$0xff]  ;;  %v11629_v20 = vld [vmem:[#allocation80_spill] sm:$0xff] }
 0xfb4   : >> { %v7846_v24 = vpop.eup %7845  ;;  %7855 = vrsqrt.f32 %v4844_v16  ;;  %v4845_v59 = vadd.f32 1e-05, %v4837_v2  ;;  %v4838_v51 = vmul.f32 0.03125, %v4820_v0 }
 0xfb5   : >> { %3338 = vst.msk [vmem:[%s11126_s18 + $0x38] sm:$0xff] %vm1191_vm7, %v3329_v8  ;;  %v4107_v3 = vadd.f32 %v4099_v14, %v11626_v50  ;;  %v4100_v57 = vadd.f32 %v9456_v62, %v4092_v41  ;;  %v4093_v32 = vmul.f32 %v9454_v39, %v4085_v7  ;;  %v4086_v11 = vmul.f32 %v7846_v24, %v10984_v42  ;;  %v4823_v5 = vpop.xlane.xlu0 %4822 }
 0xfb6   : >> { %v7848_v40 = vpop.eup %7847  ;;  %7857 = vrsqrt.f32 %v4845_v59  ;;  %v4846_v22 = vadd.f32 1e-05, %v4838_v51  ;;  %v4839_v38 = vmul.f32 0.03125, %v4823_v5  ;;  %v11630_v51 = vld [vmem:[#allocation81_spill] sm:$0xff] }
 0xfb7   : >> { %6346 = vst.msk [vmem:[%s11126_s18 + $0x80] sm:$0xff] %vm1191_vm7, %v4107_v3  ;;  %v4108_v63 = vadd.f32 %v4100_v57, %v11627_v46  ;;  %v4101_v6 = vadd.f32 %v9456_v62, %v4093_v32  ;;  %v4094_v48 = vmul.f32 %v9454_v39, %v4086_v11  ;;  %v4087_v53 = vmul.f32 %v7848_v40, %v10990_v27  ;;  %v4826_v31 = vpop.xlane.xlu1 %4825 }
 0xfb8   : >> { %v7850_v19 = vpop.eup %7849  ;;  %7859 = vrsqrt.f32 %v4846_v22  ;;  %v4847_v42 = vadd.f32 1e-05, %v4839_v38  ;;  %v4840_v23 = vmul.f32 0.03125, %v4826_v31  ;;  %v11631_v22 = vld [vmem:[#allocation82_spill] sm:$0xff] }
 0xfb9   : >> { %6347 = vst.msk [vmem:[%s11126_s18 + $0x88] sm:$0xff] %vm1191_vm7, %v4108_v63  ;;  %v4109_v13 = vadd.f32 %v4101_v6, %v11628_v12  ;;  %v4102_v44 = vadd.f32 %v9456_v62, %v4094_v48  ;;  %v4095_v61 = vmul.f32 %v9454_v39, %v4087_v53  ;;  %v4088_v37 = vmul.f32 %v7850_v19, %v10996_v4  ;;  %v4829_v36 = vpop.xlane.xlu0 %4828  ;;  %v11632_v53 = vld [vmem:[#allocation83_spill] sm:$0xff] }
 0xfba   : >> { %v7852_v16 = vpop.eup %7851  ;;  %7861 = vrsqrt.f32 %v4847_v42  ;;  %v4848_v27 = vadd.f32 1e-05, %v4840_v23  ;;  %v4841_v2 = vmul.f32 0.03125, %v4829_v36 }
 0xfbb   : >> { %6348 = vst.msk [vmem:[%s11126_s18 + $0x90] sm:$0xff] %vm1191_vm7, %v4109_v13  ;;  %v4110_v8 = vadd.f32 %v4102_v44, %v11629_v20  ;;  %v4103_v14 = vadd.f32 %v9456_v62, %v4095_v61  ;;  %v4096_v41 = vmul.f32 %v9454_v39, %v4088_v37  ;;  %v4089_v7 = vmul.f32 %v7852_v16, %v11002_v35  ;;  %v4832_v0 = vpop.xlane.xlu1 %4831 }
 0xfbc   : >> { %v7854_v24 = vpop.eup %7853  ;;  %7863 = vrsqrt.f32 %v4848_v27  ;;  %v4849_v4 = vadd.f32 1e-05, %v4841_v2  ;;  %v4842_v59 = vmul.f32 0.03125, %v4832_v0 }
 0xfbd   : >> { %6349 = vst.msk [vmem:[%s11126_s18 + $0x98] sm:$0xff] %vm1191_vm7, %v4110_v8  ;;  %v4111_v50 = vadd.f32 %v4103_v14, %v11630_v51  ;;  %v4104_v3 = vadd.f32 %v9456_v62, %v4096_v41  ;;  %v4097_v57 = vmul.f32 %v9454_v39, %v4089_v7  ;;  %v4090_v32 = vmul.f32 %v7854_v24, %v11008_v52  ;;  %v4835_v11 = vpop.xlane.xlu0 %4834 }
 0xfbe   : >> { %v7856_v5 = vpop.eup %7855  ;;  %7865 = vrsqrt.f32 %v4849_v4  ;;  %v4850_v35 = vadd.f32 1e-05, %v4842_v59  ;;  %v4843_v40 = vmul.f32 0.03125, %v4835_v11  ;;  %v11634_v11 = vld [vmem:[#allocation85_spill] sm:$0xff] }
 0xfbf   : >> { %6350 = vst.msk [vmem:[%s11126_s18 + $0xa0] sm:$0xff] %vm1191_vm7, %v4111_v50  ;;  %v4112_v38 = vadd.f32 %v4104_v3, %v11631_v22  ;;  %v4105_v46 = vadd.f32 %v9456_v62, %v4097_v57  ;;  %v4098_v63 = vmul.f32 %v9454_v39, %v4090_v32  ;;  %v4860_v6 = vmul.f32 %v7856_v5, %v11014_v43  ;;  %v11633_v43 = vld [vmem:[#allocation84_spill] sm:$0xff] }
 0xfc0   : >> { %v7858_v48 = vpop.eup %7857  ;;  %7867 = vrsqrt.f32 %v4850_v35  ;;  %v4851_v52 = vadd.f32 1e-05, %v4843_v40  ;;  %v11635_v35 = vld [vmem:[#allocation86_spill] sm:$0xff] }
 0xfc1   : >> { %6351 = vst.msk [vmem:[%s11126_s18 + $0xa8] sm:$0xff] %vm1191_vm7, %v4112_v38  ;;  %v4113_v31 = vadd.f32 %v4105_v46, %v11632_v53  ;;  %v4106_v19 = vadd.f32 %v9456_v62, %v4098_v63  ;;  %v4868_v42 = vmul.f32 %v9454_v39, %v4860_v6  ;;  %v4861_v23 = vmul.f32 %v7858_v48, %v11020_v49 }
 0xfc2   : >> { %v7860_v12 = vpop.eup %7859  ;;  %7869 = vrsqrt.f32 %v4851_v52 }
 0xfc3   : >> { %6352 = vst.msk [vmem:[%s11126_s18 + $0xb0] sm:$0xff] %vm1191_vm7, %v4113_v31  ;;  %v4114_v13 = vadd.f32 %v4106_v19, %v11633_v43  ;;  %v4876_v44 = vadd.f32 %v9456_v62, %v4868_v42  ;;  %v4869_v61 = vmul.f32 %v9454_v39, %v4861_v23  ;;  %v4862_v37 = vmul.f32 %v7860_v12, %v11026_v60 }
 0xfc4   : >> { %v7862_v36 = vpop.eup %7861 }
 0xfc5   : >> { %6353 = vst.msk [vmem:[%s11126_s18 + $0xb8] sm:$0xff] %vm1191_vm7, %v4114_v13  ;;  %v4884_v16 = vadd.f32 %v4876_v44, %v10395_v29  ;;  %v4877_v49 = vadd.f32 %v9456_v62, %v4869_v61  ;;  %v4870_v27 = vmul.f32 %v9454_v39, %v4862_v37  ;;  %v4863_v2 = vmul.f32 %v7862_v36, %v11032_v55 }
 0xfc6   : >> { %v7864_v20 = vpop.eup %7863 }
 0xfc7   : >> { %6385 = vst.msk [vmem:[%s11126_s18 + $0x100] sm:$0xff] %vm1191_vm7, %v4884_v16  ;;  %v4885_v8 = vadd.f32 %v4877_v49, %v10397_v9  ;;  %v4878_v14 = vadd.f32 %v9456_v62, %v4870_v27  ;;  %v4871_v60 = vmul.f32 %v9454_v39, %v4863_v2  ;;  %v4864_v41 = vmul.f32 %v7864_v20, %v11038_v15 }
 0xfc8   : >> { %v7866_v29 = vpop.eup %7865 }
 0xfc9   : >> { %6386 = vst.msk [vmem:[%s11126_s18 + $0x108] sm:$0xff] %vm1191_vm7, %v4885_v8  ;;  %v4886_v7 = vadd.f32 %v4878_v14, %v10401_v25  ;;  %v4879_v55 = vadd.f32 %v9456_v62, %v4871_v60  ;;  %v4872_v0 = vmul.f32 %v9454_v39, %v4864_v41  ;;  %v4865_v24 = vmul.f32 %v7866_v29, %v11044_v33 }
 0xfca   : >> { %v7868_v9 = vpop.eup %7867 }
 0xfcb   : >> { %6387 = vst.msk [vmem:[%s11126_s18 + $0x110] sm:$0xff] %vm1191_vm7, %v4886_v7  ;;  %v4887_v4 = vadd.f32 %v4879_v55, %v10403_v54  ;;  %v4880_v15 = vadd.f32 %v9456_v62, %v4872_v0  ;;  %v4873_v59 = vmul.f32 %v9454_v39, %v4865_v24  ;;  %v4866_v25 = vmul.f32 %v7868_v9, %v11050_v30  ;;  %v11636_v0 = vld [vmem:[#allocation89_spill] sm:$0xff] }
 0xfcc   : >> { %v7870_v51 = vpop.eup %7869 }
 0xfcd   : >> { %6388 = vst.msk [vmem:[%s11126_s18 + $0x118] sm:$0xff] %vm1191_vm7, %v4887_v4  ;;  %v4888_v50 = vadd.f32 %v4880_v15, %v10434_v56  ;;  %v4881_v33 = vadd.f32 %v9456_v62, %v4873_v59  ;;  %v4874_v3 = vmul.f32 %v9454_v39, %v4866_v25  ;;  %v4867_v57 = vmul.f32 %v7870_v51, %v11056_v21  ;;  %v11637_v59 = vld [vmem:[#allocation90_spill] sm:$0xff] }
 0xfcf   : >> { %6389 = vst.msk [vmem:[%s11126_s18 + $0x120] sm:$0xff] %vm1191_vm7, %v4888_v50  ;;  %v4889_v54 = vadd.f32 %v4881_v33, %v10436_v17  ;;  %v4882_v32 = vadd.f32 %v9456_v62, %v4874_v3  ;;  %v4875_v30 = vmul.f32 %v9454_v39, %v4867_v57  ;;  %v11638_v3 = vld [vmem:[#allocation87_spill] sm:$0xff] }
 0xfd1   : >> { %6390 = vst.msk [vmem:[%s11126_s18 + $0x128] sm:$0xff] %vm1191_vm7, %v4889_v54  ;;  %v4890_v5 = vadd.f32 %v4882_v32, %v11634_v11  ;;  %v4883_v56 = vadd.f32 %v9456_v62, %v4875_v30  ;;  %v11639_v11 = vld [vmem:[#allocation88_spill] sm:$0xff] }
 0xfd3   : >> { %6391 = vst.msk [vmem:[%s11126_s18 + $0x130] sm:$0xff] %vm1191_vm7, %v4890_v5  ;;  %v4891_v40 = vadd.f32 %v4883_v56, %v11635_v35 }
 0xfd5   : >> { %6392 = vst.msk [vmem:[%s11126_s18 + $0x138] sm:$0xff] %vm1191_vm7, %v4891_v40 }
0x1013   : >> { %v5597_v21 = vpop.xlane.xlu1 %5596 }
0x1014   : >> { %v5615_v22 = vmul.f32 0.03125, %v5597_v21  ;;  %v11640_v21 = vld [vmem:[#allocation91_spill] sm:$0xff] }
0x1015   : >> { %v5600_v38 = vpop.xlane.xlu0 %5599 }
0x1016   : >> { %v5623_v17 = vadd.f32 1e-05, %v5615_v22  ;;  %v5616_v46 = vmul.f32 0.03125, %v5600_v38 }
0x1017   : >> { %v5591_v63 = vpop.xlane.xlu1 %5590 }
0x1018   : >> { %7871 = vrsqrt.f32 %v5623_v17  ;;  %v5624_v6 = vadd.f32 1e-05, %v5616_v46  ;;  %v5613_v48 = vmul.f32 0.03125, %v5591_v63  ;;  %v11641_v46 = vld [vmem:[#allocation92_spill] sm:$0xff] }
0x1019   : >> { %v5594_v52 = vpop.xlane.xlu0 %5593 }
0x101a   : >> { %7873 = vrsqrt.f32 %v5624_v6  ;;  %v5621_v53 = vadd.f32 1e-05, %v5613_v48  ;;  %v5614_v31 = vmul.f32 0.03125, %v5594_v52  ;;  %v11642_v48 = vld [vmem:[#allocation93_spill] sm:$0xff] }
0x101c   : >> { %7875 = vrsqrt.f32 %v5621_v53  ;;  %v5622_v19 = vadd.f32 1e-05, %v5614_v31  ;;  %v5603_v42 = vpop.xlane.xlu1 %5602  ;;  %v11643_v31 = vld [vmem:[#allocation94_spill] sm:$0xff] }
0x101d   : >> { %v5617_v23 = vmul.f32 0.03125, %v5603_v42 }
0x101e   : >> { %7877 = vrsqrt.f32 %v5622_v19  ;;  %v5606_v12 = vpop.xlane.xlu0 %5605 }
0x101f   : >> { %v5625_v43 = vadd.f32 1e-05, %v5617_v23  ;;  %v5618_v13 = vmul.f32 0.03125, %v5606_v12 }
0x1020   : >> { %v5609_v44 = vpop.xlane.xlu1 %5608 }
0x1021   : >> { %7879 = vrsqrt.f32 %v5625_v43  ;;  %v5626_v61 = vadd.f32 1e-05, %v5618_v13  ;;  %v5619_v37 = vmul.f32 0.03125, %v5609_v44 }
0x1022   : >> { %v7872_v36 = vpop.eup %7871  ;;  %v5612_v16 = vpop.xlane.xlu0 %5611 }
0x1023   : >> { %v5639_v49 = vmul.f32 %v7872_v36, %v11070_v34  ;;  %7881 = vrsqrt.f32 %v5626_v61  ;;  %v5627_v27 = vadd.f32 1e-05, %v5619_v37  ;;  %v5620_v2 = vmul.f32 0.03125, %v5612_v16 }
0x1024   : >> { %v7874_v20 = vpop.eup %7873 }
0x1025   : >> { %v5647_v8 = vmul.f32 %v9454_v39, %v5639_v49  ;;  %v5640_v14 = vmul.f32 %v7874_v20, %v11073_v28  ;;  %7883 = vrsqrt.f32 %v5627_v27  ;;  %v5628_v60 = vadd.f32 1e-05, %v5620_v2 }
0x1026   : >> { %v7876_v41 = vpop.eup %7875 }
0x1027   : >> { %v5655_v29 = vadd.f32 %v9456_v62, %v5647_v8  ;;  %v5648_v7 = vmul.f32 %v9454_v39, %v5640_v14  ;;  %v5637_v55 = vmul.f32 %v7876_v41, %v11078_v45  ;;  %7885 = vrsqrt.f32 %v5628_v60 }
0x1028   : >> { %v7878_v34 = vpop.eup %7877 }
0x1029   : >> { %v5663_v24 = vadd.f32 %v5655_v29, %v11636_v0  ;;  %v5656_v9 = vadd.f32 %v9456_v62, %v5648_v7  ;;  %v5645_v4 = vmul.f32 %v9454_v39, %v5637_v55  ;;  %v5638_v28 = vmul.f32 %v7878_v34, %v11084_v47 }
0x102b   : >> { %v7880_v15 = vpop.eup %7879  ;;  %6426 = vst.msk [vmem:[%s11126_s18 + $0x190] sm:$0xff] %vm1191_vm7, %v5663_v24  ;;  %v5664_v25 = vadd.f32 %v5656_v9, %v11637_v59  ;;  %v5653_v51 = vadd.f32 %v9456_v62, %v5645_v4  ;;  %v5646_v45 = vmul.f32 %v9454_v39, %v5638_v28 }
0x102c   : >> { %v5641_v50 = vmul.f32 %v7880_v15, %v11093_v18 }
0x102d   : >> { %v7882_v33 = vpop.eup %7881  ;;  %6427 = vst.msk [vmem:[%s11126_s18 + $0x198] sm:$0xff] %vm1191_vm7, %v5664_v25  ;;  %v5661_v57 = vadd.f32 %v5653_v51, %v11638_v3  ;;  %v5654_v47 = vadd.f32 %v9456_v62, %v5646_v45 }
0x102e   : >> { %v5649_v54 = vmul.f32 %v9454_v39, %v5641_v50  ;;  %v5642_v32 = vmul.f32 %v7882_v33, %v11097_v10 }
0x102f   : >> { %v7884_v30 = vpop.eup %7883  ;;  %6424 = vst.msk [vmem:[%s11126_s18 + $0x180] sm:$0xff] %vm1191_vm7, %v5661_v57  ;;  %v5662_v5 = vadd.f32 %v5654_v47, %v11639_v11 }
0x1030   : >> { %v5657_v18 = vadd.f32 %v9456_v62, %v5649_v54  ;;  %v5650_v56 = vmul.f32 %v9454_v39, %v5642_v32  ;;  %v5643_v35 = vmul.f32 %v7884_v30, %v11102_v26 }
0x1031   : >> { %v7886_v40 = vpop.eup %7885  ;;  %6425 = vst.msk [vmem:[%s11126_s18 + $0x188] sm:$0xff] %vm1191_vm7, %v5662_v5 }
0x1032   : >> { %v5665_v22 = vadd.f32 %v5657_v18, %v11640_v21  ;;  %v5658_v10 = vadd.f32 %v9456_v62, %v5650_v56  ;;  %v5651_v38 = vmul.f32 %v9454_v39, %v5643_v35  ;;  %v5644_v17 = vmul.f32 %v7886_v40, %v11108_v1 }
0x1034   : >> { %6428 = vst.msk [vmem:[%s11126_s18 + $0x1a0] sm:$0xff] %vm1191_vm7, %v5665_v22  ;;  %v5666_v63 = vadd.f32 %v5658_v10, %v11641_v46  ;;  %v5659_v6 = vadd.f32 %v9456_v62, %v5651_v38  ;;  %v5652_v26 = vmul.f32 %v9454_v39, %v5644_v17  ;;  %2476 = sbr.rel (!%p2474_p11) target bundleno = 1010 (0x3f2), region = 214 }
0x1036   : >> { %6429 = vst.msk [vmem:[%s11126_s18 + $0x1a8] sm:$0xff] %vm1191_vm7, %v5666_v63  ;;  %v5667_v52 = vadd.f32 %v5659_v6, %v11642_v48  ;;  %v5660_v53 = vadd.f32 %v9456_v62, %v5652_v26 }
0x1038   : >> { %6430 = vst.msk [vmem:[%s11126_s18 + $0x1b0] sm:$0xff] %vm1191_vm7, %v5667_v52  ;;  %v5668_v19 = vadd.f32 %v5660_v53, %v11643_v31 }
0x103a   : >> { %6431 = vst.msk [vmem:[%s11126_s18 + $0x1b8] sm:$0xff] %vm1191_vm7, %v5668_v19 }
0x103b PF: > { %s5679_s3 = scalar_lea.sflag [#allocation8], %s651_s9 }
0x103c   : > { %s11645_s15 = sld [smem:[#allocation65_spill]]  ;;  %s11647_s20 = sld [smem:[#allocation53_spill]] }
0x103d   : > { %s5712_s1 = sshll.u32 %s653_s19, 4  ;;  %s8339_s0 = smov 2048   ;;  %s5713_s1 = int_to_ptr.vmem [resolvable:$true] %s5712_s1 }
0x103e   : > { %s8340_s9 = smov 4096   ;;  %s8341_s28 = smov 16  }
0x103f   : > { %s8342_s8 = smov 128   ;;  %s8343_s25 = smov 8  }
0x1040   : > { %s11648_s29 = sld [smem:[#allocation104_spill]]  ;;  %s8344_s12 = smov [#allocation28]  }
0x1041   : > { %s8345_s26 = smov 0  }
0x1042   : > { %p11646_p5 = scmp.ne.s32.totalorder %s11645_s15, 0 }
0x1044   : > { %s7106_s11 = scalar_select %p11646_p5, [#allocation4], [#allocation37] }
0x1045   : > { %s11678_s20 = smov (!%p11646_p5, %s11647_s20), 0  ;;  %7108 = sst [smem:[#allocation29]] (%p11646_p5), %s8339_s0 }
0x1046   : > { %s5686_s4 = sld [smem:[%s7106_s11 + %s11678_s20]] }
0x1047   : > { %7109 = sst [smem:[#allocation29 + $0x1]] (%p11646_p5), %s8340_s9 }
0x1048   : > { %7110 = sst [smem:[#allocation29 + $0x2]] (%p11646_p5), %s8341_s28 }
0x1049   : > { %7111 = sst [smem:[#allocation29 + $0x3]] (%p11646_p5), %s8342_s8 }
0x104a   : > { %7112 = sst [smem:[#allocation29 + $0x4]] (%p11646_p5), %s8342_s8 }
0x104b   : > { %7113 = sst [smem:[#allocation29 + $0x5]] (%p11646_p5), %s8343_s25 }
0x104c   : > { %s6440_s5 = sshll.u32 %s5686_s4, 11 }
0x104d   : > { %s5695_s6 = scalar_lea.hbm %s11648_s29, %s6440_s5 }
0x104e   : > { %7114 = dma.general (%p11646_p5), %s5713_s1, 8192, %s5695_s6, %s5679_s3, %s8344_s12, [#allocation29], %s8345_s26, 0  }
0x104f PF: > { %s11649_s18 = sld [smem:[#allocation47_spill]]  ;;  %s11650_s22 = sld [smem:[#allocation67_spill]] }
0x1050   : > { %p7146_p8 = scmp.ge.s32.totalorder %s8295_s14, 2 }
0x1055   : > { %s5740_s20 = sand.u32 1, %s11649_s18   ;;  %p11651_p1 = scmp.ne.s32.totalorder %s11650_s22, 0 }
0x1056   : > { %s5741_s11 = scalar_lea.sflag [#allocation8], %s5740_s20 }
0x1057   : > { %p7133_p0 = pnand %p7146_p8, %p11651_p1 }
0x1059   : > { %8222 = dma.done.wait (!%p7133_p0), %s5741_s11, 8192  }
0x105a   : > { %8224 = vsyncadd (!%p7133_p0), %s5741_s11, 4294959104  ;;  %s41_s14 = sadd.s32 1, %s8295_s14   ;;  %s11653_s0 = sld [smem:[#allocation48_spill]] }
0x105b   : > { %p11348_p3 = scmp.ge.s32.totalorder %s41_s14, 5   ;;  %s11654_s18 = sld [smem:[#allocation49_spill]] }
0x105c   : > { %s11655_s19 = sld [smem:[#allocation66_spill]]  ;;  %s11657_s3 = sld [smem:[#allocation64_spill]] }
0x105d   : > { %s11656_s1 = sld [smem:[#allocation50_spill]]  ;;  %s11658_s15 = sld [smem:[#allocation61_spill]] }
0x105e   : > { %s11659_s25 = sld [smem:[#allocation51_spill]]  ;;  %s11660_s9 = sld [smem:[#allocation60_spill]] }
0x105f   : > { %s11661_s28 = sld [smem:[#allocation52_spill]]  ;;  %s11662_s8 = sld [smem:[#allocation59_spill]] }
0x1060   : > { %s11663_s5 = sld [smem:[#allocation54_spill]]  ;;  %s11664_s20 = smov %s8247_s21 }
0x1061   : > { %s11666_s22 = smov %s8255_s23  ;;  %s11667_s23 = smov %s8259_s24 }
0x1062   : > { %s11665_s21 = smov %s11657_s3  ;;  %s11669_s26 = smov %s8271_s27 }
0x1063   : > { %s11668_s24 = smov %s11658_s15  ;;  %s11671_s29 = smov %s8283_s30 }
0x1064   : > { %s11670_s27 = smov %s11660_s9  ;;  %s11673_s12 = smov %s8291_s13 }
0x1065   : > { %s11672_s30 = smov %s11662_s8  ;;  %40 = sbr.rel (!%p11348_p3) target bundleno = 42 (0x2a), region = 225 }
0x1066   : > { %s11674_s13 = smov %s11663_s5 }
0x106c   :  { %5746 = vsyncpa [#allocation7], 1 }
0x106d   :  { %5748 = vsyncpa [#allocation7 + $0x1], 1 }
0x106e   :  { %5749 = vsyncpa [#allocation10], 1 }
0x106f   :  { %5751 = vsyncpa [#allocation10 + $0x1], 1 }
0x1070   :  { %5752 = vsyncpa [#allocation13], 1 }
0x1071   :  { %5754 = vsyncpa [#allocation13 + $0x1], 1 }
0x1072   :  { %5755 = vsyncpa [#allocation16], 1 }
0x1073   :  { %5756 = vsyncpa [#allocation19], 1 }
0x1074   :  { %5757 = vsyncpa [#allocation8], 1 }
0x1075   :  { %5759 = vsyncpa [#allocation8 + $0x1], 1 }

</bundles_post_ra>
